<compile_context>
chip_gen: v7x
topology: tpu7x:2x2x1
jax: 0.10.0
libtpu: 0.0.40
codegen_flags: <defaults>
</compile_context>

<pallas_src>
import functools

import jax
import jax.numpy as jnp
from jax.experimental import pallas as pl
from jax.experimental.pallas import tpu as pltpu

NEG_SLOPE = 0.01                      # F.leaky_relu default


# ---------------------------------------------------------------------------
# Helpers
# ---------------------------------------------------------------------------
def _round_up(x, m):
    return ((x + m - 1) // m) * m


_VMEM_LIMIT = None


def _vmem_limit_bytes():
    """Per-generation VMEM budget: ~3/4 of physical, capped at 100 MiB."""
    global _VMEM_LIMIT
    if _VMEM_LIMIT is None:
        try:
            cap = int(pltpu.get_tpu_info().vmem_capacity_bytes)
        except Exception:
            cap = 64 * 1024 * 1024            # conservative (v7x physical)
        _VMEM_LIMIT = min(cap * 3 // 4, 100 * 1024 * 1024)
    return _VMEM_LIMIT


def _pick_tile_m(M, K, N_out, budget_bytes):
    """Prefer 2 grid steps (v7x dual TC), then 1 (least overhead), then the
    fewest multiple-of-8 tiles whose double-buffered blocks fit the budget."""
    def fits(tm):
        per_step = 2 * 2 * (tm * K + tm * N_out) + 2 * 2 * K * N_out  # bf16, 2x buffered
        return per_step <= budget_bytes

    if M % 16 == 0 and fits(M // 2):
        return M // 2
    if fits(M):
        return M
    for steps in range(3, M + 1):
        if M % steps == 0:
            tm = M // steps
            if tm % 8 == 0 and fits(tm):
                return tm
    return M


# ---------------------------------------------------------------------------
# Pallas kernels
# ---------------------------------------------------------------------------
def _matmul_bias_act_kernel(a_ref, b_ref, bias_ref, o_ref, *, leaky):
    """o = act(a @ b + bias); bf16 operands, f32 MXU accumulation + epilogue."""
    acc = jnp.dot(a_ref[...], b_ref[...], preferred_element_type=jnp.float32)
    acc = acc + bias_ref[...]
    if leaky:
        acc = jnp.where(acc >= 0, acc, NEG_SLOPE * acc)
    o_ref[...] = acc.astype(o_ref.dtype)


def matmul_bias_act(a, b, bias_row, *, leaky, out_dtype):
    """(M,K)bf16 @ (K,N)bf16 + (1,N)f32 with fused activation.

    N is always 128 here (lane-dense output), so we tile only over M."""
    M, K = a.shape
    K2, N = b.shape
    assert K == K2 and bias_row.shape == (1, N)
    tm = _pick_tile_m(M, K, N, _vmem_limit_bytes() // 2)
    grid = (M // tm,)
    return pl.pallas_call(
        functools.partial(_matmul_bias_act_kernel, leaky=leaky),
        out_shape=jax.ShapeDtypeStruct((M, N), out_dtype),
        grid_spec=pltpu.PrefetchScalarGridSpec(
            num_scalar_prefetch=0,
            grid=grid,
            in_specs=[
                pl.BlockSpec((tm, K), lambda i: (i, 0)),
                pl.BlockSpec((K, N), lambda i: (0, 0)),
                pl.BlockSpec((1, N), lambda i: (0, 0)),
            ],
            out_specs=pl.BlockSpec((tm, N), lambda i: (i, 0)),
        ),
        compiler_params=pltpu.CompilerParams(
            dimension_semantics=("parallel",),
            vmem_limit_bytes=_vmem_limit_bytes(),
        ),
    )(a, b, bias_row)


def _maxpool_kernel(x_ref, o_ref):
    """2x2/stride-2 max pool on a (1, Ho, 2, Wo, 2*C) view of NHWC.

    H-pair max: slice the untiled axis of size 2 (cheap vreg-group select).
    W-pair max: the two 128-lane halves of the last dim (vreg-aligned)."""
    x = x_ref[...]                                   # (1, Ho, 2, Wo, 2C)
    xh = jnp.maximum(x[:, :, 0], x[:, :, 1])         # (1, Ho, Wo, 2C)
    c = o_ref.shape[-1]
    o_ref[...] = jnp.maximum(xh[..., :c], xh[..., c:])


def maxpool_2x2(x_nhwc):
    """(N, H, W, C) -> (N, H//2, W//2, C); C is 128 here (lane-dense)."""
    N, H, W, C = x_nhwc.shape
    Ho, Wo = H // 2, W // 2
    # Free row-major regrouping (no transpose, no data movement).
    xv = x_nhwc.reshape(N, Ho, 2, Wo, 2 * C)
    return pl.pallas_call(
        _maxpool_kernel,
        out_shape=jax.ShapeDtypeStruct((N, Ho, Wo, C), x_nhwc.dtype),
        grid_spec=pltpu.PrefetchScalarGridSpec(
            num_scalar_prefetch=0,
            grid=(N,),
            in_specs=[pl.BlockSpec((1, Ho, 2, Wo, 2 * C),
                                   lambda n: (n, 0, 0, 0, 0))],
            out_specs=pl.BlockSpec((1, Ho, Wo, C), lambda n: (n, 0, 0, 0)),
        ),
        compiler_params=pltpu.CompilerParams(
            dimension_semantics=("parallel",),
            vmem_limit_bytes=_vmem_limit_bytes(),
        ),
    )(xv)


def _fc_fused_kernel(x_ref, w1_ref, b1_ref, w2_ref, b2_ref, o_ref):
    """logits = (leaky(x @ W1 + b1)) @ W2 + b2, all in one kernel body."""
    h = jnp.dot(x_ref[...], w1_ref[...], preferred_element_type=jnp.float32)
    h = h + b1_ref[...]
    h = jnp.where(h >= 0, h, NEG_SLOPE * h)
    o = jnp.dot(h.astype(jnp.bfloat16), w2_ref[...],
                preferred_element_type=jnp.float32)
    o_ref[...] = (o + b2_ref[...]).astype(o_ref.dtype)


def fc_fused(x, w1, b1, w2, b2):
    """Fused fc1 (+leaky) + fc2; fc2's N is padded to 128 (lane-dense out)."""
    M, K1 = x.shape
    _, N1 = w1.shape
    _, N2 = w2.shape
    flops = 2 * M * (K1 * N1 + N1 * N2)
    bytes_accessed = (x.size + w1.size + w2.size) * 2 + (N1 + N2) * 4 + M * N2 * 4
    return pl.pallas_call(
        _fc_fused_kernel,
        out_shape=jax.ShapeDtypeStruct((M, N2), jnp.float32),
        grid_spec=pltpu.PrefetchScalarGridSpec(
            num_scalar_prefetch=0,
            grid=(1,),
            in_specs=[
                pl.BlockSpec((M, K1), lambda i: (0, 0)),
                pl.BlockSpec((K1, N1), lambda i: (0, 0)),
                pl.BlockSpec((1, N1), lambda i: (0, 0)),
                pl.BlockSpec((N1, N2), lambda i: (0, 0)),
                pl.BlockSpec((1, N2), lambda i: (0, 0)),
            ],
            out_specs=pl.BlockSpec((M, N2), lambda i: (0, 0)),
        ),
        compiler_params=pltpu.CompilerParams(
            dimension_semantics=("arbitrary",),
            vmem_limit_bytes=_vmem_limit_bytes(),
        ),
        cost_estimate=pl.CostEstimate(flops=flops, transcendentals=0,
                                      bytes_accessed=bytes_accessed),
    )(x, w1, b1, w2, b2)


# ---------------------------------------------------------------------------
# JAX glue (im2col, parameter plumbing)
# ---------------------------------------------------------------------------
def im2col_5x5_pad2(x_nhwc, k_pad):
    """5x5 patches, padding=2, stride=1.  Feature order (kh, kw, cin); K zero-
    padded up to `k_pad`; result is bf16 for the MXU."""
    N, H, W, C = x_nhwc.shape
    xp = jnp.pad(x_nhwc, ((0, 0), (2, 2), (2, 2), (0, 0)))
    cols = [xp[:, i:i + H, j:j + W, :] for i in range(5) for j in range(5)]
    patches = jnp.stack(cols, axis=3)                    # (N, H, W, 25, C)
    a = patches.reshape(N * H * W, 25 * C).astype(jnp.bfloat16)
    if k_pad > 25 * C:
        a = jnp.pad(a, ((0, 0), (0, k_pad - 25 * C)))
    return a


def conv5x5_leakyrelu(x_nhwc, w_kc, b_row):
    """Conv2d(k=5, s=1, p=2) + bias + leaky_relu via im2col + Pallas GEMM.

    Output channels are padded to 128 (zeros) -> lane-dense stores."""
    N, H, W, _ = x_nhwc.shape
    k_pad, c_out_pad = w_kc.shape
    a = im2col_5x5_pad2(x_nhwc, k_pad)                       # (N*H*W, k_pad) bf16
    y = matmul_bias_act(a, w_kc, b_row, leaky=True,
                        out_dtype=jnp.bfloat16)              # (N*H*W, 128) bf16
    return y.reshape(N, H, W, c_out_pad)


def prepare_params(params):
    """One-time, hoisted weight layout prep (kernel-ready, bf16, padded)."""
    def conv_w(w_oihw):
        c_out, c_in = w_oihw.shape[0], w_oihw.shape[1]
        k = 25 * c_in
        k_pad = _round_up(k, 8)                              # 25->32, 800->800
        w = jnp.transpose(w_oihw, (2, 3, 1, 0)).reshape(k, c_out)
        w = jnp.pad(w, ((0, k_pad - k), (0, 128 - c_out)))   # lane-dense N=128
        return w.astype(jnp.bfloat16)

    def bias_row(b, n_pad):
        b = jnp.pad(b, (0, n_pad - b.shape[0]))
        return b.reshape(1, -1).astype(jnp.float32)

    # fc1 weight rows permuted so it consumes the NHWC flatten directly
    # (PyTorch flattens NCHW: in index = c*49 + h*7 + w).
    fc1_w = params["fc1_w"].reshape(1024, 64, 7, 7)
    fc1_w = jnp.transpose(fc1_w, (2, 3, 1, 0)).reshape(7 * 7 * 64, 1024)

    fc2_w = jnp.pad(params["fc2_w"].T, ((0, 0), (0, 128 - 10)))

    return {
        "conv1_w": conv_w(params["conv1_w"]),                # (32, 128)
        "conv1_b": bias_row(params["conv1_b"], 128),
        "conv2_w": conv_w(params["conv2_w"]),                # (800, 128)
        "conv2_b": bias_row(params["conv2_b"], 128),
        "fc1_w": fc1_w.astype(jnp.bfloat16),                 # (3136, 1024)
        "fc1_b": bias_row(params["fc1_b"], 1024),
        "fc2_w": fc2_w.astype(jnp.bfloat16),                 # (1024, 128)
        "fc2_b": bias_row(params["fc2_b"], 128),
    }


def cnn_forward(x_nchw, prep):
    # Normalize(mean=0, std=1) == identity; all "+ d[i]" adds are + 0 (no-ops).
    N, C, H, W = x_nchw.shape
    x = x_nchw.reshape(N, H, W, C).astype(jnp.bfloat16)      # C=1: pure reshape

    h1 = conv5x5_leakyrelu(x, prep["conv1_w"], prep["conv1_b"])     # (N,28,28,128)
    p1 = maxpool_2x2(h1)                                            # (N,14,14,128)
    h2 = conv5x5_leakyrelu(p1[..., :32],
                           prep["conv2_w"], prep["conv2_b"])        # (N,14,14,128)
    p2 = maxpool_2x2(h2)                                            # (N,7,7,128)

    # NHWC flatten; fc1 weight rows were pre-permuted to match (no transpose).
    flat = p2[..., :64].reshape(N, 7 * 7 * 64)                      # (N, 3136) bf16

    logits = fc_fused(flat, prep["fc1_w"], prep["fc1_b"],
                      prep["fc2_w"], prep["fc2_b"])                 # (N, 128) f32
    return logits[:, :10]


def init_params(key):
    """Deterministic synthetic parameters; shapes mirror the PyTorch module."""
    ks = jax.random.split(key, 8)

    def w(k, shape, scale):
        return (scale * jax.random.normal(k, shape)).astype(jnp.float32)

    return {
        "conv1_w": w(ks[0], (32, 1, 5, 5), 0.1),    # nn.Conv2d(1, 32, 5)
        "conv1_b": w(ks[1], (32,), 0.1),
        "conv2_w": w(ks[2], (64, 32, 5, 5), 0.05),  # nn.Conv2d(32, 64, 5)
        "conv2_b": w(ks[3], (64,), 0.05),
        "fc1_w": w(ks[4], (1024, 3136), 0.02),      # nn.Linear(7*7*64, 1024)
        "fc1_b": w(ks[5], (1024,), 0.02),
        "fc2_w": w(ks[6], (10, 1024), 0.02),        # nn.Linear(1024, 10)
        "fc2_b": w(ks[7], (10,), 0.02),
    }


if __name__ == "__main__":
    key = jax.random.PRNGKey(0)
    pkey, xkey = jax.random.split(key)
    params = init_params(pkey)
    prep = prepare_params(params)            # hoisted, once: not in the jitted path
    # 28x28 is required: fc1 expects exactly 7*7*64 flattened features.
    x = jax.random.normal(xkey, (2, 1, 28, 28), dtype=jnp.float32)

    logits = jax.jit(cnn_forward)(x, prep)
    logits = jax.block_until_ready(logits)

    assert logits.shape == (2, 10), logits.shape
    assert bool(jnp.all(jnp.isfinite(logits)))
    print("KERNEL_OK")
</pallas_src>

<mosaic_0001>
module attributes {stable_mosaic.version = 11 : i64} {
  func.func @_matmul_bias_act_kernel(%arg0: i32, %arg1: memref<784x32xbf16, #tpu.memory_space<vmem>>, %arg2: memref<32x128xbf16, #tpu.memory_space<vmem>>, %arg3: memref<1x128xf32, #tpu.memory_space<vmem>>, %arg4: memref<784x128xbf16, #tpu.memory_space<vmem>>) attributes {dimension_semantics = [#tpu.dimension_semantics<parallel>], iteration_bounds = array<i64: 2>, scalar_prefetch = 0 : i64, scratch_operands = 0 : i64, tpu.core_type = #tpu.core_type<tc>, window_params = [{transform_indices = @transform_0, window_bounds = array<i64: 784, 32>}, {pipeline_mode = #tpu.pipeline_mode<synchronous>, transform_indices = @transform_1, window_bounds = array<i64: 32, 128>}, {pipeline_mode = #tpu.pipeline_mode<synchronous>, transform_indices = @transform_2, window_bounds = array<i64: 1, 128>}, {transform_indices = @transform_3, window_bounds = array<i64: 784, 128>}]} {
    %c0 = arith.constant 0 : index
    %c0_0 = arith.constant 0 : index
    %0 = vector.load %arg1[%c0, %c0_0] : memref<784x32xbf16, #tpu.memory_space<vmem>>, vector<784x32xbf16>
    %c0_1 = arith.constant 0 : index
    %c0_2 = arith.constant 0 : index
    %1 = vector.load %arg2[%c0_1, %c0_2] : memref<32x128xbf16, #tpu.memory_space<vmem>>, vector<32x128xbf16>
    %cst = arith.constant dense<0.000000e+00> : vector<784x128xf32>
    %2 = tpu.matmul %0, %1, %cst {dimension_numbers = #tpu.dot_dimension_numbers<[1], [0], [0], [1], [0, 0, 1, 1], [], []>} : vector<784x32xbf16>, vector<32x128xbf16>, vector<784x128xf32> -> vector<784x128xf32>
    %c0_3 = arith.constant 0 : index
    %c0_4 = arith.constant 0 : index
    %3 = vector.load %arg3[%c0_3, %c0_4] : memref<1x128xf32, #tpu.memory_space<vmem>>, vector<1x128xf32>
    %4 = vector.broadcast %3 : vector<1x128xf32> to vector<784x128xf32>
    %5 = arith.addf %2, %4 : vector<784x128xf32>
    %cst_5 = arith.constant 0.000000e+00 : f32
    %6 = vector.broadcast %cst_5 : f32 to vector<784x128xf32>
    %7 = arith.cmpf oge, %5, %6 : vector<784x128xf32>
    %cst_6 = arith.constant 0.00999999977 : f32
    %8 = vector.broadcast %cst_6 : f32 to vector<784x128xf32>
    %9 = arith.mulf %8, %5 : vector<784x128xf32>
    %10 = arith.select %7, %5, %9 : vector<784x128xi1>, vector<784x128xf32>
    %11 = arith.truncf %10 : vector<784x128xf32> to vector<784x128xbf16>
    %c0_7 = arith.constant 0 : index
    %c0_8 = arith.constant 0 : index
    %12 = vector.load %arg4[%c0_7, %c0_8] : memref<784x128xbf16, #tpu.memory_space<vmem>>, vector<784x128xbf16>
    tpu.vector_store %arg4[%c0_7, %c0_8], %11 {strides = array<i32>} : memref<784x128xbf16, #tpu.memory_space<vmem>>, vector<784x128xbf16>,
    return
  }
  func.func @transform_0(%arg0: i32) -> (i32, i32) {
    %c0_i32 = arith.constant 0 : i32
    %c0_i32_0 = arith.constant 0 : i32
    return %arg0, %c0_i32 : i32, i32
  }
  func.func @transform_1(%arg0: i32) -> (i32, i32) {
    %c0_i32 = arith.constant 0 : i32
    %c0_i32_0 = arith.constant 0 : i32
    %c0_i32_1 = arith.constant 0 : i32
    return %c0_i32, %c0_i32_0 : i32, i32
  }
  func.func @transform_2(%arg0: i32) -> (i32, i32) {
    %c0_i32 = arith.constant 0 : i32
    %c0_i32_0 = arith.constant 0 : i32
    %c0_i32_1 = arith.constant 0 : i32
    return %c0_i32, %c0_i32_0 : i32, i32
  }
  func.func @transform_3(%arg0: i32) -> (i32, i32) {
    %c0_i32 = arith.constant 0 : i32
    %c0_i32_0 = arith.constant 0 : i32
    return %arg0, %c0_i32 : i32, i32
  }
}

module attributes {stable_mosaic.version = 11 : i64} {
  func.func @_maxpool_kernel(%arg0: i32, %arg1: memref<1x14x2x14x256xbf16, #tpu.memory_space<vmem>>, %arg2: memref<1x14x14x128xbf16, #tpu.memory_space<vmem>>) attributes {dimension_semantics = [#tpu.dimension_semantics<parallel>], iteration_bounds = array<i64: 2>, scalar_prefetch = 0 : i64, scratch_operands = 0 : i64, tpu.core_type = #tpu.core_type<tc>, window_params = [{transform_indices = @transform_0, window_bounds = array<i64: 1, 14, 2, 14, 256>}, {transform_indices = @transform_1, window_bounds = array<i64: 1, 14, 14, 128>}]} {
    %c0 = arith.constant 0 : index
    %c0_0 = arith.constant 0 : index
    %c0_1 = arith.constant 0 : index
    %c0_2 = arith.constant 0 : index
    %c0_3 = arith.constant 0 : index
    %0 = vector.load %arg1[%c0, %c0_0, %c0_1, %c0_2, %c0_3] : memref<1x14x2x14x256xbf16, #tpu.memory_space<vmem>>, vector<1x14x2x14x256xbf16>
    %1 = vector.extract_strided_slice %0 {offsets = [0, 0, 0, 0, 0], sizes = [1, 14, 1, 14, 256], strides = [1, 1, 1, 1, 1]} : vector<1x14x2x14x256xbf16> to vector<1x14x1x14x256xbf16>
    %2 = vector.shape_cast %1 : vector<1x14x1x14x256xbf16> to vector<1x14x14x256xbf16>
    %3 = vector.extract_strided_slice %0 {offsets = [0, 0, 1, 0, 0], sizes = [1, 14, 1, 14, 256], strides = [1, 1, 1, 1, 1]} : vector<1x14x2x14x256xbf16> to vector<1x14x1x14x256xbf16>
    %4 = vector.shape_cast %3 : vector<1x14x1x14x256xbf16> to vector<1x14x14x256xbf16>
    %5 = arith.maximumf %2, %4 : vector<1x14x14x256xbf16>
    %6 = vector.extract_strided_slice %5 {offsets = [0, 0, 0, 0], sizes = [1, 14, 14, 128], strides = [1, 1, 1, 1]} : vector<1x14x14x256xbf16> to vector<1x14x14x128xbf16>
    %7 = vector.extract_strided_slice %5 {offsets = [0, 0, 0, 128], sizes = [1, 14, 14, 128], strides = [1, 1, 1, 1]} : vector<1x14x14x256xbf16> to vector<1x14x14x128xbf16>
    %8 = arith.maximumf %6, %7 : vector<1x14x14x128xbf16>
    %c0_4 = arith.constant 0 : index
    %c0_5 = arith.constant 0 : index
    %c0_6 = arith.constant 0 : index
    %c0_7 = arith.constant 0 : index
    %9 = vector.load %arg2[%c0_4, %c0_5, %c0_6, %c0_7] : memref<1x14x14x128xbf16, #tpu.memory_space<vmem>>, vector<1x14x14x128xbf16>
    tpu.vector_store %arg2[%c0_4, %c0_5, %c0_6, %c0_7], %8 {strides = array<i32>} : memref<1x14x14x128xbf16, #tpu.memory_space<vmem>>, vector<1x14x14x128xbf16>,
    return
  }
  func.func @transform_0(%arg0: i32) -> (i32, i32, i32, i32, i32) {
    %c0_i32 = arith.constant 0 : i32
    %c0_i32_0 = arith.constant 0 : i32
    %c0_i32_1 = arith.constant 0 : i32
    %c0_i32_2 = arith.constant 0 : i32
    %c0_i32_3 = arith.constant 0 : i32
    return %arg0, %c0_i32, %c0_i32_0, %c0_i32_1, %c0_i32_2 : i32, i32, i32, i32, i32
  }
  func.func @transform_1(%arg0: i32) -> (i32, i32, i32, i32) {
    %c0_i32 = arith.constant 0 : i32
    %c0_i32_0 = arith.constant 0 : i32
    %c0_i32_1 = arith.constant 0 : i32
    %c0_i32_2 = arith.constant 0 : i32
    return %arg0, %c0_i32, %c0_i32_0, %c0_i32_1 : i32, i32, i32, i32
  }
}

module attributes {stable_mosaic.version = 11 : i64} {
  func.func @_matmul_bias_act_kernel(%arg0: i32, %arg1: memref<392x800xbf16, #tpu.memory_space<vmem>>, %arg2: memref<800x128xbf16, #tpu.memory_space<vmem>>, %arg3: memref<1x128xf32, #tpu.memory_space<vmem>>, %arg4: memref<392x128xbf16, #tpu.memory_space<vmem>>) attributes {dimension_semantics = [#tpu.dimension_semantics<parallel>], iteration_bounds = array<i64: 1>, scalar_prefetch = 0 : i64, scratch_operands = 0 : i64, tpu.core_type = #tpu.core_type<tc>, window_params = [{transform_indices = @transform_0, window_bounds = array<i64: 392, 800>}, {pipeline_mode = #tpu.pipeline_mode<synchronous>, transform_indices = @transform_1, window_bounds = array<i64: 800, 128>}, {pipeline_mode = #tpu.pipeline_mode<synchronous>, transform_indices = @transform_2, window_bounds = array<i64: 1, 128>}, {transform_indices = @transform_3, window_bounds = array<i64: 392, 128>}]} {
    %c0 = arith.constant 0 : index
    %c0_0 = arith.constant 0 : index
    %0 = vector.load %arg1[%c0, %c0_0] : memref<392x800xbf16, #tpu.memory_space<vmem>>, vector<392x800xbf16>
    %c0_1 = arith.constant 0 : index
    %c0_2 = arith.constant 0 : index
    %1 = vector.load %arg2[%c0_1, %c0_2] : memref<800x128xbf16, #tpu.memory_space<vmem>>, vector<800x128xbf16>
    %cst = arith.constant dense<0.000000e+00> : vector<392x128xf32>
    %2 = tpu.matmul %0, %1, %cst {dimension_numbers = #tpu.dot_dimension_numbers<[1], [0], [0], [1], [0, 0, 1, 1], [], []>} : vector<392x800xbf16>, vector<800x128xbf16>, vector<392x128xf32> -> vector<392x128xf32>
    %c0_3 = arith.constant 0 : index
    %c0_4 = arith.constant 0 : index
    %3 = vector.load %arg3[%c0_3, %c0_4] : memref<1x128xf32, #tpu.memory_space<vmem>>, vector<1x128xf32>
    %4 = vector.broadcast %3 : vector<1x128xf32> to vector<392x128xf32>
    %5 = arith.addf %2, %4 : vector<392x128xf32>
    %cst_5 = arith.constant 0.000000e+00 : f32
    %6 = vector.broadcast %cst_5 : f32 to vector<392x128xf32>
    %7 = arith.cmpf oge, %5, %6 : vector<392x128xf32>
    %cst_6 = arith.constant 0.00999999977 : f32
    %8 = vector.broadcast %cst_6 : f32 to vector<392x128xf32>
    %9 = arith.mulf %8, %5 : vector<392x128xf32>
    %10 = arith.select %7, %5, %9 : vector<392x128xi1>, vector<392x128xf32>
    %11 = arith.truncf %10 : vector<392x128xf32> to vector<392x128xbf16>
    %c0_7 = arith.constant 0 : index
    %c0_8 = arith.constant 0 : index
    %12 = vector.load %arg4[%c0_7, %c0_8] : memref<392x128xbf16, #tpu.memory_space<vmem>>, vector<392x128xbf16>
    tpu.vector_store %arg4[%c0_7, %c0_8], %11 {strides = array<i32>} : memref<392x128xbf16, #tpu.memory_space<vmem>>, vector<392x128xbf16>,
    return
  }
  func.func @transform_0(%arg0: i32) -> (i32, i32) {
    %c0_i32 = arith.constant 0 : i32
    %c0_i32_0 = arith.constant 0 : i32
    return %arg0, %c0_i32 : i32, i32
  }
  func.func @transform_1(%arg0: i32) -> (i32, i32) {
    %c0_i32 = arith.constant 0 : i32
    %c0_i32_0 = arith.constant 0 : i32
    %c0_i32_1 = arith.constant 0 : i32
    return %c0_i32, %c0_i32_0 : i32, i32
  }
  func.func @transform_2(%arg0: i32) -> (i32, i32) {
    %c0_i32 = arith.constant 0 : i32
    %c0_i32_0 = arith.constant 0 : i32
    %c0_i32_1 = arith.constant 0 : i32
    return %c0_i32, %c0_i32_0 : i32, i32
  }
  func.func @transform_3(%arg0: i32) -> (i32, i32) {
    %c0_i32 = arith.constant 0 : i32
    %c0_i32_0 = arith.constant 0 : i32
    return %arg0, %c0_i32 : i32, i32
  }
}

module attributes {stable_mosaic.version = 11 : i64} {
  func.func @_maxpool_kernel(%arg0: i32, %arg1: memref<1x7x2x7x256xbf16, #tpu.memory_space<vmem>>, %arg2: memref<1x7x7x128xbf16, #tpu.memory_space<vmem>>) attributes {dimension_semantics = [#tpu.dimension_semantics<parallel>], iteration_bounds = array<i64: 2>, scalar_prefetch = 0 : i64, scratch_operands = 0 : i64, tpu.core_type = #tpu.core_type<tc>, window_params = [{transform_indices = @transform_0, window_bounds = array<i64: 1, 7, 2, 7, 256>}, {transform_indices = @transform_1, window_bounds = array<i64: 1, 7, 7, 128>}]} {
    %c0 = arith.constant 0 : index
    %c0_0 = arith.constant 0 : index
    %c0_1 = arith.constant 0 : index
    %c0_2 = arith.constant 0 : index
    %c0_3 = arith.constant 0 : index
    %0 = vector.load %arg1[%c0, %c0_0, %c0_1, %c0_2, %c0_3] : memref<1x7x2x7x256xbf16, #tpu.memory_space<vmem>>, vector<1x7x2x7x256xbf16>
    %1 = vector.extract_strided_slice %0 {offsets = [0, 0, 0, 0, 0], sizes = [1, 7, 1, 7, 256], strides = [1, 1, 1, 1, 1]} : vector<1x7x2x7x256xbf16> to vector<1x7x1x7x256xbf16>
    %2 = vector.shape_cast %1 : vector<1x7x1x7x256xbf16> to vector<1x7x7x256xbf16>
    %3 = vector.extract_strided_slice %0 {offsets = [0, 0, 1, 0, 0], sizes = [1, 7, 1, 7, 256], strides = [1, 1, 1, 1, 1]} : vector<1x7x2x7x256xbf16> to vector<1x7x1x7x256xbf16>
    %4 = vector.shape_cast %3 : vector<1x7x1x7x256xbf16> to vector<1x7x7x256xbf16>
    %5 = arith.maximumf %2, %4 : vector<1x7x7x256xbf16>
    %6 = vector.extract_strided_slice %5 {offsets = [0, 0, 0, 0], sizes = [1, 7, 7, 128], strides = [1, 1, 1, 1]} : vector<1x7x7x256xbf16> to vector<1x7x7x128xbf16>
    %7 = vector.extract_strided_slice %5 {offsets = [0, 0, 0, 128], sizes = [1, 7, 7, 128], strides = [1, 1, 1, 1]} : vector<1x7x7x256xbf16> to vector<1x7x7x128xbf16>
    %8 = arith.maximumf %6, %7 : vector<1x7x7x128xbf16>
    %c0_4 = arith.constant 0 : index
    %c0_5 = arith.constant 0 : index
    %c0_6 = arith.constant 0 : index
    %c0_7 = arith.constant 0 : index
    %9 = vector.load %arg2[%c0_4, %c0_5, %c0_6, %c0_7] : memref<1x7x7x128xbf16, #tpu.memory_space<vmem>>, vector<1x7x7x128xbf16>
    tpu.vector_store %arg2[%c0_4, %c0_5, %c0_6, %c0_7], %8 {strides = array<i32>} : memref<1x7x7x128xbf16, #tpu.memory_space<vmem>>, vector<1x7x7x128xbf16>,
    return
  }
  func.func @transform_0(%arg0: i32) -> (i32, i32, i32, i32, i32) {
    %c0_i32 = arith.constant 0 : i32
    %c0_i32_0 = arith.constant 0 : i32
    %c0_i32_1 = arith.constant 0 : i32
    %c0_i32_2 = arith.constant 0 : i32
    %c0_i32_3 = arith.constant 0 : i32
    return %arg0, %c0_i32, %c0_i32_0, %c0_i32_1, %c0_i32_2 : i32, i32, i32, i32, i32
  }
  func.func @transform_1(%arg0: i32) -> (i32, i32, i32, i32) {
    %c0_i32 = arith.constant 0 : i32
    %c0_i32_0 = arith.constant 0 : i32
    %c0_i32_1 = arith.constant 0 : i32
    %c0_i32_2 = arith.constant 0 : i32
    return %arg0, %c0_i32, %c0_i32_0, %c0_i32_1 : i32, i32, i32, i32
  }
}

module attributes {stable_mosaic.version = 11 : i64} {
  func.func @_fc_fused_kernel(%arg0: i32, %arg1: memref<2x3136xbf16, #tpu.memory_space<vmem>>, %arg2: memref<3136x1024xbf16, #tpu.memory_space<vmem>>, %arg3: memref<1x1024xf32, #tpu.memory_space<vmem>>, %arg4: memref<1024x128xbf16, #tpu.memory_space<vmem>>, %arg5: memref<1x128xf32, #tpu.memory_space<vmem>>, %arg6: memref<2x128xf32, #tpu.memory_space<vmem>>) attributes {dimension_semantics = [#tpu.dimension_semantics<arbitrary>], iteration_bounds = array<i64: 1>, scalar_prefetch = 0 : i64, scratch_operands = 0 : i64, tpu.core_type = #tpu.core_type<tc>, window_params = [{pipeline_mode = #tpu.pipeline_mode<synchronous>, transform_indices = @transform_0, window_bounds = array<i64: 2, 3136>}, {pipeline_mode = #tpu.pipeline_mode<synchronous>, transform_indices = @transform_1, window_bounds = array<i64: 3136, 1024>}, {pipeline_mode = #tpu.pipeline_mode<synchronous>, transform_indices = @transform_2, window_bounds = array<i64: 1, 1024>}, {pipeline_mode = #tpu.pipeline_mode<synchronous>, transform_indices = @transform_3, window_bounds = array<i64: 1024, 128>}, {pipeline_mode = #tpu.pipeline_mode<synchronous>, transform_indices = @transform_4, window_bounds = array<i64: 1, 128>}, {pipeline_mode = #tpu.pipeline_mode<synchronous>, transform_indices = @transform_5, window_bounds = array<i64: 2, 128>}]} {
    %c0 = arith.constant 0 : index
    %c0_0 = arith.constant 0 : index
    %0 = vector.load %arg1[%c0, %c0_0] : memref<2x3136xbf16, #tpu.memory_space<vmem>>, vector<2x3136xbf16>
    %c0_1 = arith.constant 0 : index
    %c0_2 = arith.constant 0 : index
    %1 = vector.load %arg2[%c0_1, %c0_2] : memref<3136x1024xbf16, #tpu.memory_space<vmem>>, vector<3136x1024xbf16>
    %cst = arith.constant dense<0.000000e+00> : vector<2x1024xf32>
    %2 = tpu.matmul %0, %1, %cst {dimension_numbers = #tpu.dot_dimension_numbers<[1], [0], [0], [1], [0, 0, 1, 1], [], []>} : vector<2x3136xbf16>, vector<3136x1024xbf16>, vector<2x1024xf32> -> vector<2x1024xf32>
    %c0_3 = arith.constant 0 : index
    %c0_4 = arith.constant 0 : index
    %3 = vector.load %arg3[%c0_3, %c0_4] : memref<1x1024xf32, #tpu.memory_space<vmem>>, vector<1x1024xf32>
    %4 = vector.broadcast %3 : vector<1x1024xf32> to vector<2x1024xf32>
    %5 = arith.addf %2, %4 : vector<2x1024xf32>
    %cst_5 = arith.constant 0.000000e+00 : f32
    %6 = vector.broadcast %cst_5 : f32 to vector<2x1024xf32>
    %7 = arith.cmpf oge, %5, %6 : vector<2x1024xf32>
    %cst_6 = arith.constant 0.00999999977 : f32
    %8 = vector.broadcast %cst_6 : f32 to vector<2x1024xf32>
    %9 = arith.mulf %8, %5 : vector<2x1024xf32>
    %10 = arith.select %7, %5, %9 : vector<2x1024xi1>, vector<2x1024xf32>
    %11 = arith.truncf %10 : vector<2x1024xf32> to vector<2x1024xbf16>
    %c0_7 = arith.constant 0 : index
    %c0_8 = arith.constant 0 : index
    %12 = vector.load %arg4[%c0_7, %c0_8] : memref<1024x128xbf16, #tpu.memory_space<vmem>>, vector<1024x128xbf16>
    %cst_9 = arith.constant dense<0.000000e+00> : vector<2x128xf32>
    %13 = tpu.matmul %11, %12, %cst_9 {dimension_numbers = #tpu.dot_dimension_numbers<[1], [0], [0], [1], [0, 0, 1, 1], [], []>} : vector<2x1024xbf16>, vector<1024x128xbf16>, vector<2x128xf32> -> vector<2x128xf32>
    %c0_10 = arith.constant 0 : index
    %c0_11 = arith.constant 0 : index
    %14 = vector.load %arg5[%c0_10, %c0_11] : memref<1x128xf32, #tpu.memory_space<vmem>>, vector<1x128xf32>
    %15 = vector.broadcast %14 : vector<1x128xf32> to vector<2x128xf32>
    %16 = arith.addf %13, %15 : vector<2x128xf32>
    %c0_12 = arith.constant 0 : index
    %c0_13 = arith.constant 0 : index
    %17 = vector.load %arg6[%c0_12, %c0_13] : memref<2x128xf32, #tpu.memory_space<vmem>>, vector<2x128xf32>
    tpu.vector_store %arg6[%c0_12, %c0_13], %16 {strides = array<i32>} : memref<2x128xf32, #tpu.memory_space<vmem>>, vector<2x128xf32>,
    return
  }
  func.func @transform_0(%arg0: i32) -> (i32, i32) {
    %c0_i32 = arith.constant 0 : i32
    %c0_i32_0 = arith.constant 0 : i32
    %c0_i32_1 = arith.constant 0 : i32
    return %c0_i32, %c0_i32_0 : i32, i32
  }
  func.func @transform_1(%arg0: i32) -> (i32, i32) {
    %c0_i32 = arith.constant 0 : i32
    %c0_i32_0 = arith.constant 0 : i32
    %c0_i32_1 = arith.constant 0 : i32
    return %c0_i32, %c0_i32_0 : i32, i32
  }
  func.func @transform_2(%arg0: i32) -> (i32, i32) {
    %c0_i32 = arith.constant 0 : i32
    %c0_i32_0 = arith.constant 0 : i32
    %c0_i32_1 = arith.constant 0 : i32
    return %c0_i32, %c0_i32_0 : i32, i32
  }
  func.func @transform_3(%arg0: i32) -> (i32, i32) {
    %c0_i32 = arith.constant 0 : i32
    %c0_i32_0 = arith.constant 0 : i32
    %c0_i32_1 = arith.constant 0 : i32
    return %c0_i32, %c0_i32_0 : i32, i32
  }
  func.func @transform_4(%arg0: i32) -> (i32, i32) {
    %c0_i32 = arith.constant 0 : i32
    %c0_i32_0 = arith.constant 0 : i32
    %c0_i32_1 = arith.constant 0 : i32
    return %c0_i32, %c0_i32_0 : i32, i32
  }
  func.func @transform_5(%arg0: i32) -> (i32, i32) {
    %c0_i32 = arith.constant 0 : i32
    %c0_i32_0 = arith.constant 0 : i32
    %c0_i32_1 = arith.constant 0 : i32
    return %c0_i32, %c0_i32_0 : i32, i32
  }
}

</mosaic_0001>

<bundles_post_ra>
// kernel: cnn_forward.6
= control target key start
LH: loop header
LB: loop body
LE: loop exit
PB: predicated region body
PF: predicated region fallthrough
CT: control target
= control target key end

     0   :  { %s433_s6 = smov 0   ;;  %s538_s0 = inlined_call_operand.vmem [shape: bf16[2,14,2,14,256], index: 0, kind: input, shape index: {}]   ;;  %s539_s1 = inlined_call_operand.vmem [shape: bf16[2,14,14,128], index: 1, kind: output, shape index: {}]  }
   0x1 LB: > { %s396_s7 = sadd.s32 4294967295, %s421_s6   ;;  %p400_p0 = scmp.ge.s32.totalorder %s421_s6, 1  ;;  %s421_s6 = sphi %s433_s6, %s11_s6  }
   0x2   : > { %p87_p1 = scmp.lt.s32.totalorder %s421_s6, 3 }
   0x4   : > { %p88_p2 = pnand %p400_p0, %p87_p1 }
   0x5   : > { %p107_p3 = scmp.lt.s32.totalorder (!%p88_p2), %s396_s7, 1 }
   0x6   : > { %91 = sbr.rel (%p88_p2) target bundleno = 49 (0x31), region = 24 }
   0xd   : > { %s541_s7 = smov (!%p107_p3, %s396_s7), 1 }
   0xe   : > { %s405_s8 = smul.u32 448, %s541_s7 }
   0xf   : > { %s406_s12 = smul.u32 112, %s541_s7 }
  0x10   : > { %s444_s11 = scalar_lea.vmem %s538_s0, %s405_s8 }
  0x11   : > { %v117_v0 = vld [vmem:[%s444_s11] sm:$0xff]  ;;  %v119_v1 = vld [vmem:[%s444_s11 + $0x10] sm:$0xff]  ;;  %v118_v2 = vld [vmem:[%s444_s11 + $0x8] sm:$0x77]  ;;  %s461_s15 = scalar_lea.vmem %s539_s1, %s406_s12 }
  0x12   : > { %v173_v3 = vmax.bf16 %v119_v1, %v117_v0  ;;  %v120_v4 = vld [vmem:[%s444_s11 + $0x18] sm:$0x77]  ;;  %v121_v5 = vld [vmem:[%s444_s11 + $0x20] sm:$0xff]  ;;  %v123_v6 = vld [vmem:[%s444_s11 + $0x30] sm:$0xff] }
  0x13   : > { %v174_v7 = vmax.bf16 %v120_v4, %v118_v2  ;;  %v175_v8 = vmax.bf16 %v123_v6, %v121_v5  ;;  %v122_v9 = vld [vmem:[%s444_s11 + $0x28] sm:$0x77]  ;;  %v124_v10 = vld [vmem:[%s444_s11 + $0x38] sm:$0x77]  ;;  %v125_v11 = vld [vmem:[%s444_s11 + $0x40] sm:$0xff] }
  0x14   : > { %v229_v12 = vrot.slane %v173_v3, 4  ;;  %v176_v13 = vmax.bf16 %v124_v10, %v122_v9  ;;  %v127_v14 = vld [vmem:[%s444_s11 + $0x50] sm:$0xff]  ;;  %v126_v15 = vld [vmem:[%s444_s11 + $0x48] sm:$0x77]  ;;  %v128_v16 = vld [vmem:[%s444_s11 + $0x58] sm:$0x77] }
  0x15   : > { %v230_v17 = vrot.slane %v174_v7, 4  ;;  %v231_v18 = vrot.slane %v175_v8, 4  ;;  %v177_v19 = vmax.bf16 %v127_v14, %v125_v11  ;;  %v178_v20 = vmax.bf16 %v128_v16, %v126_v15  ;;  %v129_v21 = vld [vmem:[%s444_s11 + $0x60] sm:$0xff]  ;;  %v131_v22 = vld [vmem:[%s444_s11 + $0x70] sm:$0xff]  ;;  %v130_v23 = vld [vmem:[%s444_s11 + $0x68] sm:$0x77] }
  0x16   : > { %v285_v24 = vmax.bf16 %v229_v12, %v173_v3  ;;  %v232_v25 = vrot.slane %v176_v13, 4  ;;  %v179_v26 = vmax.bf16 %v131_v22, %v129_v21  ;;  %v132_v27 = vld [vmem:[%s444_s11 + $0x78] sm:$0x77]  ;;  %v133_v28 = vld [vmem:[%s444_s11 + $0x80] sm:$0xff]  ;;  %v135_v29 = vld [vmem:[%s444_s11 + $0x90] sm:$0xff] }
  0x17   : > { %v286_v30 = vmax.bf16 %v230_v17, %v174_v7  ;;  %v287_v31 = vmax.bf16 %v231_v18, %v175_v8  ;;  %v233_v32 = vrot.slane %v177_v19, 4  ;;  %v234_v33 = vrot.slane %v178_v20, 4  ;;  %v134_v34 = vld [vmem:[%s444_s11 + $0x88] sm:$0x77]  ;;  %v136_v35 = vld [vmem:[%s444_s11 + $0x98] sm:$0x77] }
  0x18   : > { %313 = vst [vmem:[%s461_s15] sm:$0xf] %v285_v24  ;;  %v288_v36 = vmax.bf16 %v232_v25, %v176_v13  ;;  %v235_v37 = vrot.slane %v179_v26, 4  ;;  %v180_v38 = vmax.bf16 %v132_v27, %v130_v23  ;;  %v181_v39 = vmax.bf16 %v135_v29, %v133_v28  ;;  %v137_v40 = vld [vmem:[%s444_s11 + $0xa0] sm:$0xff]  ;;  %v139_v41 = vld [vmem:[%s444_s11 + $0xb0] sm:$0xff]  ;;  %v138_v42 = vld [vmem:[%s444_s11 + $0xa8] sm:$0x77] }
  0x19   : > { %314 = vst [vmem:[%s461_s15 + $0x4] sm:$0x7] %v286_v30  ;;  %315 = vst [vmem:[%s461_s15 + $0x8] sm:$0xf] %v287_v31  ;;  %v289_v43 = vmax.bf16 %v233_v32, %v177_v19  ;;  %v290_v44 = vmax.bf16 %v234_v33, %v178_v20  ;;  %v182_v45 = vmax.bf16 %v136_v35, %v134_v34  ;;  %v140_v47 = vld [vmem:[%s444_s11 + $0xb8] sm:$0x77] }
  0x1a   : > { %v183_v46 = vmax.bf16 %v139_v41, %v137_v40  ;;  %v141_v48 = vld [vmem:[%s444_s11 + $0xc0] sm:$0xff]  ;;  %v143_v49 = vld [vmem:[%s444_s11 + $0xd0] sm:$0xff]  ;;  %316 = vst [vmem:[%s461_s15 + $0xc] sm:$0x7] %v288_v36  ;;  %v291_v50 = vmax.bf16 %v235_v37, %v179_v26  ;;  %v236_v51 = vrot.slane %v180_v38, 4  ;;  %v237_v52 = vrot.slane %v181_v39, 4 }
  0x1b   : > { %v184_v53 = vmax.bf16 %v140_v47, %v138_v42  ;;  %v142_v54 = vld [vmem:[%s444_s11 + $0xc8] sm:$0x77]  ;;  %v144_v55 = vld [vmem:[%s444_s11 + $0xd8] sm:$0x77]  ;;  %317 = vst [vmem:[%s461_s15 + $0x10] sm:$0xf] %v289_v43  ;;  %v185_v58 = vmax.bf16 %v143_v49, %v141_v48 }
  0x1c   : > { %318 = vst [vmem:[%s461_s15 + $0x14] sm:$0x7] %v290_v44  ;;  %v238_v56 = vrot.slane %v182_v45, 4  ;;  %v239_v57 = vrot.slane %v183_v46, 4  ;;  %v186_v59 = vmax.bf16 %v144_v55, %v142_v54  ;;  %v145_v60 = vld [vmem:[%s444_s11 + $0xe0] sm:$0xff]  ;;  %v147_v61 = vld [vmem:[%s444_s11 + $0xf0] sm:$0xff]  ;;  %v292_v63 = vmax.bf16 %v236_v51, %v180_v38 }
  0x1d   : > { %v146_v62 = vld [vmem:[%s444_s11 + $0xe8] sm:$0x77]  ;;  %319 = vst [vmem:[%s461_s15 + $0x18] sm:$0xf] %v291_v50  ;;  %v293_v0 = vmax.bf16 %v237_v52, %v181_v39  ;;  %v240_v1 = vrot.slane %v184_v53, 4  ;;  %v187_v2 = vmax.bf16 %v147_v61, %v145_v60  ;;  %v149_v4 = vld [vmem:[%s444_s11 + $0x100] sm:$0xff] }
  0x1e   : > { %v148_v3 = vld [vmem:[%s444_s11 + $0xf8] sm:$0x77]  ;;  %v151_v5 = vld [vmem:[%s444_s11 + $0x110] sm:$0xff]  ;;  %v294_v6 = vmax.bf16 %v238_v56, %v182_v45  ;;  %v295_v7 = vmax.bf16 %v239_v57, %v183_v46  ;;  %v241_v8 = vrot.slane %v185_v58, 4  ;;  %v242_v9 = vrot.slane %v186_v59, 4  ;;  %v153_v16 = vld [vmem:[%s444_s11 + $0x120] sm:$0xff] }
  0x1f   : > { %v150_v10 = vld [vmem:[%s444_s11 + $0x108] sm:$0x77]  ;;  %v152_v11 = vld [vmem:[%s444_s11 + $0x118] sm:$0x77]  ;;  %320 = vst [vmem:[%s461_s15 + $0x1c] sm:$0x7] %v292_v63  ;;  %v296_v12 = vmax.bf16 %v240_v1, %v184_v53  ;;  %v188_v14 = vmax.bf16 %v148_v3, %v146_v62  ;;  %v189_v15 = vmax.bf16 %v151_v5, %v149_v4 }
  0x20   : > { %321 = vst [vmem:[%s461_s15 + $0x20] sm:$0xf] %v293_v0  ;;  %v243_v13 = vrot.slane %v187_v2, 4  ;;  %v155_v17 = vld [vmem:[%s444_s11 + $0x130] sm:$0xff]  ;;  %v154_v18 = vld [vmem:[%s444_s11 + $0x128] sm:$0x77]  ;;  %v297_v19 = vmax.bf16 %v241_v8, %v185_v58  ;;  %v298_v20 = vmax.bf16 %v242_v9, %v186_v59  ;;  %v190_v21 = vmax.bf16 %v152_v11, %v150_v10 }
  0x21   : > { %322 = vst [vmem:[%s461_s15 + $0x24] sm:$0x7] %v294_v6  ;;  %323 = vst [vmem:[%s461_s15 + $0x28] sm:$0xf] %v295_v7  ;;  %v191_v22 = vmax.bf16 %v155_v17, %v153_v16  ;;  %v156_v23 = vld [vmem:[%s444_s11 + $0x138] sm:$0x77] }
  0x22   : > { %v157_v24 = vld [vmem:[%s444_s11 + $0x140] sm:$0xff]  ;;  %v159_v25 = vld [vmem:[%s444_s11 + $0x150] sm:$0xff]  ;;  %324 = vst [vmem:[%s461_s15 + $0x2c] sm:$0x7] %v296_v12  ;;  %v299_v26 = vmax.bf16 %v243_v13, %v187_v2  ;;  %v244_v27 = vrot.slane %v188_v14, 4  ;;  %v245_v28 = vrot.slane %v189_v15, 4  ;;  %v192_v29 = vmax.bf16 %v156_v23, %v154_v18 }
  0x23   : > { %v158_v30 = vld [vmem:[%s444_s11 + $0x148] sm:$0x77]  ;;  %v160_v31 = vld [vmem:[%s444_s11 + $0x158] sm:$0x77]  ;;  %325 = vst [vmem:[%s461_s15 + $0x30] sm:$0xf] %v297_v19  ;;  %v193_v34 = vmax.bf16 %v159_v25, %v157_v24 }
  0x24   : > { %326 = vst [vmem:[%s461_s15 + $0x34] sm:$0x7] %v298_v20  ;;  %v246_v32 = vrot.slane %v190_v21, 4  ;;  %v247_v33 = vrot.slane %v191_v22, 4  ;;  %v194_v35 = vmax.bf16 %v160_v31, %v158_v30  ;;  %v161_v36 = vld [vmem:[%s444_s11 + $0x160] sm:$0xff]  ;;  %v163_v37 = vld [vmem:[%s444_s11 + $0x170] sm:$0xff]  ;;  %v300_v39 = vmax.bf16 %v244_v27, %v188_v14 }
  0x25   : > { %v162_v38 = vld [vmem:[%s444_s11 + $0x168] sm:$0x77]  ;;  %327 = vst [vmem:[%s461_s15 + $0x38] sm:$0xf] %v299_v26  ;;  %v301_v40 = vmax.bf16 %v245_v28, %v189_v15  ;;  %v248_v41 = vrot.slane %v192_v29, 4  ;;  %v195_v42 = vmax.bf16 %v163_v37, %v161_v36  ;;  %v165_v44 = vld [vmem:[%s444_s11 + $0x180] sm:$0xff] }
  0x26   : > { %v164_v43 = vld [vmem:[%s444_s11 + $0x178] sm:$0x77]  ;;  %v167_v45 = vld [vmem:[%s444_s11 + $0x190] sm:$0xff]  ;;  %v302_v46 = vmax.bf16 %v246_v32, %v190_v21  ;;  %v303_v47 = vmax.bf16 %v247_v33, %v191_v22  ;;  %v249_v48 = vrot.slane %v193_v34, 4  ;;  %v250_v49 = vrot.slane %v194_v35, 4  ;;  %v169_v56 = vld [vmem:[%s444_s11 + $0x1a0] sm:$0xff] }
  0x27   : > { %v166_v50 = vld [vmem:[%s444_s11 + $0x188] sm:$0x77]  ;;  %v168_v51 = vld [vmem:[%s444_s11 + $0x198] sm:$0x77]  ;;  %328 = vst [vmem:[%s461_s15 + $0x3c] sm:$0x7] %v300_v39  ;;  %v304_v52 = vmax.bf16 %v248_v41, %v192_v29  ;;  %v196_v54 = vmax.bf16 %v164_v43, %v162_v38  ;;  %v197_v55 = vmax.bf16 %v167_v45, %v165_v44 }
  0x28   : > { %329 = vst [vmem:[%s461_s15 + $0x40] sm:$0xf] %v301_v40  ;;  %v251_v53 = vrot.slane %v195_v42, 4  ;;  %v171_v57 = vld [vmem:[%s444_s11 + $0x1b0] sm:$0xff]  ;;  %v170_v58 = vld [vmem:[%s444_s11 + $0x1a8] sm:$0x77]  ;;  %v305_v59 = vmax.bf16 %v249_v48, %v193_v34  ;;  %v306_v60 = vmax.bf16 %v250_v49, %v194_v35  ;;  %v198_v61 = vmax.bf16 %v168_v51, %v166_v50 }
  0x29   : > { %330 = vst [vmem:[%s461_s15 + $0x44] sm:$0x7] %v302_v46  ;;  %331 = vst [vmem:[%s461_s15 + $0x48] sm:$0xf] %v303_v47  ;;  %v199_v62 = vmax.bf16 %v171_v57, %v169_v56  ;;  %v172_v63 = vld [vmem:[%s444_s11 + $0x1b8] sm:$0x77] }
  0x2a   : > { %332 = vst [vmem:[%s461_s15 + $0x4c] sm:$0x7] %v304_v52  ;;  %v307_v0 = vmax.bf16 %v251_v53, %v195_v42  ;;  %v252_v1 = vrot.slane %v196_v54, 4  ;;  %v253_v2 = vrot.slane %v197_v55, 4  ;;  %v200_v3 = vmax.bf16 %v172_v63, %v170_v58  ;;  %333 = vst [vmem:[%s461_s15 + $0x50] sm:$0xf] %v305_v59 }
  0x2b   : > { %334 = vst [vmem:[%s461_s15 + $0x54] sm:$0x7] %v306_v60  ;;  %v254_v4 = vrot.slane %v198_v61, 4  ;;  %v255_v5 = vrot.slane %v199_v62, 4 }
  0x2c   : > { %335 = vst [vmem:[%s461_s15 + $0x58] sm:$0xf] %v307_v0  ;;  %v308_v6 = vmax.bf16 %v252_v1, %v196_v54  ;;  %v309_v7 = vmax.bf16 %v253_v2, %v197_v55  ;;  %v256_v8 = vrot.slane %v200_v3, 4 }
  0x2d   : > { %v310_v9 = vmax.bf16 %v254_v4, %v198_v61  ;;  %v311_v10 = vmax.bf16 %v255_v5, %v199_v62 }
  0x2e   : > { %336 = vst [vmem:[%s461_s15 + $0x5c] sm:$0x7] %v308_v6  ;;  %337 = vst [vmem:[%s461_s15 + $0x60] sm:$0xf] %v309_v7  ;;  %v312_v11 = vmax.bf16 %v256_v8, %v200_v3 }
  0x2f   : > { %338 = vst [vmem:[%s461_s15 + $0x64] sm:$0x7] %v310_v9  ;;  %339 = vst [vmem:[%s461_s15 + $0x68] sm:$0xf] %v311_v10 }
  0x30   : > { %340 = vst [vmem:[%s461_s15 + $0x6c] sm:$0x7] %v312_v11 }
  0x31 PF: > { %s11_s6 = sadd.s32 1, %s421_s6  }
  0x32   : > { %p8_p4 = scmp.ge.s32.totalorder %s11_s6, 4  }
  0x34   :  { %10 = sbr.rel (!%p8_p4) target bundleno = 1 (0x1), region = 54 }

// kernel: cnn_forward.5
= control target key start
LH: loop header
LB: loop body
LE: loop exit
PB: predicated region body
PF: predicated region fallthrough
CT: control target
= control target key end

     0   :  { %s2900_s12 = smov 0   ;;  %s3291_s0 = inlined_call_operand.vmem [shape: bf16[1568,32], index: 0, kind: input, shape index: {}]   ;;  %s3292_s1 = inlined_call_operand.vmem [shape: bf16[32,128], index: 1, kind: input, shape index: {}]   ;;  %s3293_s2 = inlined_call_operand.vmem [shape: f32[1,128], index: 2, kind: input, shape index: {}]   ;;  %s3294_s3 = inlined_call_operand.vmem [shape: bf16[1568,128], index: 3, kind: output, shape index: {}]  }
   0x1 LB: > { %s1954_s13 = sadd.s32 4294967295, %s2876_s12   ;;  %p1958_p0 = scmp.ge.s32.totalorder %s2876_s12, 1  ;;  %s2876_s12 = sphi %s2900_s12, %s13_s12  }
   0x2   : > { %p138_p1 = scmp.lt.s32.totalorder %s2876_s12, 3 }
   0x4   : > { %p139_p2 = pnand %p1958_p0, %p138_p1 }
   0x5   : > { %v2818_v0 = vld [vmem:[%s3292_s1] sm:$0xff] (!%p139_p2)   ;;  %v2878_v1 = vmov (!%p139_p2), 0.0   ;;  %v2819_v2 = vld [vmem:[%s3292_s1 + $0x8] sm:$0xff] (!%p139_p2)   ;;  %s162_s18 = smul.u32 (!%p139_p2), 98, %s1954_s13  ;;  %vm2879_vm0 = vmmov (!%p139_p2), 0   ;;  %vm541_vm1 = vcmask (!%p139_p2), 261120  }
   0x6   : > { %142 = sbr.rel (%p139_p2) target bundleno = 431 (0x1af), region = 32  ;;  %2604 = vmatprep.subr.bf16.mxu0 (!%p139_p2), %v2878_v1  ;;  %2804 = vmatprep.subr.bf16.mxu1 (!%p139_p2), %v2878_v1  ;;  %v3127_v52 = vld [vmem:[%s3293_s2] ss:$0 sm:$0xff] (!%p139_p2) }
   0x7   : > { %2605 = vmatpush3.bf16.msra.mxu0 (!%p139_p2), %v2818_v0  ;;  %2806 = vmatpush3.bf16.msra.mxu1 (!%p139_p2), %v2818_v0  ;;  %p163_p3 = scmp.lt.s32.totalorder (!%p139_p2), %s162_s18, 195 }
   0x8   : > { %2606 = vmatprep.subr.bf16.mxu0 (!%p139_p2), %v2878_v1  ;;  %2608 = vmatprep.mubr.msk.bf16.mxu0 (!%p139_p2), %vm2879_vm0, %v2878_v1 }
   0x9   : > { %2805 = vmatprep.subr.bf16.mxu1 (!%p139_p2), %v2878_v1  ;;  %2708 = vmatprep.mubr.msk.bf16.mxu1 (!%p139_p2), %vm2879_vm0, %v2878_v1 }
   0xb   : > { %2607 = vmatpush3.bf16.msra.mxu0 (!%p139_p2), %v2819_v2  ;;  %2807 = vmatpush3.bf16.msra.mxu1 (!%p139_p2), %v2819_v2 }
   0xd   : > { %s3296_s18 = smov (!%p163_p3, %s162_s18), 195 }
   0xe   : > { %s1959_s19 = sshll.u32 %s3296_s18, 2 }
   0xf   : > { %s2930_s22 = scalar_lea.vmem %s3291_s0, %s1959_s19  ;;  %s3138_s27 = scalar_lea.vmem %s3294_s3, %s1959_s19 }
  0x10   : > { %v2820_v3 = vld [vmem:[%s2930_s22] sm:$0xff]   ;;  %v2821_v4 = vld [vmem:[%s2930_s22 + $0xc8] sm:$0xff]   ;;  %v2823_v6 = vld [vmem:[%s2930_s22 + $0xd0] sm:$0xff]  }
  0x11   : > { %2609 = vmatmul.mubr.msk.bf16.vlgmr.msra.gmra.mrb[0].mxu0 %vm541_vm1, %v2820_v3  ;;  %2709 = vmatmul.mubr.msk.bf16.vlgmr.msra.gmra.mrb[0].mxu1 %vm541_vm1, %v2821_v4  ;;  %v2822_v5 = vld [vmem:[%s2930_s22 + $0x8] sm:$0xff]   ;;  %v2824_v7 = vld [vmem:[%s2930_s22 + $0x10] sm:$0xff]   ;;  %v2825_v8 = vld [vmem:[%s2930_s22 + $0xd8] sm:$0xff]  }
  0x12   : > { %2612 = vmatprep.mubr.msk.bf16.mxu0 %vm2879_vm0, %v2878_v1  ;;  %2712 = vmatprep.mubr.msk.bf16.mxu1 %vm2879_vm0, %v2878_v1  ;;  %v2826_v9 = vld [vmem:[%s2930_s22 + $0x18] sm:$0xff]   ;;  %v2827_v10 = vld [vmem:[%s2930_s22 + $0xe0] sm:$0xff]   ;;  %v2829_v12 = vld [vmem:[%s2930_s22 + $0xe8] sm:$0xff]  }
  0x13   : > { %v2828_v11 = vld [vmem:[%s2930_s22 + $0x20] sm:$0xff]   ;;  %v2830_v13 = vld [vmem:[%s2930_s22 + $0x28] sm:$0xff]   ;;  %v2831_v14 = vld [vmem:[%s2930_s22 + $0xf0] sm:$0xff]  }
  0x14   : > { %v2832_v15 = vld [vmem:[%s2930_s22 + $0x30] sm:$0xff]   ;;  %v2833_v16 = vld [vmem:[%s2930_s22 + $0xf8] sm:$0xff]   ;;  %v2835_v18 = vld [vmem:[%s2930_s22 + $0x100] sm:$0xff]  }
  0x15   : > { %v2834_v17 = vld [vmem:[%s2930_s22 + $0x38] sm:$0xff]   ;;  %v2836_v19 = vld [vmem:[%s2930_s22 + $0x40] sm:$0xff]   ;;  %v2837_v20 = vld [vmem:[%s2930_s22 + $0x108] sm:$0xff]  }
  0x16   : > { %v2838_v21 = vld [vmem:[%s2930_s22 + $0x48] sm:$0xff]   ;;  %v2839_v22 = vld [vmem:[%s2930_s22 + $0x110] sm:$0xff]   ;;  %v2841_v24 = vld [vmem:[%s2930_s22 + $0x118] sm:$0xff]  }
  0x17   : > { %v2840_v23 = vld [vmem:[%s2930_s22 + $0x50] sm:$0xff]   ;;  %v2842_v25 = vld [vmem:[%s2930_s22 + $0x58] sm:$0xff]   ;;  %v2843_v26 = vld [vmem:[%s2930_s22 + $0x120] sm:$0xff]  }
  0x18   : > { %v2844_v27 = vld [vmem:[%s2930_s22 + $0x60] sm:$0xff]   ;;  %v2845_v28 = vld [vmem:[%s2930_s22 + $0x128] sm:$0xff]   ;;  %v2847_v30 = vld [vmem:[%s2930_s22 + $0x130] sm:$0xff]  }
  0x19   : > { %2613 = vmatmul.mubr.msk.bf16.gmra.mrb[4].mxu0 %vm541_vm1, %v2822_v5  ;;  %2713 = vmatmul.mubr.msk.bf16.gmra.mrb[4].mxu1 %vm541_vm1, %v2823_v6  ;;  %v2846_v29 = vld [vmem:[%s2930_s22 + $0x68] sm:$0xff]   ;;  %v2848_v31 = vld [vmem:[%s2930_s22 + $0x70] sm:$0xff]   ;;  %v2849_v32 = vld [vmem:[%s2930_s22 + $0x138] sm:$0xff]  }
  0x1a   : > { %2616 = vmatprep.mubr.msk.bf16.mxu0 %vm2879_vm0, %v2878_v1  ;;  %2716 = vmatprep.mubr.msk.bf16.mxu1 %vm2879_vm0, %v2878_v1  ;;  %v2850_v33 = vld [vmem:[%s2930_s22 + $0x78] sm:$0xff]   ;;  %v2851_v34 = vld [vmem:[%s2930_s22 + $0x140] sm:$0xff]   ;;  %v2853_v36 = vld [vmem:[%s2930_s22 + $0x148] sm:$0xff]  }
  0x1b   : > { %v2852_v35 = vld [vmem:[%s2930_s22 + $0x80] sm:$0xff]   ;;  %v2854_v37 = vld [vmem:[%s2930_s22 + $0x88] sm:$0xff]   ;;  %v2855_v38 = vld [vmem:[%s2930_s22 + $0x150] sm:$0xff]  }
  0x1c   : > { %v2856_v39 = vld [vmem:[%s2930_s22 + $0x90] sm:$0xff]   ;;  %v2857_v40 = vld [vmem:[%s2930_s22 + $0x158] sm:$0xff]   ;;  %v2859_v42 = vld [vmem:[%s2930_s22 + $0x160] sm:$0xff]  }
  0x1d   : > { %v2858_v41 = vld [vmem:[%s2930_s22 + $0x98] sm:$0xff]   ;;  %v2860_v43 = vld [vmem:[%s2930_s22 + $0xa0] sm:$0xff]   ;;  %v2861_v44 = vld [vmem:[%s2930_s22 + $0x168] sm:$0xff]  }
  0x1e   : > { %v2862_v45 = vld [vmem:[%s2930_s22 + $0xa8] sm:$0xff]   ;;  %v2863_v46 = vld [vmem:[%s2930_s22 + $0x170] sm:$0xff]   ;;  %v2865_v48 = vld [vmem:[%s2930_s22 + $0x178] sm:$0xff]  }
  0x1f   : > { %v2864_v47 = vld [vmem:[%s2930_s22 + $0xb0] sm:$0xff]   ;;  %v2866_v49 = vld [vmem:[%s2930_s22 + $0xb8] sm:$0xff]   ;;  %v2867_v50 = vld [vmem:[%s2930_s22 + $0x180] sm:$0xff]  }
  0x20   : > { %v2868_v51 = vld [vmem:[%s2930_s22 + $0xc0] sm:$0xff]  }
  0x21   : > { %2617 = vmatmul.mubr.msk.bf16.gmra.mrb[8].mxu0 %vm541_vm1, %v2824_v7  ;;  %2717 = vmatmul.mubr.msk.bf16.gmra.mrb[8].mxu1 %vm541_vm1, %v2825_v8 }
  0x22   : > { %2620 = vmatprep.mubr.msk.bf16.mxu0 %vm2879_vm0, %v2878_v1  ;;  %2720 = vmatprep.mubr.msk.bf16.mxu1 %vm2879_vm0, %v2878_v1 }
  0x29   : > { %2621 = vmatmul.mubr.msk.bf16.gmra.mrb[12].mxu0 %vm541_vm1, %v2826_v9  ;;  %2721 = vmatmul.mubr.msk.bf16.gmra.mrb[12].mxu1 %vm541_vm1, %v2827_v10 }
  0x2a   : > { %2624 = vmatprep.mubr.msk.bf16.mxu0 %vm2879_vm0, %v2878_v1  ;;  %2724 = vmatprep.mubr.msk.bf16.mxu1 %vm2879_vm0, %v2878_v1 }
  0x31   : > { %2625 = vmatmul.mubr.msk.bf16.gmra.mrb[16].mxu0 %vm541_vm1, %v2828_v11  ;;  %2725 = vmatmul.mubr.msk.bf16.gmra.mrb[16].mxu1 %vm541_vm1, %v2829_v12 }
  0x32   : > { %2628 = vmatprep.mubr.msk.bf16.mxu0 %vm2879_vm0, %v2878_v1  ;;  %2728 = vmatprep.mubr.msk.bf16.mxu1 %vm2879_vm0, %v2878_v1 }
  0x39   : > { %2629 = vmatmul.mubr.msk.bf16.gmra.mrb[20].mxu0 %vm541_vm1, %v2830_v13  ;;  %2729 = vmatmul.mubr.msk.bf16.gmra.mrb[20].mxu1 %vm541_vm1, %v2831_v14 }
  0x3a   : > { %2632 = vmatprep.mubr.msk.bf16.mxu0 %vm2879_vm0, %v2878_v1  ;;  %2732 = vmatprep.mubr.msk.bf16.mxu1 %vm2879_vm0, %v2878_v1 }
  0x41   : > { %2633 = vmatmul.mubr.msk.bf16.gmra.mrb[24].mxu0 %vm541_vm1, %v2832_v15  ;;  %2733 = vmatmul.mubr.msk.bf16.gmra.mrb[24].mxu1 %vm541_vm1, %v2833_v16 }
  0x42   : > { %2636 = vmatprep.mubr.msk.bf16.mxu0 %vm2879_vm0, %v2878_v1  ;;  %2736 = vmatprep.mubr.msk.bf16.mxu1 %vm2879_vm0, %v2878_v1 }
  0x49   : > { %2637 = vmatmul.mubr.msk.bf16.gmra.mrb[28].mxu0 %vm541_vm1, %v2834_v17  ;;  %2737 = vmatmul.mubr.msk.bf16.gmra.mrb[28].mxu1 %vm541_vm1, %v2835_v18 }
  0x4a   : > { %2640 = vmatprep.mubr.msk.bf16.mxu0 %vm2879_vm0, %v2878_v1  ;;  %2740 = vmatprep.mubr.msk.bf16.mxu1 %vm2879_vm0, %v2878_v1 }
  0x51   : > { %2641 = vmatmul.mubr.msk.bf16.gmra.mrb[32].mxu0 %vm541_vm1, %v2836_v19  ;;  %2741 = vmatmul.mubr.msk.bf16.gmra.mrb[32].mxu1 %vm541_vm1, %v2837_v20 }
  0x52   : > { %2644 = vmatprep.mubr.msk.bf16.mxu0 %vm2879_vm0, %v2878_v1  ;;  %2744 = vmatprep.mubr.msk.bf16.mxu1 %vm2879_vm0, %v2878_v1 }
  0x59   : > { %2645 = vmatmul.mubr.msk.bf16.gmra.mrb[36].mxu0 %vm541_vm1, %v2838_v21  ;;  %2745 = vmatmul.mubr.msk.bf16.gmra.mrb[36].mxu1 %vm541_vm1, %v2839_v22 }
  0x5a   : > { %2648 = vmatprep.mubr.msk.bf16.mxu0 %vm2879_vm0, %v2878_v1  ;;  %2748 = vmatprep.mubr.msk.bf16.mxu1 %vm2879_vm0, %v2878_v1 }
  0x61   : > { %2649 = vmatmul.mubr.msk.bf16.gmra.mrb[40].mxu0 %vm541_vm1, %v2840_v23  ;;  %2749 = vmatmul.mubr.msk.bf16.gmra.mrb[40].mxu1 %vm541_vm1, %v2841_v24 }
  0x62   : > { %2652 = vmatprep.mubr.msk.bf16.mxu0 %vm2879_vm0, %v2878_v1  ;;  %2752 = vmatprep.mubr.msk.bf16.mxu1 %vm2879_vm0, %v2878_v1 }
  0x69   : > { %2653 = vmatmul.mubr.msk.bf16.gmra.mrb[44].mxu0 %vm541_vm1, %v2842_v25  ;;  %2753 = vmatmul.mubr.msk.bf16.gmra.mrb[44].mxu1 %vm541_vm1, %v2843_v26 }
  0x6a   : > { %2656 = vmatprep.mubr.msk.bf16.mxu0 %vm2879_vm0, %v2878_v1  ;;  %2756 = vmatprep.mubr.msk.bf16.mxu1 %vm2879_vm0, %v2878_v1 }
  0x71   : > { %2657 = vmatmul.mubr.msk.bf16.gmra.mrb[48].mxu0 %vm541_vm1, %v2844_v27  ;;  %2757 = vmatmul.mubr.msk.bf16.gmra.mrb[48].mxu1 %vm541_vm1, %v2845_v28 }
  0x72   : > { %2660 = vmatprep.mubr.msk.bf16.mxu0 %vm2879_vm0, %v2878_v1  ;;  %2760 = vmatprep.mubr.msk.bf16.mxu1 %vm2879_vm0, %v2878_v1 }
  0x79   : > { %2661 = vmatmul.mubr.msk.bf16.gmra.mrb[52].mxu0 %vm541_vm1, %v2846_v29  ;;  %2761 = vmatmul.mubr.msk.bf16.gmra.mrb[52].mxu1 %vm541_vm1, %v2847_v30 }
  0x7a   : > { %2664 = vmatprep.mubr.msk.bf16.mxu0 %vm2879_vm0, %v2878_v1  ;;  %2764 = vmatprep.mubr.msk.bf16.mxu1 %vm2879_vm0, %v2878_v1 }
  0x81   : > { %2665 = vmatmul.mubr.msk.bf16.gmra.mrb[56].mxu0 %vm541_vm1, %v2848_v31  ;;  %2765 = vmatmul.mubr.msk.bf16.gmra.mrb[56].mxu1 %vm541_vm1, %v2849_v32 }
  0x82   : > { %2668 = vmatprep.mubr.msk.bf16.mxu0 %vm2879_vm0, %v2878_v1  ;;  %2768 = vmatprep.mubr.msk.bf16.mxu1 %vm2879_vm0, %v2878_v1 }
  0x89   : > { %2669 = vmatmul.mubr.msk.bf16.gmra.mrb[60].mxu0 %vm541_vm1, %v2850_v33  ;;  %2769 = vmatmul.mubr.msk.bf16.gmra.mrb[60].mxu1 %vm541_vm1, %v2851_v34 }
  0x8a   : > { %2672 = vmatprep.mubr.msk.bf16.mxu0 %vm2879_vm0, %v2878_v1  ;;  %2772 = vmatprep.mubr.msk.bf16.mxu1 %vm2879_vm0, %v2878_v1 }
  0x91   : > { %2673 = vmatmul.mubr.msk.bf16.gmra.mrb[64].mxu0 %vm541_vm1, %v2852_v35  ;;  %2773 = vmatmul.mubr.msk.bf16.gmra.mrb[64].mxu1 %vm541_vm1, %v2853_v36 }
  0x92   : > { %2676 = vmatprep.mubr.msk.bf16.mxu0 %vm2879_vm0, %v2878_v1  ;;  %2776 = vmatprep.mubr.msk.bf16.mxu1 %vm2879_vm0, %v2878_v1 }
  0x99   : > { %2677 = vmatmul.mubr.msk.bf16.gmra.mrb[68].mxu0 %vm541_vm1, %v2854_v37  ;;  %2777 = vmatmul.mubr.msk.bf16.gmra.mrb[68].mxu1 %vm541_vm1, %v2855_v38 }
  0x9a   : > { %2680 = vmatprep.mubr.msk.bf16.mxu0 %vm2879_vm0, %v2878_v1  ;;  %2780 = vmatprep.mubr.msk.bf16.mxu1 %vm2879_vm0, %v2878_v1 }
  0xa1   : > { %2681 = vmatmul.mubr.msk.bf16.gmra.mrb[72].mxu0 %vm541_vm1, %v2856_v39  ;;  %2781 = vmatmul.mubr.msk.bf16.gmra.mrb[72].mxu1 %vm541_vm1, %v2857_v40 }
  0xa2   : > { %2684 = vmatprep.mubr.msk.bf16.mxu0 %vm2879_vm0, %v2878_v1  ;;  %2784 = vmatprep.mubr.msk.bf16.mxu1 %vm2879_vm0, %v2878_v1 }
  0xa9   : > { %2685 = vmatmul.mubr.msk.bf16.gmra.mrb[76].mxu0 %vm541_vm1, %v2858_v41  ;;  %2785 = vmatmul.mubr.msk.bf16.gmra.mrb[76].mxu1 %vm541_vm1, %v2859_v42 }
  0xaa   : > { %2688 = vmatprep.mubr.msk.bf16.mxu0 %vm2879_vm0, %v2878_v1  ;;  %2788 = vmatprep.mubr.msk.bf16.mxu1 %vm2879_vm0, %v2878_v1 }
  0xb1   : > { %2689 = vmatmul.mubr.msk.bf16.gmra.mrb[80].mxu0 %vm541_vm1, %v2860_v43  ;;  %2789 = vmatmul.mubr.msk.bf16.gmra.mrb[80].mxu1 %vm541_vm1, %v2861_v44 }
  0xb2   : > { %2692 = vmatprep.mubr.msk.bf16.mxu0 %vm2879_vm0, %v2878_v1  ;;  %2792 = vmatprep.mubr.msk.bf16.mxu1 %vm2879_vm0, %v2878_v1 }
  0xb9   : > { %2693 = vmatmul.mubr.msk.bf16.gmra.mrb[84].mxu0 %vm541_vm1, %v2862_v45  ;;  %2793 = vmatmul.mubr.msk.bf16.gmra.mrb[84].mxu1 %vm541_vm1, %v2863_v46 }
  0xba   : > { %2696 = vmatprep.mubr.msk.bf16.mxu0 %vm2879_vm0, %v2878_v1  ;;  %2796 = vmatprep.mubr.msk.bf16.mxu1 %vm2879_vm0, %v2878_v1 }
  0xc1   : > { %2697 = vmatmul.mubr.msk.bf16.gmra.mrb[88].mxu0 %vm541_vm1, %v2864_v47  ;;  %2797 = vmatmul.mubr.msk.bf16.gmra.mrb[88].mxu1 %vm541_vm1, %v2865_v48 }
  0xc2   : > { %2700 = vmatprep.mubr.msk.bf16.mxu0 %vm2879_vm0, %v2878_v1  ;;  %2800 = vmatprep.mubr.msk.bf16.mxu1 %vm2879_vm0, %v2878_v1 }
  0xc9   : > { %2701 = vmatmul.mubr.msk.bf16.gmra.mrb[92].mxu0 %vm541_vm1, %v2866_v49  ;;  %2801 = vmatmul.mubr.msk.bf16.gmra.mrb[92].mxu1 %vm541_vm1, %v2867_v50 }
  0xca   : > { %2704 = vmatprep.mubr.msk.bf16.mxu0 %vm2879_vm0, %v2878_v1 }
  0xd1   : > { %2705 = vmatmul.mubr.msk.bf16.gmra.mrb[96].mxu0 %vm541_vm1, %v2868_v51 }
  0xe4   : > { %v723_v53 = vpop.f32.mrb[0].mxu0  ;;  %v923_v56 = vpop.f32.mrb[0].mxu1 }
  0xe5   : > { %v724_v54 = vadd.f32 %v3127_v52, %v723_v53  ;;  %v2610_v55 = vpop.f32.mrb[1].mxu0  ;;  %v924_v58 = vadd.f32 %v3127_v52, %v923_v56  ;;  %v2710_v59 = vpop.f32.mrb[1].mxu1 }
  0xe6   : > { %v726_v57 = vpop.f32.mrb[2].mxu0  ;;  %v926_v63 = vpop.f32.mrb[2].mxu1 }
  0xe7   : > { %v1212_v60 = vmul.f32 0.01, %v724_v54  ;;  %v727_v61 = vadd.f32 %v3127_v52, %v726_v57  ;;  %v2611_v62 = vpop.f32.mrb[3].mxu0  ;;  %vm1114_vm2 = vcmp.ge.f32.partialorder %v724_v54, 0.0  ;;  %vm1164_vm3 = vcmp.ge.f32.partialorder %v924_v58, 0.0  ;;  %v2711_v2 = vpop.f32.mrb[3].mxu1 }
  0xe8   : > { %v1262_v0 = vmul.f32 0.01, %v924_v58  ;;  %v927_v1 = vadd.f32 %v3127_v52, %v926_v63 }
  0xe9   : > { %vm1115_vm4 = vcmp.ge.f32.partialorder %v727_v61, 0.0  ;;  %v1213_v3 = vmul.f32 0.01, %v727_v61  ;;  %v1310_v6 = vsel %vm1114_vm2, %v724_v54, %v1212_v60 }
  0xea   : > { %v1360_v4 = vsel %vm1164_vm3, %v924_v58, %v1262_v0  ;;  %vm1165_vm5 = vcmp.ge.f32.partialorder %v927_v1, 0.0  ;;  %v1263_v5 = vmul.f32 0.01, %v927_v1 }
  0xeb   : > { %v1311_v7 = vsel %vm1115_vm4, %v727_v61, %v1213_v3 }
  0xec   : > { %v2263_v8 = vpack.c.bf16 %v1311_v7, %v1310_v6  ;;  %v1361_v9 = vsel %vm1165_vm5, %v927_v1, %v1263_v5  ;;  %v731_v10 = vpop.f32.mrb[4].mxu0  ;;  %v931_v14 = vpop.f32.mrb[4].mxu1 }
  0xed   : > { %v2388_v11 = vpack.c.bf16 %v1361_v9, %v1360_v4  ;;  %v732_v12 = vadd.f32 %v3127_v52, %v731_v10  ;;  %v2614_v13 = vpop.f32.mrb[5].mxu0  ;;  %v932_v16 = vadd.f32 %v3127_v52, %v931_v14  ;;  %v2714_v17 = vpop.f32.mrb[5].mxu1 }
  0xee   : > { %2264 = vst [vmem:[%s3138_s27] sm:$0xff] %v2263_v8   ;;  %v734_v15 = vpop.f32.mrb[6].mxu0  ;;  %v934_v21 = vpop.f32.mrb[6].mxu1 }
  0xef   : > { %2529 = vst [vmem:[%s3138_s27 + $0xc8] sm:$0xff] %v2388_v11   ;;  %v1214_v18 = vmul.f32 0.01, %v732_v12  ;;  %v735_v19 = vadd.f32 %v3127_v52, %v734_v15  ;;  %v2615_v20 = vpop.f32.mrb[7].mxu0  ;;  %vm1116_vm6 = vcmp.ge.f32.partialorder %v732_v12, 0.0  ;;  %vm1166_vm7 = vcmp.ge.f32.partialorder %v932_v16, 0.0 }
  0xf0   : > { %v1264_v22 = vmul.f32 0.01, %v932_v16  ;;  %v935_v23 = vadd.f32 %v3127_v52, %v934_v21  ;;  %v2715_v24 = vpop.f32.mrb[7].mxu1 }
  0xf1   : > { %vm1117_vm8 = vcmp.ge.f32.partialorder %v735_v19, 0.0  ;;  %v1215_v25 = vmul.f32 0.01, %v735_v19  ;;  %v1312_v28 = vsel %vm1116_vm6, %v732_v12, %v1214_v18 }
  0xf2   : > { %v1362_v26 = vsel %vm1166_vm7, %v932_v16, %v1264_v22  ;;  %vm1167_vm9 = vcmp.ge.f32.partialorder %v935_v23, 0.0  ;;  %v1265_v27 = vmul.f32 0.01, %v935_v23 }
  0xf3   : > { %v1313_v29 = vsel %vm1117_vm8, %v735_v19, %v1215_v25 }
  0xf4   : > { %v2268_v30 = vpack.c.bf16 %v1313_v29, %v1312_v28  ;;  %v1363_v31 = vsel %vm1167_vm9, %v935_v23, %v1265_v27  ;;  %v739_v32 = vpop.f32.mrb[8].mxu0  ;;  %v939_v36 = vpop.f32.mrb[8].mxu1 }
  0xf5   : > { %v2393_v33 = vpack.c.bf16 %v1363_v31, %v1362_v26  ;;  %v740_v34 = vadd.f32 %v3127_v52, %v739_v32  ;;  %v2618_v35 = vpop.f32.mrb[9].mxu0  ;;  %v940_v38 = vadd.f32 %v3127_v52, %v939_v36  ;;  %v2718_v39 = vpop.f32.mrb[9].mxu1 }
  0xf6   : > { %2505 = vst [vmem:[%s3138_s27 + $0x8] sm:$0xff] %v2268_v30   ;;  %v742_v37 = vpop.f32.mrb[10].mxu0  ;;  %v942_v43 = vpop.f32.mrb[10].mxu1 }
  0xf7   : > { %2530 = vst [vmem:[%s3138_s27 + $0xd0] sm:$0xff] %v2393_v33   ;;  %v1216_v40 = vmul.f32 0.01, %v740_v34  ;;  %v743_v41 = vadd.f32 %v3127_v52, %v742_v37  ;;  %v2619_v42 = vpop.f32.mrb[11].mxu0  ;;  %vm1118_vm10 = vcmp.ge.f32.partialorder %v740_v34, 0.0  ;;  %vm1168_vm11 = vcmp.ge.f32.partialorder %v940_v38, 0.0 }
  0xf8   : > { %v1266_v44 = vmul.f32 0.01, %v940_v38  ;;  %v943_v45 = vadd.f32 %v3127_v52, %v942_v43  ;;  %v2719_v46 = vpop.f32.mrb[11].mxu1 }
  0xf9   : > { %vm1119_vm12 = vcmp.ge.f32.partialorder %v743_v41, 0.0  ;;  %v1217_v47 = vmul.f32 0.01, %v743_v41  ;;  %v1314_v50 = vsel %vm1118_vm10, %v740_v34, %v1216_v40 }
  0xfa   : > { %v1364_v48 = vsel %vm1168_vm11, %v940_v38, %v1266_v44  ;;  %vm1169_vm13 = vcmp.ge.f32.partialorder %v943_v45, 0.0  ;;  %v1267_v49 = vmul.f32 0.01, %v943_v45 }
  0xfb   : > { %v1315_v51 = vsel %vm1119_vm12, %v743_v41, %v1217_v47 }
  0xfc   : > { %v2273_v53 = vpack.c.bf16 %v1315_v51, %v1314_v50  ;;  %v1365_v54 = vsel %vm1169_vm13, %v943_v45, %v1267_v49  ;;  %v747_v55 = vpop.f32.mrb[12].mxu0  ;;  %v947_v59 = vpop.f32.mrb[12].mxu1 }
  0xfd   : > { %v2398_v56 = vpack.c.bf16 %v1365_v54, %v1364_v48  ;;  %v748_v57 = vadd.f32 %v3127_v52, %v747_v55  ;;  %v2622_v58 = vpop.f32.mrb[13].mxu0  ;;  %v948_v61 = vadd.f32 %v3127_v52, %v947_v59  ;;  %v2722_v62 = vpop.f32.mrb[13].mxu1 }
  0xfe   : > { %2506 = vst [vmem:[%s3138_s27 + $0x10] sm:$0xff] %v2273_v53   ;;  %v750_v60 = vpop.f32.mrb[14].mxu0  ;;  %v950_v2 = vpop.f32.mrb[14].mxu1 }
  0xff   : > { %2531 = vst [vmem:[%s3138_s27 + $0xd8] sm:$0xff] %v2398_v56   ;;  %v1218_v63 = vmul.f32 0.01, %v748_v57  ;;  %v751_v0 = vadd.f32 %v3127_v52, %v750_v60  ;;  %v2623_v1 = vpop.f32.mrb[15].mxu0  ;;  %vm1120_vm14 = vcmp.ge.f32.partialorder %v748_v57, 0.0  ;;  %vm1170_vm15 = vcmp.ge.f32.partialorder %v948_v61, 0.0 }
 0x100   : > { %v1268_v3 = vmul.f32 0.01, %v948_v61  ;;  %v951_v4 = vadd.f32 %v3127_v52, %v950_v2  ;;  %v2723_v5 = vpop.f32.mrb[15].mxu1 }
 0x101   : > { %vm1121_vm0 = vcmp.ge.f32.partialorder %v751_v0, 0.0  ;;  %v1219_v6 = vmul.f32 0.01, %v751_v0  ;;  %v1316_v9 = vsel %vm1120_vm14, %v748_v57, %v1218_v63 }
 0x102   : > { %v1366_v7 = vsel %vm1170_vm15, %v948_v61, %v1268_v3  ;;  %vm1171_vm1 = vcmp.ge.f32.partialorder %v951_v4, 0.0  ;;  %v1269_v8 = vmul.f32 0.01, %v951_v4 }
 0x103   : > { %v1317_v10 = vsel %vm1121_vm0, %v751_v0, %v1219_v6 }
 0x104   : > { %v2278_v11 = vpack.c.bf16 %v1317_v10, %v1316_v9  ;;  %v1367_v12 = vsel %vm1171_vm1, %v951_v4, %v1269_v8  ;;  %v755_v13 = vpop.f32.mrb[16].mxu0  ;;  %v955_v17 = vpop.f32.mrb[16].mxu1 }
 0x105   : > { %v2403_v14 = vpack.c.bf16 %v1367_v12, %v1366_v7  ;;  %v756_v15 = vadd.f32 %v3127_v52, %v755_v13  ;;  %v2626_v16 = vpop.f32.mrb[17].mxu0  ;;  %v956_v19 = vadd.f32 %v3127_v52, %v955_v17  ;;  %v2726_v20 = vpop.f32.mrb[17].mxu1 }
 0x106   : > { %2507 = vst [vmem:[%s3138_s27 + $0x18] sm:$0xff] %v2278_v11   ;;  %v758_v18 = vpop.f32.mrb[18].mxu0  ;;  %v958_v24 = vpop.f32.mrb[18].mxu1 }
 0x107   : > { %2532 = vst [vmem:[%s3138_s27 + $0xe0] sm:$0xff] %v2403_v14   ;;  %v1220_v21 = vmul.f32 0.01, %v756_v15  ;;  %v759_v22 = vadd.f32 %v3127_v52, %v758_v18  ;;  %v2627_v23 = vpop.f32.mrb[19].mxu0  ;;  %vm1122_vm2 = vcmp.ge.f32.partialorder %v756_v15, 0.0  ;;  %vm1172_vm3 = vcmp.ge.f32.partialorder %v956_v19, 0.0 }
 0x108   : > { %v1270_v25 = vmul.f32 0.01, %v956_v19  ;;  %v959_v26 = vadd.f32 %v3127_v52, %v958_v24  ;;  %v2727_v27 = vpop.f32.mrb[19].mxu1 }
 0x109   : > { %vm1123_vm4 = vcmp.ge.f32.partialorder %v759_v22, 0.0  ;;  %v1221_v28 = vmul.f32 0.01, %v759_v22  ;;  %v1318_v31 = vsel %vm1122_vm2, %v756_v15, %v1220_v21 }
 0x10a   : > { %v1368_v29 = vsel %vm1172_vm3, %v956_v19, %v1270_v25  ;;  %vm1173_vm5 = vcmp.ge.f32.partialorder %v959_v26, 0.0  ;;  %v1271_v30 = vmul.f32 0.01, %v959_v26 }
 0x10b   : > { %v1319_v32 = vsel %vm1123_vm4, %v759_v22, %v1221_v28 }
 0x10c   : > { %v2283_v33 = vpack.c.bf16 %v1319_v32, %v1318_v31  ;;  %v1369_v34 = vsel %vm1173_vm5, %v959_v26, %v1271_v30  ;;  %v763_v35 = vpop.f32.mrb[20].mxu0  ;;  %v963_v39 = vpop.f32.mrb[20].mxu1 }
 0x10d   : > { %v2408_v36 = vpack.c.bf16 %v1369_v34, %v1368_v29  ;;  %v764_v37 = vadd.f32 %v3127_v52, %v763_v35  ;;  %v2630_v38 = vpop.f32.mrb[21].mxu0  ;;  %v964_v41 = vadd.f32 %v3127_v52, %v963_v39  ;;  %v2730_v42 = vpop.f32.mrb[21].mxu1 }
 0x10e   : > { %2508 = vst [vmem:[%s3138_s27 + $0x20] sm:$0xff] %v2283_v33   ;;  %v766_v40 = vpop.f32.mrb[22].mxu0  ;;  %v966_v46 = vpop.f32.mrb[22].mxu1 }
 0x10f   : > { %2533 = vst [vmem:[%s3138_s27 + $0xe8] sm:$0xff] %v2408_v36   ;;  %v1222_v43 = vmul.f32 0.01, %v764_v37  ;;  %v767_v44 = vadd.f32 %v3127_v52, %v766_v40  ;;  %v2631_v45 = vpop.f32.mrb[23].mxu0  ;;  %vm1124_vm6 = vcmp.ge.f32.partialorder %v764_v37, 0.0  ;;  %vm1174_vm7 = vcmp.ge.f32.partialorder %v964_v41, 0.0 }
 0x110   : > { %v1272_v47 = vmul.f32 0.01, %v964_v41  ;;  %v967_v48 = vadd.f32 %v3127_v52, %v966_v46  ;;  %v2731_v49 = vpop.f32.mrb[23].mxu1 }
 0x111   : > { %vm1125_vm8 = vcmp.ge.f32.partialorder %v767_v44, 0.0  ;;  %v1223_v50 = vmul.f32 0.01, %v767_v44  ;;  %v1320_v54 = vsel %vm1124_vm6, %v764_v37, %v1222_v43 }
 0x112   : > { %v1370_v51 = vsel %vm1174_vm7, %v964_v41, %v1272_v47  ;;  %vm1175_vm9 = vcmp.ge.f32.partialorder %v967_v48, 0.0  ;;  %v1273_v53 = vmul.f32 0.01, %v967_v48 }
 0x113   : > { %v1321_v55 = vsel %vm1125_vm8, %v767_v44, %v1223_v50 }
 0x114   : > { %v2288_v56 = vpack.c.bf16 %v1321_v55, %v1320_v54  ;;  %v1371_v57 = vsel %vm1175_vm9, %v967_v48, %v1273_v53  ;;  %v771_v58 = vpop.f32.mrb[24].mxu0  ;;  %v971_v62 = vpop.f32.mrb[24].mxu1 }
 0x115   : > { %v2413_v59 = vpack.c.bf16 %v1371_v57, %v1370_v51  ;;  %v772_v60 = vadd.f32 %v3127_v52, %v771_v58  ;;  %v2634_v61 = vpop.f32.mrb[25].mxu0  ;;  %v972_v0 = vadd.f32 %v3127_v52, %v971_v62  ;;  %v2734_v1 = vpop.f32.mrb[25].mxu1 }
 0x116   : > { %2509 = vst [vmem:[%s3138_s27 + $0x28] sm:$0xff] %v2288_v56   ;;  %v774_v63 = vpop.f32.mrb[26].mxu0  ;;  %v974_v5 = vpop.f32.mrb[26].mxu1 }
 0x117   : > { %2534 = vst [vmem:[%s3138_s27 + $0xf0] sm:$0xff] %v2413_v59   ;;  %v1224_v2 = vmul.f32 0.01, %v772_v60  ;;  %v775_v3 = vadd.f32 %v3127_v52, %v774_v63  ;;  %v2635_v4 = vpop.f32.mrb[27].mxu0  ;;  %vm1126_vm10 = vcmp.ge.f32.partialorder %v772_v60, 0.0  ;;  %vm1176_vm11 = vcmp.ge.f32.partialorder %v972_v0, 0.0 }
 0x118   : > { %v1274_v6 = vmul.f32 0.01, %v972_v0  ;;  %v975_v7 = vadd.f32 %v3127_v52, %v974_v5  ;;  %v2735_v8 = vpop.f32.mrb[27].mxu1 }
 0x119   : > { %vm1127_vm12 = vcmp.ge.f32.partialorder %v775_v3, 0.0  ;;  %v1225_v9 = vmul.f32 0.01, %v775_v3  ;;  %v1322_v12 = vsel %vm1126_vm10, %v772_v60, %v1224_v2 }
 0x11a   : > { %v1372_v10 = vsel %vm1176_vm11, %v972_v0, %v1274_v6  ;;  %vm1177_vm13 = vcmp.ge.f32.partialorder %v975_v7, 0.0  ;;  %v1275_v11 = vmul.f32 0.01, %v975_v7 }
 0x11b   : > { %v1323_v13 = vsel %vm1127_vm12, %v775_v3, %v1225_v9 }
 0x11c   : > { %v2293_v14 = vpack.c.bf16 %v1323_v13, %v1322_v12  ;;  %v1373_v15 = vsel %vm1177_vm13, %v975_v7, %v1275_v11  ;;  %v779_v16 = vpop.f32.mrb[28].mxu0  ;;  %v979_v20 = vpop.f32.mrb[28].mxu1 }
 0x11d   : > { %v2418_v17 = vpack.c.bf16 %v1373_v15, %v1372_v10  ;;  %v780_v18 = vadd.f32 %v3127_v52, %v779_v16  ;;  %v2638_v19 = vpop.f32.mrb[29].mxu0  ;;  %v980_v22 = vadd.f32 %v3127_v52, %v979_v20  ;;  %v2738_v23 = vpop.f32.mrb[29].mxu1 }
 0x11e   : > { %2510 = vst [vmem:[%s3138_s27 + $0x30] sm:$0xff] %v2293_v14   ;;  %v782_v21 = vpop.f32.mrb[30].mxu0  ;;  %v982_v27 = vpop.f32.mrb[30].mxu1 }
 0x11f   : > { %2535 = vst [vmem:[%s3138_s27 + $0xf8] sm:$0xff] %v2418_v17   ;;  %v1226_v24 = vmul.f32 0.01, %v780_v18  ;;  %v783_v25 = vadd.f32 %v3127_v52, %v782_v21  ;;  %v2639_v26 = vpop.f32.mrb[31].mxu0  ;;  %vm1128_vm14 = vcmp.ge.f32.partialorder %v780_v18, 0.0  ;;  %vm1178_vm15 = vcmp.ge.f32.partialorder %v980_v22, 0.0 }
 0x120   : > { %v1276_v28 = vmul.f32 0.01, %v980_v22  ;;  %v983_v29 = vadd.f32 %v3127_v52, %v982_v27  ;;  %v2739_v30 = vpop.f32.mrb[31].mxu1 }
 0x121   : > { %vm1129_vm0 = vcmp.ge.f32.partialorder %v783_v25, 0.0  ;;  %v1227_v31 = vmul.f32 0.01, %v783_v25  ;;  %v1324_v34 = vsel %vm1128_vm14, %v780_v18, %v1226_v24 }
 0x122   : > { %v1374_v32 = vsel %vm1178_vm15, %v980_v22, %v1276_v28  ;;  %vm1179_vm1 = vcmp.ge.f32.partialorder %v983_v29, 0.0  ;;  %v1277_v33 = vmul.f32 0.01, %v983_v29 }
 0x123   : > { %v1325_v35 = vsel %vm1129_vm0, %v783_v25, %v1227_v31 }
 0x124   : > { %v2298_v36 = vpack.c.bf16 %v1325_v35, %v1324_v34  ;;  %v1375_v37 = vsel %vm1179_vm1, %v983_v29, %v1277_v33  ;;  %v787_v38 = vpop.f32.mrb[32].mxu0  ;;  %v987_v42 = vpop.f32.mrb[32].mxu1 }
 0x125   : > { %v2423_v39 = vpack.c.bf16 %v1375_v37, %v1374_v32  ;;  %v788_v40 = vadd.f32 %v3127_v52, %v787_v38  ;;  %v2642_v41 = vpop.f32.mrb[33].mxu0  ;;  %v988_v44 = vadd.f32 %v3127_v52, %v987_v42  ;;  %v2742_v45 = vpop.f32.mrb[33].mxu1 }
 0x126   : > { %2511 = vst [vmem:[%s3138_s27 + $0x38] sm:$0xff] %v2298_v36   ;;  %v790_v43 = vpop.f32.mrb[34].mxu0  ;;  %v990_v49 = vpop.f32.mrb[34].mxu1 }
 0x127   : > { %2536 = vst [vmem:[%s3138_s27 + $0x100] sm:$0xff] %v2423_v39   ;;  %v1228_v46 = vmul.f32 0.01, %v788_v40  ;;  %v791_v47 = vadd.f32 %v3127_v52, %v790_v43  ;;  %v2643_v48 = vpop.f32.mrb[35].mxu0  ;;  %vm1130_vm2 = vcmp.ge.f32.partialorder %v788_v40, 0.0  ;;  %vm1180_vm3 = vcmp.ge.f32.partialorder %v988_v44, 0.0 }
 0x128   : > { %v1278_v50 = vmul.f32 0.01, %v988_v44  ;;  %v991_v51 = vadd.f32 %v3127_v52, %v990_v49  ;;  %v2743_v53 = vpop.f32.mrb[35].mxu1 }
 0x129   : > { %vm1131_vm4 = vcmp.ge.f32.partialorder %v791_v47, 0.0  ;;  %v1229_v54 = vmul.f32 0.01, %v791_v47  ;;  %v1326_v57 = vsel %vm1130_vm2, %v788_v40, %v1228_v46 }
 0x12a   : > { %v1376_v55 = vsel %vm1180_vm3, %v988_v44, %v1278_v50  ;;  %vm1181_vm5 = vcmp.ge.f32.partialorder %v991_v51, 0.0  ;;  %v1279_v56 = vmul.f32 0.01, %v991_v51 }
 0x12b   : > { %v1327_v58 = vsel %vm1131_vm4, %v791_v47, %v1229_v54 }
 0x12c   : > { %v2303_v59 = vpack.c.bf16 %v1327_v58, %v1326_v57  ;;  %v1377_v60 = vsel %vm1181_vm5, %v991_v51, %v1279_v56  ;;  %v795_v61 = vpop.f32.mrb[36].mxu0  ;;  %v995_v1 = vpop.f32.mrb[36].mxu1 }
 0x12d   : > { %v2428_v62 = vpack.c.bf16 %v1377_v60, %v1376_v55  ;;  %v796_v63 = vadd.f32 %v3127_v52, %v795_v61  ;;  %v2646_v0 = vpop.f32.mrb[37].mxu0  ;;  %v996_v3 = vadd.f32 %v3127_v52, %v995_v1  ;;  %v2746_v4 = vpop.f32.mrb[37].mxu1 }
 0x12e   : > { %2512 = vst [vmem:[%s3138_s27 + $0x40] sm:$0xff] %v2303_v59   ;;  %v798_v2 = vpop.f32.mrb[38].mxu0  ;;  %v998_v8 = vpop.f32.mrb[38].mxu1 }
 0x12f   : > { %2537 = vst [vmem:[%s3138_s27 + $0x108] sm:$0xff] %v2428_v62   ;;  %v1230_v5 = vmul.f32 0.01, %v796_v63  ;;  %v799_v6 = vadd.f32 %v3127_v52, %v798_v2  ;;  %v2647_v7 = vpop.f32.mrb[39].mxu0  ;;  %vm1132_vm6 = vcmp.ge.f32.partialorder %v796_v63, 0.0  ;;  %vm1182_vm7 = vcmp.ge.f32.partialorder %v996_v3, 0.0 }
 0x130   : > { %v1280_v9 = vmul.f32 0.01, %v996_v3  ;;  %v999_v10 = vadd.f32 %v3127_v52, %v998_v8  ;;  %v2747_v11 = vpop.f32.mrb[39].mxu1 }
 0x131   : > { %vm1133_vm8 = vcmp.ge.f32.partialorder %v799_v6, 0.0  ;;  %v1231_v12 = vmul.f32 0.01, %v799_v6  ;;  %v1328_v15 = vsel %vm1132_vm6, %v796_v63, %v1230_v5 }
 0x132   : > { %v1378_v13 = vsel %vm1182_vm7, %v996_v3, %v1280_v9  ;;  %vm1183_vm9 = vcmp.ge.f32.partialorder %v999_v10, 0.0  ;;  %v1281_v14 = vmul.f32 0.01, %v999_v10 }
 0x133   : > { %v1329_v16 = vsel %vm1133_vm8, %v799_v6, %v1231_v12 }
 0x134   : > { %v2308_v17 = vpack.c.bf16 %v1329_v16, %v1328_v15  ;;  %v1379_v18 = vsel %vm1183_vm9, %v999_v10, %v1281_v14  ;;  %v803_v19 = vpop.f32.mrb[40].mxu0  ;;  %v1003_v23 = vpop.f32.mrb[40].mxu1 }
 0x135   : > { %v2433_v20 = vpack.c.bf16 %v1379_v18, %v1378_v13  ;;  %v804_v21 = vadd.f32 %v3127_v52, %v803_v19  ;;  %v2650_v22 = vpop.f32.mrb[41].mxu0  ;;  %v1004_v25 = vadd.f32 %v3127_v52, %v1003_v23  ;;  %v2750_v26 = vpop.f32.mrb[41].mxu1 }
 0x136   : > { %2513 = vst [vmem:[%s3138_s27 + $0x48] sm:$0xff] %v2308_v17   ;;  %v806_v24 = vpop.f32.mrb[42].mxu0  ;;  %v1006_v30 = vpop.f32.mrb[42].mxu1 }
 0x137   : > { %2538 = vst [vmem:[%s3138_s27 + $0x110] sm:$0xff] %v2433_v20   ;;  %v1232_v27 = vmul.f32 0.01, %v804_v21  ;;  %v807_v28 = vadd.f32 %v3127_v52, %v806_v24  ;;  %v2651_v29 = vpop.f32.mrb[43].mxu0  ;;  %vm1134_vm10 = vcmp.ge.f32.partialorder %v804_v21, 0.0  ;;  %vm1184_vm11 = vcmp.ge.f32.partialorder %v1004_v25, 0.0 }
 0x138   : > { %v1282_v31 = vmul.f32 0.01, %v1004_v25  ;;  %v1007_v32 = vadd.f32 %v3127_v52, %v1006_v30  ;;  %v2751_v33 = vpop.f32.mrb[43].mxu1 }
 0x139   : > { %vm1135_vm12 = vcmp.ge.f32.partialorder %v807_v28, 0.0  ;;  %v1233_v34 = vmul.f32 0.01, %v807_v28  ;;  %v1330_v37 = vsel %vm1134_vm10, %v804_v21, %v1232_v27 }
 0x13a   : > { %v1380_v35 = vsel %vm1184_vm11, %v1004_v25, %v1282_v31  ;;  %vm1185_vm13 = vcmp.ge.f32.partialorder %v1007_v32, 0.0  ;;  %v1283_v36 = vmul.f32 0.01, %v1007_v32 }
 0x13b   : > { %v1331_v38 = vsel %vm1135_vm12, %v807_v28, %v1233_v34 }
 0x13c   : > { %v2313_v39 = vpack.c.bf16 %v1331_v38, %v1330_v37  ;;  %v1381_v40 = vsel %vm1185_vm13, %v1007_v32, %v1283_v36  ;;  %v811_v41 = vpop.f32.mrb[44].mxu0  ;;  %v1011_v45 = vpop.f32.mrb[44].mxu1 }
 0x13d   : > { %v2438_v42 = vpack.c.bf16 %v1381_v40, %v1380_v35  ;;  %v812_v43 = vadd.f32 %v3127_v52, %v811_v41  ;;  %v2654_v44 = vpop.f32.mrb[45].mxu0  ;;  %v1012_v47 = vadd.f32 %v3127_v52, %v1011_v45  ;;  %v2754_v48 = vpop.f32.mrb[45].mxu1 }
 0x13e   : > { %2514 = vst [vmem:[%s3138_s27 + $0x50] sm:$0xff] %v2313_v39   ;;  %v814_v46 = vpop.f32.mrb[46].mxu0  ;;  %v1014_v53 = vpop.f32.mrb[46].mxu1 }
 0x13f   : > { %2539 = vst [vmem:[%s3138_s27 + $0x118] sm:$0xff] %v2438_v42   ;;  %v1234_v49 = vmul.f32 0.01, %v812_v43  ;;  %v815_v50 = vadd.f32 %v3127_v52, %v814_v46  ;;  %v2655_v51 = vpop.f32.mrb[47].mxu0  ;;  %vm1136_vm14 = vcmp.ge.f32.partialorder %v812_v43, 0.0  ;;  %vm1186_vm15 = vcmp.ge.f32.partialorder %v1012_v47, 0.0 }
 0x140   : > { %v1284_v54 = vmul.f32 0.01, %v1012_v47  ;;  %v1015_v55 = vadd.f32 %v3127_v52, %v1014_v53  ;;  %v2755_v56 = vpop.f32.mrb[47].mxu1 }
 0x141   : > { %vm1137_vm0 = vcmp.ge.f32.partialorder %v815_v50, 0.0  ;;  %v1235_v57 = vmul.f32 0.01, %v815_v50  ;;  %v1332_v60 = vsel %vm1136_vm14, %v812_v43, %v1234_v49 }
 0x142   : > { %v1382_v58 = vsel %vm1186_vm15, %v1012_v47, %v1284_v54  ;;  %vm1187_vm1 = vcmp.ge.f32.partialorder %v1015_v55, 0.0  ;;  %v1285_v59 = vmul.f32 0.01, %v1015_v55 }
 0x143   : > { %v1333_v61 = vsel %vm1137_vm0, %v815_v50, %v1235_v57 }
 0x144   : > { %v2318_v62 = vpack.c.bf16 %v1333_v61, %v1332_v60  ;;  %v1383_v63 = vsel %vm1187_vm1, %v1015_v55, %v1285_v59  ;;  %v819_v0 = vpop.f32.mrb[48].mxu0  ;;  %v1019_v4 = vpop.f32.mrb[48].mxu1 }
 0x145   : > { %v2443_v1 = vpack.c.bf16 %v1383_v63, %v1382_v58  ;;  %v820_v2 = vadd.f32 %v3127_v52, %v819_v0  ;;  %v2658_v3 = vpop.f32.mrb[49].mxu0  ;;  %v1020_v6 = vadd.f32 %v3127_v52, %v1019_v4  ;;  %v2758_v7 = vpop.f32.mrb[49].mxu1 }
 0x146   : > { %2515 = vst [vmem:[%s3138_s27 + $0x58] sm:$0xff] %v2318_v62   ;;  %v822_v5 = vpop.f32.mrb[50].mxu0  ;;  %v1022_v11 = vpop.f32.mrb[50].mxu1 }
 0x147   : > { %2540 = vst [vmem:[%s3138_s27 + $0x120] sm:$0xff] %v2443_v1   ;;  %v1236_v8 = vmul.f32 0.01, %v820_v2  ;;  %v823_v9 = vadd.f32 %v3127_v52, %v822_v5  ;;  %v2659_v10 = vpop.f32.mrb[51].mxu0  ;;  %vm1138_vm2 = vcmp.ge.f32.partialorder %v820_v2, 0.0  ;;  %vm1188_vm3 = vcmp.ge.f32.partialorder %v1020_v6, 0.0 }
 0x148   : > { %v1286_v12 = vmul.f32 0.01, %v1020_v6  ;;  %v1023_v13 = vadd.f32 %v3127_v52, %v1022_v11  ;;  %v2759_v14 = vpop.f32.mrb[51].mxu1 }
 0x149   : > { %vm1139_vm4 = vcmp.ge.f32.partialorder %v823_v9, 0.0  ;;  %v1237_v15 = vmul.f32 0.01, %v823_v9  ;;  %v1334_v18 = vsel %vm1138_vm2, %v820_v2, %v1236_v8 }
 0x14a   : > { %v1384_v16 = vsel %vm1188_vm3, %v1020_v6, %v1286_v12  ;;  %vm1189_vm5 = vcmp.ge.f32.partialorder %v1023_v13, 0.0  ;;  %v1287_v17 = vmul.f32 0.01, %v1023_v13 }
 0x14b   : > { %v1335_v19 = vsel %vm1139_vm4, %v823_v9, %v1237_v15 }
 0x14c   : > { %v2323_v20 = vpack.c.bf16 %v1335_v19, %v1334_v18  ;;  %v1385_v21 = vsel %vm1189_vm5, %v1023_v13, %v1287_v17  ;;  %v827_v22 = vpop.f32.mrb[52].mxu0  ;;  %v1027_v26 = vpop.f32.mrb[52].mxu1 }
 0x14d   : > { %v2448_v23 = vpack.c.bf16 %v1385_v21, %v1384_v16  ;;  %v828_v24 = vadd.f32 %v3127_v52, %v827_v22  ;;  %v2662_v25 = vpop.f32.mrb[53].mxu0  ;;  %v1028_v28 = vadd.f32 %v3127_v52, %v1027_v26  ;;  %v2762_v29 = vpop.f32.mrb[53].mxu1 }
 0x14e   : > { %2516 = vst [vmem:[%s3138_s27 + $0x60] sm:$0xff] %v2323_v20   ;;  %v830_v27 = vpop.f32.mrb[54].mxu0  ;;  %v1030_v33 = vpop.f32.mrb[54].mxu1 }
 0x14f   : > { %2541 = vst [vmem:[%s3138_s27 + $0x128] sm:$0xff] %v2448_v23   ;;  %v1238_v30 = vmul.f32 0.01, %v828_v24  ;;  %v831_v31 = vadd.f32 %v3127_v52, %v830_v27  ;;  %v2663_v32 = vpop.f32.mrb[55].mxu0  ;;  %vm1140_vm6 = vcmp.ge.f32.partialorder %v828_v24, 0.0  ;;  %vm1190_vm7 = vcmp.ge.f32.partialorder %v1028_v28, 0.0 }
 0x150   : > { %v1288_v34 = vmul.f32 0.01, %v1028_v28  ;;  %v1031_v35 = vadd.f32 %v3127_v52, %v1030_v33  ;;  %v2763_v36 = vpop.f32.mrb[55].mxu1 }
 0x151   : > { %vm1141_vm8 = vcmp.ge.f32.partialorder %v831_v31, 0.0  ;;  %v1239_v37 = vmul.f32 0.01, %v831_v31  ;;  %v1336_v40 = vsel %vm1140_vm6, %v828_v24, %v1238_v30 }
 0x152   : > { %v1386_v38 = vsel %vm1190_vm7, %v1028_v28, %v1288_v34  ;;  %vm1191_vm9 = vcmp.ge.f32.partialorder %v1031_v35, 0.0  ;;  %v1289_v39 = vmul.f32 0.01, %v1031_v35 }
 0x153   : > { %v1337_v41 = vsel %vm1141_vm8, %v831_v31, %v1239_v37 }
 0x154   : > { %v2328_v42 = vpack.c.bf16 %v1337_v41, %v1336_v40  ;;  %v1387_v43 = vsel %vm1191_vm9, %v1031_v35, %v1289_v39  ;;  %v835_v44 = vpop.f32.mrb[56].mxu0  ;;  %v1035_v48 = vpop.f32.mrb[56].mxu1 }
 0x155   : > { %v2453_v45 = vpack.c.bf16 %v1387_v43, %v1386_v38  ;;  %v836_v46 = vadd.f32 %v3127_v52, %v835_v44  ;;  %v2666_v47 = vpop.f32.mrb[57].mxu0  ;;  %v1036_v50 = vadd.f32 %v3127_v52, %v1035_v48  ;;  %v2766_v51 = vpop.f32.mrb[57].mxu1 }
 0x156   : > { %2517 = vst [vmem:[%s3138_s27 + $0x68] sm:$0xff] %v2328_v42   ;;  %v838_v49 = vpop.f32.mrb[58].mxu0  ;;  %v1038_v56 = vpop.f32.mrb[58].mxu1 }
 0x157   : > { %2542 = vst [vmem:[%s3138_s27 + $0x130] sm:$0xff] %v2453_v45   ;;  %v1240_v53 = vmul.f32 0.01, %v836_v46  ;;  %v839_v54 = vadd.f32 %v3127_v52, %v838_v49  ;;  %v2667_v55 = vpop.f32.mrb[59].mxu0  ;;  %vm1142_vm10 = vcmp.ge.f32.partialorder %v836_v46, 0.0  ;;  %vm1192_vm11 = vcmp.ge.f32.partialorder %v1036_v50, 0.0 }
 0x158   : > { %v1290_v57 = vmul.f32 0.01, %v1036_v50  ;;  %v1039_v58 = vadd.f32 %v3127_v52, %v1038_v56  ;;  %v2767_v59 = vpop.f32.mrb[59].mxu1 }
 0x159   : > { %vm1143_vm12 = vcmp.ge.f32.partialorder %v839_v54, 0.0  ;;  %v1241_v60 = vmul.f32 0.01, %v839_v54  ;;  %v1338_v63 = vsel %vm1142_vm10, %v836_v46, %v1240_v53 }
 0x15a   : > { %v1388_v61 = vsel %vm1192_vm11, %v1036_v50, %v1290_v57  ;;  %vm1193_vm13 = vcmp.ge.f32.partialorder %v1039_v58, 0.0  ;;  %v1291_v62 = vmul.f32 0.01, %v1039_v58 }
 0x15b   : > { %v1339_v0 = vsel %vm1143_vm12, %v839_v54, %v1241_v60 }
 0x15c   : > { %v2333_v1 = vpack.c.bf16 %v1339_v0, %v1338_v63  ;;  %v1389_v2 = vsel %vm1193_vm13, %v1039_v58, %v1291_v62  ;;  %v843_v3 = vpop.f32.mrb[60].mxu0  ;;  %v1043_v7 = vpop.f32.mrb[60].mxu1 }
 0x15d   : > { %v2458_v4 = vpack.c.bf16 %v1389_v2, %v1388_v61  ;;  %v844_v5 = vadd.f32 %v3127_v52, %v843_v3  ;;  %v2670_v6 = vpop.f32.mrb[61].mxu0  ;;  %v1044_v9 = vadd.f32 %v3127_v52, %v1043_v7  ;;  %v2770_v10 = vpop.f32.mrb[61].mxu1 }
 0x15e   : > { %2518 = vst [vmem:[%s3138_s27 + $0x70] sm:$0xff] %v2333_v1   ;;  %v846_v8 = vpop.f32.mrb[62].mxu0  ;;  %v1046_v14 = vpop.f32.mrb[62].mxu1 }
 0x15f   : > { %2543 = vst [vmem:[%s3138_s27 + $0x138] sm:$0xff] %v2458_v4   ;;  %v1242_v11 = vmul.f32 0.01, %v844_v5  ;;  %v847_v12 = vadd.f32 %v3127_v52, %v846_v8  ;;  %v2671_v13 = vpop.f32.mrb[63].mxu0  ;;  %vm1144_vm14 = vcmp.ge.f32.partialorder %v844_v5, 0.0  ;;  %vm1194_vm15 = vcmp.ge.f32.partialorder %v1044_v9, 0.0 }
 0x160   : > { %v1292_v15 = vmul.f32 0.01, %v1044_v9  ;;  %v1047_v16 = vadd.f32 %v3127_v52, %v1046_v14  ;;  %v2771_v17 = vpop.f32.mrb[63].mxu1 }
 0x161   : > { %vm1145_vm0 = vcmp.ge.f32.partialorder %v847_v12, 0.0  ;;  %v1243_v18 = vmul.f32 0.01, %v847_v12  ;;  %v1340_v21 = vsel %vm1144_vm14, %v844_v5, %v1242_v11 }
 0x162   : > { %v1390_v19 = vsel %vm1194_vm15, %v1044_v9, %v1292_v15  ;;  %vm1195_vm1 = vcmp.ge.f32.partialorder %v1047_v16, 0.0  ;;  %v1293_v20 = vmul.f32 0.01, %v1047_v16  ;;  %v3249_v15 = vld [vmem:[%s3293_s2] ss:$0 sm:$0xff] }
 0x163   : > { %v1341_v22 = vsel %vm1145_vm0, %v847_v12, %v1243_v18 }
 0x164   : > { %v2338_v23 = vpack.c.bf16 %v1341_v22, %v1340_v21  ;;  %v1391_v24 = vsel %vm1195_vm1, %v1047_v16, %v1293_v20  ;;  %v851_v25 = vpop.f32.mrb[64].mxu0  ;;  %v1051_v29 = vpop.f32.mrb[64].mxu1 }
 0x165   : > { %v2463_v26 = vpack.c.bf16 %v1391_v24, %v1390_v19  ;;  %v852_v27 = vadd.f32 %v3127_v52, %v851_v25  ;;  %v2674_v28 = vpop.f32.mrb[65].mxu0  ;;  %v1052_v31 = vadd.f32 %v3127_v52, %v1051_v29  ;;  %v2774_v32 = vpop.f32.mrb[65].mxu1 }
 0x166   : > { %2519 = vst [vmem:[%s3138_s27 + $0x78] sm:$0xff] %v2338_v23   ;;  %v854_v30 = vpop.f32.mrb[66].mxu0  ;;  %v1054_v36 = vpop.f32.mrb[66].mxu1 }
 0x167   : > { %2544 = vst [vmem:[%s3138_s27 + $0x140] sm:$0xff] %v2463_v26   ;;  %v1244_v33 = vmul.f32 0.01, %v852_v27  ;;  %v855_v34 = vadd.f32 %v3127_v52, %v854_v30  ;;  %v2675_v35 = vpop.f32.mrb[67].mxu0  ;;  %vm1146_vm2 = vcmp.ge.f32.partialorder %v852_v27, 0.0  ;;  %vm1196_vm3 = vcmp.ge.f32.partialorder %v1052_v31, 0.0 }
 0x168   : > { %v1294_v37 = vmul.f32 0.01, %v1052_v31  ;;  %v1055_v38 = vadd.f32 %v3127_v52, %v1054_v36  ;;  %v2775_v39 = vpop.f32.mrb[67].mxu1 }
 0x169   : > { %vm1147_vm4 = vcmp.ge.f32.partialorder %v855_v34, 0.0  ;;  %v1245_v40 = vmul.f32 0.01, %v855_v34  ;;  %v1342_v43 = vsel %vm1146_vm2, %v852_v27, %v1244_v33 }
 0x16a   : > { %v1392_v41 = vsel %vm1196_vm3, %v1052_v31, %v1294_v37  ;;  %vm1197_vm5 = vcmp.ge.f32.partialorder %v1055_v38, 0.0  ;;  %v1295_v42 = vmul.f32 0.01, %v1055_v38 }
 0x16b   : > { %v1343_v44 = vsel %vm1147_vm4, %v855_v34, %v1245_v40 }
 0x16c   : > { %v2343_v45 = vpack.c.bf16 %v1343_v44, %v1342_v43  ;;  %v1393_v46 = vsel %vm1197_vm5, %v1055_v38, %v1295_v42  ;;  %v859_v47 = vpop.f32.mrb[68].mxu0  ;;  %v1059_v51 = vpop.f32.mrb[68].mxu1 }
 0x16d   : > { %v2468_v48 = vpack.c.bf16 %v1393_v46, %v1392_v41  ;;  %v860_v49 = vadd.f32 %v3127_v52, %v859_v47  ;;  %v2678_v50 = vpop.f32.mrb[69].mxu0  ;;  %v1060_v54 = vadd.f32 %v3127_v52, %v1059_v51  ;;  %v2778_v55 = vpop.f32.mrb[69].mxu1 }
 0x16e   : > { %2520 = vst [vmem:[%s3138_s27 + $0x80] sm:$0xff] %v2343_v45   ;;  %v862_v53 = vpop.f32.mrb[70].mxu0  ;;  %v1062_v59 = vpop.f32.mrb[70].mxu1 }
 0x16f   : > { %2545 = vst [vmem:[%s3138_s27 + $0x148] sm:$0xff] %v2468_v48   ;;  %v1246_v56 = vmul.f32 0.01, %v860_v49  ;;  %v863_v57 = vadd.f32 %v3127_v52, %v862_v53  ;;  %v2679_v58 = vpop.f32.mrb[71].mxu0  ;;  %vm1148_vm6 = vcmp.ge.f32.partialorder %v860_v49, 0.0  ;;  %vm1198_vm7 = vcmp.ge.f32.partialorder %v1060_v54, 0.0 }
 0x170   : > { %v1296_v60 = vmul.f32 0.01, %v1060_v54  ;;  %v1063_v61 = vadd.f32 %v3127_v52, %v1062_v59  ;;  %v2779_v62 = vpop.f32.mrb[71].mxu1 }
 0x171   : > { %vm1149_vm8 = vcmp.ge.f32.partialorder %v863_v57, 0.0  ;;  %v1247_v63 = vmul.f32 0.01, %v863_v57  ;;  %v1344_v2 = vsel %vm1148_vm6, %v860_v49, %v1246_v56 }
 0x172   : > { %v1394_v0 = vsel %vm1198_vm7, %v1060_v54, %v1296_v60  ;;  %vm1199_vm9 = vcmp.ge.f32.partialorder %v1063_v61, 0.0  ;;  %v1297_v1 = vmul.f32 0.01, %v1063_v61 }
 0x173   : > { %v1345_v3 = vsel %vm1149_vm8, %v863_v57, %v1247_v63 }
 0x174   : > { %v2348_v4 = vpack.c.bf16 %v1345_v3, %v1344_v2  ;;  %v1395_v5 = vsel %vm1199_vm9, %v1063_v61, %v1297_v1  ;;  %v867_v6 = vpop.f32.mrb[72].mxu0  ;;  %v1067_v10 = vpop.f32.mrb[72].mxu1 }
 0x175   : > { %v2473_v7 = vpack.c.bf16 %v1395_v5, %v1394_v0  ;;  %v868_v8 = vadd.f32 %v3127_v52, %v867_v6  ;;  %v2682_v9 = vpop.f32.mrb[73].mxu0  ;;  %v1068_v12 = vadd.f32 %v3127_v52, %v1067_v10  ;;  %v2782_v13 = vpop.f32.mrb[73].mxu1 }
 0x176   : > { %2521 = vst [vmem:[%s3138_s27 + $0x88] sm:$0xff] %v2348_v4   ;;  %v870_v11 = vpop.f32.mrb[74].mxu0  ;;  %v1070_v18 = vpop.f32.mrb[74].mxu1 }
 0x177   : > { %2546 = vst [vmem:[%s3138_s27 + $0x150] sm:$0xff] %v2473_v7   ;;  %v1248_v14 = vmul.f32 0.01, %v868_v8  ;;  %v871_v16 = vadd.f32 %v3249_v15, %v870_v11  ;;  %v2683_v17 = vpop.f32.mrb[75].mxu0  ;;  %vm1150_vm10 = vcmp.ge.f32.partialorder %v868_v8, 0.0  ;;  %vm1200_vm11 = vcmp.ge.f32.partialorder %v1068_v12, 0.0 }
 0x178   : > { %v1298_v19 = vmul.f32 0.01, %v1068_v12  ;;  %v1071_v20 = vadd.f32 %v3249_v15, %v1070_v18  ;;  %v2783_v21 = vpop.f32.mrb[75].mxu1 }
 0x179   : > { %vm1151_vm12 = vcmp.ge.f32.partialorder %v871_v16, 0.0  ;;  %v1249_v52 = vmul.f32 0.01, %v871_v16  ;;  %v1346_v24 = vsel %vm1150_vm10, %v868_v8, %v1248_v14 }
 0x17a   : > { %v1396_v22 = vsel %vm1200_vm11, %v1068_v12, %v1298_v19  ;;  %vm1201_vm13 = vcmp.ge.f32.partialorder %v1071_v20, 0.0  ;;  %v1299_v23 = vmul.f32 0.01, %v1071_v20 }
 0x17b   : > { %v1347_v25 = vsel %vm1151_vm12, %v871_v16, %v1249_v52 }
 0x17c   : > { %v2353_v26 = vpack.c.bf16 %v1347_v25, %v1346_v24  ;;  %v1397_v27 = vsel %vm1201_vm13, %v1071_v20, %v1299_v23  ;;  %v875_v28 = vpop.f32.mrb[76].mxu0  ;;  %v1075_v32 = vpop.f32.mrb[76].mxu1 }
 0x17d   : > { %v2478_v29 = vpack.c.bf16 %v1397_v27, %v1396_v22  ;;  %v876_v30 = vadd.f32 %v3249_v15, %v875_v28  ;;  %v2686_v31 = vpop.f32.mrb[77].mxu0  ;;  %v1076_v34 = vadd.f32 %v3249_v15, %v1075_v32  ;;  %v2786_v35 = vpop.f32.mrb[77].mxu1 }
 0x17e   : > { %2522 = vst [vmem:[%s3138_s27 + $0x90] sm:$0xff] %v2353_v26   ;;  %v878_v33 = vpop.f32.mrb[78].mxu0  ;;  %v1078_v39 = vpop.f32.mrb[78].mxu1 }
 0x17f   : > { %2547 = vst [vmem:[%s3138_s27 + $0x158] sm:$0xff] %v2478_v29   ;;  %v1250_v36 = vmul.f32 0.01, %v876_v30  ;;  %v879_v37 = vadd.f32 %v3249_v15, %v878_v33  ;;  %v2687_v38 = vpop.f32.mrb[79].mxu0  ;;  %vm1152_vm14 = vcmp.ge.f32.partialorder %v876_v30, 0.0  ;;  %vm1202_vm15 = vcmp.ge.f32.partialorder %v1076_v34, 0.0 }
 0x180   : > { %v1300_v40 = vmul.f32 0.01, %v1076_v34  ;;  %v1079_v41 = vadd.f32 %v3249_v15, %v1078_v39  ;;  %v2787_v42 = vpop.f32.mrb[79].mxu1 }
 0x181   : > { %vm1153_vm0 = vcmp.ge.f32.partialorder %v879_v37, 0.0  ;;  %v1251_v43 = vmul.f32 0.01, %v879_v37  ;;  %v1348_v46 = vsel %vm1152_vm14, %v876_v30, %v1250_v36 }
 0x182   : > { %v1398_v44 = vsel %vm1202_vm15, %v1076_v34, %v1300_v40  ;;  %vm1203_vm1 = vcmp.ge.f32.partialorder %v1079_v41, 0.0  ;;  %v1301_v45 = vmul.f32 0.01, %v1079_v41 }
 0x183   : > { %v1349_v47 = vsel %vm1153_vm0, %v879_v37, %v1251_v43 }
 0x184   : > { %v2358_v48 = vpack.c.bf16 %v1349_v47, %v1348_v46  ;;  %v1399_v49 = vsel %vm1203_vm1, %v1079_v41, %v1301_v45  ;;  %v883_v50 = vpop.f32.mrb[80].mxu0  ;;  %v1083_v55 = vpop.f32.mrb[80].mxu1 }
 0x185   : > { %v2483_v51 = vpack.c.bf16 %v1399_v49, %v1398_v44  ;;  %v884_v53 = vadd.f32 %v3249_v15, %v883_v50  ;;  %v2690_v54 = vpop.f32.mrb[81].mxu0  ;;  %v1084_v57 = vadd.f32 %v3249_v15, %v1083_v55  ;;  %v2790_v58 = vpop.f32.mrb[81].mxu1 }
 0x186   : > { %2523 = vst [vmem:[%s3138_s27 + $0x98] sm:$0xff] %v2358_v48   ;;  %v886_v56 = vpop.f32.mrb[82].mxu0  ;;  %v1086_v62 = vpop.f32.mrb[82].mxu1 }
 0x187   : > { %2548 = vst [vmem:[%s3138_s27 + $0x160] sm:$0xff] %v2483_v51   ;;  %v1252_v59 = vmul.f32 0.01, %v884_v53  ;;  %v887_v60 = vadd.f32 %v3249_v15, %v886_v56  ;;  %v2691_v61 = vpop.f32.mrb[83].mxu0  ;;  %vm1154_vm2 = vcmp.ge.f32.partialorder %v884_v53, 0.0  ;;  %vm1204_vm3 = vcmp.ge.f32.partialorder %v1084_v57, 0.0 }
 0x188   : > { %v1302_v63 = vmul.f32 0.01, %v1084_v57  ;;  %v1087_v0 = vadd.f32 %v3249_v15, %v1086_v62  ;;  %v2791_v1 = vpop.f32.mrb[83].mxu1 }
 0x189   : > { %vm1155_vm4 = vcmp.ge.f32.partialorder %v887_v60, 0.0  ;;  %v1253_v2 = vmul.f32 0.01, %v887_v60  ;;  %v1350_v5 = vsel %vm1154_vm2, %v884_v53, %v1252_v59 }
 0x18a   : > { %v1400_v3 = vsel %vm1204_vm3, %v1084_v57, %v1302_v63  ;;  %vm1205_vm5 = vcmp.ge.f32.partialorder %v1087_v0, 0.0  ;;  %v1303_v4 = vmul.f32 0.01, %v1087_v0 }
 0x18b   : > { %v1351_v6 = vsel %vm1155_vm4, %v887_v60, %v1253_v2 }
 0x18c   : > { %v2363_v7 = vpack.c.bf16 %v1351_v6, %v1350_v5  ;;  %v1401_v8 = vsel %vm1205_vm5, %v1087_v0, %v1303_v4  ;;  %v891_v9 = vpop.f32.mrb[84].mxu0  ;;  %v1091_v13 = vpop.f32.mrb[84].mxu1 }
 0x18d   : > { %v2488_v10 = vpack.c.bf16 %v1401_v8, %v1400_v3  ;;  %v892_v11 = vadd.f32 %v3249_v15, %v891_v9  ;;  %v2694_v12 = vpop.f32.mrb[85].mxu0  ;;  %v1092_v16 = vadd.f32 %v3249_v15, %v1091_v13  ;;  %v2794_v17 = vpop.f32.mrb[85].mxu1 }
 0x18e   : > { %2524 = vst [vmem:[%s3138_s27 + $0xa0] sm:$0xff] %v2363_v7   ;;  %v894_v14 = vpop.f32.mrb[86].mxu0  ;;  %v1094_v21 = vpop.f32.mrb[86].mxu1 }
 0x18f   : > { %2549 = vst [vmem:[%s3138_s27 + $0x168] sm:$0xff] %v2488_v10   ;;  %v1254_v18 = vmul.f32 0.01, %v892_v11  ;;  %v895_v19 = vadd.f32 %v3249_v15, %v894_v14  ;;  %v2695_v20 = vpop.f32.mrb[87].mxu0  ;;  %vm1156_vm6 = vcmp.ge.f32.partialorder %v892_v11, 0.0  ;;  %vm1206_vm7 = vcmp.ge.f32.partialorder %v1092_v16, 0.0 }
 0x190   : > { %v1304_v52 = vmul.f32 0.01, %v1092_v16  ;;  %v1095_v22 = vadd.f32 %v3249_v15, %v1094_v21  ;;  %v2795_v23 = vpop.f32.mrb[87].mxu1 }
 0x191   : > { %vm1157_vm8 = vcmp.ge.f32.partialorder %v895_v19, 0.0  ;;  %v1255_v24 = vmul.f32 0.01, %v895_v19  ;;  %v1352_v27 = vsel %vm1156_vm6, %v892_v11, %v1254_v18 }
 0x192   : > { %v1402_v25 = vsel %vm1206_vm7, %v1092_v16, %v1304_v52  ;;  %vm1207_vm9 = vcmp.ge.f32.partialorder %v1095_v22, 0.0  ;;  %v1305_v26 = vmul.f32 0.01, %v1095_v22 }
 0x193   : > { %v1353_v28 = vsel %vm1157_vm8, %v895_v19, %v1255_v24 }
 0x194   : > { %v2368_v29 = vpack.c.bf16 %v1353_v28, %v1352_v27  ;;  %v1403_v30 = vsel %vm1207_vm9, %v1095_v22, %v1305_v26  ;;  %v899_v31 = vpop.f32.mrb[88].mxu0  ;;  %v1099_v35 = vpop.f32.mrb[88].mxu1 }
 0x195   : > { %v2493_v32 = vpack.c.bf16 %v1403_v30, %v1402_v25  ;;  %v900_v33 = vadd.f32 %v3249_v15, %v899_v31  ;;  %v2698_v34 = vpop.f32.mrb[89].mxu0  ;;  %v1100_v37 = vadd.f32 %v3249_v15, %v1099_v35  ;;  %v2798_v38 = vpop.f32.mrb[89].mxu1 }
 0x196   : > { %2525 = vst [vmem:[%s3138_s27 + $0xa8] sm:$0xff] %v2368_v29   ;;  %v902_v36 = vpop.f32.mrb[90].mxu0  ;;  %v1102_v42 = vpop.f32.mrb[90].mxu1 }
 0x197   : > { %2550 = vst [vmem:[%s3138_s27 + $0x170] sm:$0xff] %v2493_v32   ;;  %v1256_v39 = vmul.f32 0.01, %v900_v33  ;;  %v903_v40 = vadd.f32 %v3249_v15, %v902_v36  ;;  %v2699_v41 = vpop.f32.mrb[91].mxu0  ;;  %vm1158_vm10 = vcmp.ge.f32.partialorder %v900_v33, 0.0  ;;  %vm1208_vm11 = vcmp.ge.f32.partialorder %v1100_v37, 0.0 }
 0x198   : > { %v1306_v43 = vmul.f32 0.01, %v1100_v37  ;;  %v1103_v44 = vadd.f32 %v3249_v15, %v1102_v42  ;;  %v2799_v45 = vpop.f32.mrb[91].mxu1 }
 0x199   : > { %vm1159_vm12 = vcmp.ge.f32.partialorder %v903_v40, 0.0  ;;  %v1257_v46 = vmul.f32 0.01, %v903_v40  ;;  %v1354_v49 = vsel %vm1158_vm10, %v900_v33, %v1256_v39 }
 0x19a   : > { %v1404_v47 = vsel %vm1208_vm11, %v1100_v37, %v1306_v43  ;;  %vm1209_vm13 = vcmp.ge.f32.partialorder %v1103_v44, 0.0  ;;  %v1307_v48 = vmul.f32 0.01, %v1103_v44 }
 0x19b   : > { %v1355_v50 = vsel %vm1159_vm12, %v903_v40, %v1257_v46 }
 0x19c   : > { %v2373_v51 = vpack.c.bf16 %v1355_v50, %v1354_v49  ;;  %v1405_v53 = vsel %vm1209_vm13, %v1103_v44, %v1307_v48  ;;  %v907_v54 = vpop.f32.mrb[92].mxu0  ;;  %v1107_v58 = vpop.f32.mrb[92].mxu1 }
 0x19d   : > { %v2498_v55 = vpack.c.bf16 %v1405_v53, %v1404_v47  ;;  %v908_v56 = vadd.f32 %v3249_v15, %v907_v54  ;;  %v2702_v57 = vpop.f32.mrb[93].mxu0  ;;  %v1108_v60 = vadd.f32 %v3249_v15, %v1107_v58  ;;  %v2802_v61 = vpop.f32.mrb[93].mxu1 }
 0x19e   : > { %2526 = vst [vmem:[%s3138_s27 + $0xb0] sm:$0xff] %v2373_v51   ;;  %v910_v59 = vpop.f32.mrb[94].mxu0  ;;  %v1110_v1 = vpop.f32.mrb[94].mxu1 }
 0x19f   : > { %2551 = vst [vmem:[%s3138_s27 + $0x178] sm:$0xff] %v2498_v55   ;;  %v1258_v62 = vmul.f32 0.01, %v908_v56  ;;  %v911_v63 = vadd.f32 %v3249_v15, %v910_v59  ;;  %v2703_v0 = vpop.f32.mrb[95].mxu0  ;;  %vm1160_vm14 = vcmp.ge.f32.partialorder %v908_v56, 0.0  ;;  %vm1210_vm15 = vcmp.ge.f32.partialorder %v1108_v60, 0.0 }
 0x1a0   : > { %v1308_v2 = vmul.f32 0.01, %v1108_v60  ;;  %v1111_v3 = vadd.f32 %v3249_v15, %v1110_v1  ;;  %v2803_v4 = vpop.f32.mrb[95].mxu1 }
 0x1a1   : > { %vm1161_vm0 = vcmp.ge.f32.partialorder %v911_v63, 0.0  ;;  %v1259_v5 = vmul.f32 0.01, %v911_v63  ;;  %v1356_v8 = vsel %vm1160_vm14, %v908_v56, %v1258_v62 }
 0x1a2   : > { %v1406_v6 = vsel %vm1210_vm15, %v1108_v60, %v1308_v2  ;;  %vm1211_vm1 = vcmp.ge.f32.partialorder %v1111_v3, 0.0  ;;  %v1309_v7 = vmul.f32 0.01, %v1111_v3 }
 0x1a3   : > { %v1357_v9 = vsel %vm1161_vm0, %v911_v63, %v1259_v5 }
 0x1a4   : > { %v2378_v10 = vpack.c.bf16 %v1357_v9, %v1356_v8  ;;  %v1407_v11 = vsel %vm1211_vm1, %v1111_v3, %v1309_v7  ;;  %v915_v12 = vpop.f32.mrb[96].mxu0 }
 0x1a5   : > { %v2503_v13 = vpack.c.bf16 %v1407_v11, %v1406_v6  ;;  %v916_v14 = vadd.f32 %v3249_v15, %v915_v12  ;;  %v2706_v16 = vpop.f32.mrb[97].mxu0 }
 0x1a6   : > { %2527 = vst [vmem:[%s3138_s27 + $0xb8] sm:$0xff] %v2378_v10   ;;  %v918_v17 = vpop.f32.mrb[98].mxu0 }
 0x1a7   : > { %2552 = vst [vmem:[%s3138_s27 + $0x180] sm:$0xff] %v2503_v13   ;;  %v1260_v18 = vmul.f32 0.01, %v916_v14  ;;  %v919_v19 = vadd.f32 %v3249_v15, %v918_v17  ;;  %v2707_v20 = vpop.f32.mrb[99].mxu0  ;;  %vm1162_vm2 = vcmp.ge.f32.partialorder %v916_v14, 0.0 }
 0x1a9   : > { %vm1163_vm3 = vcmp.ge.f32.partialorder %v919_v19, 0.0  ;;  %v1261_v21 = vmul.f32 0.01, %v919_v19  ;;  %v1358_v52 = vsel %vm1162_vm2, %v916_v14, %v1260_v18 }
 0x1ab   : > { %v1359_v22 = vsel %vm1163_vm3, %v919_v19, %v1261_v21 }
 0x1ac   : > { %v2383_v23 = vpack.c.bf16 %v1359_v22, %v1358_v52 }
 0x1ae   : > { %2528 = vst [vmem:[%s3138_s27 + $0xc0] sm:$0xff] %v2383_v23  }
 0x1af PF: > { %s13_s12 = sadd.s32 1, %s2876_s12  }
 0x1b0   : > { %p10_p4 = scmp.ge.s32.totalorder %s13_s12, 4  }
 0x1b2   :  { %12 = sbr.rel (!%p10_p4) target bundleno = 1 (0x1), region = 62 }

// kernel: cnn_forward.8
= control target key start
LH: loop header
LB: loop body
LE: loop exit
PB: predicated region body
PF: predicated region fallthrough
CT: control target
= control target key end

     0   :  { %s282_s6 = smov 0   ;;  %s349_s0 = inlined_call_operand.vmem [shape: bf16[2,7,2,7,256], index: 0, kind: input, shape index: {}]   ;;  %s350_s1 = inlined_call_operand.vmem [shape: bf16[2,7,7,128], index: 1, kind: output, shape index: {}]  }
   0x1 LB: > { %s245_s7 = sadd.s32 4294967295, %s270_s6   ;;  %p249_p0 = scmp.ge.s32.totalorder %s270_s6, 1  ;;  %s270_s6 = sphi %s282_s6, %s11_s6  }
   0x2   : > { %p87_p1 = scmp.lt.s32.totalorder %s270_s6, 3 }
   0x4   : > { %p88_p2 = pnand %p249_p0, %p87_p1 }
   0x5   : > { %p107_p3 = scmp.lt.s32.totalorder (!%p88_p2), %s245_s7, 1  ;;  %vm166_vm0 = vcmask (!%p88_p2), 1043456   ;;  %vm167_vm1 = vsmask.f32 (!%p88_p2), 3328 }
   0x6   : > { %91 = sbr.rel (%p88_p2) target bundleno = 31 (0x1f), region = 24  ;;  %vm306_vm2 = vmand (!%p88_p2), %vm166_vm0, %vm167_vm1 }
   0xd   : > { %s354_s7 = smov (!%p107_p3, %s245_s7), 1 }
   0xe   : > { %s254_s8 = smul.u32 112, %s354_s7 }
   0xf   : > { %s255_s9 = smul.u32 28, %s354_s7 }
  0x10   : > { %s293_s12 = scalar_lea.vmem %s349_s0, %s254_s8 }
  0x11   : > { %v117_v0 = vld [vmem:[%s293_s12] sm:$0xff]  ;;  %v118_v1 = vld [vmem:[%s293_s12 + $0x8] sm:$0xff]  ;;  %v119_v2 = vld [vmem:[%s293_s12 + $0x10] sm:$0xff]  ;;  %s301_s15 = scalar_lea.vmem %s350_s1, %s255_s9 }
  0x12   : > { %v131_v3 = vmax.bf16 %v118_v1, %v117_v0  ;;  %v120_v4 = vld [vmem:[%s293_s12 + $0x18] sm:$0xff]  ;;  %v121_v6 = vld [vmem:[%s293_s12 + $0x20] sm:$0xff]  ;;  %v122_v7 = vld [vmem:[%s293_s12 + $0x28] sm:$0xff] }
  0x13   : > { %v132_v5 = vmax.bf16 %v120_v4, %v119_v2  ;;  %v133_v10 = vmax.bf16 %v122_v7, %v121_v6  ;;  %v123_v11 = vld [vmem:[%s293_s12 + $0x30] sm:$0xff]  ;;  %v124_v12 = vld [vmem:[%s293_s12 + $0x38] sm:$0xff]  ;;  %v169_v13 = vld [vmem:[%s301_s15] sm:$0xf] }
  0x14   : > { %v145_v8 = vrot.slane %v131_v3, 4  ;;  %v134_v15 = vmax.bf16 %v124_v12, %v123_v11  ;;  %v125_v16 = vld [vmem:[%s293_s12 + $0x40] sm:$0xff]  ;;  %v126_v17 = vld [vmem:[%s293_s12 + $0x48] sm:$0xff]  ;;  %v127_v22 = vld [vmem:[%s293_s12 + $0x50] sm:$0xff] }
  0x15   : > { %v146_v14 = vrot.slane %v132_v5, 4  ;;  %v172_v19 = vld [vmem:[%s301_s15 + $0x4] sm:$0xf]  ;;  %v147_v20 = vrot.slane %v133_v10, 4  ;;  %v135_v21 = vmax.bf16 %v126_v17, %v125_v16  ;;  %v128_v23 = vld [vmem:[%s293_s12 + $0x58] sm:$0xff]  ;;  %v130_v29 = vld [vmem:[%s293_s12 + $0x68] sm:$0xff] }
  0x16   : > { %v159_v18 = vmax.bf16 %v145_v8, %v131_v3  ;;  %v175_v25 = vld [vmem:[%s301_s15 + $0x8] sm:$0xf]  ;;  %v148_v26 = vrot.slane %v134_v15, 4  ;;  %v136_v27 = vmax.bf16 %v128_v23, %v127_v22  ;;  %v129_v28 = vld [vmem:[%s293_s12 + $0x60] sm:$0xff]  ;;  %v178_v32 = vld [vmem:[%s301_s15 + $0xc] sm:$0xf] }
  0x17   : > { %v160_v24 = vmax.bf16 %v146_v14, %v132_v5  ;;  %v161_v31 = vmax.bf16 %v147_v20, %v133_v10  ;;  %v149_v33 = vrot.slane %v135_v21, 4  ;;  %v137_v34 = vmax.bf16 %v130_v29, %v129_v28  ;;  %v181_v37 = vld [vmem:[%s301_s15 + $0x10] sm:$0xf]  ;;  %v184_v41 = vld [vmem:[%s301_s15 + $0x14] sm:$0xf] }
  0x18   : > { %v170_v30 = vsel %vm306_vm2, %v159_v18, %v169_v13  ;;  %v162_v36 = vmax.bf16 %v148_v26, %v134_v15  ;;  %v150_v38 = vrot.slane %v136_v27, 4  ;;  %v187_v45 = vld [vmem:[%s301_s15 + $0x18] sm:$0xf] }
  0x19   : > { %171 = vst [vmem:[%s301_s15] sm:$0xf] %v170_v30  ;;  %v173_v35 = vsel %vm306_vm2, %v160_v24, %v172_v19  ;;  %v176_v39 = vsel %vm306_vm2, %v161_v31, %v175_v25  ;;  %v163_v40 = vmax.bf16 %v149_v33, %v135_v21  ;;  %v151_v42 = vrot.slane %v137_v34, 4 }
  0x1a   : > { %174 = vst [vmem:[%s301_s15 + $0x4] sm:$0xf] %v173_v35  ;;  %177 = vst [vmem:[%s301_s15 + $0x8] sm:$0xf] %v176_v39  ;;  %v179_v43 = vsel %vm306_vm2, %v162_v36, %v178_v32  ;;  %v164_v44 = vmax.bf16 %v150_v38, %v136_v27 }
  0x1b   : > { %180 = vst [vmem:[%s301_s15 + $0xc] sm:$0xf] %v179_v43  ;;  %v182_v46 = vsel %vm306_vm2, %v163_v40, %v181_v37  ;;  %v165_v47 = vmax.bf16 %v151_v42, %v137_v34 }
  0x1c   : > { %183 = vst [vmem:[%s301_s15 + $0x10] sm:$0xf] %v182_v46  ;;  %v185_v48 = vsel %vm306_vm2, %v164_v44, %v184_v41 }
  0x1d   : > { %186 = vst [vmem:[%s301_s15 + $0x14] sm:$0xf] %v185_v48  ;;  %v188_v49 = vsel %vm306_vm2, %v165_v47, %v187_v45 }
  0x1e   : > { %189 = vst [vmem:[%s301_s15 + $0x18] sm:$0xf] %v188_v49 }
  0x1f PF: > { %s11_s6 = sadd.s32 1, %s270_s6  }
  0x20   : > { %p8_p4 = scmp.ge.s32.totalorder %s11_s6, 4  }
  0x22   :  { %10 = sbr.rel (!%p8_p4) target bundleno = 1 (0x1), region = 54 }

// kernel: cnn_forward.7
= control target key start
LH: loop header
LB: loop body
LE: loop exit
PB: predicated region body
PF: predicated region fallthrough
CT: control target
= control target key end

     0   :  { %v4104_v0 = vmov 0   ;;  %v4105_v40 = vmov 0.0   ;;  %vm4106_vm0 = vmmov 0   ;;  %vm1482_vm1 = vcmask 261120   ;;  %s5047_s1 = inlined_call_operand.vmem [shape: bf16[800,128], index: 1, kind: input, shape index: {}]   ;;  %s5048_s0 = inlined_call_operand.vmem [shape: bf16[392,800], index: 0, kind: input, shape index: {}]   ;;  %s5049_s2 = inlined_call_operand.vmem [shape: f32[1,128], index: 2, kind: input, shape index: {}]   ;;  %s5050_s3 = inlined_call_operand.vmem [shape: bf16[392,128], index: 3, kind: output, shape index: {}]  }
   0x1   :  { %1558 = vmatprep.subr.bf16.mxu1 %v4104_v0  ;;  %2022 = vmatprep.subr.bf16.mxu0 %v4104_v0  ;;  %v3807_v1 = vld [vmem:[%s5047_s1] sm:$0xff]   ;;  %v3809_v3 = vld [vmem:[%s5047_s1 + $0x8] sm:$0xff]   ;;  %v3811_v5 = vld [vmem:[%s5047_s1 + $0x10] sm:$0xff]  }
   0x2   :  { %v3808_v2 = vld [vmem:[%s5047_s1 + $0x100] sm:$0xff]   ;;  %1559 = vmatpush1.bf16.msra.mxu1 %v3807_v1  ;;  %v3810_v4 = vld [vmem:[%s5047_s1 + $0x108] sm:$0xff]   ;;  %v3812_v6 = vld [vmem:[%s5047_s1 + $0x110] sm:$0xff]  }
   0x3   :  { %2023 = vmatpush1.bf16.msra.mxu0 %v3808_v2  ;;  %1560 = vmatprep.subr.bf16.mxu1 %v4104_v0  ;;  %v3813_v7 = vld [vmem:[%s5047_s1 + $0x18] sm:$0xff]   ;;  %v3815_v9 = vld [vmem:[%s5047_s1 + $0x20] sm:$0xff]   ;;  %v3817_v11 = vld [vmem:[%s5047_s1 + $0x28] sm:$0xff]  }
   0x4   :  { %2024 = vmatprep.subr.bf16.mxu0 %v4104_v0  ;;  %v3814_v8 = vld [vmem:[%s5047_s1 + $0x118] sm:$0xff]   ;;  %v3816_v10 = vld [vmem:[%s5047_s1 + $0x120] sm:$0xff]   ;;  %v3818_v12 = vld [vmem:[%s5047_s1 + $0x128] sm:$0xff]  }
   0x5   :  { %v3819_v13 = vld [vmem:[%s5047_s1 + $0x30] sm:$0xff]   ;;  %v3821_v15 = vld [vmem:[%s5047_s1 + $0x38] sm:$0xff]   ;;  %v3823_v17 = vld [vmem:[%s5047_s1 + $0x40] sm:$0xff]  }
   0x6   :  { %1561 = vmatpush1.bf16.msra.mxu1 %v3809_v3  ;;  %v3820_v14 = vld [vmem:[%s5047_s1 + $0x130] sm:$0xff]   ;;  %v3822_v16 = vld [vmem:[%s5047_s1 + $0x138] sm:$0xff]   ;;  %v3824_v18 = vld [vmem:[%s5047_s1 + $0x140] sm:$0xff]  }
   0x7   :  { %2025 = vmatpush1.bf16.msra.mxu0 %v3810_v4  ;;  %1562 = vmatprep.subr.bf16.mxu1 %v4104_v0  ;;  %v3841_v19 = vld [vmem:[%s5048_s0 + $0x4] ss:$28 sps:$4 sm:$0xff]   ;;  %v3825_v20 = vld [vmem:[%s5047_s1 + $0x48] sm:$0xff]   ;;  %v3844_v21 = vld [vmem:[%s5048_s0 + $0x14] ss:$28 sps:$4 sm:$0xff]  }
   0x8   :  { %2026 = vmatprep.subr.bf16.mxu0 %v4104_v0  ;;  %v3826_v22 = vld [vmem:[%s5047_s1 + $0x148] sm:$0xff]   ;;  %1590 = vmatprep.mubr.bf16.mxu1 %v3841_v19  ;;  %v3827_v23 = vld [vmem:[%s5047_s1 + $0x50] sm:$0xff]   ;;  %v3829_v25 = vld [vmem:[%s5047_s1 + $0x58] sm:$0xff]  }
   0x9   :  { %2054 = vmatprep.mubr.bf16.mxu0 %v3844_v21  ;;  %v3828_v24 = vld [vmem:[%s5047_s1 + $0x150] sm:$0xff]   ;;  %v3830_v26 = vld [vmem:[%s5047_s1 + $0x158] sm:$0xff]   ;;  %v3831_v27 = vld [vmem:[%s5047_s1 + $0x60] sm:$0xff]  }
   0xa   :  { %1563 = vmatpush1.bf16.msra.mxu1 %v3811_v5  ;;  %v3832_v28 = vld [vmem:[%s5047_s1 + $0x160] sm:$0xff]   ;;  %v3833_v29 = vld [vmem:[%s5047_s1 + $0x68] sm:$0xff]   ;;  %v3835_v31 = vld [vmem:[%s5047_s1 + $0x70] sm:$0xff]  }
   0xb   :  { %2027 = vmatpush1.bf16.msra.mxu0 %v3812_v6  ;;  %1564 = vmatprep.subr.bf16.mxu1 %v4104_v0  ;;  %v3834_v30 = vld [vmem:[%s5047_s1 + $0x168] sm:$0xff]   ;;  %v3836_v32 = vld [vmem:[%s5047_s1 + $0x170] sm:$0xff]   ;;  %v3837_v33 = vld [vmem:[%s5047_s1 + $0x78] sm:$0xff]  }
   0xc   :  { %2028 = vmatprep.subr.bf16.mxu0 %v4104_v0  ;;  %v3838_v34 = vld [vmem:[%s5047_s1 + $0x178] sm:$0xff]   ;;  %v3842_v36 = vld [vmem:[%s5048_s0 + $0x10] ss:$28 sps:$4 sm:$0xff]   ;;  %v3845_v37 = vld [vmem:[%s5047_s1 + $0x80] sm:$0xff]  }
   0xd   :  { %v3839_v35 = vld [vmem:[%s5048_s0] ss:$28 sps:$4 sm:$0xff]   ;;  %v3849_v41 = vld [vmem:[%s5048_s0 + $0x4c] ss:$28 sps:$4 sm:$0xff]   ;;  %v3851_v43 = vld [vmem:[%s5048_s0 + $0x38] ss:$28 sps:$4 sm:$0xff]  }
   0xe   :  { %1565 = vmatpush1.bf16.msra.mxu1 %v3813_v7  ;;  %v3846_v38 = vld [vmem:[%s5047_s1 + $0x180] sm:$0xff]   ;;  %v3847_v39 = vld [vmem:[%s5048_s0 + $0x3c] ss:$28 sps:$4 sm:$0xff]   ;;  %v3853_v42 = vld [vmem:[%s5047_s1 + $0x88] sm:$0xff]  }
   0xf   :  { %2029 = vmatpush1.bf16.msra.mxu0 %v3814_v8  ;;  %1566 = vmatprep.subr.bf16.mxu1 %v4104_v0  ;;  %v3852_v44 = vld [vmem:[%s5048_s0 + $0x48] ss:$28 sps:$4 sm:$0xff]   ;;  %v3854_v45 = vld [vmem:[%s5048_s0 + $0x74] ss:$28 sps:$4 sm:$0xff]   ;;  %v3875_v49 = vld [vmem:[%s5047_s1 + $0x98] sm:$0xff]  }
  0x10   :  { %2030 = vmatprep.subr.bf16.mxu0 %v4104_v0  ;;  %v3856_v46 = vld [vmem:[%s5048_s0 + $0x84] ss:$28 sps:$4 sm:$0xff]   ;;  %v3866_v47 = vld [vmem:[%s5047_s1 + $0x90] sm:$0xff]   ;;  %v3860_v51 = vld [vmem:[%s5048_s0 + $0xac] ss:$28 sps:$4 sm:$0xff]  }
  0x11   :  { %v3858_v48 = vld [vmem:[%s5048_s0 + $0x70] ss:$28 sps:$4 sm:$0xff]   ;;  %v3859_v50 = vld [vmem:[%s5048_s0 + $0x80] ss:$28 sps:$4 sm:$0xff]   ;;  %v3864_v56 = vld [vmem:[%s5048_s0 + $0xa8] ss:$28 sps:$4 sm:$0xff]  }
  0x12   :  { %1567 = vmatpush1.bf16.msra.mxu1 %v3815_v9  ;;  %v3862_v52 = vld [vmem:[%s5048_s0 + $0xbc] ss:$28 sps:$4 sm:$0xff]   ;;  %v3886_v53 = vld [vmem:[%s5047_s1 + $0xa0] sm:$0xff]   ;;  %v3931_v54 = vld [vmem:[%s5047_s1 + $0x188] sm:$0xff]  }
  0x13   :  { %2031 = vmatpush1.bf16.msra.mxu0 %v3816_v10  ;;  %1568 = vmatprep.subr.bf16.mxu1 %v4104_v0  ;;  %v3898_v55 = vld [vmem:[%s5047_s1 + $0xa8] sm:$0xff]   ;;  %v3865_v57 = vld [vmem:[%s5048_s0 + $0xb8] ss:$28 sps:$4 sm:$0xff]   ;;  %v3867_v58 = vld [vmem:[%s5048_s0 + $0xe4] ss:$28 sps:$4 sm:$0xff]  }
  0x14   :  { %2032 = vmatprep.subr.bf16.mxu0 %v4104_v0  ;;  %v3869_v59 = vld [vmem:[%s5048_s0 + $0xf4] ss:$28 sps:$4 sm:$0xff]   ;;  %v3919_v61 = vld [vmem:[%s5047_s1 + $0xb8] sm:$0xff]   ;;  %v3876_v2 = vld [vmem:[%s5048_s0 + $0x12c] ss:$28 sps:$4 sm:$0xff]  }
  0x15   :  { %v3906_v60 = vld [vmem:[%s5047_s1 + $0xb0] sm:$0xff]   ;;  %v3871_v62 = vld [vmem:[%s5048_s0 + $0xe0] ss:$28 sps:$4 sm:$0xff]   ;;  %v3940_v4 = vld [vmem:[%s5047_s1 + $0xc8] sm:$0xff]  }
  0x16   :  { %1569 = vmatpush1.bf16.msra.mxu1 %v3817_v11  ;;  %v3872_v63 = vld [vmem:[%s5048_s0 + $0xf0] ss:$28 sps:$4 sm:$0xff]   ;;  %v3873_v1 = vld [vmem:[%s5048_s0 + $0x11c] ss:$28 sps:$4 sm:$0xff]   ;;  %v3926_v3 = vld [vmem:[%s5047_s1 + $0xc0] sm:$0xff]  }
  0x17   :  { %2033 = vmatpush1.bf16.msra.mxu0 %v3818_v12  ;;  %1570 = vmatprep.subr.bf16.mxu1 %v4104_v0  ;;  %v3878_v5 = vld [vmem:[%s5048_s0 + $0x118] ss:$28 sps:$4 sm:$0xff]   ;;  %v3879_v6 = vld [vmem:[%s5048_s0 + $0x128] ss:$28 sps:$4 sm:$0xff]   ;;  %v3884_v10 = vld [vmem:[%s5048_s0 + $0x150] ss:$28 sps:$4 sm:$0xff]  }
  0x18   :  { %2034 = vmatprep.subr.bf16.mxu0 %v4104_v0  ;;  %v3880_v7 = vld [vmem:[%s5048_s0 + $0x154] ss:$28 sps:$4 sm:$0xff]   ;;  %v3882_v8 = vld [vmem:[%s5048_s0 + $0x164] ss:$28 sps:$4 sm:$0xff]   ;;  %v3960_v11 = vld [vmem:[%s5047_s1 + $0xd8] sm:$0xff]  }
  0x19   :  { %v3947_v9 = vld [vmem:[%s5047_s1 + $0xd0] sm:$0xff]   ;;  %v3885_v12 = vld [vmem:[%s5048_s0 + $0x160] ss:$28 sps:$4 sm:$0xff]  }
  0x1a   :  { %1571 = vmatpush1.bf16.msra.mxu1 %v3819_v13  ;;  %v3887_v13 = vld [vmem:[%s5048_s0 + $0x18c] ss:$28 sps:$4 sm:$0xff]   ;;  %v3893_v19 = vld [vmem:[%s5048_s0 + $0x1c4] ss:$28 sps:$4 sm:$0xff]   ;;  %v3992_v21 = vld [vmem:[%s5047_s1 + $0xf0] sm:$0xff]  }
  0x1b   :  { %2035 = vmatpush1.bf16.msra.mxu0 %v3820_v14  ;;  %1572 = vmatprep.subr.bf16.mxu1 %v4104_v0  ;;  %v3889_v14 = vld [vmem:[%s5048_s0 + $0x19c] ss:$28 sps:$4 sm:$0xff]  }
  0x1c   :  { %2036 = vmatprep.subr.bf16.mxu0 %v4104_v0 }
  0x1e   :  { %1573 = vmatpush1.bf16.msra.mxu1 %v3821_v15  ;;  %v3969_v15 = vld [vmem:[%s5047_s1 + $0xe0] sm:$0xff]  }
  0x1f   :  { %2037 = vmatpush1.bf16.msra.mxu0 %v3822_v16  ;;  %1574 = vmatprep.subr.bf16.mxu1 %v4104_v0  ;;  %v3891_v16 = vld [vmem:[%s5048_s0 + $0x188] ss:$28 sps:$4 sm:$0xff]  }
  0x20   :  { %2038 = vmatprep.subr.bf16.mxu0 %v4104_v0 }
  0x22   :  { %1575 = vmatpush1.bf16.msra.mxu1 %v3823_v17  ;;  %v3980_v17 = vld [vmem:[%s5047_s1 + $0xe8] sm:$0xff]  }
  0x23   :  { %2039 = vmatpush1.bf16.msra.mxu0 %v3824_v18  ;;  %1576 = vmatprep.subr.bf16.mxu1 %v4104_v0  ;;  %v3892_v18 = vld [vmem:[%s5048_s0 + $0x198] ss:$28 sps:$4 sm:$0xff]  }
  0x24   :  { %2040 = vmatprep.subr.bf16.mxu0 %v4104_v0 }
  0x26   :  { %1577 = vmatpush1.bf16.msra.mxu1 %v3825_v20  ;;  %v3895_v20 = vld [vmem:[%s5048_s0 + $0x1d4] ss:$28 sps:$4 sm:$0xff]  }
  0x27   :  { %2041 = vmatpush1.bf16.msra.mxu0 %v3826_v22  ;;  %1578 = vmatprep.subr.bf16.mxu1 %v4104_v0  ;;  %v4000_v22 = vld [vmem:[%s5047_s1 + $0xf8] sm:$0xff]  }
  0x28   :  { %2042 = vmatprep.subr.bf16.mxu0 %v4104_v0 }
  0x2a   :  { %1579 = vmatpush1.bf16.msra.mxu1 %v3827_v23  ;;  %v3897_v23 = vld [vmem:[%s5048_s0 + $0x1c0] ss:$28 sps:$4 sm:$0xff]  }
  0x2b   :  { %2043 = vmatpush1.bf16.msra.mxu0 %v3828_v24  ;;  %1580 = vmatprep.subr.bf16.mxu1 %v4104_v0  ;;  %v3899_v24 = vld [vmem:[%s5048_s0 + $0x1d0] ss:$28 sps:$4 sm:$0xff]  }
  0x2c   :  { %2044 = vmatprep.subr.bf16.mxu0 %v4104_v0 }
  0x2e   :  { %1581 = vmatpush1.bf16.msra.mxu1 %v3829_v25  ;;  %v3900_v25 = vld [vmem:[%s5048_s0 + $0x1fc] ss:$28 sps:$4 sm:$0xff]  }
  0x2f   :  { %2045 = vmatpush1.bf16.msra.mxu0 %v3830_v26  ;;  %1582 = vmatprep.subr.bf16.mxu1 %v4104_v0  ;;  %v3902_v26 = vld [vmem:[%s5048_s0 + $0x20c] ss:$28 sps:$4 sm:$0xff]  }
  0x30   :  { %2046 = vmatprep.subr.bf16.mxu0 %v4104_v0 }
  0x32   :  { %1583 = vmatpush1.bf16.msra.mxu1 %v3831_v27  ;;  %v3904_v27 = vld [vmem:[%s5048_s0 + $0x1f8] ss:$28 sps:$4 sm:$0xff]  }
  0x33   :  { %2047 = vmatpush1.bf16.msra.mxu0 %v3832_v28  ;;  %1584 = vmatprep.subr.bf16.mxu1 %v4104_v0  ;;  %v3905_v28 = vld [vmem:[%s5048_s0 + $0x208] ss:$28 sps:$4 sm:$0xff]  }
  0x34   :  { %2048 = vmatprep.subr.bf16.mxu0 %v4104_v0 }
  0x36   :  { %1585 = vmatpush1.bf16.msra.mxu1 %v3833_v29  ;;  %v3909_v29 = vld [vmem:[%s5048_s0 + $0x244] ss:$28 sps:$4 sm:$0xff]  }
  0x37   :  { %2049 = vmatpush1.bf16.msra.mxu0 %v3834_v30  ;;  %1586 = vmatprep.subr.bf16.mxu1 %v4104_v0  ;;  %v3911_v30 = vld [vmem:[%s5048_s0 + $0x230] ss:$28 sps:$4 sm:$0xff]  }
  0x38   :  { %2050 = vmatprep.subr.bf16.mxu0 %v4104_v0 }
  0x3a   :  { %1587 = vmatpush1.bf16.msra.mxu1 %v3835_v31  ;;  %v3912_v31 = vld [vmem:[%s5048_s0 + $0x240] ss:$28 sps:$4 sm:$0xff]  }
  0x3b   :  { %2051 = vmatpush1.bf16.msra.mxu0 %v3836_v32  ;;  %1588 = vmatprep.subr.bf16.mxu1 %v4104_v0  ;;  %v3913_v32 = vld [vmem:[%s5048_s0 + $0x26c] ss:$28 sps:$4 sm:$0xff]  }
  0x3c   :  { %2052 = vmatprep.subr.bf16.mxu0 %v4104_v0 }
  0x3e   :  { %1589 = vmatpush1.bf16.msra.mxu1 %v3837_v33  ;;  %v3915_v33 = vld [vmem:[%s5048_s0 + $0x27c] ss:$28 sps:$4 sm:$0xff]  }
  0x3f   :  { %2053 = vmatpush1.bf16.msra.mxu0 %v3838_v34  ;;  %1790 = vmatprep.subr.bf16.mxu1 %v4104_v0  ;;  %v3917_v34 = vld [vmem:[%s5048_s0 + $0x268] ss:$28 sps:$4 sm:$0xff]  }
  0x40   :  { %3402 = vmatprep.subr.bf16.mxu0 %v4105_v40 }
  0x41   :  { %1591 = vmatmul.mubr.bf16.vlgmr.msra.gmra.mrb[0].mxu1 %v3839_v35  ;;  %v3918_v35 = vld [vmem:[%s5048_s0 + $0x278] ss:$28 sps:$4 sm:$0xff]  }
  0x42   :  { %2055 = vmatmul.mubr.bf16.vlgmr.msra.gmra.mrb[0].mxu0 %v3842_v36  ;;  %1791 = vmatpush1.bf16.msra.mxu1 %v3845_v37  ;;  %v3920_v36 = vld [vmem:[%s5048_s0 + $0x2a4] ss:$28 sps:$4 sm:$0xff]   ;;  %v3922_v37 = vld [vmem:[%s5048_s0 + $0x2b4] ss:$28 sps:$4 sm:$0xff]  }
  0x43   :  { %3403 = vmatpush3.bf16.msra.mxu0 %v3846_v38  ;;  %1598 = vmatprep.mubr.bf16.mxu1 %v3847_v39  ;;  %v3924_v38 = vld [vmem:[%s5048_s0 + $0x2a0] ss:$28 sps:$4 sm:$0xff]   ;;  %v3925_v39 = vld [vmem:[%s5048_s0 + $0x2b0] ss:$28 sps:$4 sm:$0xff]  }
  0x44   :  { %2062 = vmatprep.mubr.bf16.mxu0 %v3849_v41  ;;  %1792 = vmatprep.subr.bf16.mxu1 %v4104_v0  ;;  %v3927_v41 = vld [vmem:[%s5048_s0 + $0x2dc] ss:$28 sps:$4 sm:$0xff]  }
  0x45   :  { %3404 = vmatprep.subr.bf16.mxu0 %v4105_v40 }
  0x46   :  { %1793 = vmatpush1.bf16.msra.mxu1 %v3853_v42  ;;  %v3929_v42 = vld [vmem:[%s5048_s0 + $0x2ec] ss:$28 sps:$4 sm:$0xff]  }
  0x47   :  { %1794 = vmatprep.subr.bf16.mxu1 %v4104_v0  ;;  %3405 = vmatpush3.bf16.msra.mxu0 %v3931_v54  ;;  %v3950_v54 = vld [vmem:[%s5048_s0 + $0x394] ss:$28 sps:$4 sm:$0xff]  }
  0x49   :  { %1599 = vmatmul.mubr.bf16.gmra.mrb[4].mxu1 %v3851_v43  ;;  %v3932_v43 = vld [vmem:[%s5048_s0 + $0x2d8] ss:$28 sps:$4 sm:$0xff]  }
  0x4a   :  { %2063 = vmatmul.mubr.bf16.gmra.mrb[4].mxu0 %v3852_v44  ;;  %1606 = vmatprep.mubr.bf16.mxu1 %v3854_v45  ;;  %v3933_v44 = vld [vmem:[%s5048_s0 + $0x2e8] ss:$28 sps:$4 sm:$0xff]   ;;  %v3934_v45 = vld [vmem:[%s5048_s0 + $0x314] ss:$28 sps:$4 sm:$0xff]  }
  0x4b   :  { %2070 = vmatprep.mubr.bf16.mxu0 %v3856_v46  ;;  %1795 = vmatpush1.bf16.msra.mxu1 %v3866_v47  ;;  %v3936_v46 = vld [vmem:[%s5048_s0 + $0x324] ss:$28 sps:$4 sm:$0xff]   ;;  %v3938_v47 = vld [vmem:[%s5048_s0 + $0x310] ss:$28 sps:$4 sm:$0xff]  }
  0x4c   :  { %1796 = vmatprep.subr.bf16.mxu1 %v4104_v0 }
  0x4f   :  { %1797 = vmatpush1.bf16.msra.mxu1 %v3875_v49  ;;  %v3941_v49 = vld [vmem:[%s5048_s0 + $0x34c] ss:$28 sps:$4 sm:$0xff]  }
  0x50   :  { %1798 = vmatprep.subr.bf16.mxu1 %v4104_v0 }
  0x51   :  { %1607 = vmatmul.mubr.bf16.gmra.mrb[8].mxu1 %v3858_v48  ;;  %v3939_v48 = vld [vmem:[%s5048_s0 + $0x320] ss:$28 sps:$4 sm:$0xff]  }
  0x52   :  { %2071 = vmatmul.mubr.bf16.gmra.mrb[8].mxu0 %v3859_v50  ;;  %1614 = vmatprep.mubr.bf16.mxu1 %v3860_v51  ;;  %v3943_v50 = vld [vmem:[%s5048_s0 + $0x35c] ss:$28 sps:$4 sm:$0xff]   ;;  %v3945_v51 = vld [vmem:[%s5048_s0 + $0x348] ss:$28 sps:$4 sm:$0xff]  }
  0x53   :  { %2078 = vmatprep.mubr.bf16.mxu0 %v3862_v52  ;;  %1799 = vmatpush1.bf16.msra.mxu1 %v3886_v53  ;;  %v3946_v52 = vld [vmem:[%s5048_s0 + $0x358] ss:$28 sps:$4 sm:$0xff]   ;;  %v3948_v53 = vld [vmem:[%s5048_s0 + $0x384] ss:$28 sps:$4 sm:$0xff]  }
  0x54   :  { %1800 = vmatprep.subr.bf16.mxu1 %v4104_v0 }
  0x57   :  { %1801 = vmatpush1.bf16.msra.mxu1 %v3898_v55  ;;  %v3952_v55 = vld [vmem:[%s5048_s0 + $0x380] ss:$28 sps:$4 sm:$0xff]  }
  0x58   :  { %1802 = vmatprep.subr.bf16.mxu1 %v4104_v0 }
  0x59   :  { %1615 = vmatmul.mubr.bf16.gmra.mrb[12].mxu1 %v3864_v56  ;;  %v3953_v56 = vld [vmem:[%s5048_s0 + $0x390] ss:$28 sps:$4 sm:$0xff]  }
  0x5a   :  { %2079 = vmatmul.mubr.bf16.gmra.mrb[12].mxu0 %v3865_v57  ;;  %1622 = vmatprep.mubr.bf16.mxu1 %v3867_v58  ;;  %v3954_v57 = vld [vmem:[%s5048_s0 + $0x3bc] ss:$28 sps:$4 sm:$0xff]   ;;  %v3956_v58 = vld [vmem:[%s5048_s0 + $0x3cc] ss:$28 sps:$4 sm:$0xff]  }
  0x5b   :  { %2086 = vmatprep.mubr.bf16.mxu0 %v3869_v59  ;;  %1803 = vmatpush1.bf16.msra.mxu1 %v3906_v60  ;;  %v3958_v59 = vld [vmem:[%s5048_s0 + $0x3b8] ss:$28 sps:$4 sm:$0xff]   ;;  %v3959_v60 = vld [vmem:[%s5048_s0 + $0x3c8] ss:$28 sps:$4 sm:$0xff]  }
  0x5c   :  { %1804 = vmatprep.subr.bf16.mxu1 %v4104_v0 }
  0x5f   :  { %1805 = vmatpush1.bf16.msra.mxu1 %v3919_v61  ;;  %v3961_v61 = vld [vmem:[%s5048_s0 + $0x3f4] ss:$28 sps:$4 sm:$0xff]  }
  0x60   :  { %1806 = vmatprep.subr.bf16.mxu1 %v4104_v0 }
  0x61   :  { %1623 = vmatmul.mubr.bf16.gmra.mrb[16].mxu1 %v3871_v62  ;;  %v3963_v62 = vld [vmem:[%s5048_s0 + $0x404] ss:$28 sps:$4 sm:$0xff]  }
  0x62   :  { %2087 = vmatmul.mubr.bf16.gmra.mrb[16].mxu0 %v3872_v63  ;;  %1630 = vmatprep.mubr.bf16.mxu1 %v3873_v1  ;;  %v3965_v63 = vld [vmem:[%s5048_s0 + $0x3f0] ss:$28 sps:$4 sm:$0xff]   ;;  %v3966_v1 = vld [vmem:[%s5048_s0 + $0x400] ss:$28 sps:$4 sm:$0xff]  }
  0x63   :  { %2094 = vmatprep.mubr.bf16.mxu0 %v3876_v2  ;;  %1807 = vmatpush1.bf16.msra.mxu1 %v3926_v3  ;;  %v3967_v2 = vld [vmem:[%s5048_s0 + $0x42c] ss:$28 sps:$4 sm:$0xff]   ;;  %v3970_v3 = vld [vmem:[%s5048_s0 + $0x43c] ss:$28 sps:$4 sm:$0xff]  }
  0x64   :  { %1808 = vmatprep.subr.bf16.mxu1 %v4104_v0 }
  0x67   :  { %1809 = vmatpush1.bf16.msra.mxu1 %v3940_v4  ;;  %v3972_v4 = vld [vmem:[%s5048_s0 + $0x428] ss:$28 sps:$4 sm:$0xff]  }
  0x68   :  { %1810 = vmatprep.subr.bf16.mxu1 %v4104_v0 }
  0x69   :  { %1631 = vmatmul.mubr.bf16.gmra.mrb[20].mxu1 %v3878_v5  ;;  %v3973_v5 = vld [vmem:[%s5048_s0 + $0x438] ss:$28 sps:$4 sm:$0xff]  }
  0x6a   :  { %2095 = vmatmul.mubr.bf16.gmra.mrb[20].mxu0 %v3879_v6  ;;  %1638 = vmatprep.mubr.bf16.mxu1 %v3880_v7  ;;  %v3974_v6 = vld [vmem:[%s5048_s0 + $0x464] ss:$28 sps:$4 sm:$0xff]   ;;  %v3976_v7 = vld [vmem:[%s5048_s0 + $0x474] ss:$28 sps:$4 sm:$0xff]  }
  0x6b   :  { %2102 = vmatprep.mubr.bf16.mxu0 %v3882_v8  ;;  %1811 = vmatpush1.bf16.msra.mxu1 %v3947_v9  ;;  %v3978_v8 = vld [vmem:[%s5048_s0 + $0x460] ss:$28 sps:$4 sm:$0xff]   ;;  %v3979_v9 = vld [vmem:[%s5048_s0 + $0x470] ss:$28 sps:$4 sm:$0xff]  }
  0x6c   :  { %1812 = vmatprep.subr.bf16.mxu1 %v4104_v0 }
  0x6f   :  { %1813 = vmatpush1.bf16.msra.mxu1 %v3960_v11  ;;  %v3983_v11 = vld [vmem:[%s5048_s0 + $0x4ac] ss:$28 sps:$4 sm:$0xff]  }
  0x70   :  { %1814 = vmatprep.subr.bf16.mxu1 %v4104_v0 }
  0x71   :  { %1639 = vmatmul.mubr.bf16.gmra.mrb[24].mxu1 %v3884_v10  ;;  %v3981_v10 = vld [vmem:[%s5048_s0 + $0x49c] ss:$28 sps:$4 sm:$0xff]  }
  0x72   :  { %2103 = vmatmul.mubr.bf16.gmra.mrb[24].mxu0 %v3885_v12  ;;  %1646 = vmatprep.mubr.bf16.mxu1 %v3887_v13  ;;  %v3985_v12 = vld [vmem:[%s5048_s0 + $0x498] ss:$28 sps:$4 sm:$0xff]   ;;  %v3986_v13 = vld [vmem:[%s5048_s0 + $0x4a8] ss:$28 sps:$4 sm:$0xff]  }
  0x73   :  { %2110 = vmatprep.mubr.bf16.mxu0 %v3889_v14  ;;  %1815 = vmatpush1.bf16.msra.mxu1 %v3969_v15  ;;  %v3987_v14 = vld [vmem:[%s5048_s0 + $0x4d4] ss:$28 sps:$4 sm:$0xff]   ;;  %v3989_v15 = vld [vmem:[%s5048_s0 + $0x4e4] ss:$28 sps:$4 sm:$0xff]  }
  0x74   :  { %1816 = vmatprep.subr.bf16.mxu1 %v4104_v0 }
  0x77   :  { %1817 = vmatpush1.bf16.msra.mxu1 %v3980_v17  ;;  %v3993_v17 = vld [vmem:[%s5048_s0 + $0x4e0] ss:$28 sps:$4 sm:$0xff]  }
  0x78   :  { %1818 = vmatprep.subr.bf16.mxu1 %v4104_v0 }
  0x79   :  { %1647 = vmatmul.mubr.bf16.gmra.mrb[28].mxu1 %v3891_v16  ;;  %v3991_v16 = vld [vmem:[%s5048_s0 + $0x4d0] ss:$28 sps:$4 sm:$0xff]  }
  0x7a   :  { %2111 = vmatmul.mubr.bf16.gmra.mrb[28].mxu0 %v3892_v18  ;;  %1654 = vmatprep.mubr.bf16.mxu1 %v3893_v19  ;;  %v3994_v18 = vld [vmem:[%s5048_s0 + $0x50c] ss:$28 sps:$4 sm:$0xff]   ;;  %v3996_v19 = vld [vmem:[%s5048_s0 + $0x51c] ss:$28 sps:$4 sm:$0xff]  }
  0x7b   :  { %2118 = vmatprep.mubr.bf16.mxu0 %v3895_v20  ;;  %1819 = vmatpush1.bf16.msra.mxu1 %v3992_v21  ;;  %v207_v20 = vld [vmem:[%s5048_s0 + $0x540] sm:$0xff]  ;;  %v209_v21 = vld [vmem:[%s5048_s0 + $0x550] sm:$0xff] }
  0x7c   :  { %1820 = vmatprep.subr.bf16.mxu1 %v4104_v0  ;;  %v3907_v0 = vld [vmem:[%s5048_s0 + $0x234] ss:$28 sps:$4 sm:$0xff]  }
  0x7f   :  { %1821 = vmatpush1.bf16.msra.mxu1 %v4000_v22  ;;  %v3998_v22 = vld [vmem:[%s5048_s0 + $0x508] ss:$28 sps:$4 sm:$0xff]  }
  0x81   :  { %1655 = vmatmul.mubr.bf16.gmra.mrb[32].mxu1 %v3897_v23  ;;  %v3999_v23 = vld [vmem:[%s5048_s0 + $0x518] ss:$28 sps:$4 sm:$0xff]  }
  0x82   :  { %2119 = vmatmul.mubr.bf16.gmra.mrb[32].mxu0 %v3899_v24  ;;  %1662 = vmatprep.mubr.bf16.mxu1 %v3900_v25  ;;  %v3053_v24 = vcombine.high %v207_v20, %v207_v20  ;;  %v3057_v25 = vcombine.high %v209_v21, %v209_v21 }
  0x83   :  { %2126 = vmatprep.mubr.bf16.mxu0 %v3902_v26  ;;  %v3052_v26 = vcombine.low %v207_v20, %v207_v20  ;;  %v4079_v20 = vld [vmem:[%s5048_s0 + $0x3f8] ss:$28 sps:$4 sm:$0xff]  }
  0x89   :  { %1663 = vmatmul.mubr.bf16.gmra.mrb[36].mxu1 %v3904_v27  ;;  %v3056_v27 = vcombine.low %v209_v21, %v209_v21  ;;  %v4080_v21 = vld [vmem:[%s5048_s0 + $0x408] ss:$28 sps:$4 sm:$0xff]  }
  0x8a   :  { %2127 = vmatmul.mubr.bf16.gmra.mrb[36].mxu0 %v3905_v28  ;;  %1670 = vmatprep.mubr.bf16.mxu1 %v3907_v0  ;;  %v4007_v28 = vld [vmem:[%s5048_s0 + $0xc] ss:$28 sps:$4 sm:$0xff]  }
  0x8b   :  { %2134 = vmatprep.mubr.bf16.mxu0 %v3909_v29  ;;  %v4005_v0 = vld [vmem:[%s5048_s0 + $0x8] ss:$28 sps:$4 sm:$0xff]   ;;  %v4008_v29 = vld [vmem:[%s5048_s0 + $0x18] ss:$28 sps:$4 sm:$0xff]  }
  0x91   :  { %1671 = vmatmul.mubr.bf16.gmra.mrb[40].mxu1 %v3911_v30  ;;  %v4009_v30 = vld [vmem:[%s5048_s0 + $0x44] ss:$28 sps:$4 sm:$0xff]  }
  0x92   :  { %2135 = vmatmul.mubr.bf16.gmra.mrb[40].mxu0 %v3912_v31  ;;  %1678 = vmatprep.mubr.bf16.mxu1 %v3913_v32  ;;  %v4011_v31 = vld [vmem:[%s5048_s0 + $0x40] ss:$28 sps:$4 sm:$0xff]   ;;  %v4012_v32 = vld [vmem:[%s5048_s0 + $0x50] ss:$28 sps:$4 sm:$0xff]  }
  0x93   :  { %2142 = vmatprep.mubr.bf16.mxu0 %v3915_v33  ;;  %v4013_v33 = vld [vmem:[%s5048_s0 + $0x7c] ss:$28 sps:$4 sm:$0xff]  }
  0x99   :  { %1679 = vmatmul.mubr.bf16.gmra.mrb[44].mxu1 %v3917_v34  ;;  %v4015_v34 = vld [vmem:[%s5048_s0 + $0x78] ss:$28 sps:$4 sm:$0xff]  }
  0x9a   :  { %2143 = vmatmul.mubr.bf16.gmra.mrb[44].mxu0 %v3918_v35  ;;  %1686 = vmatprep.mubr.bf16.mxu1 %v3920_v36  ;;  %v4016_v35 = vld [vmem:[%s5048_s0 + $0x88] ss:$28 sps:$4 sm:$0xff]   ;;  %v4017_v36 = vld [vmem:[%s5048_s0 + $0xb4] ss:$28 sps:$4 sm:$0xff]  }
  0x9b   :  { %2150 = vmatprep.mubr.bf16.mxu0 %v3922_v37  ;;  %v4019_v37 = vld [vmem:[%s5048_s0 + $0xb0] ss:$28 sps:$4 sm:$0xff]  }
  0xa1   :  { %1687 = vmatmul.mubr.bf16.gmra.mrb[48].mxu1 %v3924_v38  ;;  %v4020_v38 = vld [vmem:[%s5048_s0 + $0xc0] ss:$28 sps:$4 sm:$0xff]  }
  0xa2   :  { %2151 = vmatmul.mubr.bf16.gmra.mrb[48].mxu0 %v3925_v39  ;;  %1694 = vmatprep.mubr.bf16.mxu1 %v3927_v41  ;;  %v4021_v39 = vld [vmem:[%s5048_s0 + $0xec] ss:$28 sps:$4 sm:$0xff]  }
  0xa3   :  { %2158 = vmatprep.mubr.bf16.mxu0 %v3929_v42  ;;  %v4023_v41 = vld [vmem:[%s5048_s0 + $0xe8] ss:$28 sps:$4 sm:$0xff]   ;;  %v4024_v42 = vld [vmem:[%s5048_s0 + $0xf8] ss:$28 sps:$4 sm:$0xff]  }
  0xa9   :  { %1695 = vmatmul.mubr.bf16.gmra.mrb[52].mxu1 %v3932_v43  ;;  %v4025_v43 = vld [vmem:[%s5048_s0 + $0x124] ss:$28 sps:$4 sm:$0xff]  }
  0xaa   :  { %2159 = vmatmul.mubr.bf16.gmra.mrb[52].mxu0 %v3933_v44  ;;  %1702 = vmatprep.mubr.bf16.mxu1 %v3934_v45  ;;  %v4027_v44 = vld [vmem:[%s5048_s0 + $0x120] ss:$28 sps:$4 sm:$0xff]   ;;  %v4028_v45 = vld [vmem:[%s5048_s0 + $0x130] ss:$28 sps:$4 sm:$0xff]  }
  0xab   :  { %2166 = vmatprep.mubr.bf16.mxu0 %v3936_v46  ;;  %v4029_v46 = vld [vmem:[%s5048_s0 + $0x15c] ss:$28 sps:$4 sm:$0xff]  }
  0xb1   :  { %1703 = vmatmul.mubr.bf16.gmra.mrb[56].mxu1 %v3938_v47  ;;  %v4031_v47 = vld [vmem:[%s5048_s0 + $0x158] ss:$28 sps:$4 sm:$0xff]  }
  0xb2   :  { %2167 = vmatmul.mubr.bf16.gmra.mrb[56].mxu0 %v3939_v48  ;;  %1710 = vmatprep.mubr.bf16.mxu1 %v3941_v49  ;;  %v4032_v48 = vld [vmem:[%s5048_s0 + $0x168] ss:$28 sps:$4 sm:$0xff]   ;;  %v4033_v49 = vld [vmem:[%s5048_s0 + $0x194] ss:$28 sps:$4 sm:$0xff]  }
  0xb3   :  { %2174 = vmatprep.mubr.bf16.mxu0 %v3943_v50  ;;  %v4035_v50 = vld [vmem:[%s5048_s0 + $0x190] ss:$28 sps:$4 sm:$0xff]  }
  0xb9   :  { %1711 = vmatmul.mubr.bf16.gmra.mrb[60].mxu1 %v3945_v51  ;;  %v4036_v51 = vld [vmem:[%s5048_s0 + $0x1a0] ss:$28 sps:$4 sm:$0xff]  }
  0xba   :  { %2175 = vmatmul.mubr.bf16.gmra.mrb[60].mxu0 %v3946_v52  ;;  %1718 = vmatprep.mubr.bf16.mxu1 %v3948_v53  ;;  %v4037_v52 = vld [vmem:[%s5048_s0 + $0x1cc] ss:$28 sps:$4 sm:$0xff]  }
  0xbb   :  { %2182 = vmatprep.mubr.bf16.mxu0 %v3950_v54  ;;  %v4039_v53 = vld [vmem:[%s5048_s0 + $0x1c8] ss:$28 sps:$4 sm:$0xff]   ;;  %v4040_v54 = vld [vmem:[%s5048_s0 + $0x1d8] ss:$28 sps:$4 sm:$0xff]  }
  0xc1   :  { %1719 = vmatmul.mubr.bf16.gmra.mrb[64].mxu1 %v3952_v55  ;;  %v4041_v55 = vld [vmem:[%s5048_s0 + $0x204] ss:$28 sps:$4 sm:$0xff]  }
  0xc2   :  { %2183 = vmatmul.mubr.bf16.gmra.mrb[64].mxu0 %v3953_v56  ;;  %1726 = vmatprep.mubr.bf16.mxu1 %v3954_v57  ;;  %v4043_v56 = vld [vmem:[%s5048_s0 + $0x200] ss:$28 sps:$4 sm:$0xff]   ;;  %v4044_v57 = vld [vmem:[%s5048_s0 + $0x210] ss:$28 sps:$4 sm:$0xff]  }
  0xc3   :  { %2190 = vmatprep.mubr.bf16.mxu0 %v3956_v58  ;;  %v4045_v58 = vld [vmem:[%s5048_s0 + $0x23c] ss:$28 sps:$4 sm:$0xff]  }
  0xc9   :  { %1727 = vmatmul.mubr.bf16.gmra.mrb[68].mxu1 %v3958_v59  ;;  %v4047_v59 = vld [vmem:[%s5048_s0 + $0x238] ss:$28 sps:$4 sm:$0xff]  }
  0xca   :  { %2191 = vmatmul.mubr.bf16.gmra.mrb[68].mxu0 %v3959_v60  ;;  %1734 = vmatprep.mubr.bf16.mxu1 %v3961_v61  ;;  %v4048_v60 = vld [vmem:[%s5048_s0 + $0x248] ss:$28 sps:$4 sm:$0xff]   ;;  %v4049_v61 = vld [vmem:[%s5048_s0 + $0x274] ss:$28 sps:$4 sm:$0xff]  }
  0xcb   :  { %2198 = vmatprep.mubr.bf16.mxu0 %v3963_v62  ;;  %v4051_v62 = vld [vmem:[%s5048_s0 + $0x270] ss:$28 sps:$4 sm:$0xff]  }
  0xd1   :  { %1735 = vmatmul.mubr.bf16.gmra.mrb[72].mxu1 %v3965_v63  ;;  %v4052_v63 = vld [vmem:[%s5048_s0 + $0x280] ss:$28 sps:$4 sm:$0xff]  }
  0xd2   :  { %2199 = vmatmul.mubr.bf16.gmra.mrb[72].mxu0 %v3966_v1  ;;  %1742 = vmatprep.mubr.bf16.mxu1 %v3967_v2  ;;  %v4053_v1 = vld [vmem:[%s5048_s0 + $0x2ac] ss:$28 sps:$4 sm:$0xff]  }
  0xd3   :  { %2206 = vmatprep.mubr.bf16.mxu0 %v3970_v3  ;;  %v4055_v2 = vld [vmem:[%s5048_s0 + $0x2a8] ss:$28 sps:$4 sm:$0xff]   ;;  %v4056_v3 = vld [vmem:[%s5048_s0 + $0x2b8] ss:$28 sps:$4 sm:$0xff]  }
  0xd9   :  { %1743 = vmatmul.mubr.bf16.gmra.mrb[76].mxu1 %v3972_v4  ;;  %v4057_v4 = vld [vmem:[%s5048_s0 + $0x2e4] ss:$28 sps:$4 sm:$0xff]  }
  0xda   :  { %2207 = vmatmul.mubr.bf16.gmra.mrb[76].mxu0 %v3973_v5  ;;  %1750 = vmatprep.mubr.bf16.mxu1 %v3974_v6  ;;  %v4059_v5 = vld [vmem:[%s5048_s0 + $0x2e0] ss:$28 sps:$4 sm:$0xff]   ;;  %v4060_v6 = vld [vmem:[%s5048_s0 + $0x2f0] ss:$28 sps:$4 sm:$0xff]  }
  0xdb   :  { %2214 = vmatprep.mubr.bf16.mxu0 %v3976_v7  ;;  %v4061_v7 = vld [vmem:[%s5048_s0 + $0x31c] ss:$28 sps:$4 sm:$0xff]  }
  0xe1   :  { %1751 = vmatmul.mubr.bf16.gmra.mrb[80].mxu1 %v3978_v8  ;;  %v4063_v8 = vld [vmem:[%s5048_s0 + $0x318] ss:$28 sps:$4 sm:$0xff]  }
  0xe2   :  { %2215 = vmatmul.mubr.bf16.gmra.mrb[80].mxu0 %v3979_v9  ;;  %1758 = vmatprep.mubr.bf16.mxu1 %v3981_v10  ;;  %v4064_v9 = vld [vmem:[%s5048_s0 + $0x328] ss:$28 sps:$4 sm:$0xff]   ;;  %v4065_v10 = vld [vmem:[%s5048_s0 + $0x354] ss:$28 sps:$4 sm:$0xff]  }
  0xe3   :  { %2222 = vmatprep.mubr.bf16.mxu0 %v3983_v11  ;;  %v4067_v11 = vld [vmem:[%s5048_s0 + $0x350] ss:$28 sps:$4 sm:$0xff]  }
  0xe9   :  { %1759 = vmatmul.mubr.bf16.gmra.mrb[84].mxu1 %v3985_v12  ;;  %v4068_v12 = vld [vmem:[%s5048_s0 + $0x360] ss:$28 sps:$4 sm:$0xff]  }
  0xea   :  { %2223 = vmatmul.mubr.bf16.gmra.mrb[84].mxu0 %v3986_v13  ;;  %1766 = vmatprep.mubr.bf16.mxu1 %v3987_v14  ;;  %v4069_v13 = vld [vmem:[%s5048_s0 + $0x38c] ss:$28 sps:$4 sm:$0xff]  }
  0xeb   :  { %2230 = vmatprep.mubr.bf16.mxu0 %v3989_v15  ;;  %v4071_v14 = vld [vmem:[%s5048_s0 + $0x388] ss:$28 sps:$4 sm:$0xff]   ;;  %v4072_v15 = vld [vmem:[%s5048_s0 + $0x398] ss:$28 sps:$4 sm:$0xff]  }
  0xf1   :  { %1767 = vmatmul.mubr.bf16.gmra.mrb[88].mxu1 %v3991_v16  ;;  %v4073_v16 = vld [vmem:[%s5048_s0 + $0x3c4] ss:$28 sps:$4 sm:$0xff]  }
  0xf2   :  { %2231 = vmatmul.mubr.bf16.gmra.mrb[88].mxu0 %v3993_v17  ;;  %1774 = vmatprep.mubr.bf16.mxu1 %v3994_v18  ;;  %v4075_v17 = vld [vmem:[%s5048_s0 + $0x3c0] ss:$28 sps:$4 sm:$0xff]   ;;  %v4076_v18 = vld [vmem:[%s5048_s0 + $0x3d0] ss:$28 sps:$4 sm:$0xff]  }
  0xf3   :  { %2238 = vmatprep.mubr.bf16.mxu0 %v3996_v19  ;;  %v4077_v19 = vld [vmem:[%s5048_s0 + $0x3fc] ss:$28 sps:$4 sm:$0xff]  }
  0xf9   :  { %1775 = vmatmul.mubr.bf16.gmra.mrb[92].mxu1 %v3998_v22  ;;  %v4081_v22 = vld [vmem:[%s5048_s0 + $0x434] ss:$28 sps:$4 sm:$0xff]  }
  0xfa   :  { %2239 = vmatmul.mubr.bf16.gmra.mrb[92].mxu0 %v3999_v23  ;;  %1782 = vmatprep.mubr.bf16.mxu1 %v3053_v24  ;;  %v4083_v23 = vld [vmem:[%s5048_s0 + $0x430] ss:$28 sps:$4 sm:$0xff]   ;;  %v4084_v24 = vld [vmem:[%s5048_s0 + $0x440] ss:$28 sps:$4 sm:$0xff]  }
  0xfb   :  { %2246 = vmatprep.mubr.bf16.mxu0 %v3057_v25  ;;  %v4085_v25 = vld [vmem:[%s5048_s0 + $0x46c] ss:$28 sps:$4 sm:$0xff]  }
 0x101   :  { %1783 = vmatmul.mubr.bf16.gmra.mrb[96].mxu1 %v3052_v26  ;;  %v4087_v26 = vld [vmem:[%s5048_s0 + $0x468] ss:$28 sps:$4 sm:$0xff]  }
 0x102   :  { %2247 = vmatmul.mubr.bf16.gmra.mrb[96].mxu0 %v3056_v27  ;;  %1822 = vmatprep.mubr.bf16.mxu1 %v4007_v28  ;;  %v4088_v27 = vld [vmem:[%s5048_s0 + $0x478] ss:$28 sps:$4 sm:$0xff]   ;;  %v4089_v28 = vld [vmem:[%s5048_s0 + $0x4a4] ss:$28 sps:$4 sm:$0xff]  }
 0x103   :  { %3406 = vmatprep.mubr.msk.bf16.mxu0 %vm4106_vm0, %v4105_v40 }
 0x109   :  { %1823 = vmatmul.mubr.bf16.vlgmr.msra.gmra.mrb[0].mxu1 %v4005_v0  ;;  %v4091_v0 = vld [vmem:[%s5048_s0 + $0x4a0] ss:$28 sps:$4 sm:$0xff]  }
 0x10a   :  { %3407 = vmatmul.mubr.msk.bf16.vlgmr.msra.gmra.mrb[0].mxu0 %vm1482_vm1, %v4008_v29  ;;  %1830 = vmatprep.mubr.bf16.mxu1 %v4009_v30  ;;  %v4092_v29 = vld [vmem:[%s5048_s0 + $0x4b0] ss:$28 sps:$4 sm:$0xff]   ;;  %v4093_v30 = vld [vmem:[%s5048_s0 + $0x4dc] ss:$28 sps:$4 sm:$0xff]  }
 0x10b   :  { %3410 = vmatprep.mubr.msk.bf16.mxu0 %vm4106_vm0, %v4105_v40 }
 0x111   :  { %1831 = vmatmul.mubr.bf16.gmra.mrb[4].mxu1 %v4011_v31  ;;  %v4095_v31 = vld [vmem:[%s5048_s0 + $0x4d8] ss:$28 sps:$4 sm:$0xff]  }
 0x112   :  { %3411 = vmatmul.mubr.msk.bf16.gmra.mrb[4].mxu0 %vm1482_vm1, %v4012_v32  ;;  %1838 = vmatprep.mubr.bf16.mxu1 %v4013_v33  ;;  %v4096_v32 = vld [vmem:[%s5048_s0 + $0x4e8] ss:$28 sps:$4 sm:$0xff]   ;;  %v4097_v33 = vld [vmem:[%s5048_s0 + $0x514] ss:$28 sps:$4 sm:$0xff]  }
 0x113   :  { %3414 = vmatprep.mubr.msk.bf16.mxu0 %vm4106_vm0, %v4105_v40 }
 0x119   :  { %1839 = vmatmul.mubr.bf16.gmra.mrb[8].mxu1 %v4015_v34  ;;  %v208_v34 = vld [vmem:[%s5048_s0 + $0x548] sm:$0xff] }
 0x11a   :  { %3415 = vmatmul.mubr.msk.bf16.gmra.mrb[8].mxu0 %vm1482_vm1, %v4016_v35  ;;  %1846 = vmatprep.mubr.bf16.mxu1 %v4017_v36  ;;  %v4099_v35 = vld [vmem:[%s5048_s0 + $0x510] ss:$28 sps:$4 sm:$0xff]   ;;  %v4100_v36 = vld [vmem:[%s5048_s0 + $0x520] ss:$28 sps:$4 sm:$0xff]  }
 0x11b   :  { %3418 = vmatprep.mubr.msk.bf16.mxu0 %vm4106_vm0, %v4105_v40 }
 0x121   :  { %1847 = vmatmul.mubr.bf16.gmra.mrb[12].mxu1 %v4019_v37  ;;  %v3055_v37 = vcombine.high %v208_v34, %v208_v34 }
 0x122   :  { %3419 = vmatmul.mubr.msk.bf16.gmra.mrb[12].mxu0 %vm1482_vm1, %v4020_v38  ;;  %1854 = vmatprep.mubr.bf16.mxu1 %v4021_v39  ;;  %v3054_v38 = vcombine.low %v208_v34, %v208_v34  ;;  %v4103_v39 = vld [vmem:[%s5048_s0 + $0x558] ss:$0 sps:$4 sm:$0xff]  }
 0x123   :  { %3422 = vmatprep.mubr.msk.bf16.mxu0 %vm4106_vm0, %v4105_v40 }
 0x129   :  { %1855 = vmatmul.mubr.bf16.gmra.mrb[16].mxu1 %v4023_v41  ;;  %v4921_v41 = vld [vmem:[%s5049_s2] ss:$0 sm:$0xff] }
 0x12a   :  { %3423 = vmatmul.mubr.msk.bf16.gmra.mrb[16].mxu0 %vm1482_vm1, %v4024_v42  ;;  %1862 = vmatprep.mubr.bf16.mxu1 %v4025_v43 }
 0x12b   :  { %3426 = vmatprep.mubr.msk.bf16.mxu0 %vm4106_vm0, %v4105_v40 }
 0x131   :  { %1863 = vmatmul.mubr.bf16.gmra.mrb[20].mxu1 %v4027_v44 }
 0x132   :  { %3427 = vmatmul.mubr.msk.bf16.gmra.mrb[20].mxu0 %vm1482_vm1, %v4028_v45  ;;  %1870 = vmatprep.mubr.bf16.mxu1 %v4029_v46 }
 0x133   :  { %3430 = vmatprep.mubr.msk.bf16.mxu0 %vm4106_vm0, %v4105_v40 }
 0x139   :  { %1871 = vmatmul.mubr.bf16.gmra.mrb[24].mxu1 %v4031_v47 }
 0x13a   :  { %3431 = vmatmul.mubr.msk.bf16.gmra.mrb[24].mxu0 %vm1482_vm1, %v4032_v48  ;;  %1878 = vmatprep.mubr.bf16.mxu1 %v4033_v49 }
 0x13b   :  { %3434 = vmatprep.mubr.msk.bf16.mxu0 %vm4106_vm0, %v4105_v40 }
 0x141   :  { %1879 = vmatmul.mubr.bf16.gmra.mrb[28].mxu1 %v4035_v50 }
 0x142   :  { %3435 = vmatmul.mubr.msk.bf16.gmra.mrb[28].mxu0 %vm1482_vm1, %v4036_v51  ;;  %1886 = vmatprep.mubr.bf16.mxu1 %v4037_v52 }
 0x143   :  { %3438 = vmatprep.mubr.msk.bf16.mxu0 %vm4106_vm0, %v4105_v40 }
 0x149   :  { %1887 = vmatmul.mubr.bf16.gmra.mrb[32].mxu1 %v4039_v53 }
 0x14a   :  { %3439 = vmatmul.mubr.msk.bf16.gmra.mrb[32].mxu0 %vm1482_vm1, %v4040_v54  ;;  %1894 = vmatprep.mubr.bf16.mxu1 %v4041_v55 }
 0x14b   :  { %3442 = vmatprep.mubr.msk.bf16.mxu0 %vm4106_vm0, %v4105_v40 }
 0x151   :  { %1895 = vmatmul.mubr.bf16.gmra.mrb[36].mxu1 %v4043_v56 }
 0x152   :  { %3443 = vmatmul.mubr.msk.bf16.gmra.mrb[36].mxu0 %vm1482_vm1, %v4044_v57  ;;  %1902 = vmatprep.mubr.bf16.mxu1 %v4045_v58 }
 0x153   :  { %3446 = vmatprep.mubr.msk.bf16.mxu0 %vm4106_vm0, %v4105_v40 }
 0x159   :  { %1903 = vmatmul.mubr.bf16.gmra.mrb[40].mxu1 %v4047_v59 }
 0x15a   :  { %3447 = vmatmul.mubr.msk.bf16.gmra.mrb[40].mxu0 %vm1482_vm1, %v4048_v60  ;;  %1910 = vmatprep.mubr.bf16.mxu1 %v4049_v61 }
 0x15b   :  { %3450 = vmatprep.mubr.msk.bf16.mxu0 %vm4106_vm0, %v4105_v40 }
 0x161   :  { %1911 = vmatmul.mubr.bf16.gmra.mrb[44].mxu1 %v4051_v62 }
 0x162   :  { %3451 = vmatmul.mubr.msk.bf16.gmra.mrb[44].mxu0 %vm1482_vm1, %v4052_v63  ;;  %1918 = vmatprep.mubr.bf16.mxu1 %v4053_v1 }
 0x163   :  { %3454 = vmatprep.mubr.msk.bf16.mxu0 %vm4106_vm0, %v4105_v40 }
 0x169   :  { %1919 = vmatmul.mubr.bf16.gmra.mrb[48].mxu1 %v4055_v2 }
 0x16a   :  { %3455 = vmatmul.mubr.msk.bf16.gmra.mrb[48].mxu0 %vm1482_vm1, %v4056_v3  ;;  %1926 = vmatprep.mubr.bf16.mxu1 %v4057_v4 }
 0x16b   :  { %3458 = vmatprep.mubr.msk.bf16.mxu0 %vm4106_vm0, %v4105_v40 }
 0x171   :  { %1927 = vmatmul.mubr.bf16.gmra.mrb[52].mxu1 %v4059_v5 }
 0x172   :  { %3459 = vmatmul.mubr.msk.bf16.gmra.mrb[52].mxu0 %vm1482_vm1, %v4060_v6  ;;  %1934 = vmatprep.mubr.bf16.mxu1 %v4061_v7 }
 0x173   :  { %3462 = vmatprep.mubr.msk.bf16.mxu0 %vm4106_vm0, %v4105_v40 }
 0x179   :  { %1935 = vmatmul.mubr.bf16.gmra.mrb[56].mxu1 %v4063_v8 }
 0x17a   :  { %3463 = vmatmul.mubr.msk.bf16.gmra.mrb[56].mxu0 %vm1482_vm1, %v4064_v9  ;;  %1942 = vmatprep.mubr.bf16.mxu1 %v4065_v10 }
 0x17b   :  { %3466 = vmatprep.mubr.msk.bf16.mxu0 %vm4106_vm0, %v4105_v40 }
 0x181   :  { %1943 = vmatmul.mubr.bf16.gmra.mrb[60].mxu1 %v4067_v11 }
 0x182   :  { %3467 = vmatmul.mubr.msk.bf16.gmra.mrb[60].mxu0 %vm1482_vm1, %v4068_v12  ;;  %1950 = vmatprep.mubr.bf16.mxu1 %v4069_v13 }
 0x183   :  { %3470 = vmatprep.mubr.msk.bf16.mxu0 %vm4106_vm0, %v4105_v40 }
 0x189   :  { %1951 = vmatmul.mubr.bf16.gmra.mrb[64].mxu1 %v4071_v14 }
 0x18a   :  { %3471 = vmatmul.mubr.msk.bf16.gmra.mrb[64].mxu0 %vm1482_vm1, %v4072_v15  ;;  %1958 = vmatprep.mubr.bf16.mxu1 %v4073_v16 }
 0x18b   :  { %3474 = vmatprep.mubr.msk.bf16.mxu0 %vm4106_vm0, %v4105_v40 }
 0x191   :  { %1959 = vmatmul.mubr.bf16.gmra.mrb[68].mxu1 %v4075_v17 }
 0x192   :  { %3475 = vmatmul.mubr.msk.bf16.gmra.mrb[68].mxu0 %vm1482_vm1, %v4076_v18  ;;  %1966 = vmatprep.mubr.bf16.mxu1 %v4077_v19 }
 0x193   :  { %3478 = vmatprep.mubr.msk.bf16.mxu0 %vm4106_vm0, %v4105_v40 }
 0x199   :  { %1967 = vmatmul.mubr.bf16.gmra.mrb[72].mxu1 %v4079_v20 }
 0x19a   :  { %3479 = vmatmul.mubr.msk.bf16.gmra.mrb[72].mxu0 %vm1482_vm1, %v4080_v21  ;;  %1974 = vmatprep.mubr.bf16.mxu1 %v4081_v22 }
 0x19b   :  { %3482 = vmatprep.mubr.msk.bf16.mxu0 %vm4106_vm0, %v4105_v40 }
 0x1a1   :  { %1975 = vmatmul.mubr.bf16.gmra.mrb[76].mxu1 %v4083_v23 }
 0x1a2   :  { %3483 = vmatmul.mubr.msk.bf16.gmra.mrb[76].mxu0 %vm1482_vm1, %v4084_v24  ;;  %1982 = vmatprep.mubr.bf16.mxu1 %v4085_v25 }
 0x1a3   :  { %3486 = vmatprep.mubr.msk.bf16.mxu0 %vm4106_vm0, %v4105_v40 }
 0x1a9   :  { %1983 = vmatmul.mubr.bf16.gmra.mrb[80].mxu1 %v4087_v26 }
 0x1aa   :  { %3487 = vmatmul.mubr.msk.bf16.gmra.mrb[80].mxu0 %vm1482_vm1, %v4088_v27  ;;  %1990 = vmatprep.mubr.bf16.mxu1 %v4089_v28 }
 0x1ab   :  { %3490 = vmatprep.mubr.msk.bf16.mxu0 %vm4106_vm0, %v4105_v40 }
 0x1b1   :  { %1991 = vmatmul.mubr.bf16.gmra.mrb[84].mxu1 %v4091_v0 }
 0x1b2   :  { %3491 = vmatmul.mubr.msk.bf16.gmra.mrb[84].mxu0 %vm1482_vm1, %v4092_v29  ;;  %1998 = vmatprep.mubr.bf16.mxu1 %v4093_v30 }
 0x1b3   :  { %3494 = vmatprep.mubr.msk.bf16.mxu0 %vm4106_vm0, %v4105_v40 }
 0x1b9   :  { %1999 = vmatmul.mubr.bf16.gmra.mrb[88].mxu1 %v4095_v31 }
 0x1ba   :  { %3495 = vmatmul.mubr.msk.bf16.gmra.mrb[88].mxu0 %vm1482_vm1, %v4096_v32  ;;  %2006 = vmatprep.mubr.bf16.mxu1 %v4097_v33 }
 0x1bb   :  { %3498 = vmatprep.mubr.msk.bf16.mxu0 %vm4106_vm0, %v4105_v40 }
 0x1c1   :  { %2007 = vmatmul.mubr.bf16.gmra.mrb[92].mxu1 %v4099_v35 }
 0x1c2   :  { %3499 = vmatmul.mubr.msk.bf16.gmra.mrb[92].mxu0 %vm1482_vm1, %v4100_v36  ;;  %2014 = vmatprep.mubr.bf16.mxu1 %v3055_v37 }
 0x1c3   :  { %3502 = vmatprep.mubr.msk.bf16.mxu0 %vm4106_vm0, %v4105_v40 }
 0x1c9   :  { %2015 = vmatmul.mubr.bf16.gmra.mrb[96].mxu1 %v3054_v38 }
 0x1ca   :  { %3503 = vmatmul.mubr.msk.bf16.gmra.mrb[96].mxu0 %vm1482_vm1, %v4103_v39 }
 0x1dc   :  { %v1824_v42 = vpop.f32.mrb[0].mxu1 }
 0x1dd   :  { %v3506_v43 = vadd.f32 %v4921_v41, %v1824_v42  ;;  %v2288_v44 = vpop.f32.mrb[0].mxu0  ;;  %v1826_v45 = vpop.f32.mrb[1].mxu1 }
 0x1de   :  { %v3408_v46 = vpop.f32.mrb[1].mxu0  ;;  %v1827_v40 = vpop.f32.mrb[2].mxu1 }
 0x1df   :  { %v3507_v47 = vadd.f32 %v3506_v43, %v2288_v44  ;;  %v3508_v48 = vadd.f32 %v4921_v41, %v1827_v40  ;;  %v2291_v49 = vpop.f32.mrb[2].mxu0  ;;  %v1829_v50 = vpop.f32.mrb[3].mxu1 }
 0x1e0   :  { %v3409_v51 = vpop.f32.mrb[3].mxu0 }
 0x1e1   :  { %v2535_v52 = vmul.f32 0.01, %v3507_v47  ;;  %v3509_v53 = vadd.f32 %v3508_v48, %v2291_v49  ;;  %vm2486_vm2 = vcmp.ge.f32.partialorder %v3507_v47, 0.0 }
 0x1e3   :  { %vm2487_vm3 = vcmp.ge.f32.partialorder %v3509_v53, 0.0  ;;  %v2536_v54 = vmul.f32 0.01, %v3509_v53  ;;  %v2584_v56 = vsel %vm2486_vm2, %v3507_v47, %v2535_v52 }
 0x1e4   :  { %v1832_v55 = vpop.f32.mrb[4].mxu1 }
 0x1e5   :  { %v2585_v57 = vsel %vm2487_vm3, %v3509_v53, %v2536_v54  ;;  %v3510_v58 = vadd.f32 %v4921_v41, %v1832_v55  ;;  %v2296_v59 = vpop.f32.mrb[4].mxu0  ;;  %v1834_v60 = vpop.f32.mrb[5].mxu1 }
 0x1e6   :  { %v3235_v61 = vpack.c.bf16 %v2585_v57, %v2584_v56  ;;  %v3412_v62 = vpop.f32.mrb[5].mxu0  ;;  %v1835_v63 = vpop.f32.mrb[6].mxu1 }
 0x1e7   :  { %v3511_v1 = vadd.f32 %v3510_v58, %v2296_v59  ;;  %v3512_v2 = vadd.f32 %v4921_v41, %v1835_v63  ;;  %v2299_v3 = vpop.f32.mrb[6].mxu0  ;;  %v1837_v4 = vpop.f32.mrb[7].mxu1 }
 0x1e8   :  { %3236 = vst [vmem:[%s5050_s3] sm:$0xff] %v3235_v61   ;;  %v3413_v5 = vpop.f32.mrb[7].mxu0 }
 0x1e9   :  { %v2537_v6 = vmul.f32 0.01, %v3511_v1  ;;  %v3513_v7 = vadd.f32 %v3512_v2, %v2299_v3  ;;  %vm2488_vm4 = vcmp.ge.f32.partialorder %v3511_v1, 0.0 }
 0x1eb   :  { %vm2489_vm5 = vcmp.ge.f32.partialorder %v3513_v7, 0.0  ;;  %v2538_v8 = vmul.f32 0.01, %v3513_v7  ;;  %v2586_v10 = vsel %vm2488_vm4, %v3511_v1, %v2537_v6 }
 0x1ec   :  { %v1840_v9 = vpop.f32.mrb[8].mxu1 }
 0x1ed   :  { %v2587_v11 = vsel %vm2489_vm5, %v3513_v7, %v2538_v8  ;;  %v3514_v12 = vadd.f32 %v4921_v41, %v1840_v9  ;;  %v2304_v13 = vpop.f32.mrb[8].mxu0  ;;  %v1842_v14 = vpop.f32.mrb[9].mxu1 }
 0x1ee   :  { %v3240_v15 = vpack.c.bf16 %v2587_v11, %v2586_v10  ;;  %v3416_v16 = vpop.f32.mrb[9].mxu0  ;;  %v1843_v17 = vpop.f32.mrb[10].mxu1 }
 0x1ef   :  { %v3515_v18 = vadd.f32 %v3514_v12, %v2304_v13  ;;  %v3516_v19 = vadd.f32 %v4921_v41, %v1843_v17  ;;  %v2307_v20 = vpop.f32.mrb[10].mxu0  ;;  %v1845_v21 = vpop.f32.mrb[11].mxu1 }
 0x1f0   :  { %3352 = vst [vmem:[%s5050_s3 + $0x8] sm:$0xff] %v3240_v15   ;;  %v3417_v22 = vpop.f32.mrb[11].mxu0 }
 0x1f1   :  { %v2539_v23 = vmul.f32 0.01, %v3515_v18  ;;  %v3517_v24 = vadd.f32 %v3516_v19, %v2307_v20  ;;  %vm2490_vm6 = vcmp.ge.f32.partialorder %v3515_v18, 0.0 }
 0x1f3   :  { %vm2491_vm7 = vcmp.ge.f32.partialorder %v3517_v24, 0.0  ;;  %v2540_v25 = vmul.f32 0.01, %v3517_v24  ;;  %v2588_v27 = vsel %vm2490_vm6, %v3515_v18, %v2539_v23 }
 0x1f4   :  { %v1848_v26 = vpop.f32.mrb[12].mxu1 }
 0x1f5   :  { %v2589_v28 = vsel %vm2491_vm7, %v3517_v24, %v2540_v25  ;;  %v3518_v0 = vadd.f32 %v4921_v41, %v1848_v26  ;;  %v2312_v29 = vpop.f32.mrb[12].mxu0  ;;  %v1850_v30 = vpop.f32.mrb[13].mxu1 }
 0x1f6   :  { %v3245_v31 = vpack.c.bf16 %v2589_v28, %v2588_v27  ;;  %v3420_v32 = vpop.f32.mrb[13].mxu0  ;;  %v1851_v33 = vpop.f32.mrb[14].mxu1 }
 0x1f7   :  { %v3519_v34 = vadd.f32 %v3518_v0, %v2312_v29  ;;  %v3520_v35 = vadd.f32 %v4921_v41, %v1851_v33  ;;  %v2315_v36 = vpop.f32.mrb[14].mxu0  ;;  %v1853_v37 = vpop.f32.mrb[15].mxu1 }
 0x1f8   :  { %3353 = vst [vmem:[%s5050_s3 + $0x10] sm:$0xff] %v3245_v31   ;;  %v3421_v38 = vpop.f32.mrb[15].mxu0 }
 0x1f9   :  { %v2541_v39 = vmul.f32 0.01, %v3519_v34  ;;  %v3521_v42 = vadd.f32 %v3520_v35, %v2315_v36  ;;  %vm2492_vm8 = vcmp.ge.f32.partialorder %v3519_v34, 0.0 }
 0x1fb   :  { %vm2493_vm9 = vcmp.ge.f32.partialorder %v3521_v42, 0.0  ;;  %v2542_v43 = vmul.f32 0.01, %v3521_v42  ;;  %v2590_v45 = vsel %vm2492_vm8, %v3519_v34, %v2541_v39 }
 0x1fc   :  { %v1856_v44 = vpop.f32.mrb[16].mxu1 }
 0x1fd   :  { %v2591_v46 = vsel %vm2493_vm9, %v3521_v42, %v2542_v43  ;;  %v3522_v40 = vadd.f32 %v4921_v41, %v1856_v44  ;;  %v2320_v47 = vpop.f32.mrb[16].mxu0  ;;  %v1858_v48 = vpop.f32.mrb[17].mxu1 }
 0x1fe   :  { %v3250_v49 = vpack.c.bf16 %v2591_v46, %v2590_v45  ;;  %v3424_v50 = vpop.f32.mrb[17].mxu0  ;;  %v1859_v51 = vpop.f32.mrb[18].mxu1 }
 0x1ff   :  { %v3523_v52 = vadd.f32 %v3522_v40, %v2320_v47  ;;  %v3524_v53 = vadd.f32 %v4921_v41, %v1859_v51  ;;  %v2323_v54 = vpop.f32.mrb[18].mxu0  ;;  %v1861_v55 = vpop.f32.mrb[19].mxu1 }
 0x200   :  { %3354 = vst [vmem:[%s5050_s3 + $0x18] sm:$0xff] %v3250_v49   ;;  %v3425_v56 = vpop.f32.mrb[19].mxu0 }
 0x201   :  { %v2543_v57 = vmul.f32 0.01, %v3523_v52  ;;  %v3525_v58 = vadd.f32 %v3524_v53, %v2323_v54  ;;  %vm2494_vm10 = vcmp.ge.f32.partialorder %v3523_v52, 0.0 }
 0x203   :  { %vm2495_vm11 = vcmp.ge.f32.partialorder %v3525_v58, 0.0  ;;  %v2544_v59 = vmul.f32 0.01, %v3525_v58  ;;  %v2592_v61 = vsel %vm2494_vm10, %v3523_v52, %v2543_v57 }
 0x204   :  { %v1864_v60 = vpop.f32.mrb[20].mxu1 }
 0x205   :  { %v2593_v62 = vsel %vm2495_vm11, %v3525_v58, %v2544_v59  ;;  %v3526_v63 = vadd.f32 %v4921_v41, %v1864_v60  ;;  %v2328_v1 = vpop.f32.mrb[20].mxu0  ;;  %v1866_v2 = vpop.f32.mrb[21].mxu1 }
 0x206   :  { %v3255_v3 = vpack.c.bf16 %v2593_v62, %v2592_v61  ;;  %v3428_v4 = vpop.f32.mrb[21].mxu0  ;;  %v1867_v5 = vpop.f32.mrb[22].mxu1 }
 0x207   :  { %v3527_v6 = vadd.f32 %v3526_v63, %v2328_v1  ;;  %v3528_v7 = vadd.f32 %v4921_v41, %v1867_v5  ;;  %v2331_v8 = vpop.f32.mrb[22].mxu0  ;;  %v1869_v9 = vpop.f32.mrb[23].mxu1 }
 0x208   :  { %3355 = vst [vmem:[%s5050_s3 + $0x20] sm:$0xff] %v3255_v3   ;;  %v3429_v10 = vpop.f32.mrb[23].mxu0 }
 0x209   :  { %v2545_v11 = vmul.f32 0.01, %v3527_v6  ;;  %v3529_v12 = vadd.f32 %v3528_v7, %v2331_v8  ;;  %vm2496_vm12 = vcmp.ge.f32.partialorder %v3527_v6, 0.0 }
 0x20b   :  { %vm2497_vm13 = vcmp.ge.f32.partialorder %v3529_v12, 0.0  ;;  %v2546_v13 = vmul.f32 0.01, %v3529_v12  ;;  %v2594_v15 = vsel %vm2496_vm12, %v3527_v6, %v2545_v11 }
 0x20c   :  { %v1872_v14 = vpop.f32.mrb[24].mxu1 }
 0x20d   :  { %v2595_v16 = vsel %vm2497_vm13, %v3529_v12, %v2546_v13  ;;  %v3530_v17 = vadd.f32 %v4921_v41, %v1872_v14  ;;  %v2336_v18 = vpop.f32.mrb[24].mxu0  ;;  %v1874_v19 = vpop.f32.mrb[25].mxu1 }
 0x20e   :  { %v3260_v20 = vpack.c.bf16 %v2595_v16, %v2594_v15  ;;  %v3432_v21 = vpop.f32.mrb[25].mxu0  ;;  %v1875_v22 = vpop.f32.mrb[26].mxu1 }
 0x20f   :  { %v3531_v23 = vadd.f32 %v3530_v17, %v2336_v18  ;;  %v3532_v24 = vadd.f32 %v4921_v41, %v1875_v22  ;;  %v2339_v25 = vpop.f32.mrb[26].mxu0  ;;  %v1877_v26 = vpop.f32.mrb[27].mxu1 }
 0x210   :  { %3356 = vst [vmem:[%s5050_s3 + $0x28] sm:$0xff] %v3260_v20   ;;  %v3433_v27 = vpop.f32.mrb[27].mxu0 }
 0x211   :  { %v2547_v28 = vmul.f32 0.01, %v3531_v23  ;;  %v3533_v0 = vadd.f32 %v3532_v24, %v2339_v25  ;;  %vm2498_vm14 = vcmp.ge.f32.partialorder %v3531_v23, 0.0 }
 0x213   :  { %vm2499_vm15 = vcmp.ge.f32.partialorder %v3533_v0, 0.0  ;;  %v2548_v29 = vmul.f32 0.01, %v3533_v0  ;;  %v2596_v31 = vsel %vm2498_vm14, %v3531_v23, %v2547_v28 }
 0x214   :  { %v1880_v30 = vpop.f32.mrb[28].mxu1 }
 0x215   :  { %v2597_v32 = vsel %vm2499_vm15, %v3533_v0, %v2548_v29  ;;  %v3534_v33 = vadd.f32 %v4921_v41, %v1880_v30  ;;  %v2344_v34 = vpop.f32.mrb[28].mxu0  ;;  %v1882_v35 = vpop.f32.mrb[29].mxu1 }
 0x216   :  { %v3265_v36 = vpack.c.bf16 %v2597_v32, %v2596_v31  ;;  %v3436_v37 = vpop.f32.mrb[29].mxu0  ;;  %v1883_v38 = vpop.f32.mrb[30].mxu1 }
 0x217   :  { %v3535_v39 = vadd.f32 %v3534_v33, %v2344_v34  ;;  %v3536_v42 = vadd.f32 %v4921_v41, %v1883_v38  ;;  %v2347_v43 = vpop.f32.mrb[30].mxu0  ;;  %v1885_v44 = vpop.f32.mrb[31].mxu1 }
 0x218   :  { %3357 = vst [vmem:[%s5050_s3 + $0x30] sm:$0xff] %v3265_v36   ;;  %v3437_v45 = vpop.f32.mrb[31].mxu0 }
 0x219   :  { %v2549_v46 = vmul.f32 0.01, %v3535_v39  ;;  %v3537_v40 = vadd.f32 %v3536_v42, %v2347_v43  ;;  %vm2500_vm0 = vcmp.ge.f32.partialorder %v3535_v39, 0.0 }
 0x21b   :  { %vm2501_vm1 = vcmp.ge.f32.partialorder %v3537_v40, 0.0  ;;  %v2550_v47 = vmul.f32 0.01, %v3537_v40  ;;  %v2598_v49 = vsel %vm2500_vm0, %v3535_v39, %v2549_v46 }
 0x21c   :  { %v1888_v48 = vpop.f32.mrb[32].mxu1 }
 0x21d   :  { %v2599_v50 = vsel %vm2501_vm1, %v3537_v40, %v2550_v47  ;;  %v3538_v51 = vadd.f32 %v4921_v41, %v1888_v48  ;;  %v2352_v52 = vpop.f32.mrb[32].mxu0  ;;  %v1890_v53 = vpop.f32.mrb[33].mxu1 }
 0x21e   :  { %v3270_v54 = vpack.c.bf16 %v2599_v50, %v2598_v49  ;;  %v3440_v55 = vpop.f32.mrb[33].mxu0  ;;  %v1891_v56 = vpop.f32.mrb[34].mxu1 }
 0x21f   :  { %v3539_v57 = vadd.f32 %v3538_v51, %v2352_v52  ;;  %v3540_v58 = vadd.f32 %v4921_v41, %v1891_v56  ;;  %v2355_v59 = vpop.f32.mrb[34].mxu0  ;;  %v1893_v60 = vpop.f32.mrb[35].mxu1 }
 0x220   :  { %3358 = vst [vmem:[%s5050_s3 + $0x38] sm:$0xff] %v3270_v54   ;;  %v3441_v61 = vpop.f32.mrb[35].mxu0 }
 0x221   :  { %v2551_v62 = vmul.f32 0.01, %v3539_v57  ;;  %v3541_v63 = vadd.f32 %v3540_v58, %v2355_v59  ;;  %vm2502_vm2 = vcmp.ge.f32.partialorder %v3539_v57, 0.0 }
 0x223   :  { %vm2503_vm3 = vcmp.ge.f32.partialorder %v3541_v63, 0.0  ;;  %v2552_v1 = vmul.f32 0.01, %v3541_v63  ;;  %v2600_v3 = vsel %vm2502_vm2, %v3539_v57, %v2551_v62 }
 0x224   :  { %v1896_v2 = vpop.f32.mrb[36].mxu1 }
 0x225   :  { %v2601_v4 = vsel %vm2503_vm3, %v3541_v63, %v2552_v1  ;;  %v3542_v5 = vadd.f32 %v4921_v41, %v1896_v2  ;;  %v2360_v6 = vpop.f32.mrb[36].mxu0  ;;  %v1898_v7 = vpop.f32.mrb[37].mxu1 }
 0x226   :  { %v3275_v8 = vpack.c.bf16 %v2601_v4, %v2600_v3  ;;  %v3444_v9 = vpop.f32.mrb[37].mxu0  ;;  %v1899_v10 = vpop.f32.mrb[38].mxu1 }
 0x227   :  { %v3543_v11 = vadd.f32 %v3542_v5, %v2360_v6  ;;  %v3544_v12 = vadd.f32 %v4921_v41, %v1899_v10  ;;  %v2363_v13 = vpop.f32.mrb[38].mxu0  ;;  %v1901_v14 = vpop.f32.mrb[39].mxu1 }
 0x228   :  { %3359 = vst [vmem:[%s5050_s3 + $0x40] sm:$0xff] %v3275_v8   ;;  %v3445_v15 = vpop.f32.mrb[39].mxu0 }
 0x229   :  { %v2553_v16 = vmul.f32 0.01, %v3543_v11  ;;  %v3545_v17 = vadd.f32 %v3544_v12, %v2363_v13  ;;  %vm2504_vm4 = vcmp.ge.f32.partialorder %v3543_v11, 0.0 }
 0x22b   :  { %vm2505_vm5 = vcmp.ge.f32.partialorder %v3545_v17, 0.0  ;;  %v2554_v18 = vmul.f32 0.01, %v3545_v17  ;;  %v2602_v20 = vsel %vm2504_vm4, %v3543_v11, %v2553_v16 }
 0x22c   :  { %v1904_v19 = vpop.f32.mrb[40].mxu1 }
 0x22d   :  { %v2603_v21 = vsel %vm2505_vm5, %v3545_v17, %v2554_v18  ;;  %v3546_v22 = vadd.f32 %v4921_v41, %v1904_v19  ;;  %v2368_v23 = vpop.f32.mrb[40].mxu0  ;;  %v1906_v24 = vpop.f32.mrb[41].mxu1 }
 0x22e   :  { %v3280_v25 = vpack.c.bf16 %v2603_v21, %v2602_v20  ;;  %v3448_v26 = vpop.f32.mrb[41].mxu0  ;;  %v1907_v27 = vpop.f32.mrb[42].mxu1 }
 0x22f   :  { %v3547_v28 = vadd.f32 %v3546_v22, %v2368_v23  ;;  %v3548_v0 = vadd.f32 %v4921_v41, %v1907_v27  ;;  %v2371_v29 = vpop.f32.mrb[42].mxu0  ;;  %v1909_v30 = vpop.f32.mrb[43].mxu1 }
 0x230   :  { %3360 = vst [vmem:[%s5050_s3 + $0x48] sm:$0xff] %v3280_v25   ;;  %v3449_v31 = vpop.f32.mrb[43].mxu0 }
 0x231   :  { %v2555_v32 = vmul.f32 0.01, %v3547_v28  ;;  %v3549_v33 = vadd.f32 %v3548_v0, %v2371_v29  ;;  %vm2506_vm6 = vcmp.ge.f32.partialorder %v3547_v28, 0.0 }
 0x233   :  { %vm2507_vm7 = vcmp.ge.f32.partialorder %v3549_v33, 0.0  ;;  %v2556_v34 = vmul.f32 0.01, %v3549_v33  ;;  %v2604_v36 = vsel %vm2506_vm6, %v3547_v28, %v2555_v32 }
 0x234   :  { %v1912_v35 = vpop.f32.mrb[44].mxu1 }
 0x235   :  { %v2605_v37 = vsel %vm2507_vm7, %v3549_v33, %v2556_v34  ;;  %v3550_v38 = vadd.f32 %v4921_v41, %v1912_v35  ;;  %v2376_v39 = vpop.f32.mrb[44].mxu0  ;;  %v1914_v42 = vpop.f32.mrb[45].mxu1 }
 0x236   :  { %v3285_v43 = vpack.c.bf16 %v2605_v37, %v2604_v36  ;;  %v3452_v44 = vpop.f32.mrb[45].mxu0  ;;  %v1915_v45 = vpop.f32.mrb[46].mxu1 }
 0x237   :  { %v3551_v46 = vadd.f32 %v3550_v38, %v2376_v39  ;;  %v3552_v40 = vadd.f32 %v4921_v41, %v1915_v45  ;;  %v2379_v47 = vpop.f32.mrb[46].mxu0  ;;  %v1917_v48 = vpop.f32.mrb[47].mxu1 }
 0x238   :  { %3361 = vst [vmem:[%s5050_s3 + $0x50] sm:$0xff] %v3285_v43   ;;  %v3453_v49 = vpop.f32.mrb[47].mxu0 }
 0x239   :  { %v2557_v50 = vmul.f32 0.01, %v3551_v46  ;;  %v3553_v51 = vadd.f32 %v3552_v40, %v2379_v47  ;;  %vm2508_vm8 = vcmp.ge.f32.partialorder %v3551_v46, 0.0 }
 0x23b   :  { %vm2509_vm9 = vcmp.ge.f32.partialorder %v3553_v51, 0.0  ;;  %v2558_v52 = vmul.f32 0.01, %v3553_v51  ;;  %v2606_v54 = vsel %vm2508_vm8, %v3551_v46, %v2557_v50 }
 0x23c   :  { %v1920_v53 = vpop.f32.mrb[48].mxu1 }
 0x23d   :  { %v2607_v55 = vsel %vm2509_vm9, %v3553_v51, %v2558_v52  ;;  %v3554_v56 = vadd.f32 %v4921_v41, %v1920_v53  ;;  %v2384_v57 = vpop.f32.mrb[48].mxu0  ;;  %v1922_v58 = vpop.f32.mrb[49].mxu1 }
 0x23e   :  { %v3290_v59 = vpack.c.bf16 %v2607_v55, %v2606_v54  ;;  %v3456_v60 = vpop.f32.mrb[49].mxu0  ;;  %v1923_v61 = vpop.f32.mrb[50].mxu1 }
 0x23f   :  { %v3555_v62 = vadd.f32 %v3554_v56, %v2384_v57  ;;  %v3556_v63 = vadd.f32 %v4921_v41, %v1923_v61  ;;  %v2387_v1 = vpop.f32.mrb[50].mxu0  ;;  %v1925_v2 = vpop.f32.mrb[51].mxu1 }
 0x240   :  { %3362 = vst [vmem:[%s5050_s3 + $0x58] sm:$0xff] %v3290_v59   ;;  %v3457_v3 = vpop.f32.mrb[51].mxu0 }
 0x241   :  { %v2559_v4 = vmul.f32 0.01, %v3555_v62  ;;  %v3557_v5 = vadd.f32 %v3556_v63, %v2387_v1  ;;  %vm2510_vm10 = vcmp.ge.f32.partialorder %v3555_v62, 0.0 }
 0x243   :  { %vm2511_vm11 = vcmp.ge.f32.partialorder %v3557_v5, 0.0  ;;  %v2560_v6 = vmul.f32 0.01, %v3557_v5  ;;  %v2608_v8 = vsel %vm2510_vm10, %v3555_v62, %v2559_v4 }
 0x244   :  { %v1928_v7 = vpop.f32.mrb[52].mxu1 }
 0x245   :  { %v2609_v9 = vsel %vm2511_vm11, %v3557_v5, %v2560_v6  ;;  %v3558_v10 = vadd.f32 %v4921_v41, %v1928_v7  ;;  %v2392_v11 = vpop.f32.mrb[52].mxu0  ;;  %v1930_v12 = vpop.f32.mrb[53].mxu1 }
 0x246   :  { %v3295_v13 = vpack.c.bf16 %v2609_v9, %v2608_v8  ;;  %v3460_v14 = vpop.f32.mrb[53].mxu0  ;;  %v1931_v15 = vpop.f32.mrb[54].mxu1 }
 0x247   :  { %v3559_v16 = vadd.f32 %v3558_v10, %v2392_v11  ;;  %v3560_v17 = vadd.f32 %v4921_v41, %v1931_v15  ;;  %v2395_v18 = vpop.f32.mrb[54].mxu0  ;;  %v1933_v19 = vpop.f32.mrb[55].mxu1 }
 0x248   :  { %3363 = vst [vmem:[%s5050_s3 + $0x60] sm:$0xff] %v3295_v13   ;;  %v3461_v20 = vpop.f32.mrb[55].mxu0 }
 0x249   :  { %v2561_v21 = vmul.f32 0.01, %v3559_v16  ;;  %v3561_v22 = vadd.f32 %v3560_v17, %v2395_v18  ;;  %vm2512_vm12 = vcmp.ge.f32.partialorder %v3559_v16, 0.0 }
 0x24b   :  { %vm2513_vm13 = vcmp.ge.f32.partialorder %v3561_v22, 0.0  ;;  %v2562_v23 = vmul.f32 0.01, %v3561_v22  ;;  %v2610_v25 = vsel %vm2512_vm12, %v3559_v16, %v2561_v21 }
 0x24c   :  { %v1936_v24 = vpop.f32.mrb[56].mxu1 }
 0x24d   :  { %v2611_v26 = vsel %vm2513_vm13, %v3561_v22, %v2562_v23  ;;  %v3562_v27 = vadd.f32 %v4921_v41, %v1936_v24  ;;  %v2400_v28 = vpop.f32.mrb[56].mxu0  ;;  %v1938_v0 = vpop.f32.mrb[57].mxu1 }
 0x24e   :  { %v3300_v29 = vpack.c.bf16 %v2611_v26, %v2610_v25  ;;  %v3464_v30 = vpop.f32.mrb[57].mxu0  ;;  %v1939_v31 = vpop.f32.mrb[58].mxu1 }
 0x24f   :  { %v3563_v32 = vadd.f32 %v3562_v27, %v2400_v28  ;;  %v3564_v33 = vadd.f32 %v4921_v41, %v1939_v31  ;;  %v2403_v34 = vpop.f32.mrb[58].mxu0  ;;  %v1941_v35 = vpop.f32.mrb[59].mxu1 }
 0x250   :  { %3364 = vst [vmem:[%s5050_s3 + $0x68] sm:$0xff] %v3300_v29   ;;  %v3465_v36 = vpop.f32.mrb[59].mxu0 }
 0x251   :  { %v2563_v37 = vmul.f32 0.01, %v3563_v32  ;;  %v3565_v38 = vadd.f32 %v3564_v33, %v2403_v34  ;;  %vm2514_vm14 = vcmp.ge.f32.partialorder %v3563_v32, 0.0 }
 0x253   :  { %vm2515_vm15 = vcmp.ge.f32.partialorder %v3565_v38, 0.0  ;;  %v2564_v39 = vmul.f32 0.01, %v3565_v38  ;;  %v2612_v43 = vsel %vm2514_vm14, %v3563_v32, %v2563_v37 }
 0x254   :  { %v1944_v42 = vpop.f32.mrb[60].mxu1 }
 0x255   :  { %v2613_v44 = vsel %vm2515_vm15, %v3565_v38, %v2564_v39  ;;  %v3566_v45 = vadd.f32 %v4921_v41, %v1944_v42  ;;  %v2408_v46 = vpop.f32.mrb[60].mxu0  ;;  %v1946_v40 = vpop.f32.mrb[61].mxu1 }
 0x256   :  { %v3305_v47 = vpack.c.bf16 %v2613_v44, %v2612_v43  ;;  %v3468_v48 = vpop.f32.mrb[61].mxu0  ;;  %v1947_v49 = vpop.f32.mrb[62].mxu1 }
 0x257   :  { %v3567_v50 = vadd.f32 %v3566_v45, %v2408_v46  ;;  %v3568_v51 = vadd.f32 %v4921_v41, %v1947_v49  ;;  %v2411_v52 = vpop.f32.mrb[62].mxu0  ;;  %v1949_v53 = vpop.f32.mrb[63].mxu1 }
 0x258   :  { %3365 = vst [vmem:[%s5050_s3 + $0x70] sm:$0xff] %v3305_v47   ;;  %v3469_v54 = vpop.f32.mrb[63].mxu0 }
 0x259   :  { %v2565_v55 = vmul.f32 0.01, %v3567_v50  ;;  %v3569_v56 = vadd.f32 %v3568_v51, %v2411_v52  ;;  %vm2516_vm0 = vcmp.ge.f32.partialorder %v3567_v50, 0.0 }
 0x25b   :  { %vm2517_vm1 = vcmp.ge.f32.partialorder %v3569_v56, 0.0  ;;  %v2566_v57 = vmul.f32 0.01, %v3569_v56  ;;  %v2614_v59 = vsel %vm2516_vm0, %v3567_v50, %v2565_v55 }
 0x25c   :  { %v1952_v58 = vpop.f32.mrb[64].mxu1 }
 0x25d   :  { %v2615_v60 = vsel %vm2517_vm1, %v3569_v56, %v2566_v57  ;;  %v3570_v61 = vadd.f32 %v4921_v41, %v1952_v58  ;;  %v2416_v62 = vpop.f32.mrb[64].mxu0  ;;  %v1954_v63 = vpop.f32.mrb[65].mxu1 }
 0x25e   :  { %v3310_v1 = vpack.c.bf16 %v2615_v60, %v2614_v59  ;;  %v3472_v2 = vpop.f32.mrb[65].mxu0  ;;  %v1955_v3 = vpop.f32.mrb[66].mxu1 }
 0x25f   :  { %v3571_v4 = vadd.f32 %v3570_v61, %v2416_v62  ;;  %v3572_v5 = vadd.f32 %v4921_v41, %v1955_v3  ;;  %v2419_v6 = vpop.f32.mrb[66].mxu0  ;;  %v1957_v7 = vpop.f32.mrb[67].mxu1 }
 0x260   :  { %3366 = vst [vmem:[%s5050_s3 + $0x78] sm:$0xff] %v3310_v1   ;;  %v3473_v8 = vpop.f32.mrb[67].mxu0 }
 0x261   :  { %v2567_v9 = vmul.f32 0.01, %v3571_v4  ;;  %v3573_v10 = vadd.f32 %v3572_v5, %v2419_v6  ;;  %vm2518_vm2 = vcmp.ge.f32.partialorder %v3571_v4, 0.0 }
 0x263   :  { %vm2519_vm3 = vcmp.ge.f32.partialorder %v3573_v10, 0.0  ;;  %v2568_v11 = vmul.f32 0.01, %v3573_v10  ;;  %v2616_v13 = vsel %vm2518_vm2, %v3571_v4, %v2567_v9 }
 0x264   :  { %v1960_v12 = vpop.f32.mrb[68].mxu1 }
 0x265   :  { %v2617_v14 = vsel %vm2519_vm3, %v3573_v10, %v2568_v11  ;;  %v3574_v15 = vadd.f32 %v4921_v41, %v1960_v12  ;;  %v2424_v16 = vpop.f32.mrb[68].mxu0  ;;  %v1962_v17 = vpop.f32.mrb[69].mxu1 }
 0x266   :  { %v3315_v18 = vpack.c.bf16 %v2617_v14, %v2616_v13  ;;  %v3476_v19 = vpop.f32.mrb[69].mxu0  ;;  %v1963_v20 = vpop.f32.mrb[70].mxu1 }
 0x267   :  { %v3575_v21 = vadd.f32 %v3574_v15, %v2424_v16  ;;  %v3576_v22 = vadd.f32 %v4921_v41, %v1963_v20  ;;  %v2427_v23 = vpop.f32.mrb[70].mxu0  ;;  %v1965_v24 = vpop.f32.mrb[71].mxu1 }
 0x268   :  { %3367 = vst [vmem:[%s5050_s3 + $0x80] sm:$0xff] %v3315_v18   ;;  %v3477_v25 = vpop.f32.mrb[71].mxu0 }
 0x269   :  { %v2569_v26 = vmul.f32 0.01, %v3575_v21  ;;  %v3577_v27 = vadd.f32 %v3576_v22, %v2427_v23  ;;  %vm2520_vm4 = vcmp.ge.f32.partialorder %v3575_v21, 0.0 }
 0x26b   :  { %vm2521_vm5 = vcmp.ge.f32.partialorder %v3577_v27, 0.0  ;;  %v2570_v28 = vmul.f32 0.01, %v3577_v27  ;;  %v2618_v29 = vsel %vm2520_vm4, %v3575_v21, %v2569_v26 }
 0x26c   :  { %v1968_v0 = vpop.f32.mrb[72].mxu1 }
 0x26d   :  { %v2619_v30 = vsel %vm2521_vm5, %v3577_v27, %v2570_v28  ;;  %v3578_v31 = vadd.f32 %v4921_v41, %v1968_v0  ;;  %v2432_v32 = vpop.f32.mrb[72].mxu0  ;;  %v1970_v33 = vpop.f32.mrb[73].mxu1 }
 0x26e   :  { %v3320_v34 = vpack.c.bf16 %v2619_v30, %v2618_v29  ;;  %v3480_v35 = vpop.f32.mrb[73].mxu0  ;;  %v1971_v36 = vpop.f32.mrb[74].mxu1 }
 0x26f   :  { %v3579_v37 = vadd.f32 %v3578_v31, %v2432_v32  ;;  %v3580_v38 = vadd.f32 %v4921_v41, %v1971_v36  ;;  %v2435_v39 = vpop.f32.mrb[74].mxu0  ;;  %v1973_v42 = vpop.f32.mrb[75].mxu1 }
 0x270   :  { %3368 = vst [vmem:[%s5050_s3 + $0x88] sm:$0xff] %v3320_v34   ;;  %v3481_v43 = vpop.f32.mrb[75].mxu0 }
 0x271   :  { %v2571_v44 = vmul.f32 0.01, %v3579_v37  ;;  %v3581_v45 = vadd.f32 %v3580_v38, %v2435_v39  ;;  %vm2522_vm6 = vcmp.ge.f32.partialorder %v3579_v37, 0.0 }
 0x273   :  { %vm2523_vm7 = vcmp.ge.f32.partialorder %v3581_v45, 0.0  ;;  %v2572_v46 = vmul.f32 0.01, %v3581_v45  ;;  %v2620_v47 = vsel %vm2522_vm6, %v3579_v37, %v2571_v44 }
 0x274   :  { %v1976_v40 = vpop.f32.mrb[76].mxu1 }
 0x275   :  { %v2621_v48 = vsel %vm2523_vm7, %v3581_v45, %v2572_v46  ;;  %v3582_v49 = vadd.f32 %v4921_v41, %v1976_v40  ;;  %v2440_v50 = vpop.f32.mrb[76].mxu0  ;;  %v1978_v51 = vpop.f32.mrb[77].mxu1 }
 0x276   :  { %v3325_v52 = vpack.c.bf16 %v2621_v48, %v2620_v47  ;;  %v3484_v53 = vpop.f32.mrb[77].mxu0  ;;  %v1979_v54 = vpop.f32.mrb[78].mxu1 }
 0x277   :  { %v3583_v55 = vadd.f32 %v3582_v49, %v2440_v50  ;;  %v3584_v56 = vadd.f32 %v4921_v41, %v1979_v54  ;;  %v2443_v57 = vpop.f32.mrb[78].mxu0  ;;  %v1981_v58 = vpop.f32.mrb[79].mxu1 }
 0x278   :  { %3369 = vst [vmem:[%s5050_s3 + $0x90] sm:$0xff] %v3325_v52   ;;  %v3485_v59 = vpop.f32.mrb[79].mxu0 }
 0x279   :  { %v2573_v60 = vmul.f32 0.01, %v3583_v55  ;;  %v3585_v61 = vadd.f32 %v3584_v56, %v2443_v57  ;;  %vm2524_vm8 = vcmp.ge.f32.partialorder %v3583_v55, 0.0 }
 0x27b   :  { %vm2525_vm9 = vcmp.ge.f32.partialorder %v3585_v61, 0.0  ;;  %v2574_v62 = vmul.f32 0.01, %v3585_v61  ;;  %v2622_v1 = vsel %vm2524_vm8, %v3583_v55, %v2573_v60 }
 0x27c   :  { %v1984_v63 = vpop.f32.mrb[80].mxu1 }
 0x27d   :  { %v2623_v2 = vsel %vm2525_vm9, %v3585_v61, %v2574_v62  ;;  %v3586_v3 = vadd.f32 %v4921_v41, %v1984_v63  ;;  %v2448_v4 = vpop.f32.mrb[80].mxu0  ;;  %v1986_v5 = vpop.f32.mrb[81].mxu1 }
 0x27e   :  { %v3330_v6 = vpack.c.bf16 %v2623_v2, %v2622_v1  ;;  %v3488_v7 = vpop.f32.mrb[81].mxu0  ;;  %v1987_v8 = vpop.f32.mrb[82].mxu1 }
 0x27f   :  { %v3587_v9 = vadd.f32 %v3586_v3, %v2448_v4  ;;  %v3588_v10 = vadd.f32 %v4921_v41, %v1987_v8  ;;  %v2451_v11 = vpop.f32.mrb[82].mxu0  ;;  %v1989_v12 = vpop.f32.mrb[83].mxu1 }
 0x280   :  { %3370 = vst [vmem:[%s5050_s3 + $0x98] sm:$0xff] %v3330_v6   ;;  %v3489_v13 = vpop.f32.mrb[83].mxu0 }
 0x281   :  { %v2575_v14 = vmul.f32 0.01, %v3587_v9  ;;  %v3589_v15 = vadd.f32 %v3588_v10, %v2451_v11  ;;  %vm2526_vm10 = vcmp.ge.f32.partialorder %v3587_v9, 0.0 }
 0x283   :  { %vm2527_vm11 = vcmp.ge.f32.partialorder %v3589_v15, 0.0  ;;  %v2576_v16 = vmul.f32 0.01, %v3589_v15  ;;  %v2624_v18 = vsel %vm2526_vm10, %v3587_v9, %v2575_v14 }
 0x284   :  { %v1992_v17 = vpop.f32.mrb[84].mxu1 }
 0x285   :  { %v2625_v19 = vsel %vm2527_vm11, %v3589_v15, %v2576_v16  ;;  %v3590_v20 = vadd.f32 %v4921_v41, %v1992_v17  ;;  %v2456_v21 = vpop.f32.mrb[84].mxu0  ;;  %v1994_v22 = vpop.f32.mrb[85].mxu1 }
 0x286   :  { %v3335_v23 = vpack.c.bf16 %v2625_v19, %v2624_v18  ;;  %v3492_v24 = vpop.f32.mrb[85].mxu0  ;;  %v1995_v25 = vpop.f32.mrb[86].mxu1 }
 0x287   :  { %v3591_v26 = vadd.f32 %v3590_v20, %v2456_v21  ;;  %v3592_v27 = vadd.f32 %v4921_v41, %v1995_v25  ;;  %v2459_v28 = vpop.f32.mrb[86].mxu0  ;;  %v1997_v0 = vpop.f32.mrb[87].mxu1 }
 0x288   :  { %3371 = vst [vmem:[%s5050_s3 + $0xa0] sm:$0xff] %v3335_v23   ;;  %v3493_v29 = vpop.f32.mrb[87].mxu0 }
 0x289   :  { %v2577_v30 = vmul.f32 0.01, %v3591_v26  ;;  %v3593_v31 = vadd.f32 %v3592_v27, %v2459_v28  ;;  %vm2528_vm12 = vcmp.ge.f32.partialorder %v3591_v26, 0.0 }
 0x28b   :  { %vm2529_vm13 = vcmp.ge.f32.partialorder %v3593_v31, 0.0  ;;  %v2578_v32 = vmul.f32 0.01, %v3593_v31  ;;  %v2626_v34 = vsel %vm2528_vm12, %v3591_v26, %v2577_v30 }
 0x28c   :  { %v2000_v33 = vpop.f32.mrb[88].mxu1 }
 0x28d   :  { %v2627_v35 = vsel %vm2529_vm13, %v3593_v31, %v2578_v32  ;;  %v3594_v36 = vadd.f32 %v4921_v41, %v2000_v33  ;;  %v2464_v37 = vpop.f32.mrb[88].mxu0  ;;  %v2002_v38 = vpop.f32.mrb[89].mxu1 }
 0x28e   :  { %v3340_v39 = vpack.c.bf16 %v2627_v35, %v2626_v34  ;;  %v3496_v42 = vpop.f32.mrb[89].mxu0  ;;  %v2003_v43 = vpop.f32.mrb[90].mxu1 }
 0x28f   :  { %v3595_v44 = vadd.f32 %v3594_v36, %v2464_v37  ;;  %v3596_v45 = vadd.f32 %v4921_v41, %v2003_v43  ;;  %v2467_v46 = vpop.f32.mrb[90].mxu0  ;;  %v2005_v40 = vpop.f32.mrb[91].mxu1 }
 0x290   :  { %3372 = vst [vmem:[%s5050_s3 + $0xa8] sm:$0xff] %v3340_v39   ;;  %v3497_v47 = vpop.f32.mrb[91].mxu0 }
 0x291   :  { %v2579_v48 = vmul.f32 0.01, %v3595_v44  ;;  %v3597_v49 = vadd.f32 %v3596_v45, %v2467_v46  ;;  %vm2530_vm14 = vcmp.ge.f32.partialorder %v3595_v44, 0.0 }
 0x293   :  { %vm2531_vm15 = vcmp.ge.f32.partialorder %v3597_v49, 0.0  ;;  %v2580_v50 = vmul.f32 0.01, %v3597_v49  ;;  %v2628_v52 = vsel %vm2530_vm14, %v3595_v44, %v2579_v48 }
 0x294   :  { %v2008_v51 = vpop.f32.mrb[92].mxu1 }
 0x295   :  { %v2629_v53 = vsel %vm2531_vm15, %v3597_v49, %v2580_v50  ;;  %v3598_v54 = vadd.f32 %v4921_v41, %v2008_v51  ;;  %v2472_v55 = vpop.f32.mrb[92].mxu0  ;;  %v2010_v56 = vpop.f32.mrb[93].mxu1 }
 0x296   :  { %v3345_v57 = vpack.c.bf16 %v2629_v53, %v2628_v52  ;;  %v3500_v58 = vpop.f32.mrb[93].mxu0  ;;  %v2011_v59 = vpop.f32.mrb[94].mxu1 }
 0x297   :  { %v3599_v60 = vadd.f32 %v3598_v54, %v2472_v55  ;;  %v3600_v61 = vadd.f32 %v4921_v41, %v2011_v59  ;;  %v2475_v62 = vpop.f32.mrb[94].mxu0  ;;  %v2013_v63 = vpop.f32.mrb[95].mxu1 }
 0x298   :  { %3373 = vst [vmem:[%s5050_s3 + $0xb0] sm:$0xff] %v3345_v57   ;;  %v3501_v1 = vpop.f32.mrb[95].mxu0 }
 0x299   :  { %v2581_v2 = vmul.f32 0.01, %v3599_v60  ;;  %v3601_v3 = vadd.f32 %v3600_v61, %v2475_v62  ;;  %vm2532_vm0 = vcmp.ge.f32.partialorder %v3599_v60, 0.0 }
 0x29b   :  { %vm2533_vm1 = vcmp.ge.f32.partialorder %v3601_v3, 0.0  ;;  %v2582_v4 = vmul.f32 0.01, %v3601_v3  ;;  %v2630_v6 = vsel %vm2532_vm0, %v3599_v60, %v2581_v2 }
 0x29c   :  { %v2016_v5 = vpop.f32.mrb[96].mxu1 }
 0x29d   :  { %v2631_v7 = vsel %vm2533_vm1, %v3601_v3, %v2582_v4  ;;  %v3602_v8 = vadd.f32 %v4921_v41, %v2016_v5  ;;  %v2480_v9 = vpop.f32.mrb[96].mxu0  ;;  %v2018_v10 = vpop.f32.mrb[97].mxu1 }
 0x29e   :  { %v3350_v11 = vpack.c.bf16 %v2631_v7, %v2630_v6  ;;  %v3504_v12 = vpop.f32.mrb[97].mxu0  ;;  %v2019_v13 = vpop.f32.mrb[98].mxu1 }
 0x29f   :  { %v3603_v14 = vadd.f32 %v3602_v8, %v2480_v9  ;;  %v2483_v15 = vpop.f32.mrb[98].mxu0  ;;  %v2020_v16 = vpop.f32.mrb[99].mxu1 }
 0x2a0   :  { %3374 = vst [vmem:[%s5050_s3 + $0xb8] sm:$0xff] %v3350_v11   ;;  %v3505_v17 = vpop.f32.mrb[99].mxu0 }
 0x2a1   :  { %vm2534_vm2 = vcmp.ge.f32.partialorder %v3603_v14, 0.0  ;;  %v2583_v18 = vmul.f32 0.01, %v3603_v14 }
 0x2a3   :  { %v2632_v19 = vsel %vm2534_vm2, %v3603_v14, %v2583_v18 }
 0x2a4   :  { %v3231_v20 = vpack.c.bf16 %v2632_v19, %v2632_v19 }
 0x2a6   :  { %2878 = vst [vmem:[%s5050_s3 + $0xc0] sm:$0xf] %v3231_v20 }

// kernel: cnn_forward.9
= control target key start
LH: loop header
LB: loop body
LE: loop exit
PB: predicated region body
PF: predicated region fallthrough
CT: control target
= control target key end

     0   :  { %v1596_v32 = vlaneseq  ;;  %v14547_v33 = vmov 1966171168   ;;  %s19787_s0 = inlined_call_operand.vmem [shape: bf16[2,3136], index: 0, kind: input, shape index: {}]   ;;  %s19788_s1 = inlined_call_operand.vmem [shape: bf16[3136,1024], index: 1, kind: input, shape index: {}]   ;;  %s19789_s2 = inlined_call_operand.vmem [shape: f32[1,1024], index: 2, kind: input, shape index: {}]   ;;  %s19790_s3 = inlined_call_operand.vmem [shape: bf16[1024,128], index: 3, kind: input, shape index: {}]   ;;  %s19791_s4 = inlined_call_operand.vmem [shape: f32[1,128], index: 4, kind: input, shape index: {}]   ;;  %s19792_s5 = inlined_call_operand.hbm [shape: f32[2,128], index: 5, kind: output, shape index: {}]  }
   0x1   :  { %v26_v0 = vld [vmem:[%s19788_s1] sm:$0xff]  ;;  %v27_v2 = vld [vmem:[%s19788_s1 + $0x8] sm:$0xff]  ;;  %v1642_v34 = vunpack.c.l.s4 %v14547_v33 }
   0x2   :  { %v30_v1 = vld [vmem:[%s19788_s1 + $0x20] sm:$0xff]  ;;  %v31_v4 = vld [vmem:[%s19788_s1 + $0x28] sm:$0xff]  ;;  %v14646_v43 = vshrl.u32 %v1596_v32, 7 }
   0x3   :  { %v12529_v3 = vcombine.high %v26_v0, %v30_v1  ;;  %v12528_v5 = vcombine.low %v26_v0, %v30_v1  ;;  %v34_v6 = vld [vmem:[%s19788_s1 + $0x40] sm:$0xff]  ;;  %v12531_v8 = vcombine.high %v27_v2, %v31_v4  ;;  %v12530_v9 = vcombine.low %v27_v2, %v31_v4  ;;  %v35_v11 = vld [vmem:[%s19788_s1 + $0x48] sm:$0xff] }
   0x4   :  { %v38_v7 = vld [vmem:[%s19788_s1 + $0x60] sm:$0xff]  ;;  %v39_v12 = vld [vmem:[%s19788_s1 + $0x68] sm:$0xff]  ;;  %v1643_v44 = vunpack.c.0.s8 %v1642_v34 }
   0x5   :  { %v12537_v10 = vcombine.high %v34_v6, %v38_v7  ;;  %v42_v13 = vld [vmem:[%s19788_s1 + $0x80] sm:$0xff]  ;;  %9669 = vmatprep.subr.bf16.mxu0 %v12529_v3  ;;  %v12539_v14 = vcombine.high %v35_v11, %v39_v12  ;;  %v43_v16 = vld [vmem:[%s19788_s1 + $0x88] sm:$0xff]  ;;  %10202 = vmatprep.subr.bf16.mxu1 %v12531_v8  ;;  %v12536_v18 = vcombine.low %v34_v6, %v38_v7 }
   0x6   :  { %v46_v15 = vld [vmem:[%s19788_s1 + $0xa0] sm:$0xff]  ;;  %v47_v17 = vld [vmem:[%s19788_s1 + $0xa8] sm:$0xff]  ;;  %9670 = vmatpush1.bf16.msra.mxu0 %v12528_v5  ;;  %10203 = vmatpush1.bf16.msra.mxu1 %v12530_v9  ;;  %v12538_v19 = vcombine.low %v35_v11, %v39_v12  ;;  %v14661_v53 = vsub.s32 %v1643_v44, %v14646_v43 }
   0x7   :  { %9671 = vmatprep.subr.bf16.mxu0 %v12537_v10  ;;  %v12545_v20 = vcombine.high %v42_v13, %v46_v15  ;;  %10204 = vmatprep.subr.bf16.mxu1 %v12539_v14  ;;  %v12547_v21 = vcombine.high %v43_v16, %v47_v17  ;;  %v50_v22 = vld [vmem:[%s19788_s1 + $0xc0] sm:$0xff]  ;;  %v51_v24 = vld [vmem:[%s19788_s1 + $0xc8] sm:$0xff]  ;;  %v12544_v26 = vcombine.low %v42_v13, %v46_v15 }
   0x8   :  { %v54_v23 = vld [vmem:[%s19788_s1 + $0xe0] sm:$0xff]  ;;  %v55_v25 = vld [vmem:[%s19788_s1 + $0xe8] sm:$0xff]  ;;  %v12546_v27 = vcombine.low %v43_v16, %v47_v17 }
   0x9   :  { %v12553_v28 = vcombine.high %v50_v22, %v54_v23  ;;  %v12555_v29 = vcombine.high %v51_v24, %v55_v25  ;;  %v58_v30 = vld [vmem:[%s19788_s1 + $0x100] sm:$0xff]  ;;  %v59_v35 = vld [vmem:[%s19788_s1 + $0x108] sm:$0xff]  ;;  %v12552_v37 = vcombine.low %v50_v22, %v54_v23  ;;  %v12554_v38 = vcombine.low %v51_v24, %v55_v25 }
   0xa   :  { %9672 = vmatpush1.bf16.msra.mxu0 %v12536_v18  ;;  %10205 = vmatpush1.bf16.msra.mxu1 %v12538_v19  ;;  %v62_v31 = vld [vmem:[%s19788_s1 + $0x120] sm:$0xff]  ;;  %v63_v36 = vld [vmem:[%s19788_s1 + $0x128] sm:$0xff] }
   0xb   :  { %9673 = vmatprep.subr.bf16.mxu0 %v12545_v20  ;;  %10206 = vmatprep.subr.bf16.mxu1 %v12547_v21  ;;  %v12561_v39 = vcombine.high %v58_v30, %v62_v31  ;;  %v12563_v40 = vcombine.high %v59_v35, %v63_v36  ;;  %v66_v41 = vld [vmem:[%s19788_s1 + $0x140] sm:$0xff]  ;;  %v67_v45 = vld [vmem:[%s19788_s1 + $0x148] sm:$0xff]  ;;  %v12560_v47 = vcombine.low %v58_v30, %v62_v31 }
   0xc   :  { %v70_v42 = vld [vmem:[%s19788_s1 + $0x160] sm:$0xff]  ;;  %v71_v46 = vld [vmem:[%s19788_s1 + $0x168] sm:$0xff]  ;;  %v12562_v48 = vcombine.low %v59_v35, %v63_v36 }
   0xd   :  { %v12569_v49 = vcombine.high %v66_v41, %v70_v42  ;;  %v12571_v50 = vcombine.high %v67_v45, %v71_v46  ;;  %v74_v51 = vld [vmem:[%s19788_s1 + $0x180] sm:$0xff]  ;;  %v75_v54 = vld [vmem:[%s19788_s1 + $0x188] sm:$0xff]  ;;  %v12568_v56 = vcombine.low %v66_v41, %v70_v42  ;;  %v12570_v57 = vcombine.low %v67_v45, %v71_v46 }
   0xe   :  { %9674 = vmatpush1.bf16.msra.mxu0 %v12544_v26  ;;  %10207 = vmatpush1.bf16.msra.mxu1 %v12546_v27  ;;  %v78_v52 = vld [vmem:[%s19788_s1 + $0x1a0] sm:$0xff]  ;;  %v79_v55 = vld [vmem:[%s19788_s1 + $0x1a8] sm:$0xff] }
   0xf   :  { %9675 = vmatprep.subr.bf16.mxu0 %v12553_v28  ;;  %10208 = vmatprep.subr.bf16.mxu1 %v12555_v29  ;;  %v12577_v58 = vcombine.high %v74_v51, %v78_v52  ;;  %v14672_v59 = vld [vmem:[%s19787_s0] sm:$0xff]  ;;  %v12579_v60 = vcombine.high %v75_v54, %v79_v55  ;;  %v83_v0 = vld [vmem:[%s19788_s1 + $0x1c8] sm:$0xff]  ;;  %v12576_v2 = vcombine.low %v74_v51, %v78_v52 }
  0x10   :  { %v82_v61 = vld [vmem:[%s19788_s1 + $0x1c0] sm:$0xff]  ;;  %v14682_v63 = vrot.slane %v14672_v59, %v14661_v53  ;;  %v87_v1 = vld [vmem:[%s19788_s1 + $0x1e8] sm:$0xff]  ;;  %v12578_v4 = vcombine.low %v75_v54, %v79_v55 }
  0x11   :  { %v86_v62 = vld [vmem:[%s19788_s1 + $0x1e0] sm:$0xff]  ;;  %v12587_v6 = vcombine.high %v83_v0, %v87_v1  ;;  %v91_v10 = vld [vmem:[%s19788_s1 + $0x208] sm:$0xff]  ;;  %v12586_v13 = vcombine.low %v83_v0, %v87_v1 }
  0x12   :  { %9676 = vmatpush1.bf16.msra.mxu0 %v12552_v37  ;;  %10209 = vmatpush1.bf16.msra.mxu1 %v12554_v38  ;;  %v1655_v3 = vcombine.high %v14682_v63, %v14682_v63  ;;  %v12585_v5 = vcombine.high %v82_v61, %v86_v62  ;;  %v90_v7 = vld [vmem:[%s19788_s1 + $0x200] sm:$0xff]  ;;  %v95_v11 = vld [vmem:[%s19788_s1 + $0x228] sm:$0xff]  ;;  %v12584_v12 = vcombine.low %v82_v61, %v86_v62 }
  0x13   :  { %9677 = vmatprep.subr.bf16.mxu0 %v12561_v39  ;;  %10210 = vmatprep.subr.bf16.mxu1 %v12563_v40  ;;  %v94_v8 = vld [vmem:[%s19788_s1 + $0x220] sm:$0xff]  ;;  %v12595_v15 = vcombine.high %v91_v10, %v95_v11  ;;  %v99_v18 = vld [vmem:[%s19788_s1 + $0x248] sm:$0xff]  ;;  %v12594_v21 = vcombine.low %v91_v10, %v95_v11 }
  0x14   :  { %v14699_v9 = vrot.slane %v1655_v3, %v14661_v53  ;;  %v12593_v14 = vcombine.high %v90_v7, %v94_v8  ;;  %v98_v16 = vld [vmem:[%s19788_s1 + $0x240] sm:$0xff]  ;;  %v103_v19 = vld [vmem:[%s19788_s1 + $0x268] sm:$0xff]  ;;  %v12592_v20 = vcombine.low %v90_v7, %v94_v8 }
  0x15   :  { %v102_v17 = vld [vmem:[%s19788_s1 + $0x260] sm:$0xff]  ;;  %v12603_v23 = vcombine.high %v99_v18, %v103_v19  ;;  %v107_v26 = vld [vmem:[%s19788_s1 + $0x288] sm:$0xff]  ;;  %v12602_v29 = vcombine.low %v99_v18, %v103_v19 }
  0x16   :  { %9678 = vmatpush1.bf16.msra.mxu0 %v12560_v47  ;;  %10211 = vmatpush1.bf16.msra.mxu1 %v12562_v48  ;;  %v12601_v22 = vcombine.high %v98_v16, %v102_v17  ;;  %v106_v24 = vld [vmem:[%s19788_s1 + $0x280] sm:$0xff]  ;;  %v111_v27 = vld [vmem:[%s19788_s1 + $0x2a8] sm:$0xff]  ;;  %v12600_v28 = vcombine.low %v98_v16, %v102_v17 }
  0x17   :  { %9679 = vmatprep.subr.bf16.mxu0 %v12569_v49  ;;  %10212 = vmatprep.subr.bf16.mxu1 %v12571_v50  ;;  %v110_v25 = vld [vmem:[%s19788_s1 + $0x2a0] sm:$0xff]  ;;  %v12611_v31 = vcombine.high %v107_v26, %v111_v27  ;;  %v115_v34 = vld [vmem:[%s19788_s1 + $0x2c8] sm:$0xff]  ;;  %v12610_v37 = vcombine.low %v107_v26, %v111_v27 }
  0x18   :  { %9701 = vmatprep.mubr.bf16.mxu0 %v14699_v9  ;;  %10234 = vmatprep.mubr.bf16.mxu1 %v14699_v9  ;;  %v12609_v30 = vcombine.high %v106_v24, %v110_v25  ;;  %v114_v32 = vld [vmem:[%s19788_s1 + $0x2c0] sm:$0xff]  ;;  %v119_v35 = vld [vmem:[%s19788_s1 + $0x2e8] sm:$0xff]  ;;  %v12608_v36 = vcombine.low %v106_v24, %v110_v25 }
  0x19   :  { %v118_v33 = vld [vmem:[%s19788_s1 + $0x2e0] sm:$0xff]  ;;  %v12619_v39 = vcombine.high %v115_v34, %v119_v35  ;;  %v123_v42 = vld [vmem:[%s19788_s1 + $0x308] sm:$0xff]  ;;  %v12618_v46 = vcombine.low %v115_v34, %v119_v35 }
  0x1a   :  { %9680 = vmatpush1.bf16.msra.mxu0 %v12568_v56  ;;  %10213 = vmatpush1.bf16.msra.mxu1 %v12570_v57  ;;  %v12617_v38 = vcombine.high %v114_v32, %v118_v33  ;;  %v122_v40 = vld [vmem:[%s19788_s1 + $0x300] sm:$0xff]  ;;  %v127_v44 = vld [vmem:[%s19788_s1 + $0x328] sm:$0xff]  ;;  %v12616_v45 = vcombine.low %v114_v32, %v118_v33  ;;  %v14835_v33 = vcombine.high %v14699_v9, %v14699_v9 }
  0x1b   :  { %9681 = vmatprep.subr.bf16.mxu0 %v12577_v58  ;;  %10214 = vmatprep.subr.bf16.mxu1 %v12579_v60  ;;  %v126_v41 = vld [vmem:[%s19788_s1 + $0x320] sm:$0xff]  ;;  %v12627_v48 = vcombine.high %v123_v42, %v127_v44  ;;  %v131_v51 = vld [vmem:[%s19788_s1 + $0x348] sm:$0xff]  ;;  %v12626_v55 = vcombine.low %v123_v42, %v127_v44 }
  0x1c   :  { %v12625_v47 = vcombine.high %v122_v40, %v126_v41  ;;  %v130_v49 = vld [vmem:[%s19788_s1 + $0x340] sm:$0xff]  ;;  %v135_v52 = vld [vmem:[%s19788_s1 + $0x368] sm:$0xff]  ;;  %v12624_v54 = vcombine.low %v122_v40, %v126_v41 }
  0x1d   :  { %v134_v50 = vld [vmem:[%s19788_s1 + $0x360] sm:$0xff]  ;;  %v12635_v57 = vcombine.high %v131_v51, %v135_v52  ;;  %v139_v61 = vld [vmem:[%s19788_s1 + $0x388] sm:$0xff]  ;;  %v12634_v1 = vcombine.low %v131_v51, %v135_v52 }
  0x1e   :  { %9682 = vmatpush1.bf16.msra.mxu0 %v12576_v2  ;;  %10215 = vmatpush1.bf16.msra.mxu1 %v12578_v4  ;;  %v12633_v56 = vcombine.high %v130_v49, %v134_v50  ;;  %v138_v58 = vld [vmem:[%s19788_s1 + $0x380] sm:$0xff]  ;;  %v143_v62 = vld [vmem:[%s19788_s1 + $0x3a8] sm:$0xff]  ;;  %v12632_v0 = vcombine.low %v130_v49, %v134_v50 }
  0x1f   :  { %9683 = vmatprep.subr.bf16.mxu0 %v12585_v5  ;;  %10216 = vmatprep.subr.bf16.mxu1 %v12587_v6  ;;  %v142_v60 = vld [vmem:[%s19788_s1 + $0x3a0] sm:$0xff]  ;;  %v12643_v3 = vcombine.high %v139_v61, %v143_v62  ;;  %v147_v6 = vld [vmem:[%s19788_s1 + $0x3c8] sm:$0xff]  ;;  %v12642_v10 = vcombine.low %v139_v61, %v143_v62 }
  0x20   :  { %v12641_v2 = vcombine.high %v138_v58, %v142_v60  ;;  %v146_v4 = vld [vmem:[%s19788_s1 + $0x3c0] sm:$0xff]  ;;  %v151_v7 = vld [vmem:[%s19788_s1 + $0x3e8] sm:$0xff]  ;;  %v12640_v8 = vcombine.low %v138_v58, %v142_v60 }
  0x21   :  { %v150_v5 = vld [vmem:[%s19788_s1 + $0x3e0] sm:$0xff]  ;;  %v159_v16 = vld [vmem:[%s19788_s1 + $0x428] sm:$0xff]  ;;  %v12650_v18 = vcombine.low %v147_v6, %v151_v7 }
  0x22   :  { %9684 = vmatpush1.bf16.msra.mxu0 %v12584_v12  ;;  %10217 = vmatpush1.bf16.msra.mxu1 %v12586_v13  ;;  %v12649_v11 = vcombine.high %v146_v4, %v150_v5  ;;  %v12651_v12 = vcombine.high %v147_v6, %v151_v7  ;;  %v154_v13 = vld [vmem:[%s19788_s1 + $0x400] sm:$0xff]  ;;  %v12648_v17 = vcombine.low %v146_v4, %v150_v5  ;;  %v163_v24 = vld [vmem:[%s19788_s1 + $0x448] sm:$0xff] }
  0x23   :  { %9685 = vmatprep.subr.bf16.mxu0 %v12593_v14  ;;  %10218 = vmatprep.subr.bf16.mxu1 %v12595_v15  ;;  %v158_v14 = vld [vmem:[%s19788_s1 + $0x420] sm:$0xff]  ;;  %v155_v15 = vld [vmem:[%s19788_s1 + $0x408] sm:$0xff] }
  0x24   :  { %v12657_v19 = vcombine.high %v154_v13, %v158_v14  ;;  %v167_v25 = vld [vmem:[%s19788_s1 + $0x468] sm:$0xff]  ;;  %v12656_v26 = vcombine.low %v154_v13, %v158_v14  ;;  %v12658_v27 = vcombine.low %v155_v15, %v159_v16 }
  0x25   :  { %v175_v32 = vld [vmem:[%s19788_s1 + $0x4a8] sm:$0xff]  ;;  %v12666_v35 = vcombine.low %v163_v24, %v167_v25 }
  0x26   :  { %9686 = vmatpush1.bf16.msra.mxu0 %v12592_v20  ;;  %10219 = vmatpush1.bf16.msra.mxu1 %v12594_v21  ;;  %v12659_v20 = vcombine.high %v155_v15, %v159_v16  ;;  %v162_v21 = vld [vmem:[%s19788_s1 + $0x440] sm:$0xff]  ;;  %v183_v41 = vld [vmem:[%s19788_s1 + $0x4e8] sm:$0xff] }
  0x27   :  { %9687 = vmatprep.subr.bf16.mxu0 %v12601_v22  ;;  %10220 = vmatprep.subr.bf16.mxu1 %v12603_v23  ;;  %v166_v22 = vld [vmem:[%s19788_s1 + $0x460] sm:$0xff]  ;;  %v14813_v23 = vrot.slane %v14682_v63, %v14661_v53  ;;  %v191_v50 = vld [vmem:[%s19788_s1 + $0x528] sm:$0xff] }
  0x28   :  { %v174_v63 = vld [vmem:[%s19788_s1 + $0x4a0] sm:$0xff]  ;;  %v12664_v34 = vcombine.low %v162_v21, %v166_v22  ;;  %v199_v60 = vld [vmem:[%s19788_s1 + $0x568] sm:$0xff] }
  0x29   :  { %v207_v5 = vld [vmem:[%s19788_s1 + $0x5a8] sm:$0xff] }
  0x2a   :  { %9688 = vmatpush1.bf16.msra.mxu0 %v12600_v28  ;;  %10221 = vmatpush1.bf16.msra.mxu1 %v12602_v29  ;;  %v12665_v28 = vcombine.high %v162_v21, %v166_v22  ;;  %v170_v29 = vld [vmem:[%s19788_s1 + $0x480] sm:$0xff]  ;;  %v215_v14 = vld [vmem:[%s19788_s1 + $0x5e8] sm:$0xff] }
  0x2b   :  { %9689 = vmatprep.subr.bf16.mxu0 %v12609_v30  ;;  %10222 = vmatprep.subr.bf16.mxu1 %v12611_v31  ;;  %v171_v30 = vld [vmem:[%s19788_s1 + $0x488] sm:$0xff]  ;;  %v12667_v31 = vcombine.high %v163_v24, %v167_v25  ;;  %v12672_v42 = vcombine.low %v170_v29, %v174_v63 }
  0x2c   :  { %v12675_v40 = vcombine.high %v171_v30, %v175_v32  ;;  %v12674_v44 = vcombine.low %v171_v30, %v175_v32  ;;  %v223_v22 = vld [vmem:[%s19788_s1 + $0x628] sm:$0xff] }
  0x2d   :  { %v231_v30 = vld [vmem:[%s19788_s1 + $0x668] sm:$0xff] }
  0x2e   :  { %9690 = vmatpush1.bf16.msra.mxu0 %v12608_v36  ;;  %10223 = vmatpush1.bf16.msra.mxu1 %v12610_v37  ;;  %v12673_v36 = vcombine.high %v170_v29, %v174_v63  ;;  %v178_v37 = vld [vmem:[%s19788_s1 + $0x4c0] sm:$0xff]  ;;  %v227_v29 = vld [vmem:[%s19788_s1 + $0x648] sm:$0xff] }
  0x2f   :  { %9691 = vmatprep.subr.bf16.mxu0 %v12617_v38  ;;  %10224 = vmatprep.subr.bf16.mxu1 %v12619_v39  ;;  %v182_v38 = vld [vmem:[%s19788_s1 + $0x4e0] sm:$0xff]  ;;  %v179_v39 = vld [vmem:[%s19788_s1 + $0x4c8] sm:$0xff] }
  0x30   :  { %v12683_v49 = vcombine.high %v179_v39, %v183_v41  ;;  %v12680_v51 = vcombine.low %v178_v37, %v182_v38  ;;  %v12682_v52 = vcombine.low %v179_v39, %v183_v41  ;;  %v239_v39 = vld [vmem:[%s19788_s1 + $0x6a8] sm:$0xff]  ;;  %v12730_v41 = vcombine.low %v227_v29, %v231_v30 }
  0x32   :  { %9692 = vmatpush1.bf16.msra.mxu0 %v12616_v45  ;;  %10225 = vmatpush1.bf16.msra.mxu1 %v12618_v46  ;;  %v12681_v45 = vcombine.high %v178_v37, %v182_v38  ;;  %v186_v46 = vld [vmem:[%s19788_s1 + $0x500] sm:$0xff]  ;;  %v235_v37 = vld [vmem:[%s19788_s1 + $0x688] sm:$0xff]  ;;  %v12731_v38 = vcombine.high %v227_v29, %v231_v30 }
  0x33   :  { %9693 = vmatprep.subr.bf16.mxu0 %v12625_v47  ;;  %10226 = vmatprep.subr.bf16.mxu1 %v12627_v48  ;;  %v190_v47 = vld [vmem:[%s19788_s1 + $0x520] sm:$0xff]  ;;  %v187_v48 = vld [vmem:[%s19788_s1 + $0x508] sm:$0xff] }
  0x34   :  { %v12691_v58 = vcombine.high %v187_v48, %v191_v50  ;;  %v12688_v61 = vcombine.low %v186_v46, %v190_v47  ;;  %v12690_v62 = vcombine.low %v187_v48, %v191_v50  ;;  %v247_v48 = vld [vmem:[%s19788_s1 + $0x6e8] sm:$0xff]  ;;  %v12738_v50 = vcombine.low %v235_v37, %v239_v39 }
  0x35   :  { %v287_v29 = vld [vmem:[%s19788_s1 + $0x828] sm:$0xff] }
  0x36   :  { %9694 = vmatpush1.bf16.msra.mxu0 %v12624_v54  ;;  %10227 = vmatpush1.bf16.msra.mxu1 %v12626_v55  ;;  %v12689_v54 = vcombine.high %v186_v46, %v190_v47  ;;  %v194_v55 = vld [vmem:[%s19788_s1 + $0x540] sm:$0xff]  ;;  %v243_v46 = vld [vmem:[%s19788_s1 + $0x6c8] sm:$0xff]  ;;  %v12739_v47 = vcombine.high %v235_v37, %v239_v39 }
  0x37   :  { %9695 = vmatprep.subr.bf16.mxu0 %v12633_v56  ;;  %10228 = vmatprep.subr.bf16.mxu1 %v12635_v57  ;;  %v198_v56 = vld [vmem:[%s19788_s1 + $0x560] sm:$0xff]  ;;  %v195_v57 = vld [vmem:[%s19788_s1 + $0x548] sm:$0xff] }
  0x38   :  { %v12699_v4 = vcombine.high %v195_v57, %v199_v60  ;;  %v12696_v6 = vcombine.low %v194_v55, %v198_v56  ;;  %v12698_v7 = vcombine.low %v195_v57, %v199_v60  ;;  %v255_v57 = vld [vmem:[%s19788_s1 + $0x728] sm:$0xff]  ;;  %v12746_v60 = vcombine.low %v243_v46, %v247_v48 }
  0x3a   :  { %9696 = vmatpush1.bf16.msra.mxu0 %v12632_v0  ;;  %10229 = vmatpush1.bf16.msra.mxu1 %v12634_v1  ;;  %v12697_v0 = vcombine.high %v194_v55, %v198_v56  ;;  %v202_v1 = vld [vmem:[%s19788_s1 + $0x580] sm:$0xff]  ;;  %v251_v55 = vld [vmem:[%s19788_s1 + $0x708] sm:$0xff]  ;;  %v12747_v56 = vcombine.high %v243_v46, %v247_v48 }
  0x3b   :  { %9697 = vmatprep.subr.bf16.mxu0 %v12641_v2  ;;  %10230 = vmatprep.subr.bf16.mxu1 %v12643_v3  ;;  %v206_v2 = vld [vmem:[%s19788_s1 + $0x5a0] sm:$0xff]  ;;  %v203_v3 = vld [vmem:[%s19788_s1 + $0x588] sm:$0xff] }
  0x3c   :  { %v12707_v13 = vcombine.high %v203_v3, %v207_v5  ;;  %v12704_v15 = vcombine.low %v202_v1, %v206_v2  ;;  %v12706_v16 = vcombine.low %v203_v3, %v207_v5  ;;  %v263_v3 = vld [vmem:[%s19788_s1 + $0x768] sm:$0xff]  ;;  %v12754_v5 = vcombine.low %v251_v55, %v255_v57 }
  0x3e   :  { %9698 = vmatpush1.bf16.msra.mxu0 %v12640_v8  ;;  %10231 = vmatpush1.bf16.msra.mxu1 %v12642_v10  ;;  %v12705_v8 = vcombine.high %v202_v1, %v206_v2  ;;  %v210_v10 = vld [vmem:[%s19788_s1 + $0x5c0] sm:$0xff]  ;;  %v259_v1 = vld [vmem:[%s19788_s1 + $0x748] sm:$0xff]  ;;  %v12755_v2 = vcombine.high %v251_v55, %v255_v57 }
  0x3f   :  { %9699 = vmatprep.subr.bf16.mxu0 %v12649_v11  ;;  %10232 = vmatprep.subr.bf16.mxu1 %v12651_v12  ;;  %v214_v11 = vld [vmem:[%s19788_s1 + $0x5e0] sm:$0xff]  ;;  %v211_v12 = vld [vmem:[%s19788_s1 + $0x5c8] sm:$0xff] }
  0x40   :  { %v12715_v21 = vcombine.high %v211_v12, %v215_v14  ;;  %v12712_v24 = vcombine.low %v210_v10, %v214_v11  ;;  %v12714_v25 = vcombine.low %v211_v12, %v215_v14  ;;  %v271_v12 = vld [vmem:[%s19788_s1 + $0x7a8] sm:$0xff]  ;;  %v12762_v14 = vcombine.low %v259_v1, %v263_v3 }
  0x42   :  { %9700 = vmatpush1.bf16.msra.mxu0 %v12648_v17  ;;  %10233 = vmatpush1.bf16.msra.mxu1 %v12650_v18  ;;  %v12713_v17 = vcombine.high %v210_v10, %v214_v11  ;;  %v218_v18 = vld [vmem:[%s19788_s1 + $0x600] sm:$0xff]  ;;  %v267_v10 = vld [vmem:[%s19788_s1 + $0x788] sm:$0xff]  ;;  %v12763_v11 = vcombine.high %v259_v1, %v263_v3 }
  0x43   :  { %9710 = vmatprep.subr.bf16.mxu0 %v12657_v19  ;;  %10243 = vmatprep.subr.bf16.mxu1 %v12659_v20  ;;  %v222_v19 = vld [vmem:[%s19788_s1 + $0x620] sm:$0xff]  ;;  %v219_v20 = vld [vmem:[%s19788_s1 + $0x608] sm:$0xff] }
  0x44   :  { %v12723_v63 = vcombine.high %v219_v20, %v223_v22  ;;  %v12722_v32 = vcombine.low %v219_v20, %v223_v22  ;;  %v279_v20 = vld [vmem:[%s19788_s1 + $0x7e8] sm:$0xff] }
  0x45   :  { %9702 = vmatmul.mubr.bf16.vlgmr.msra.gmra.mrb[0].mxu0 %v14813_v23  ;;  %10235 = vmatmul.mubr.bf16.vlgmr.msra.gmra.mrb[0].mxu1 %v14813_v23 }
  0x46   :  { %9711 = vmatpush1.bf16.msra.mxu0 %v12656_v26  ;;  %10244 = vmatpush1.bf16.msra.mxu1 %v12658_v27  ;;  %v12721_v26 = vcombine.high %v218_v18, %v222_v19  ;;  %v226_v27 = vld [vmem:[%s19788_s1 + $0x640] sm:$0xff] }
  0x47   :  { %9712 = vmatprep.subr.bf16.mxu0 %v12665_v28  ;;  %10245 = vmatprep.subr.bf16.mxu1 %v12667_v31  ;;  %v230_v28 = vld [vmem:[%s19788_s1 + $0x660] sm:$0xff]  ;;  %v12720_v31 = vcombine.low %v218_v18, %v222_v19  ;;  %v275_v18 = vld [vmem:[%s19788_s1 + $0x7c8] sm:$0xff]  ;;  %v12771_v19 = vcombine.high %v267_v10, %v271_v12 }
  0x48   :  { %9742 = vmatprep.mubr.bf16.mxu0 %v14835_v33  ;;  %10275 = vmatprep.mubr.bf16.mxu1 %v14835_v33 }
  0x4a   :  { %9713 = vmatpush1.bf16.msra.mxu0 %v12664_v34  ;;  %10246 = vmatpush1.bf16.msra.mxu1 %v12666_v35  ;;  %v12729_v34 = vcombine.high %v226_v27, %v230_v28  ;;  %v234_v35 = vld [vmem:[%s19788_s1 + $0x680] sm:$0xff] }
  0x4b   :  { %9714 = vmatprep.subr.bf16.mxu0 %v12673_v36  ;;  %10247 = vmatprep.subr.bf16.mxu1 %v12675_v40  ;;  %v238_v36 = vld [vmem:[%s19788_s1 + $0x6a0] sm:$0xff]  ;;  %v12728_v40 = vcombine.low %v226_v27, %v230_v28  ;;  %v283_v28 = vld [vmem:[%s19788_s1 + $0x808] sm:$0xff] }
  0x4c   :  { %v286_v27 = vld [vmem:[%s19788_s1 + $0x820] sm:$0xff]  ;;  %v12787_v37 = vcombine.high %v283_v28, %v287_v29 }
  0x4e   :  { %9715 = vmatpush1.bf16.msra.mxu0 %v12672_v42  ;;  %10248 = vmatpush1.bf16.msra.mxu1 %v12674_v44  ;;  %v12737_v42 = vcombine.high %v234_v35, %v238_v36  ;;  %v242_v44 = vld [vmem:[%s19788_s1 + $0x6c0] sm:$0xff] }
  0x4f   :  { %9716 = vmatprep.subr.bf16.mxu0 %v12681_v45  ;;  %10249 = vmatprep.subr.bf16.mxu1 %v12683_v49  ;;  %v246_v45 = vld [vmem:[%s19788_s1 + $0x6e0] sm:$0xff]  ;;  %v12736_v49 = vcombine.low %v234_v35, %v238_v36  ;;  %v291_v36 = vld [vmem:[%s19788_s1 + $0x848] sm:$0xff] }
  0x50   :  { %v294_v35 = vld [vmem:[%s19788_s1 + $0x860] sm:$0xff] }
  0x52   :  { %9717 = vmatpush1.bf16.msra.mxu0 %v12680_v51  ;;  %10250 = vmatpush1.bf16.msra.mxu1 %v12682_v52  ;;  %v12745_v51 = vcombine.high %v242_v44, %v246_v45  ;;  %v250_v52 = vld [vmem:[%s19788_s1 + $0x700] sm:$0xff] }
  0x53   :  { %9718 = vmatprep.subr.bf16.mxu0 %v12689_v54  ;;  %10251 = vmatprep.subr.bf16.mxu1 %v12691_v58  ;;  %v254_v54 = vld [vmem:[%s19788_s1 + $0x720] sm:$0xff]  ;;  %v12744_v58 = vcombine.low %v242_v44, %v246_v45 }
  0x56   :  { %9719 = vmatpush1.bf16.msra.mxu0 %v12688_v61  ;;  %10252 = vmatpush1.bf16.msra.mxu1 %v12690_v62  ;;  %v12753_v61 = vcombine.high %v250_v52, %v254_v54  ;;  %v258_v62 = vld [vmem:[%s19788_s1 + $0x740] sm:$0xff] }
  0x57   :  { %9720 = vmatprep.subr.bf16.mxu0 %v12697_v0  ;;  %10253 = vmatprep.subr.bf16.mxu1 %v12699_v4  ;;  %v262_v0 = vld [vmem:[%s19788_s1 + $0x760] sm:$0xff]  ;;  %v12752_v4 = vcombine.low %v250_v52, %v254_v54 }
  0x5a   :  { %9721 = vmatpush1.bf16.msra.mxu0 %v12696_v6  ;;  %10254 = vmatpush1.bf16.msra.mxu1 %v12698_v7  ;;  %v12761_v6 = vcombine.high %v258_v62, %v262_v0  ;;  %v266_v7 = vld [vmem:[%s19788_s1 + $0x780] sm:$0xff] }
  0x5b   :  { %9722 = vmatprep.subr.bf16.mxu0 %v12705_v8  ;;  %10255 = vmatprep.subr.bf16.mxu1 %v12707_v13  ;;  %v270_v8 = vld [vmem:[%s19788_s1 + $0x7a0] sm:$0xff]  ;;  %v12760_v13 = vcombine.low %v258_v62, %v262_v0 }
  0x5c   :  { %v12768_v22 = vcombine.low %v266_v7, %v270_v8 }
  0x5e   :  { %9723 = vmatpush1.bf16.msra.mxu0 %v12704_v15  ;;  %10256 = vmatpush1.bf16.msra.mxu1 %v12706_v16  ;;  %v12769_v15 = vcombine.high %v266_v7, %v270_v8  ;;  %v274_v16 = vld [vmem:[%s19788_s1 + $0x7c0] sm:$0xff] }
  0x5f   :  { %9724 = vmatprep.subr.bf16.mxu0 %v12713_v17  ;;  %10257 = vmatprep.subr.bf16.mxu1 %v12715_v21  ;;  %v278_v17 = vld [vmem:[%s19788_s1 + $0x7e0] sm:$0xff]  ;;  %v1640_v21 = vcombine.high %v14672_v59, %v14672_v59  ;;  %v12779_v59 = vcombine.high %v275_v18, %v279_v20 }
  0x60   :  { %v12776_v30 = vcombine.low %v274_v16, %v278_v17 }
  0x62   :  { %9725 = vmatpush1.bf16.msra.mxu0 %v12712_v24  ;;  %10258 = vmatpush1.bf16.msra.mxu1 %v12714_v25  ;;  %v12770_v24 = vcombine.low %v267_v10, %v271_v12  ;;  %v12777_v25 = vcombine.high %v274_v16, %v278_v17 }
  0x63   :  { %9726 = vmatprep.subr.bf16.mxu0 %v12721_v26  ;;  %10259 = vmatprep.subr.bf16.mxu1 %v12723_v63  ;;  %v282_v26 = vld [vmem:[%s19788_s1 + $0x800] sm:$0xff]  ;;  %v15012_v63 = vrot.slane %v1640_v21, %v14661_v53 }
  0x65   :  { %v1656_v39 = vcombine.high %v15012_v63, %v15012_v63 }
  0x66   :  { %9727 = vmatpush1.bf16.msra.mxu0 %v12720_v31  ;;  %10260 = vmatpush1.bf16.msra.mxu1 %v12722_v32  ;;  %v12778_v31 = vcombine.low %v275_v18, %v279_v20  ;;  %v12785_v32 = vcombine.high %v282_v26, %v286_v27 }
  0x67   :  { %9728 = vmatprep.subr.bf16.mxu0 %v12729_v34  ;;  %10261 = vmatprep.subr.bf16.mxu1 %v12731_v38  ;;  %v290_v34 = vld [vmem:[%s19788_s1 + $0x840] sm:$0xff]  ;;  %v295_v38 = vld [vmem:[%s19788_s1 + $0x868] sm:$0xff] }
  0x6a   :  { %9729 = vmatpush1.bf16.msra.mxu0 %v12728_v40  ;;  %10262 = vmatpush1.bf16.msra.mxu1 %v12730_v41  ;;  %v15030_v40 = vcombine.high %v14813_v23, %v14813_v23  ;;  %v12784_v41 = vcombine.low %v282_v26, %v286_v27 }
  0x6b   :  { %9730 = vmatprep.subr.bf16.mxu0 %v12737_v42  ;;  %10263 = vmatprep.subr.bf16.mxu1 %v12739_v47 }
  0x6e   :  { %9731 = vmatpush1.bf16.msra.mxu0 %v12736_v49  ;;  %10264 = vmatpush1.bf16.msra.mxu1 %v12738_v50 }
  0x6f   :  { %9732 = vmatprep.subr.bf16.mxu0 %v12745_v51  ;;  %10265 = vmatprep.subr.bf16.mxu1 %v12747_v56 }
  0x72   :  { %9733 = vmatpush1.bf16.msra.mxu0 %v12744_v58  ;;  %10266 = vmatpush1.bf16.msra.mxu1 %v12746_v60 }
  0x73   :  { %9734 = vmatprep.subr.bf16.mxu0 %v12753_v61  ;;  %10267 = vmatprep.subr.bf16.mxu1 %v12755_v2 }
  0x76   :  { %9735 = vmatpush1.bf16.msra.mxu0 %v12752_v4  ;;  %10268 = vmatpush1.bf16.msra.mxu1 %v12754_v5 }
  0x77   :  { %9736 = vmatprep.subr.bf16.mxu0 %v12761_v6  ;;  %10269 = vmatprep.subr.bf16.mxu1 %v12763_v11 }
  0x7a   :  { %9737 = vmatpush1.bf16.msra.mxu0 %v12760_v13  ;;  %10270 = vmatpush1.bf16.msra.mxu1 %v12762_v14 }
  0x7b   :  { %9738 = vmatprep.subr.bf16.mxu0 %v12769_v15  ;;  %10271 = vmatprep.subr.bf16.mxu1 %v12771_v19 }
  0x7e   :  { %9739 = vmatpush1.bf16.msra.mxu0 %v12768_v22  ;;  %10272 = vmatpush1.bf16.msra.mxu1 %v12770_v24 }
  0x7f   :  { %9740 = vmatprep.subr.bf16.mxu0 %v12777_v25  ;;  %10273 = vmatprep.subr.bf16.mxu1 %v12779_v59 }
  0x82   :  { %9741 = vmatpush1.bf16.msra.mxu0 %v12776_v30 }
  0x83   :  { %10 = vsyncpa [#allocation3], 0  ;;  %10274 = vmatpush1.bf16.msra.mxu1 %v12778_v31  ;;  %9751 = vmatprep.subr.bf16.mxu0 %v12785_v32  ;;  %v12786_v42 = vcombine.low %v283_v28, %v287_v29  ;;  %v12793_v44 = vcombine.high %v290_v34, %v294_v35  ;;  %v12795_v45 = vcombine.high %v291_v36, %v295_v38  ;;  %v298_v46 = vld [vmem:[%s19788_s1 + $0x880] sm:$0xff]  ;;  %v299_v49 = vld [vmem:[%s19788_s1 + $0x888] sm:$0xff]  ;;  %vm9665_vm0 = vcmask 523264  }
  0x84   :  { %10284 = vmatprep.subr.bf16.mxu1 %v12787_v37  ;;  %v302_v47 = vld [vmem:[%s19788_s1 + $0x8a0] sm:$0xff]  ;;  %v15039_v48 = vrot.slane %v1656_v39, %v14661_v53  ;;  %v303_v50 = vld [vmem:[%s19788_s1 + $0x8a8] sm:$0xff]  ;;  %v12792_v51 = vcombine.low %v290_v34, %v294_v35  ;;  %v12794_v52 = vcombine.low %v291_v36, %v295_v38 }
  0x85   :  { %9743 = vmatmul.mubr.bf16.vlgmr.msra.gmra.mrb[0].mxu0 %v15030_v40  ;;  %v12801_v54 = vcombine.high %v298_v46, %v302_v47  ;;  %v12803_v55 = vcombine.high %v299_v49, %v303_v50  ;;  %v306_v56 = vld [vmem:[%s19788_s1 + $0x8c0] sm:$0xff]  ;;  %v307_v58 = vld [vmem:[%s19788_s1 + $0x8c8] sm:$0xff]  ;;  %v12800_v61 = vcombine.low %v298_v46, %v302_v47  ;;  %v12802_v62 = vcombine.low %v299_v49, %v303_v50 }
  0x86   :  { %9752 = vmatpush1.bf16.msra.mxu0 %v12784_v41  ;;  %10276 = vmatmul.mubr.bf16.vlgmr.msra.gmra.mrb[0].mxu1 %v15030_v40  ;;  %v310_v57 = vld [vmem:[%s19788_s1 + $0x8e0] sm:$0xff]  ;;  %v311_v60 = vld [vmem:[%s19788_s1 + $0x8e8] sm:$0xff] }
  0x87   :  { %10285 = vmatpush1.bf16.msra.mxu1 %v12786_v42  ;;  %9753 = vmatprep.subr.bf16.mxu0 %v12793_v44  ;;  %v12809_v0 = vcombine.high %v306_v56, %v310_v57  ;;  %v12811_v1 = vcombine.high %v307_v58, %v311_v60  ;;  %v314_v2 = vld [vmem:[%s19788_s1 + $0x900] sm:$0xff]  ;;  %v315_v4 = vld [vmem:[%s19788_s1 + $0x908] sm:$0xff]  ;;  %v12808_v6 = vcombine.low %v306_v56, %v310_v57 }
  0x88   :  { %10286 = vmatprep.subr.bf16.mxu1 %v12795_v45  ;;  %9783 = vmatprep.mubr.bf16.mxu0 %v15039_v48  ;;  %v318_v3 = vld [vmem:[%s19788_s1 + $0x920] sm:$0xff]  ;;  %v319_v5 = vld [vmem:[%s19788_s1 + $0x928] sm:$0xff]  ;;  %v12810_v7 = vcombine.low %v307_v58, %v311_v60 }
  0x89   :  { %10316 = vmatprep.mubr.bf16.mxu1 %v15039_v48  ;;  %v12817_v8 = vcombine.high %v314_v2, %v318_v3  ;;  %v12819_v10 = vcombine.high %v315_v4, %v319_v5  ;;  %v322_v11 = vld [vmem:[%s19788_s1 + $0x940] sm:$0xff]  ;;  %v323_v13 = vld [vmem:[%s19788_s1 + $0x948] sm:$0xff]  ;;  %v12816_v15 = vcombine.low %v314_v2, %v318_v3  ;;  %v12818_v16 = vcombine.low %v315_v4, %v319_v5 }
  0x8a   :  { %9754 = vmatpush1.bf16.msra.mxu0 %v12792_v51  ;;  %v326_v12 = vld [vmem:[%s19788_s1 + $0x960] sm:$0xff]  ;;  %v327_v14 = vld [vmem:[%s19788_s1 + $0x968] sm:$0xff] }
  0x8b   :  { %10287 = vmatpush1.bf16.msra.mxu1 %v12794_v52  ;;  %9755 = vmatprep.subr.bf16.mxu0 %v12801_v54  ;;  %v12825_v17 = vcombine.high %v322_v11, %v326_v12  ;;  %v12827_v18 = vcombine.high %v323_v13, %v327_v14  ;;  %v330_v19 = vld [vmem:[%s19788_s1 + $0x980] sm:$0xff]  ;;  %v331_v21 = vld [vmem:[%s19788_s1 + $0x988] sm:$0xff]  ;;  %v12824_v24 = vcombine.low %v322_v11, %v326_v12 }
  0x8c   :  { %10288 = vmatprep.subr.bf16.mxu1 %v12803_v55  ;;  %v334_v20 = vld [vmem:[%s19788_s1 + $0x9a0] sm:$0xff]  ;;  %v335_v22 = vld [vmem:[%s19788_s1 + $0x9a8] sm:$0xff]  ;;  %v12826_v25 = vcombine.low %v323_v13, %v327_v14 }
  0x8d   :  { %v12833_v26 = vcombine.high %v330_v19, %v334_v20  ;;  %v12835_v27 = vcombine.high %v331_v21, %v335_v22  ;;  %v338_v28 = vld [vmem:[%s19788_s1 + $0x9c0] sm:$0xff]  ;;  %v339_v29 = vld [vmem:[%s19788_s1 + $0x9c8] sm:$0xff]  ;;  %v12832_v31 = vcombine.low %v330_v19, %v334_v20  ;;  %v12834_v32 = vcombine.low %v331_v21, %v335_v22 }
  0x8e   :  { %9756 = vmatpush1.bf16.msra.mxu0 %v12800_v61  ;;  %v342_v59 = vld [vmem:[%s19788_s1 + $0x9e0] sm:$0xff]  ;;  %v343_v30 = vld [vmem:[%s19788_s1 + $0x9e8] sm:$0xff] }
  0x8f   :  { %10289 = vmatpush1.bf16.msra.mxu1 %v12802_v62  ;;  %9757 = vmatprep.subr.bf16.mxu0 %v12809_v0  ;;  %v12841_v34 = vcombine.high %v338_v28, %v342_v59  ;;  %v12843_v35 = vcombine.high %v339_v29, %v343_v30  ;;  %v346_v36 = vld [vmem:[%s19788_s1 + $0xa00] sm:$0xff]  ;;  %v347_v38 = vld [vmem:[%s19788_s1 + $0xa08] sm:$0xff]  ;;  %v12840_v41 = vcombine.low %v338_v28, %v342_v59 }
  0x90   :  { %10290 = vmatprep.subr.bf16.mxu1 %v12811_v1  ;;  %v350_v37 = vld [vmem:[%s19788_s1 + $0xa20] sm:$0xff]  ;;  %v351_v39 = vld [vmem:[%s19788_s1 + $0xa28] sm:$0xff]  ;;  %v12842_v42 = vcombine.low %v339_v29, %v343_v30 }
  0x91   :  { %v12849_v44 = vcombine.high %v346_v36, %v350_v37  ;;  %v12851_v45 = vcombine.high %v347_v38, %v351_v39  ;;  %v354_v46 = vld [vmem:[%s19788_s1 + $0xa40] sm:$0xff]  ;;  %v355_v49 = vld [vmem:[%s19788_s1 + $0xa48] sm:$0xff]  ;;  %v12848_v51 = vcombine.low %v346_v36, %v350_v37  ;;  %v12850_v52 = vcombine.low %v347_v38, %v351_v39 }
  0x92   :  { %9758 = vmatpush1.bf16.msra.mxu0 %v12808_v6  ;;  %v358_v47 = vld [vmem:[%s19788_s1 + $0xa60] sm:$0xff]  ;;  %v359_v50 = vld [vmem:[%s19788_s1 + $0xa68] sm:$0xff] }
  0x93   :  { %10291 = vmatpush1.bf16.msra.mxu1 %v12810_v7  ;;  %9759 = vmatprep.subr.bf16.mxu0 %v12817_v8  ;;  %v12857_v54 = vcombine.high %v354_v46, %v358_v47  ;;  %v12859_v55 = vcombine.high %v355_v49, %v359_v50  ;;  %v362_v56 = vld [vmem:[%s19788_s1 + $0xa80] sm:$0xff]  ;;  %v363_v58 = vld [vmem:[%s19788_s1 + $0xa88] sm:$0xff]  ;;  %v12856_v61 = vcombine.low %v354_v46, %v358_v47 }
  0x94   :  { %10292 = vmatprep.subr.bf16.mxu1 %v12819_v10  ;;  %v366_v57 = vld [vmem:[%s19788_s1 + $0xaa0] sm:$0xff]  ;;  %v367_v60 = vld [vmem:[%s19788_s1 + $0xaa8] sm:$0xff]  ;;  %v12858_v62 = vcombine.low %v355_v49, %v359_v50 }
  0x95   :  { %v12865_v0 = vcombine.high %v362_v56, %v366_v57  ;;  %v12867_v1 = vcombine.high %v363_v58, %v367_v60  ;;  %v370_v2 = vld [vmem:[%s19788_s1 + $0xac0] sm:$0xff]  ;;  %v371_v4 = vld [vmem:[%s19788_s1 + $0xac8] sm:$0xff]  ;;  %v12864_v6 = vcombine.low %v362_v56, %v366_v57  ;;  %v12866_v7 = vcombine.low %v363_v58, %v367_v60 }
  0x96   :  { %9760 = vmatpush1.bf16.msra.mxu0 %v12816_v15  ;;  %v374_v3 = vld [vmem:[%s19788_s1 + $0xae0] sm:$0xff]  ;;  %v375_v5 = vld [vmem:[%s19788_s1 + $0xae8] sm:$0xff]  ;;  %v15227_v58 = vrot.slane %v15012_v63, %v14661_v53 }
  0x97   :  { %10293 = vmatpush1.bf16.msra.mxu1 %v12818_v16  ;;  %9761 = vmatprep.subr.bf16.mxu0 %v12825_v17  ;;  %v12873_v8 = vcombine.high %v370_v2, %v374_v3  ;;  %v12875_v10 = vcombine.high %v371_v4, %v375_v5  ;;  %v378_v11 = vld [vmem:[%s19788_s1 + $0xb00] sm:$0xff]  ;;  %v379_v13 = vld [vmem:[%s19788_s1 + $0xb08] sm:$0xff]  ;;  %v12872_v15 = vcombine.low %v370_v2, %v374_v3 }
  0x98   :  { %10294 = vmatprep.subr.bf16.mxu1 %v12827_v18  ;;  %v382_v12 = vld [vmem:[%s19788_s1 + $0xb20] sm:$0xff]  ;;  %v383_v14 = vld [vmem:[%s19788_s1 + $0xb28] sm:$0xff]  ;;  %v12874_v16 = vcombine.low %v371_v4, %v375_v5  ;;  %v15243_v4 = vcombine.high %v15039_v48, %v15039_v48 }
  0x99   :  { %v12881_v17 = vcombine.high %v378_v11, %v382_v12  ;;  %v12883_v18 = vcombine.high %v379_v13, %v383_v14  ;;  %v386_v19 = vld [vmem:[%s19788_s1 + $0xb40] sm:$0xff]  ;;  %v387_v21 = vld [vmem:[%s19788_s1 + $0xb48] sm:$0xff] }
  0x9a   :  { %9762 = vmatpush1.bf16.msra.mxu0 %v12824_v24  ;;  %v390_v20 = vld [vmem:[%s19788_s1 + $0xb60] sm:$0xff]  ;;  %v391_v22 = vld [vmem:[%s19788_s1 + $0xb68] sm:$0xff]  ;;  %v12880_v24 = vcombine.low %v378_v11, %v382_v12 }
  0x9b   :  { %10295 = vmatpush1.bf16.msra.mxu1 %v12826_v25  ;;  %9763 = vmatprep.subr.bf16.mxu0 %v12833_v26  ;;  %v12882_v25 = vcombine.low %v379_v13, %v383_v14  ;;  %v12889_v26 = vcombine.high %v386_v19, %v390_v20  ;;  %v394_v28 = vld [vmem:[%s19788_s1 + $0xb80] sm:$0xff]  ;;  %v395_v29 = vld [vmem:[%s19788_s1 + $0xb88] sm:$0xff] }
  0x9c   :  { %10296 = vmatprep.subr.bf16.mxu1 %v12835_v27  ;;  %v12891_v27 = vcombine.high %v387_v21, %v391_v22  ;;  %v398_v59 = vld [vmem:[%s19788_s1 + $0xba0] sm:$0xff]  ;;  %v399_v30 = vld [vmem:[%s19788_s1 + $0xba8] sm:$0xff] }
  0x9d   :  { %v402_v36 = vld [vmem:[%s19788_s1 + $0xbc0] sm:$0xff]  ;;  %v403_v38 = vld [vmem:[%s19788_s1 + $0xbc8] sm:$0xff] }
  0x9e   :  { %9764 = vmatpush1.bf16.msra.mxu0 %v12832_v31  ;;  %v12888_v31 = vcombine.low %v386_v19, %v390_v20  ;;  %v406_v37 = vld [vmem:[%s19788_s1 + $0xbe0] sm:$0xff]  ;;  %v407_v39 = vld [vmem:[%s19788_s1 + $0xbe8] sm:$0xff] }
  0x9f   :  { %10297 = vmatpush1.bf16.msra.mxu1 %v12834_v32  ;;  %9765 = vmatprep.subr.bf16.mxu0 %v12841_v34  ;;  %v12890_v32 = vcombine.low %v387_v21, %v391_v22  ;;  %v12897_v34 = vcombine.high %v394_v28, %v398_v59  ;;  %v410_v46 = vld [vmem:[%s19788_s1 + $0xc00] sm:$0xff]  ;;  %v411_v49 = vld [vmem:[%s19788_s1 + $0xc08] sm:$0xff] }
  0xa0   :  { %10298 = vmatprep.subr.bf16.mxu1 %v12843_v35  ;;  %v12899_v35 = vcombine.high %v395_v29, %v399_v30  ;;  %v414_v47 = vld [vmem:[%s19788_s1 + $0xc20] sm:$0xff]  ;;  %v415_v50 = vld [vmem:[%s19788_s1 + $0xc28] sm:$0xff] }
  0xa1   :  { %v418_v56 = vld [vmem:[%s19788_s1 + $0xc40] sm:$0xff]  ;;  %v419_v60 = vld [vmem:[%s19788_s1 + $0xc48] sm:$0xff] }
  0xa2   :  { %9766 = vmatpush1.bf16.msra.mxu0 %v12840_v41  ;;  %v12896_v41 = vcombine.low %v394_v28, %v398_v59  ;;  %v422_v57 = vld [vmem:[%s19788_s1 + $0xc60] sm:$0xff]  ;;  %v427_v5 = vld [vmem:[%s19788_s1 + $0xc88] sm:$0xff] }
  0xa3   :  { %10299 = vmatpush1.bf16.msra.mxu1 %v12842_v42  ;;  %9767 = vmatprep.subr.bf16.mxu0 %v12849_v44  ;;  %v12898_v42 = vcombine.low %v395_v29, %v399_v30  ;;  %v12905_v44 = vcombine.high %v402_v36, %v406_v37  ;;  %v426_v63 = vld [vmem:[%s19788_s1 + $0xc80] sm:$0xff]  ;;  %v435_v14 = vld [vmem:[%s19788_s1 + $0xcc8] sm:$0xff] }
  0xa4   :  { %10300 = vmatprep.subr.bf16.mxu1 %v12851_v45  ;;  %v12907_v45 = vcombine.high %v403_v38, %v407_v39  ;;  %v430_v3 = vld [vmem:[%s19788_s1 + $0xca0] sm:$0xff]  ;;  %v443_v22 = vld [vmem:[%s19788_s1 + $0xd08] sm:$0xff] }
  0xa5   :  { %v434_v12 = vld [vmem:[%s19788_s1 + $0xcc0] sm:$0xff]  ;;  %v451_v30 = vld [vmem:[%s19788_s1 + $0xd48] sm:$0xff] }
  0xa6   :  { %9768 = vmatpush1.bf16.msra.mxu0 %v12848_v51  ;;  %v12904_v51 = vcombine.low %v402_v36, %v406_v37  ;;  %v438_v13 = vld [vmem:[%s19788_s1 + $0xce0] sm:$0xff] }
  0xa7   :  { %10301 = vmatpush1.bf16.msra.mxu1 %v12850_v52  ;;  %9769 = vmatprep.subr.bf16.mxu0 %v12857_v54  ;;  %v12906_v52 = vcombine.low %v403_v38, %v407_v39  ;;  %v12913_v54 = vcombine.high %v410_v46, %v414_v47  ;;  %v442_v20 = vld [vmem:[%s19788_s1 + $0xd00] sm:$0xff]  ;;  %v459_v39 = vld [vmem:[%s19788_s1 + $0xd88] sm:$0xff] }
  0xa8   :  { %10302 = vmatprep.subr.bf16.mxu1 %v12859_v55  ;;  %v12915_v55 = vcombine.high %v411_v49, %v415_v50  ;;  %v446_v21 = vld [vmem:[%s19788_s1 + $0xd20] sm:$0xff] }
  0xa9   :  { %v450_v59 = vld [vmem:[%s19788_s1 + $0xd40] sm:$0xff] }
  0xaa   :  { %9770 = vmatpush1.bf16.msra.mxu0 %v12856_v61  ;;  %v423_v61 = vld [vmem:[%s19788_s1 + $0xc68] sm:$0xff]  ;;  %v454_v29 = vld [vmem:[%s19788_s1 + $0xd60] sm:$0xff] }
  0xab   :  { %10303 = vmatpush1.bf16.msra.mxu1 %v12858_v62  ;;  %9771 = vmatprep.subr.bf16.mxu0 %v12865_v0  ;;  %v12912_v62 = vcombine.low %v410_v46, %v414_v47  ;;  %v12914_v0 = vcombine.low %v411_v49, %v415_v50  ;;  %v12923_v2 = vcombine.high %v419_v60, %v423_v61  ;;  %v458_v37 = vld [vmem:[%s19788_s1 + $0xd80] sm:$0xff]  ;;  %v467_v50 = vld [vmem:[%s19788_s1 + $0xdc8] sm:$0xff] }
  0xac   :  { %10304 = vmatprep.subr.bf16.mxu1 %v12867_v1  ;;  %v12921_v1 = vcombine.high %v418_v56, %v422_v57  ;;  %v462_v38 = vld [vmem:[%s19788_s1 + $0xda0] sm:$0xff] }
  0xad   :  { %v466_v47 = vld [vmem:[%s19788_s1 + $0xdc0] sm:$0xff] }
  0xae   :  { %9772 = vmatpush1.bf16.msra.mxu0 %v12864_v6  ;;  %v431_v6 = vld [vmem:[%s19788_s1 + $0xca8] sm:$0xff]  ;;  %v470_v49 = vld [vmem:[%s19788_s1 + $0xde0] sm:$0xff] }
  0xaf   :  { %10305 = vmatpush1.bf16.msra.mxu1 %v12866_v7  ;;  %9773 = vmatprep.subr.bf16.mxu0 %v12873_v8  ;;  %v12920_v7 = vcombine.low %v418_v56, %v422_v57  ;;  %v12922_v8 = vcombine.low %v419_v60, %v423_v61  ;;  %v12931_v11 = vcombine.high %v427_v5, %v431_v6  ;;  %v474_v57 = vld [vmem:[%s19788_s1 + $0xe00] sm:$0xff]  ;;  %v475_v61 = vld [vmem:[%s19788_s1 + $0xe08] sm:$0xff] }
  0xb0   :  { %10306 = vmatprep.subr.bf16.mxu1 %v12875_v10  ;;  %v12929_v10 = vcombine.high %v426_v63, %v430_v3  ;;  %v478_v60 = vld [vmem:[%s19788_s1 + $0xe20] sm:$0xff] }
  0xb2   :  { %9774 = vmatpush1.bf16.msra.mxu0 %v12872_v15  ;;  %v439_v15 = vld [vmem:[%s19788_s1 + $0xce8] sm:$0xff] }
  0xb3   :  { %10307 = vmatpush1.bf16.msra.mxu1 %v12874_v16  ;;  %9775 = vmatprep.subr.bf16.mxu0 %v12881_v17  ;;  %v12928_v16 = vcombine.low %v426_v63, %v430_v3  ;;  %v12930_v17 = vcombine.low %v427_v5, %v431_v6  ;;  %v12939_v19 = vcombine.high %v435_v14, %v439_v15  ;;  %v482_v3 = vld [vmem:[%s19788_s1 + $0xe40] sm:$0xff]  ;;  %v483_v6 = vld [vmem:[%s19788_s1 + $0xe48] sm:$0xff] }
  0xb4   :  { %10308 = vmatprep.subr.bf16.mxu1 %v12883_v18  ;;  %v12937_v18 = vcombine.high %v434_v12, %v438_v13  ;;  %v486_v5 = vld [vmem:[%s19788_s1 + $0xe60] sm:$0xff] }
  0xb6   :  { %9776 = vmatpush1.bf16.msra.mxu0 %v12880_v24  ;;  %v447_v24 = vld [vmem:[%s19788_s1 + $0xd28] sm:$0xff] }
  0xb7   :  { %10309 = vmatpush1.bf16.msra.mxu1 %v12882_v25  ;;  %9777 = vmatprep.subr.bf16.mxu0 %v12889_v26  ;;  %v12936_v25 = vcombine.low %v434_v12, %v438_v13  ;;  %v12938_v26 = vcombine.low %v435_v14, %v439_v15  ;;  %v12947_v28 = vcombine.high %v443_v22, %v447_v24  ;;  %v490_v13 = vld [vmem:[%s19788_s1 + $0xe80] sm:$0xff]  ;;  %v491_v15 = vld [vmem:[%s19788_s1 + $0xe88] sm:$0xff] }
  0xb8   :  { %10310 = vmatprep.subr.bf16.mxu1 %v12891_v27  ;;  %v12945_v27 = vcombine.high %v442_v20, %v446_v21  ;;  %v494_v14 = vld [vmem:[%s19788_s1 + $0xea0] sm:$0xff] }
  0xba   :  { %9778 = vmatpush1.bf16.msra.mxu0 %v12888_v31  ;;  %v455_v31 = vld [vmem:[%s19788_s1 + $0xd68] sm:$0xff] }
  0xbb   :  { %10311 = vmatpush1.bf16.msra.mxu1 %v12890_v32  ;;  %9779 = vmatprep.subr.bf16.mxu0 %v12897_v34  ;;  %v12944_v32 = vcombine.low %v442_v20, %v446_v21  ;;  %v12946_v34 = vcombine.low %v443_v22, %v447_v24  ;;  %v12955_v36 = vcombine.high %v451_v30, %v455_v31  ;;  %v498_v21 = vld [vmem:[%s19788_s1 + $0xec0] sm:$0xff]  ;;  %v499_v24 = vld [vmem:[%s19788_s1 + $0xec8] sm:$0xff] }
  0xbc   :  { %10312 = vmatprep.subr.bf16.mxu1 %v12899_v35  ;;  %v12953_v35 = vcombine.high %v450_v59, %v454_v29  ;;  %v502_v22 = vld [vmem:[%s19788_s1 + $0xee0] sm:$0xff] }
  0xbe   :  { %9780 = vmatpush1.bf16.msra.mxu0 %v12896_v41  ;;  %v463_v41 = vld [vmem:[%s19788_s1 + $0xda8] sm:$0xff] }
  0xbf   :  { %10313 = vmatpush1.bf16.msra.mxu1 %v12898_v42  ;;  %9781 = vmatprep.subr.bf16.mxu0 %v12905_v44  ;;  %v12952_v42 = vcombine.low %v450_v59, %v454_v29  ;;  %v12954_v44 = vcombine.low %v451_v30, %v455_v31  ;;  %v12963_v46 = vcombine.high %v459_v39, %v463_v41  ;;  %v506_v29 = vld [vmem:[%s19788_s1 + $0xf00] sm:$0xff]  ;;  %v507_v31 = vld [vmem:[%s19788_s1 + $0xf08] sm:$0xff] }
  0xc0   :  { %10314 = vmatprep.subr.bf16.mxu1 %v12907_v45  ;;  %v12961_v45 = vcombine.high %v458_v37, %v462_v38  ;;  %v510_v30 = vld [vmem:[%s19788_s1 + $0xf20] sm:$0xff] }
  0xc2   :  { %9782 = vmatpush1.bf16.msra.mxu0 %v12904_v51  ;;  %v471_v51 = vld [vmem:[%s19788_s1 + $0xde8] sm:$0xff] }
  0xc3   :  { %10315 = vmatpush1.bf16.msra.mxu1 %v12906_v52  ;;  %9792 = vmatprep.subr.bf16.mxu0 %v12913_v54  ;;  %v12960_v52 = vcombine.low %v458_v37, %v462_v38  ;;  %v12962_v54 = vcombine.low %v459_v39, %v463_v41  ;;  %v12971_v56 = vcombine.high %v467_v50, %v471_v51  ;;  %v514_v38 = vld [vmem:[%s19788_s1 + $0xf40] sm:$0xff]  ;;  %v515_v41 = vld [vmem:[%s19788_s1 + $0xf48] sm:$0xff] }
  0xc4   :  { %10325 = vmatprep.subr.bf16.mxu1 %v12915_v55  ;;  %v12969_v55 = vcombine.high %v466_v47, %v470_v49  ;;  %v518_v39 = vld [vmem:[%s19788_s1 + $0xf60] sm:$0xff] }
  0xc5   :  { %9784 = vmatmul.mubr.bf16.vlgmr.msra.gmra.mrb[0].mxu0 %v15227_v58 }
  0xc6   :  { %9793 = vmatpush1.bf16.msra.mxu0 %v12912_v62  ;;  %10317 = vmatmul.mubr.bf16.vlgmr.msra.gmra.mrb[0].mxu1 %v15227_v58  ;;  %v479_v62 = vld [vmem:[%s19788_s1 + $0xe28] sm:$0xff] }
  0xc7   :  { %10326 = vmatpush1.bf16.msra.mxu1 %v12914_v0  ;;  %9794 = vmatprep.subr.bf16.mxu0 %v12921_v1  ;;  %v12968_v0 = vcombine.low %v466_v47, %v470_v49  ;;  %v12970_v1 = vcombine.low %v467_v50, %v471_v51  ;;  %v12979_v63 = vcombine.high %v475_v61, %v479_v62  ;;  %v522_v49 = vld [vmem:[%s19788_s1 + $0xf80] sm:$0xff]  ;;  %v523_v51 = vld [vmem:[%s19788_s1 + $0xf88] sm:$0xff] }
  0xc8   :  { %10327 = vmatprep.subr.bf16.mxu1 %v12923_v2  ;;  %9824 = vmatprep.mubr.bf16.mxu0 %v15243_v4  ;;  %v12977_v2 = vcombine.high %v474_v57, %v478_v60  ;;  %v526_v50 = vld [vmem:[%s19788_s1 + $0xfa0] sm:$0xff] }
  0xc9   :  { %10357 = vmatprep.mubr.bf16.mxu1 %v15243_v4 }
  0xca   :  { %9795 = vmatpush1.bf16.msra.mxu0 %v12920_v7  ;;  %v487_v7 = vld [vmem:[%s19788_s1 + $0xe68] sm:$0xff] }
  0xcb   :  { %10328 = vmatpush1.bf16.msra.mxu1 %v12922_v8  ;;  %9796 = vmatprep.subr.bf16.mxu0 %v12929_v10  ;;  %v12976_v8 = vcombine.low %v474_v57, %v478_v60  ;;  %v12978_v10 = vcombine.low %v475_v61, %v479_v62  ;;  %v12987_v12 = vcombine.high %v483_v6, %v487_v7  ;;  %v530_v60 = vld [vmem:[%s19788_s1 + $0xfc0] sm:$0xff]  ;;  %v531_v62 = vld [vmem:[%s19788_s1 + $0xfc8] sm:$0xff] }
  0xcc   :  { %10329 = vmatprep.subr.bf16.mxu1 %v12931_v11  ;;  %v12985_v11 = vcombine.high %v482_v3, %v486_v5  ;;  %v534_v61 = vld [vmem:[%s19788_s1 + $0xfe0] sm:$0xff] }
  0xce   :  { %9797 = vmatpush1.bf16.msra.mxu0 %v12928_v16  ;;  %v495_v16 = vld [vmem:[%s19788_s1 + $0xea8] sm:$0xff] }
  0xcf   :  { %10330 = vmatpush1.bf16.msra.mxu1 %v12930_v17  ;;  %9798 = vmatprep.subr.bf16.mxu0 %v12937_v18  ;;  %v12984_v17 = vcombine.low %v482_v3, %v486_v5  ;;  %v12986_v18 = vcombine.low %v483_v6, %v487_v7  ;;  %v12995_v20 = vcombine.high %v491_v15, %v495_v16  ;;  %v538_v6 = vld [vmem:[%s19788_s1 + $0x1000] sm:$0xff] }
  0xd0   :  { %10331 = vmatprep.subr.bf16.mxu1 %v12939_v19  ;;  %v12993_v19 = vcombine.high %v490_v13, %v494_v14  ;;  %v13033_v3 = vcombine.high %v530_v60, %v534_v61  ;;  %v542_v7 = vld [vmem:[%s19788_s1 + $0x1020] sm:$0xff] }
  0xd2   :  { %9799 = vmatpush1.bf16.msra.mxu0 %v12936_v25  ;;  %v503_v25 = vld [vmem:[%s19788_s1 + $0xee8] sm:$0xff] }
  0xd3   :  { %10332 = vmatpush1.bf16.msra.mxu1 %v12938_v26  ;;  %9800 = vmatprep.subr.bf16.mxu0 %v12945_v27  ;;  %v12992_v26 = vcombine.low %v490_v13, %v494_v14  ;;  %v12994_v27 = vcombine.low %v491_v15, %v495_v16  ;;  %v13003_v59 = vcombine.high %v499_v24, %v503_v25  ;;  %v546_v16 = vld [vmem:[%s19788_s1 + $0x1040] sm:$0xff] }
  0xd4   :  { %10333 = vmatprep.subr.bf16.mxu1 %v12947_v28  ;;  %v13001_v28 = vcombine.high %v498_v21, %v502_v22  ;;  %v13041_v14 = vcombine.high %v538_v6, %v542_v7 }
  0xd6   :  { %9801 = vmatpush1.bf16.msra.mxu0 %v12944_v32  ;;  %v511_v32 = vld [vmem:[%s19788_s1 + $0xf28] sm:$0xff] }
  0xd7   :  { %10334 = vmatpush1.bf16.msra.mxu1 %v12946_v34  ;;  %9802 = vmatprep.subr.bf16.mxu0 %v12953_v35  ;;  %v13000_v34 = vcombine.low %v498_v21, %v502_v22  ;;  %v13002_v35 = vcombine.low %v499_v24, %v503_v25  ;;  %v13011_v37 = vcombine.high %v507_v31, %v511_v32  ;;  %v551_v21 = vld [vmem:[%s19788_s1 + $0x1068] sm:$0xff] }
  0xd8   :  { %10335 = vmatprep.subr.bf16.mxu1 %v12955_v36  ;;  %v13009_v36 = vcombine.high %v506_v29, %v510_v30  ;;  %v13040_v22 = vcombine.low %v538_v6, %v542_v7  ;;  %v587_v6 = vld [vmem:[%s19788_s1 + $0x1188] sm:$0xff] }
  0xd9   :  { %v591_v7 = vld [vmem:[%s19788_s1 + $0x11a8] sm:$0xff] }
  0xda   :  { %9803 = vmatpush1.bf16.msra.mxu0 %v12952_v42  ;;  %v519_v42 = vld [vmem:[%s19788_s1 + $0xf68] sm:$0xff] }
  0xdb   :  { %10336 = vmatpush1.bf16.msra.mxu1 %v12954_v44  ;;  %9804 = vmatprep.subr.bf16.mxu0 %v12961_v45  ;;  %v13008_v44 = vcombine.low %v506_v29, %v510_v30  ;;  %v13010_v45 = vcombine.low %v507_v31, %v511_v32  ;;  %v13019_v47 = vcombine.high %v515_v41, %v519_v42  ;;  %v555_v29 = vld [vmem:[%s19788_s1 + $0x1088] sm:$0xff] }
  0xdc   :  { %10337 = vmatprep.subr.bf16.mxu1 %v12963_v46  ;;  %v13017_v46 = vcombine.high %v514_v38, %v518_v39  ;;  %v559_v30 = vld [vmem:[%s19788_s1 + $0x10a8] sm:$0xff] }
  0xde   :  { %9805 = vmatpush1.bf16.msra.mxu0 %v12960_v52  ;;  %v527_v52 = vld [vmem:[%s19788_s1 + $0xfa8] sm:$0xff] }
  0xdf   :  { %10338 = vmatpush1.bf16.msra.mxu1 %v12962_v54  ;;  %9806 = vmatprep.subr.bf16.mxu0 %v12969_v55  ;;  %v13016_v54 = vcombine.low %v514_v38, %v518_v39  ;;  %v13018_v55 = vcombine.low %v515_v41, %v519_v42  ;;  %v13027_v57 = vcombine.high %v523_v51, %v527_v52  ;;  %v563_v38 = vld [vmem:[%s19788_s1 + $0x10c8] sm:$0xff] }
  0xe0   :  { %10339 = vmatprep.subr.bf16.mxu1 %v12971_v56  ;;  %v13025_v56 = vcombine.high %v522_v49, %v526_v50  ;;  %v567_v39 = vld [vmem:[%s19788_s1 + $0x10e8] sm:$0xff]  ;;  %v13058_v42 = vcombine.low %v555_v29, %v559_v30 }
  0xe2   :  { %9807 = vmatpush1.bf16.msra.mxu0 %v12968_v0  ;;  %v535_v0 = vld [vmem:[%s19788_s1 + $0xfe8] sm:$0xff] }
  0xe3   :  { %10340 = vmatpush1.bf16.msra.mxu1 %v12970_v1  ;;  %9808 = vmatprep.subr.bf16.mxu0 %v12977_v2  ;;  %v15414_v1 = vld [vmem:[%s19787_s0 + $0x8] sm:$0xff]  ;;  %v13024_v2 = vcombine.low %v522_v49, %v526_v50  ;;  %v13035_v5 = vcombine.high %v531_v62, %v535_v0  ;;  %v13034_v13 = vcombine.low %v531_v62, %v535_v0 }
  0xe4   :  { %10341 = vmatprep.subr.bf16.mxu1 %v12979_v63  ;;  %v13026_v63 = vcombine.low %v523_v51, %v527_v52  ;;  %v571_v49 = vld [vmem:[%s19788_s1 + $0x1108] sm:$0xff]  ;;  %v13066_v52 = vcombine.low %v563_v38, %v567_v39 }
  0xe5   :  { %v575_v50 = vld [vmem:[%s19788_s1 + $0x1128] sm:$0xff] }
  0xe6   :  { %9809 = vmatpush1.bf16.msra.mxu0 %v12976_v8  ;;  %v15424_v8 = vrot.slane %v15414_v1, %v14661_v53  ;;  %v13074_v0 = vcombine.low %v571_v49, %v575_v50 }
  0xe7   :  { %10342 = vmatpush1.bf16.msra.mxu1 %v12978_v10  ;;  %9810 = vmatprep.subr.bf16.mxu0 %v12985_v11  ;;  %v539_v10 = vld [vmem:[%s19788_s1 + $0x1008] sm:$0xff] }
  0xe8   :  { %10343 = vmatprep.subr.bf16.mxu1 %v12987_v12  ;;  %v543_v11 = vld [vmem:[%s19788_s1 + $0x1028] sm:$0xff]  ;;  %v13032_v12 = vcombine.low %v530_v60, %v534_v61 }
  0xe9   :  { %v13043_v15 = vcombine.high %v539_v10, %v543_v11  ;;  %v13042_v24 = vcombine.low %v539_v10, %v543_v11  ;;  %v579_v60 = vld [vmem:[%s19788_s1 + $0x1148] sm:$0xff] }
  0xea   :  { %9811 = vmatpush1.bf16.msra.mxu0 %v12984_v17  ;;  %v550_v17 = vld [vmem:[%s19788_s1 + $0x1060] sm:$0xff]  ;;  %v583_v61 = vld [vmem:[%s19788_s1 + $0x1168] sm:$0xff] }
  0xeb   :  { %10344 = vmatpush1.bf16.msra.mxu1 %v12986_v18  ;;  %9812 = vmatprep.subr.bf16.mxu0 %v12993_v19  ;;  %v1704_v18 = vcombine.high %v15424_v8, %v15424_v8  ;;  %v15442_v19 = vcombine.high %v15227_v58, %v15227_v58  ;;  %v13049_v25 = vcombine.high %v546_v16, %v550_v17 }
  0xec   :  { %10345 = vmatprep.subr.bf16.mxu1 %v12995_v20  ;;  %v547_v20 = vld [vmem:[%s19788_s1 + $0x1048] sm:$0xff]  ;;  %v13048_v31 = vcombine.low %v546_v16, %v550_v17  ;;  %v13082_v11 = vcombine.low %v579_v60, %v583_v61 }
  0xed   :  { %v13050_v32 = vcombine.low %v547_v20, %v551_v21  ;;  %v595_v16 = vld [vmem:[%s19788_s1 + $0x11c8] sm:$0xff] }
  0xee   :  { %9813 = vmatpush1.bf16.msra.mxu0 %v12992_v26  ;;  %v13051_v26 = vcombine.high %v547_v20, %v551_v21  ;;  %v599_v17 = vld [vmem:[%s19788_s1 + $0x11e8] sm:$0xff]  ;;  %v13090_v20 = vcombine.low %v587_v6, %v591_v7 }
  0xef   :  { %10346 = vmatpush1.bf16.msra.mxu1 %v12994_v27  ;;  %9814 = vmatprep.subr.bf16.mxu0 %v13001_v28  ;;  %v554_v27 = vld [vmem:[%s19788_s1 + $0x1080] sm:$0xff] }
  0xf0   :  { %10347 = vmatprep.subr.bf16.mxu1 %v13003_v59  ;;  %v558_v28 = vld [vmem:[%s19788_s1 + $0x10a0] sm:$0xff]  ;;  %v15457_v59 = vrot.slane %v1704_v18, %v14661_v53 }
  0xf1   :  { %v13056_v41 = vcombine.low %v554_v27, %v558_v28 }
  0xf2   :  { %9815 = vmatpush1.bf16.msra.mxu0 %v13000_v34  ;;  %v13057_v34 = vcombine.high %v554_v27, %v558_v28  ;;  %v607_v27 = vld [vmem:[%s19788_s1 + $0x1228] sm:$0xff] }
  0xf3   :  { %10348 = vmatpush1.bf16.msra.mxu1 %v13002_v35  ;;  %9816 = vmatprep.subr.bf16.mxu0 %v13009_v36  ;;  %v13059_v35 = vcombine.high %v555_v29, %v559_v30  ;;  %v562_v36 = vld [vmem:[%s19788_s1 + $0x10c0] sm:$0xff]  ;;  %v13098_v29 = vcombine.low %v595_v16, %v599_v17 }
  0xf4   :  { %10349 = vmatprep.subr.bf16.mxu1 %v13011_v37  ;;  %v566_v37 = vld [vmem:[%s19788_s1 + $0x10e0] sm:$0xff] }
  0xf5   :  { %v13064_v51 = vcombine.low %v562_v36, %v566_v37 }
  0xf6   :  { %9817 = vmatpush1.bf16.msra.mxu0 %v13008_v44  ;;  %v13065_v44 = vcombine.high %v562_v36, %v566_v37  ;;  %v615_v36 = vld [vmem:[%s19788_s1 + $0x1268] sm:$0xff] }
  0xf7   :  { %10350 = vmatpush1.bf16.msra.mxu1 %v13010_v45  ;;  %9818 = vmatprep.subr.bf16.mxu0 %v13017_v46  ;;  %v13067_v45 = vcombine.high %v563_v38, %v567_v39  ;;  %v570_v46 = vld [vmem:[%s19788_s1 + $0x1100] sm:$0xff] }
  0xf8   :  { %10351 = vmatprep.subr.bf16.mxu1 %v13019_v47  ;;  %v574_v47 = vld [vmem:[%s19788_s1 + $0x1120] sm:$0xff] }
  0xf9   :  { %v13072_v62 = vcombine.low %v570_v46, %v574_v47 }
  0xfa   :  { %9819 = vmatpush1.bf16.msra.mxu0 %v13016_v54  ;;  %v13073_v54 = vcombine.high %v570_v46, %v574_v47  ;;  %v623_v46 = vld [vmem:[%s19788_s1 + $0x12a8] sm:$0xff] }
  0xfb   :  { %10352 = vmatpush1.bf16.msra.mxu1 %v13018_v55  ;;  %9820 = vmatprep.subr.bf16.mxu0 %v13025_v56  ;;  %v13075_v55 = vcombine.high %v571_v49, %v575_v50  ;;  %v578_v56 = vld [vmem:[%s19788_s1 + $0x1140] sm:$0xff] }
  0xfc   :  { %10353 = vmatprep.subr.bf16.mxu1 %v13027_v57  ;;  %v582_v57 = vld [vmem:[%s19788_s1 + $0x1160] sm:$0xff] }
  0xfd   :  { %v13080_v10 = vcombine.low %v578_v56, %v582_v57 }
  0xfe   :  { %9821 = vmatpush1.bf16.msra.mxu0 %v13024_v2  ;;  %v13081_v2 = vcombine.high %v578_v56, %v582_v57  ;;  %v631_v56 = vld [vmem:[%s19788_s1 + $0x12e8] sm:$0xff] }
  0xff   :  { %10354 = vmatpush1.bf16.msra.mxu1 %v13026_v63  ;;  %9822 = vmatprep.subr.bf16.mxu0 %v13033_v3  ;;  %v13083_v63 = vcombine.high %v579_v60, %v583_v61  ;;  %v586_v3 = vld [vmem:[%s19788_s1 + $0x1180] sm:$0xff] }
 0x100   :  { %10355 = vmatprep.subr.bf16.mxu1 %v13035_v5  ;;  %v590_v5 = vld [vmem:[%s19788_s1 + $0x11a0] sm:$0xff] }
 0x101   :  { %v13088_v18 = vcombine.low %v586_v3, %v590_v5 }
 0x102   :  { %9823 = vmatpush1.bf16.msra.mxu0 %v13032_v12  ;;  %v13089_v12 = vcombine.high %v586_v3, %v590_v5  ;;  %v639_v3 = vld [vmem:[%s19788_s1 + $0x1328] sm:$0xff] }
 0x103   :  { %10356 = vmatpush1.bf16.msra.mxu1 %v13034_v13  ;;  %9833 = vmatprep.subr.bf16.mxu0 %v13041_v14  ;;  %v13091_v13 = vcombine.high %v587_v6, %v591_v7  ;;  %v594_v14 = vld [vmem:[%s19788_s1 + $0x11c0] sm:$0xff] }
 0x104   :  { %10366 = vmatprep.subr.bf16.mxu1 %v13043_v15  ;;  %v598_v15 = vld [vmem:[%s19788_s1 + $0x11e0] sm:$0xff] }
 0x105   :  { %9825 = vmatmul.mubr.bf16.vlgmr.msra.gmra.mrb[0].mxu0 %v15442_v19  ;;  %v13097_v21 = vcombine.high %v594_v14, %v598_v15  ;;  %v13096_v28 = vcombine.low %v594_v14, %v598_v15  ;;  %v647_v14 = vld [vmem:[%s19788_s1 + $0x1368] sm:$0xff] }
 0x106   :  { %9834 = vmatpush1.bf16.msra.mxu0 %v13040_v22  ;;  %10358 = vmatmul.mubr.bf16.vlgmr.msra.gmra.mrb[0].mxu1 %v15442_v19  ;;  %v13099_v22 = vcombine.high %v595_v16, %v599_v17 }
 0x107   :  { %10367 = vmatpush1.bf16.msra.mxu1 %v13042_v24  ;;  %9835 = vmatprep.subr.bf16.mxu0 %v13049_v25  ;;  %v602_v24 = vld [vmem:[%s19788_s1 + $0x1200] sm:$0xff] }
 0x108   :  { %10368 = vmatprep.subr.bf16.mxu1 %v13051_v26  ;;  %9865 = vmatprep.mubr.bf16.mxu0 %v15457_v59  ;;  %v606_v25 = vld [vmem:[%s19788_s1 + $0x1220] sm:$0xff]  ;;  %v603_v26 = vld [vmem:[%s19788_s1 + $0x1208] sm:$0xff] }
 0x109   :  { %10398 = vmatprep.mubr.bf16.mxu1 %v15457_v59  ;;  %v13105_v30 = vcombine.high %v602_v24, %v606_v25  ;;  %v13104_v37 = vcombine.low %v602_v24, %v606_v25  ;;  %v13106_v38 = vcombine.low %v603_v26, %v607_v27  ;;  %v655_v24 = vld [vmem:[%s19788_s1 + $0x13a8] sm:$0xff] }
 0x10a   :  { %9836 = vmatpush1.bf16.msra.mxu0 %v13048_v31  ;;  %v13107_v31 = vcombine.high %v603_v26, %v607_v27 }
 0x10b   :  { %10369 = vmatpush1.bf16.msra.mxu1 %v13050_v32  ;;  %9837 = vmatprep.subr.bf16.mxu0 %v13057_v34  ;;  %v610_v32 = vld [vmem:[%s19788_s1 + $0x1240] sm:$0xff] }
 0x10c   :  { %10370 = vmatprep.subr.bf16.mxu1 %v13059_v35  ;;  %v614_v34 = vld [vmem:[%s19788_s1 + $0x1260] sm:$0xff]  ;;  %v611_v35 = vld [vmem:[%s19788_s1 + $0x1248] sm:$0xff] }
 0x10d   :  { %v13113_v39 = vcombine.high %v610_v32, %v614_v34  ;;  %v13112_v47 = vcombine.low %v610_v32, %v614_v34  ;;  %v13114_v49 = vcombine.low %v611_v35, %v615_v36  ;;  %v663_v32 = vld [vmem:[%s19788_s1 + $0x13e8] sm:$0xff] }
 0x10e   :  { %9838 = vmatpush1.bf16.msra.mxu0 %v13056_v41  ;;  %v13115_v41 = vcombine.high %v611_v35, %v615_v36 }
 0x10f   :  { %10371 = vmatpush1.bf16.msra.mxu1 %v13058_v42  ;;  %9839 = vmatprep.subr.bf16.mxu0 %v13065_v44  ;;  %v618_v42 = vld [vmem:[%s19788_s1 + $0x1280] sm:$0xff] }
 0x110   :  { %10372 = vmatprep.subr.bf16.mxu1 %v13067_v45  ;;  %v622_v44 = vld [vmem:[%s19788_s1 + $0x12a0] sm:$0xff]  ;;  %v619_v45 = vld [vmem:[%s19788_s1 + $0x1288] sm:$0xff] }
 0x111   :  { %v13121_v50 = vcombine.high %v618_v42, %v622_v44  ;;  %v13120_v57 = vcombine.low %v618_v42, %v622_v44  ;;  %v13122_v60 = vcombine.low %v619_v45, %v623_v46  ;;  %v671_v42 = vld [vmem:[%s19788_s1 + $0x1428] sm:$0xff] }
 0x112   :  { %9840 = vmatpush1.bf16.msra.mxu0 %v13064_v51  ;;  %v13123_v51 = vcombine.high %v619_v45, %v623_v46 }
 0x113   :  { %10373 = vmatpush1.bf16.msra.mxu1 %v13066_v52  ;;  %9841 = vmatprep.subr.bf16.mxu0 %v13073_v54  ;;  %v626_v52 = vld [vmem:[%s19788_s1 + $0x12c0] sm:$0xff] }
 0x114   :  { %10374 = vmatprep.subr.bf16.mxu1 %v13075_v55  ;;  %v630_v54 = vld [vmem:[%s19788_s1 + $0x12e0] sm:$0xff]  ;;  %v627_v55 = vld [vmem:[%s19788_s1 + $0x12c8] sm:$0xff] }
 0x115   :  { %v13129_v61 = vcombine.high %v626_v52, %v630_v54  ;;  %v13128_v5 = vcombine.low %v626_v52, %v630_v54  ;;  %v13130_v6 = vcombine.low %v627_v55, %v631_v56  ;;  %v675_v52 = vld [vmem:[%s19788_s1 + $0x1448] sm:$0xff] }
 0x116   :  { %9842 = vmatpush1.bf16.msra.mxu0 %v13072_v62  ;;  %v13131_v62 = vcombine.high %v627_v55, %v631_v56  ;;  %v679_v54 = vld [vmem:[%s19788_s1 + $0x1468] sm:$0xff] }
 0x117   :  { %10375 = vmatpush1.bf16.msra.mxu1 %v13074_v0  ;;  %9843 = vmatprep.subr.bf16.mxu0 %v13081_v2  ;;  %v634_v0 = vld [vmem:[%s19788_s1 + $0x1300] sm:$0xff] }
 0x118   :  { %10376 = vmatprep.subr.bf16.mxu1 %v13083_v63  ;;  %v638_v2 = vld [vmem:[%s19788_s1 + $0x1320] sm:$0xff]  ;;  %v635_v63 = vld [vmem:[%s19788_s1 + $0x1308] sm:$0xff] }
 0x119   :  { %v13137_v7 = vcombine.high %v634_v0, %v638_v2  ;;  %v13136_v15 = vcombine.low %v634_v0, %v638_v2  ;;  %v13138_v16 = vcombine.low %v635_v63, %v639_v3  ;;  %v683_v0 = vld [vmem:[%s19788_s1 + $0x1488] sm:$0xff] }
 0x11a   :  { %9844 = vmatpush1.bf16.msra.mxu0 %v13080_v10  ;;  %v13139_v10 = vcombine.high %v635_v63, %v639_v3  ;;  %v687_v2 = vld [vmem:[%s19788_s1 + $0x14a8] sm:$0xff]  ;;  %v13178_v3 = vcombine.low %v675_v52, %v679_v54 }
 0x11b   :  { %10377 = vmatpush1.bf16.msra.mxu1 %v13082_v11  ;;  %9845 = vmatprep.subr.bf16.mxu0 %v13089_v12  ;;  %v642_v11 = vld [vmem:[%s19788_s1 + $0x1340] sm:$0xff] }
 0x11c   :  { %10378 = vmatprep.subr.bf16.mxu1 %v13091_v13  ;;  %v646_v12 = vld [vmem:[%s19788_s1 + $0x1360] sm:$0xff]  ;;  %v643_v13 = vld [vmem:[%s19788_s1 + $0x1348] sm:$0xff] }
 0x11d   :  { %v13145_v17 = vcombine.high %v642_v11, %v646_v12  ;;  %v13144_v25 = vcombine.low %v642_v11, %v646_v12  ;;  %v13146_v26 = vcombine.low %v643_v13, %v647_v14  ;;  %v691_v11 = vld [vmem:[%s19788_s1 + $0x14c8] sm:$0xff] }
 0x11e   :  { %9846 = vmatpush1.bf16.msra.mxu0 %v13088_v18  ;;  %v13147_v18 = vcombine.high %v643_v13, %v647_v14  ;;  %v695_v12 = vld [vmem:[%s19788_s1 + $0x14e8] sm:$0xff]  ;;  %v13186_v14 = vcombine.low %v683_v0, %v687_v2 }
 0x11f   :  { %10379 = vmatpush1.bf16.msra.mxu1 %v13090_v20  ;;  %9847 = vmatprep.subr.bf16.mxu0 %v13097_v21  ;;  %v650_v20 = vld [vmem:[%s19788_s1 + $0x1380] sm:$0xff] }
 0x120   :  { %10380 = vmatprep.subr.bf16.mxu1 %v13099_v22  ;;  %v654_v21 = vld [vmem:[%s19788_s1 + $0x13a0] sm:$0xff]  ;;  %v651_v22 = vld [vmem:[%s19788_s1 + $0x1388] sm:$0xff] }
 0x121   :  { %v13153_v27 = vcombine.high %v650_v20, %v654_v21  ;;  %v13152_v34 = vcombine.low %v650_v20, %v654_v21  ;;  %v13154_v35 = vcombine.low %v651_v22, %v655_v24  ;;  %v699_v20 = vld [vmem:[%s19788_s1 + $0x1508] sm:$0xff] }
 0x122   :  { %9848 = vmatpush1.bf16.msra.mxu0 %v13096_v28  ;;  %v13155_v28 = vcombine.high %v651_v22, %v655_v24  ;;  %v703_v21 = vld [vmem:[%s19788_s1 + $0x1528] sm:$0xff]  ;;  %v13194_v24 = vcombine.low %v691_v11, %v695_v12 }
 0x123   :  { %10381 = vmatpush1.bf16.msra.mxu1 %v13098_v29  ;;  %9849 = vmatprep.subr.bf16.mxu0 %v13105_v30  ;;  %v658_v29 = vld [vmem:[%s19788_s1 + $0x13c0] sm:$0xff] }
 0x124   :  { %10382 = vmatprep.subr.bf16.mxu1 %v13107_v31  ;;  %v662_v30 = vld [vmem:[%s19788_s1 + $0x13e0] sm:$0xff]  ;;  %v659_v31 = vld [vmem:[%s19788_s1 + $0x13c8] sm:$0xff] }
 0x125   :  { %v13161_v36 = vcombine.high %v658_v29, %v662_v30  ;;  %v13160_v44 = vcombine.low %v658_v29, %v662_v30  ;;  %v13162_v45 = vcombine.low %v659_v31, %v663_v32  ;;  %v707_v29 = vld [vmem:[%s19788_s1 + $0x1548] sm:$0xff] }
 0x126   :  { %9850 = vmatpush1.bf16.msra.mxu0 %v13104_v37  ;;  %v13163_v37 = vcombine.high %v659_v31, %v663_v32  ;;  %v711_v30 = vld [vmem:[%s19788_s1 + $0x1568] sm:$0xff]  ;;  %v13202_v32 = vcombine.low %v699_v20, %v703_v21 }
 0x127   :  { %10383 = vmatpush1.bf16.msra.mxu1 %v13106_v38  ;;  %9851 = vmatprep.subr.bf16.mxu0 %v13113_v39  ;;  %v666_v38 = vld [vmem:[%s19788_s1 + $0x1400] sm:$0xff] }
 0x128   :  { %10384 = vmatprep.subr.bf16.mxu1 %v13115_v41  ;;  %v670_v39 = vld [vmem:[%s19788_s1 + $0x1420] sm:$0xff]  ;;  %v667_v41 = vld [vmem:[%s19788_s1 + $0x1408] sm:$0xff] }
 0x129   :  { %v13169_v46 = vcombine.high %v666_v38, %v670_v39  ;;  %v13168_v55 = vcombine.low %v666_v38, %v670_v39  ;;  %v13170_v56 = vcombine.low %v667_v41, %v671_v42  ;;  %v715_v38 = vld [vmem:[%s19788_s1 + $0x1588] sm:$0xff] }
 0x12a   :  { %9852 = vmatpush1.bf16.msra.mxu0 %v13112_v47  ;;  %v13171_v47 = vcombine.high %v667_v41, %v671_v42  ;;  %v719_v39 = vld [vmem:[%s19788_s1 + $0x15a8] sm:$0xff]  ;;  %v13210_v42 = vcombine.low %v707_v29, %v711_v30 }
 0x12b   :  { %10385 = vmatpush1.bf16.msra.mxu1 %v13114_v49  ;;  %9853 = vmatprep.subr.bf16.mxu0 %v13121_v50  ;;  %v674_v49 = vld [vmem:[%s19788_s1 + $0x1440] sm:$0xff] }
 0x12c   :  { %10386 = vmatprep.subr.bf16.mxu1 %v13123_v51  ;;  %v678_v50 = vld [vmem:[%s19788_s1 + $0x1460] sm:$0xff]  ;;  %v15645_v51 = vrot.slane %v15424_v8, %v14661_v53 }
 0x12d   :  { %v682_v8 = vld [vmem:[%s19788_s1 + $0x1480] sm:$0xff]  ;;  %v13176_v63 = vcombine.low %v674_v49, %v678_v50 }
 0x12e   :  { %9854 = vmatpush1.bf16.msra.mxu0 %v13120_v57  ;;  %v13177_v57 = vcombine.high %v674_v49, %v678_v50  ;;  %v723_v49 = vld [vmem:[%s19788_s1 + $0x15c8] sm:$0xff] }
 0x12f   :  { %10387 = vmatpush1.bf16.msra.mxu1 %v13122_v60  ;;  %9855 = vmatprep.subr.bf16.mxu0 %v13129_v61  ;;  %v13179_v60 = vcombine.high %v675_v52, %v679_v54  ;;  %v686_v61 = vld [vmem:[%s19788_s1 + $0x14a0] sm:$0xff]  ;;  %v727_v50 = vld [vmem:[%s19788_s1 + $0x15e8] sm:$0xff]  ;;  %v13218_v54 = vcombine.low %v715_v38, %v719_v39 }
 0x130   :  { %10388 = vmatprep.subr.bf16.mxu1 %v13131_v62  ;;  %v15661_v62 = vcombine.high %v15457_v59, %v15457_v59  ;;  %v13184_v13 = vcombine.low %v682_v8, %v686_v61 }
 0x132   :  { %9856 = vmatpush1.bf16.msra.mxu0 %v13128_v5  ;;  %v13185_v5 = vcombine.high %v682_v8, %v686_v61  ;;  %v731_v8 = vld [vmem:[%s19788_s1 + $0x1608] sm:$0xff] }
 0x133   :  { %10389 = vmatpush1.bf16.msra.mxu1 %v13130_v6  ;;  %9857 = vmatprep.subr.bf16.mxu0 %v13137_v7  ;;  %v13187_v6 = vcombine.high %v683_v0, %v687_v2  ;;  %v690_v7 = vld [vmem:[%s19788_s1 + $0x14c0] sm:$0xff]  ;;  %v735_v61 = vld [vmem:[%s19788_s1 + $0x1628] sm:$0xff]  ;;  %v13226_v2 = vcombine.low %v723_v49, %v727_v50 }
 0x134   :  { %10390 = vmatprep.subr.bf16.mxu1 %v13139_v10  ;;  %v694_v10 = vld [vmem:[%s19788_s1 + $0x14e0] sm:$0xff] }
 0x135   :  { %v13192_v22 = vcombine.low %v690_v7, %v694_v10 }
 0x136   :  { %9858 = vmatpush1.bf16.msra.mxu0 %v13136_v15  ;;  %v13193_v15 = vcombine.high %v690_v7, %v694_v10  ;;  %v739_v7 = vld [vmem:[%s19788_s1 + $0x1648] sm:$0xff] }
 0x137   :  { %10391 = vmatpush1.bf16.msra.mxu1 %v13138_v16  ;;  %9859 = vmatprep.subr.bf16.mxu0 %v13145_v17  ;;  %v13195_v16 = vcombine.high %v691_v11, %v695_v12  ;;  %v698_v17 = vld [vmem:[%s19788_s1 + $0x1500] sm:$0xff]  ;;  %v743_v10 = vld [vmem:[%s19788_s1 + $0x1668] sm:$0xff]  ;;  %v13234_v12 = vcombine.low %v731_v8, %v735_v61 }
 0x138   :  { %10392 = vmatprep.subr.bf16.mxu1 %v13147_v18  ;;  %v702_v18 = vld [vmem:[%s19788_s1 + $0x1520] sm:$0xff] }
 0x139   :  { %v13200_v31 = vcombine.low %v698_v17, %v702_v18 }
 0x13a   :  { %9860 = vmatpush1.bf16.msra.mxu0 %v13144_v25  ;;  %v13201_v25 = vcombine.high %v698_v17, %v702_v18  ;;  %v747_v17 = vld [vmem:[%s19788_s1 + $0x1688] sm:$0xff] }
 0x13b   :  { %10393 = vmatpush1.bf16.msra.mxu1 %v13146_v26  ;;  %9861 = vmatprep.subr.bf16.mxu0 %v13153_v27  ;;  %v13203_v26 = vcombine.high %v699_v20, %v703_v21  ;;  %v706_v27 = vld [vmem:[%s19788_s1 + $0x1540] sm:$0xff]  ;;  %v751_v18 = vld [vmem:[%s19788_s1 + $0x16a8] sm:$0xff]  ;;  %v13242_v21 = vcombine.low %v739_v7, %v743_v10 }
 0x13c   :  { %10394 = vmatprep.subr.bf16.mxu1 %v13155_v28  ;;  %v710_v28 = vld [vmem:[%s19788_s1 + $0x1560] sm:$0xff] }
 0x13d   :  { %v13208_v41 = vcombine.low %v706_v27, %v710_v28 }
 0x13e   :  { %9862 = vmatpush1.bf16.msra.mxu0 %v13152_v34  ;;  %v13209_v34 = vcombine.high %v706_v27, %v710_v28  ;;  %v755_v27 = vld [vmem:[%s19788_s1 + $0x16c8] sm:$0xff] }
 0x13f   :  { %10395 = vmatpush1.bf16.msra.mxu1 %v13154_v35  ;;  %9863 = vmatprep.subr.bf16.mxu0 %v13161_v36  ;;  %v13211_v35 = vcombine.high %v707_v29, %v711_v30  ;;  %v714_v36 = vld [vmem:[%s19788_s1 + $0x1580] sm:$0xff]  ;;  %v759_v28 = vld [vmem:[%s19788_s1 + $0x16e8] sm:$0xff]  ;;  %v13250_v30 = vcombine.low %v747_v17, %v751_v18 }
 0x140   :  { %10396 = vmatprep.subr.bf16.mxu1 %v13163_v37  ;;  %v718_v37 = vld [vmem:[%s19788_s1 + $0x15a0] sm:$0xff] }
 0x141   :  { %v13216_v52 = vcombine.low %v714_v36, %v718_v37 }
 0x142   :  { %9864 = vmatpush1.bf16.msra.mxu0 %v13160_v44  ;;  %v13217_v44 = vcombine.high %v714_v36, %v718_v37  ;;  %v763_v36 = vld [vmem:[%s19788_s1 + $0x1708] sm:$0xff] }
 0x143   :  { %10397 = vmatpush1.bf16.msra.mxu1 %v13162_v45  ;;  %9874 = vmatprep.subr.bf16.mxu0 %v13169_v46  ;;  %v13219_v45 = vcombine.high %v715_v38, %v719_v39  ;;  %v722_v46 = vld [vmem:[%s19788_s1 + $0x15c0] sm:$0xff]  ;;  %v767_v37 = vld [vmem:[%s19788_s1 + $0x1728] sm:$0xff]  ;;  %v13258_v39 = vcombine.low %v755_v27, %v759_v28 }
 0x144   :  { %10407 = vmatprep.subr.bf16.mxu1 %v13171_v47  ;;  %v726_v47 = vld [vmem:[%s19788_s1 + $0x15e0] sm:$0xff] }
 0x145   :  { %9866 = vmatmul.mubr.bf16.vlgmr.msra.gmra.mrb[0].mxu0 %v15645_v51  ;;  %v13224_v0 = vcombine.low %v722_v46, %v726_v47 }
 0x146   :  { %9875 = vmatpush1.bf16.msra.mxu0 %v13168_v55  ;;  %10399 = vmatmul.mubr.bf16.vlgmr.msra.gmra.mrb[0].mxu1 %v15645_v51  ;;  %v13225_v55 = vcombine.high %v722_v46, %v726_v47  ;;  %v771_v46 = vld [vmem:[%s19788_s1 + $0x1748] sm:$0xff] }
 0x147   :  { %10408 = vmatpush1.bf16.msra.mxu1 %v13170_v56  ;;  %9876 = vmatprep.subr.bf16.mxu0 %v13177_v57  ;;  %v13227_v56 = vcombine.high %v723_v49, %v727_v50  ;;  %v730_v57 = vld [vmem:[%s19788_s1 + $0x1600] sm:$0xff]  ;;  %v775_v47 = vld [vmem:[%s19788_s1 + $0x1768] sm:$0xff]  ;;  %v13266_v50 = vcombine.low %v763_v36, %v767_v37 }
 0x148   :  { %10409 = vmatprep.subr.bf16.mxu1 %v13179_v60  ;;  %9906 = vmatprep.mubr.bf16.mxu0 %v15661_v62  ;;  %v734_v60 = vld [vmem:[%s19788_s1 + $0x1620] sm:$0xff] }
 0x149   :  { %10439 = vmatprep.mubr.bf16.mxu1 %v15661_v62  ;;  %v13232_v11 = vcombine.low %v730_v57, %v734_v60 }
 0x14a   :  { %9877 = vmatpush1.bf16.msra.mxu0 %v13176_v63  ;;  %v13233_v63 = vcombine.high %v730_v57, %v734_v60  ;;  %v779_v57 = vld [vmem:[%s19788_s1 + $0x1788] sm:$0xff] }
 0x14b   :  { %10410 = vmatpush1.bf16.msra.mxu1 %v13178_v3  ;;  %9878 = vmatprep.subr.bf16.mxu0 %v13185_v5  ;;  %v13235_v3 = vcombine.high %v731_v8, %v735_v61  ;;  %v738_v5 = vld [vmem:[%s19788_s1 + $0x1640] sm:$0xff]  ;;  %v783_v60 = vld [vmem:[%s19788_s1 + $0x17a8] sm:$0xff]  ;;  %v13274_v61 = vcombine.low %v771_v46, %v775_v47 }
 0x14c   :  { %10411 = vmatprep.subr.bf16.mxu1 %v13187_v6  ;;  %v742_v6 = vld [vmem:[%s19788_s1 + $0x1660] sm:$0xff] }
 0x14d   :  { %v13240_v20 = vcombine.low %v738_v5, %v742_v6 }
 0x14e   :  { %9879 = vmatpush1.bf16.msra.mxu0 %v13184_v13  ;;  %v13241_v13 = vcombine.high %v738_v5, %v742_v6  ;;  %v1689_v5 = vcombine.high %v15414_v1, %v15414_v1  ;;  %v787_v6 = vld [vmem:[%s19788_s1 + $0x17c8] sm:$0xff]  ;;  %v794_v1 = vld [vmem:[%s19788_s1 + $0x1800] sm:$0xff] }
 0x14f   :  { %10412 = vmatpush1.bf16.msra.mxu1 %v13186_v14  ;;  %9880 = vmatprep.subr.bf16.mxu0 %v13193_v15  ;;  %v13243_v14 = vcombine.high %v739_v7, %v743_v10  ;;  %v746_v15 = vld [vmem:[%s19788_s1 + $0x1680] sm:$0xff]  ;;  %v791_v7 = vld [vmem:[%s19788_s1 + $0x17e8] sm:$0xff] }
 0x150   :  { %10413 = vmatprep.subr.bf16.mxu1 %v13195_v16  ;;  %v750_v16 = vld [vmem:[%s19788_s1 + $0x16a0] sm:$0xff] }
 0x151   :  { %v13248_v29 = vcombine.low %v746_v15, %v750_v16 }
 0x152   :  { %9881 = vmatpush1.bf16.msra.mxu0 %v13192_v22  ;;  %v13249_v22 = vcombine.high %v746_v15, %v750_v16  ;;  %v15838_v15 = vrot.slane %v1689_v5, %v14661_v53  ;;  %v795_v16 = vld [vmem:[%s19788_s1 + $0x1808] sm:$0xff]  ;;  %v834_v5 = vld [vmem:[%s19788_s1 + $0x1940] sm:$0xff] }
 0x153   :  { %10414 = vmatpush1.bf16.msra.mxu1 %v13194_v24  ;;  %9882 = vmatprep.subr.bf16.mxu0 %v13201_v25  ;;  %v13251_v24 = vcombine.high %v747_v17, %v751_v18  ;;  %v754_v25 = vld [vmem:[%s19788_s1 + $0x16c0] sm:$0xff]  ;;  %v799_v17 = vld [vmem:[%s19788_s1 + $0x1828] sm:$0xff] }
 0x154   :  { %10415 = vmatprep.subr.bf16.mxu1 %v13203_v26  ;;  %v758_v26 = vld [vmem:[%s19788_s1 + $0x16e0] sm:$0xff] }
 0x155   :  { %v13256_v38 = vcombine.low %v754_v25, %v758_v26 }
 0x156   :  { %9883 = vmatpush1.bf16.msra.mxu0 %v13200_v31  ;;  %v13257_v31 = vcombine.high %v754_v25, %v758_v26  ;;  %v806_v25 = vld [vmem:[%s19788_s1 + $0x1860] sm:$0xff]  ;;  %v1705_v26 = vcombine.high %v15838_v15, %v15838_v15 }
 0x157   :  { %10416 = vmatpush1.bf16.msra.mxu1 %v13202_v32  ;;  %9884 = vmatprep.subr.bf16.mxu0 %v13209_v34  ;;  %v13259_v32 = vcombine.high %v755_v27, %v759_v28  ;;  %v762_v34 = vld [vmem:[%s19788_s1 + $0x1700] sm:$0xff]  ;;  %v15856_v27 = vcombine.high %v15645_v51, %v15645_v51  ;;  %v803_v28 = vld [vmem:[%s19788_s1 + $0x1848] sm:$0xff] }
 0x158   :  { %10417 = vmatprep.subr.bf16.mxu1 %v13211_v35  ;;  %v766_v35 = vld [vmem:[%s19788_s1 + $0x1720] sm:$0xff] }
 0x159   :  { %v13264_v49 = vcombine.low %v762_v34, %v766_v35 }
 0x15a   :  { %9885 = vmatpush1.bf16.msra.mxu0 %v13208_v41  ;;  %v13265_v41 = vcombine.high %v762_v34, %v766_v35  ;;  %v810_v35 = vld [vmem:[%s19788_s1 + $0x1880] sm:$0xff] }
 0x15b   :  { %10418 = vmatpush1.bf16.msra.mxu1 %v13210_v42  ;;  %9886 = vmatprep.subr.bf16.mxu0 %v13217_v44  ;;  %v13267_v42 = vcombine.high %v763_v36, %v767_v37  ;;  %v770_v44 = vld [vmem:[%s19788_s1 + $0x1740] sm:$0xff]  ;;  %v15871_v37 = vrot.slane %v1705_v26, %v14661_v53 }
 0x15c   :  { %10419 = vmatprep.subr.bf16.mxu1 %v13219_v45  ;;  %v774_v45 = vld [vmem:[%s19788_s1 + $0x1760] sm:$0xff] }
 0x15d   :  { %v13272_v8 = vcombine.low %v770_v44, %v774_v45  ;;  %v814_v36 = vld [vmem:[%s19788_s1 + $0x18a0] sm:$0xff] }
 0x15e   :  { %9887 = vmatpush1.bf16.msra.mxu0 %v13216_v52  ;;  %v13273_v52 = vcombine.high %v770_v44, %v774_v45  ;;  %v13313_v44 = vcombine.high %v810_v35, %v814_v36  ;;  %v854_v26 = vld [vmem:[%s19788_s1 + $0x19e0] sm:$0xff] }
 0x15f   :  { %10420 = vmatpush1.bf16.msra.mxu1 %v13218_v54  ;;  %9888 = vmatprep.subr.bf16.mxu0 %v13225_v55  ;;  %v13275_v54 = vcombine.high %v771_v46, %v775_v47  ;;  %v778_v55 = vld [vmem:[%s19788_s1 + $0x1780] sm:$0xff] }
 0x160   :  { %10421 = vmatprep.subr.bf16.mxu1 %v13227_v56  ;;  %v782_v56 = vld [vmem:[%s19788_s1 + $0x17a0] sm:$0xff] }
 0x161   :  { %v13280_v10 = vcombine.low %v778_v55, %v782_v56  ;;  %v818_v46 = vld [vmem:[%s19788_s1 + $0x18c0] sm:$0xff] }
 0x162   :  { %9889 = vmatpush1.bf16.msra.mxu0 %v13224_v0  ;;  %v13281_v0 = vcombine.high %v778_v55, %v782_v56  ;;  %v822_v47 = vld [vmem:[%s19788_s1 + $0x18e0] sm:$0xff] }
 0x163   :  { %10422 = vmatpush1.bf16.msra.mxu1 %v13226_v2  ;;  %9890 = vmatprep.subr.bf16.mxu0 %v13233_v63  ;;  %v13283_v2 = vcombine.high %v779_v57, %v783_v60  ;;  %v786_v63 = vld [vmem:[%s19788_s1 + $0x17c0] sm:$0xff]  ;;  %v13321_v55 = vcombine.high %v818_v46, %v822_v47 }
 0x164   :  { %10423 = vmatprep.subr.bf16.mxu1 %v13235_v3  ;;  %v790_v3 = vld [vmem:[%s19788_s1 + $0x17e0] sm:$0xff] }
 0x165   :  { %v13288_v18 = vcombine.low %v786_v63, %v790_v3 }
 0x166   :  { %9891 = vmatpush1.bf16.msra.mxu0 %v13232_v11  ;;  %v13282_v11 = vcombine.low %v779_v57, %v783_v60  ;;  %v826_v57 = vld [vmem:[%s19788_s1 + $0x1900] sm:$0xff] }
 0x167   :  { %10424 = vmatpush1.bf16.msra.mxu1 %v13234_v12  ;;  %9892 = vmatprep.subr.bf16.mxu0 %v13241_v13  ;;  %v13289_v12 = vcombine.high %v786_v63, %v790_v3  ;;  %v13291_v13 = vcombine.high %v787_v6, %v791_v7  ;;  %v830_v60 = vld [vmem:[%s19788_s1 + $0x1920] sm:$0xff] }
 0x168   :  { %10425 = vmatprep.subr.bf16.mxu1 %v13243_v14  ;;  %v798_v14 = vld [vmem:[%s19788_s1 + $0x1820] sm:$0xff]  ;;  %v13329_v63 = vcombine.high %v826_v57, %v830_v60 }
 0x16a   :  { %9893 = vmatpush1.bf16.msra.mxu0 %v13240_v20  ;;  %v13290_v20 = vcombine.low %v787_v6, %v791_v7  ;;  %v838_v6 = vld [vmem:[%s19788_s1 + $0x1960] sm:$0xff]  ;;  %v835_v7 = vld [vmem:[%s19788_s1 + $0x1948] sm:$0xff] }
 0x16b   :  { %10426 = vmatpush1.bf16.msra.mxu1 %v13242_v21  ;;  %9894 = vmatprep.subr.bf16.mxu0 %v13249_v22  ;;  %v13297_v21 = vcombine.high %v794_v1, %v798_v14  ;;  %v13299_v22 = vcombine.high %v795_v16, %v799_v17 }
 0x16c   :  { %10427 = vmatprep.subr.bf16.mxu1 %v13251_v24  ;;  %v802_v24 = vld [vmem:[%s19788_s1 + $0x1840] sm:$0xff] }
 0x16e   :  { %9895 = vmatpush1.bf16.msra.mxu0 %v13248_v29  ;;  %v807_v29 = vld [vmem:[%s19788_s1 + $0x1868] sm:$0xff] }
 0x16f   :  { %10428 = vmatpush1.bf16.msra.mxu1 %v13250_v30  ;;  %9896 = vmatprep.subr.bf16.mxu0 %v13257_v31  ;;  %v13296_v30 = vcombine.low %v794_v1, %v798_v14  ;;  %v13298_v31 = vcombine.low %v795_v16, %v799_v17  ;;  %v13307_v34 = vcombine.high %v803_v28, %v807_v29  ;;  %v842_v14 = vld [vmem:[%s19788_s1 + $0x1980] sm:$0xff]  ;;  %v843_v17 = vld [vmem:[%s19788_s1 + $0x1988] sm:$0xff] }
 0x170   :  { %10429 = vmatprep.subr.bf16.mxu1 %v13259_v32  ;;  %v13305_v32 = vcombine.high %v802_v24, %v806_v25  ;;  %v846_v16 = vld [vmem:[%s19788_s1 + $0x19a0] sm:$0xff] }
 0x172   :  { %9897 = vmatpush1.bf16.msra.mxu0 %v13256_v38  ;;  %v811_v38 = vld [vmem:[%s19788_s1 + $0x1888] sm:$0xff] }
 0x173   :  { %10430 = vmatpush1.bf16.msra.mxu1 %v13258_v39  ;;  %9898 = vmatprep.subr.bf16.mxu0 %v13265_v41  ;;  %v815_v39 = vld [vmem:[%s19788_s1 + $0x18a8] sm:$0xff]  ;;  %v13304_v41 = vcombine.low %v802_v24, %v806_v25  ;;  %v850_v25 = vld [vmem:[%s19788_s1 + $0x19c0] sm:$0xff] }
 0x174   :  { %10431 = vmatprep.subr.bf16.mxu1 %v13267_v42  ;;  %v13306_v42 = vcombine.low %v803_v28, %v807_v29  ;;  %v13315_v45 = vcombine.high %v811_v38, %v815_v39  ;;  %v851_v28 = vld [vmem:[%s19788_s1 + $0x19c8] sm:$0xff] }
 0x175   :  { %v855_v29 = vld [vmem:[%s19788_s1 + $0x19e8] sm:$0xff] }
 0x176   :  { %9899 = vmatpush1.bf16.msra.mxu0 %v13264_v49  ;;  %v819_v49 = vld [vmem:[%s19788_s1 + $0x18c8] sm:$0xff] }
 0x177   :  { %10432 = vmatpush1.bf16.msra.mxu1 %v13266_v50  ;;  %9900 = vmatprep.subr.bf16.mxu0 %v13273_v52  ;;  %v823_v50 = vld [vmem:[%s19788_s1 + $0x18e8] sm:$0xff]  ;;  %v13312_v52 = vcombine.low %v810_v35, %v814_v36  ;;  %v858_v35 = vld [vmem:[%s19788_s1 + $0x1a00] sm:$0xff] }
 0x178   :  { %10433 = vmatprep.subr.bf16.mxu1 %v13275_v54  ;;  %v13314_v54 = vcombine.low %v811_v38, %v815_v39  ;;  %v13323_v56 = vcombine.high %v819_v49, %v823_v50  ;;  %v862_v36 = vld [vmem:[%s19788_s1 + $0x1a20] sm:$0xff]  ;;  %v859_v38 = vld [vmem:[%s19788_s1 + $0x1a08] sm:$0xff] }
 0x179   :  { %v863_v39 = vld [vmem:[%s19788_s1 + $0x1a28] sm:$0xff] }
 0x17a   :  { %9901 = vmatpush1.bf16.msra.mxu0 %v13272_v8  ;;  %v827_v8 = vld [vmem:[%s19788_s1 + $0x1908] sm:$0xff] }
 0x17b   :  { %10434 = vmatpush1.bf16.msra.mxu1 %v13274_v61  ;;  %9902 = vmatprep.subr.bf16.mxu0 %v13281_v0  ;;  %v831_v61 = vld [vmem:[%s19788_s1 + $0x1928] sm:$0xff]  ;;  %v13320_v0 = vcombine.low %v818_v46, %v822_v47  ;;  %v866_v46 = vld [vmem:[%s19788_s1 + $0x1a40] sm:$0xff] }
 0x17c   :  { %10435 = vmatprep.subr.bf16.mxu1 %v13283_v2  ;;  %v13322_v2 = vcombine.low %v819_v49, %v823_v50  ;;  %v13331_v3 = vcombine.high %v827_v8, %v831_v61  ;;  %v870_v47 = vld [vmem:[%s19788_s1 + $0x1a60] sm:$0xff]  ;;  %v867_v49 = vld [vmem:[%s19788_s1 + $0x1a48] sm:$0xff] }
 0x17d   :  { %v871_v50 = vld [vmem:[%s19788_s1 + $0x1a68] sm:$0xff] }
 0x17e   :  { %9903 = vmatpush1.bf16.msra.mxu0 %v13280_v10  ;;  %v839_v10 = vld [vmem:[%s19788_s1 + $0x1968] sm:$0xff] }
 0x17f   :  { %10436 = vmatpush1.bf16.msra.mxu1 %v13282_v11  ;;  %9904 = vmatprep.subr.bf16.mxu0 %v13289_v12  ;;  %v13328_v11 = vcombine.low %v826_v57, %v830_v60  ;;  %v13330_v12 = vcombine.low %v827_v8, %v831_v61  ;;  %v13339_v1 = vcombine.high %v835_v7, %v839_v10  ;;  %v874_v57 = vld [vmem:[%s19788_s1 + $0x1a80] sm:$0xff]  ;;  %v875_v8 = vld [vmem:[%s19788_s1 + $0x1a88] sm:$0xff] }
 0x180   :  { %10437 = vmatprep.subr.bf16.mxu1 %v13291_v13  ;;  %v13337_v13 = vcombine.high %v834_v5, %v838_v6  ;;  %v878_v60 = vld [vmem:[%s19788_s1 + $0x1aa0] sm:$0xff]  ;;  %v879_v61 = vld [vmem:[%s19788_s1 + $0x1aa8] sm:$0xff] }
 0x182   :  { %9905 = vmatpush1.bf16.msra.mxu0 %v13288_v18  ;;  %v847_v18 = vld [vmem:[%s19788_s1 + $0x19a8] sm:$0xff] }
 0x183   :  { %10438 = vmatpush1.bf16.msra.mxu1 %v13290_v20  ;;  %9915 = vmatprep.subr.bf16.mxu0 %v13297_v21  ;;  %v13336_v20 = vcombine.low %v834_v5, %v838_v6  ;;  %v13338_v21 = vcombine.low %v835_v7, %v839_v10  ;;  %v13347_v24 = vcombine.high %v843_v17, %v847_v18  ;;  %v882_v5 = vld [vmem:[%s19788_s1 + $0x1ac0] sm:$0xff]  ;;  %v883_v7 = vld [vmem:[%s19788_s1 + $0x1ac8] sm:$0xff] }
 0x184   :  { %10448 = vmatprep.subr.bf16.mxu1 %v13299_v22  ;;  %v13345_v22 = vcombine.high %v842_v14, %v846_v16  ;;  %v886_v6 = vld [vmem:[%s19788_s1 + $0x1ae0] sm:$0xff]  ;;  %v887_v10 = vld [vmem:[%s19788_s1 + $0x1ae8] sm:$0xff] }
 0x185   :  { %9907 = vmatmul.mubr.bf16.vlgmr.msra.gmra.mrb[0].mxu0 %v15856_v27 }
 0x186   :  { %9916 = vmatpush1.bf16.msra.mxu0 %v13296_v30  ;;  %10440 = vmatmul.mubr.bf16.vlgmr.msra.gmra.mrb[0].mxu1 %v15856_v27  ;;  %v13344_v30 = vcombine.low %v842_v14, %v846_v16  ;;  %v890_v14 = vld [vmem:[%s19788_s1 + $0x1b00] sm:$0xff] }
 0x187   :  { %10449 = vmatpush1.bf16.msra.mxu1 %v13298_v31  ;;  %9917 = vmatprep.subr.bf16.mxu0 %v13305_v32  ;;  %v13346_v31 = vcombine.low %v843_v17, %v847_v18  ;;  %v13353_v32 = vcombine.high %v850_v25, %v854_v26  ;;  %v894_v16 = vld [vmem:[%s19788_s1 + $0x1b20] sm:$0xff]  ;;  %v891_v17 = vld [vmem:[%s19788_s1 + $0x1b08] sm:$0xff] }
 0x188   :  { %10450 = vmatprep.subr.bf16.mxu1 %v13307_v34  ;;  %9947 = vmatprep.mubr.bf16.mxu0 %v15871_v37  ;;  %v13355_v34 = vcombine.high %v851_v28, %v855_v29  ;;  %v895_v18 = vld [vmem:[%s19788_s1 + $0x1b28] sm:$0xff] }
 0x189   :  { %10480 = vmatprep.mubr.bf16.mxu1 %v15871_v37 }
 0x18a   :  { %9918 = vmatpush1.bf16.msra.mxu0 %v13304_v41  ;;  %v13352_v41 = vcombine.low %v850_v25, %v854_v26  ;;  %v898_v25 = vld [vmem:[%s19788_s1 + $0x1b40] sm:$0xff] }
 0x18b   :  { %10451 = vmatpush1.bf16.msra.mxu1 %v13306_v42  ;;  %9919 = vmatprep.subr.bf16.mxu0 %v13313_v44  ;;  %v13354_v42 = vcombine.low %v851_v28, %v855_v29  ;;  %v13361_v44 = vcombine.high %v858_v35, %v862_v36  ;;  %v902_v26 = vld [vmem:[%s19788_s1 + $0x1b60] sm:$0xff]  ;;  %v899_v28 = vld [vmem:[%s19788_s1 + $0x1b48] sm:$0xff] }
 0x18c   :  { %10452 = vmatprep.subr.bf16.mxu1 %v13315_v45  ;;  %v13363_v45 = vcombine.high %v859_v38, %v863_v39  ;;  %v903_v29 = vld [vmem:[%s19788_s1 + $0x1b68] sm:$0xff] }
 0x18e   :  { %9920 = vmatpush1.bf16.msra.mxu0 %v13312_v52  ;;  %v13360_v52 = vcombine.low %v858_v35, %v862_v36  ;;  %v906_v35 = vld [vmem:[%s19788_s1 + $0x1b80] sm:$0xff] }
 0x18f   :  { %10453 = vmatpush1.bf16.msra.mxu1 %v13314_v54  ;;  %9921 = vmatprep.subr.bf16.mxu0 %v13321_v55  ;;  %v13362_v54 = vcombine.low %v859_v38, %v863_v39  ;;  %v13369_v55 = vcombine.high %v866_v46, %v870_v47  ;;  %v910_v36 = vld [vmem:[%s19788_s1 + $0x1ba0] sm:$0xff]  ;;  %v907_v38 = vld [vmem:[%s19788_s1 + $0x1b88] sm:$0xff] }
 0x190   :  { %10454 = vmatprep.subr.bf16.mxu1 %v13323_v56  ;;  %v13371_v56 = vcombine.high %v867_v49, %v871_v50  ;;  %v911_v39 = vld [vmem:[%s19788_s1 + $0x1ba8] sm:$0xff] }
 0x192   :  { %9922 = vmatpush1.bf16.msra.mxu0 %v13320_v0  ;;  %v13368_v0 = vcombine.low %v866_v46, %v870_v47  ;;  %v914_v46 = vld [vmem:[%s19788_s1 + $0x1bc0] sm:$0xff] }
 0x193   :  { %10455 = vmatpush1.bf16.msra.mxu1 %v13322_v2  ;;  %9923 = vmatprep.subr.bf16.mxu0 %v13329_v63  ;;  %v13370_v2 = vcombine.low %v867_v49, %v871_v50  ;;  %v13377_v63 = vcombine.high %v874_v57, %v878_v60  ;;  %v918_v47 = vld [vmem:[%s19788_s1 + $0x1be0] sm:$0xff]  ;;  %v915_v49 = vld [vmem:[%s19788_s1 + $0x1bc8] sm:$0xff] }
 0x194   :  { %10456 = vmatprep.subr.bf16.mxu1 %v13331_v3  ;;  %v13379_v3 = vcombine.high %v875_v8, %v879_v61  ;;  %v919_v50 = vld [vmem:[%s19788_s1 + $0x1be8] sm:$0xff] }
 0x196   :  { %9924 = vmatpush1.bf16.msra.mxu0 %v13328_v11  ;;  %v13376_v11 = vcombine.low %v874_v57, %v878_v60  ;;  %v922_v57 = vld [vmem:[%s19788_s1 + $0x1c00] sm:$0xff] }
 0x197   :  { %10457 = vmatpush1.bf16.msra.mxu1 %v13330_v12  ;;  %9925 = vmatprep.subr.bf16.mxu0 %v13337_v13  ;;  %v13378_v12 = vcombine.low %v875_v8, %v879_v61  ;;  %v13385_v13 = vcombine.high %v882_v5, %v886_v6  ;;  %v926_v60 = vld [vmem:[%s19788_s1 + $0x1c20] sm:$0xff]  ;;  %v923_v8 = vld [vmem:[%s19788_s1 + $0x1c08] sm:$0xff] }
 0x198   :  { %10458 = vmatprep.subr.bf16.mxu1 %v13339_v1  ;;  %v13387_v1 = vcombine.high %v883_v7, %v887_v10  ;;  %v927_v61 = vld [vmem:[%s19788_s1 + $0x1c28] sm:$0xff] }
 0x19a   :  { %9926 = vmatpush1.bf16.msra.mxu0 %v13336_v20  ;;  %v13384_v20 = vcombine.low %v882_v5, %v886_v6  ;;  %v930_v5 = vld [vmem:[%s19788_s1 + $0x1c40] sm:$0xff] }
 0x19b   :  { %10459 = vmatpush1.bf16.msra.mxu1 %v13338_v21  ;;  %9927 = vmatprep.subr.bf16.mxu0 %v13345_v22  ;;  %v13386_v21 = vcombine.low %v883_v7, %v887_v10  ;;  %v13393_v22 = vcombine.high %v890_v14, %v894_v16  ;;  %v934_v6 = vld [vmem:[%s19788_s1 + $0x1c60] sm:$0xff]  ;;  %v16059_v7 = vrot.slane %v15838_v15, %v14661_v53  ;;  %v931_v10 = vld [vmem:[%s19788_s1 + $0x1c48] sm:$0xff] }
 0x19c   :  { %10460 = vmatprep.subr.bf16.mxu1 %v13347_v24  ;;  %v13395_v24 = vcombine.high %v891_v17, %v895_v18  ;;  %v938_v15 = vld [vmem:[%s19788_s1 + $0x1c80] sm:$0xff] }
 0x19e   :  { %9928 = vmatpush1.bf16.msra.mxu0 %v13344_v30  ;;  %v13392_v30 = vcombine.low %v890_v14, %v894_v16  ;;  %v942_v16 = vld [vmem:[%s19788_s1 + $0x1ca0] sm:$0xff] }
 0x19f   :  { %10461 = vmatpush1.bf16.msra.mxu1 %v13346_v31  ;;  %9929 = vmatprep.subr.bf16.mxu0 %v13353_v32  ;;  %v13394_v31 = vcombine.low %v891_v17, %v895_v18  ;;  %v13401_v32 = vcombine.high %v898_v25, %v902_v26  ;;  %v16075_v17 = vcombine.high %v15871_v37, %v15871_v37  ;;  %v939_v18 = vld [vmem:[%s19788_s1 + $0x1c88] sm:$0xff] }
 0x1a0   :  { %10462 = vmatprep.subr.bf16.mxu1 %v13355_v34  ;;  %v13403_v34 = vcombine.high %v899_v28, %v903_v29 }
 0x1a2   :  { %9930 = vmatpush1.bf16.msra.mxu0 %v13352_v41  ;;  %v13400_v41 = vcombine.low %v898_v25, %v902_v26  ;;  %v946_v26 = vld [vmem:[%s19788_s1 + $0x1cc0] sm:$0xff] }
 0x1a3   :  { %10463 = vmatpush1.bf16.msra.mxu1 %v13354_v42  ;;  %9931 = vmatprep.subr.bf16.mxu0 %v13361_v44  ;;  %v13402_v42 = vcombine.low %v899_v28, %v903_v29  ;;  %v13409_v44 = vcombine.high %v906_v35, %v910_v36  ;;  %v950_v28 = vld [vmem:[%s19788_s1 + $0x1ce0] sm:$0xff]  ;;  %v947_v29 = vld [vmem:[%s19788_s1 + $0x1cc8] sm:$0xff] }
 0x1a4   :  { %10464 = vmatprep.subr.bf16.mxu1 %v13363_v45  ;;  %v13411_v45 = vcombine.high %v907_v38, %v911_v39 }
 0x1a6   :  { %9932 = vmatpush1.bf16.msra.mxu0 %v13360_v52  ;;  %v13408_v52 = vcombine.low %v906_v35, %v910_v36  ;;  %v954_v36 = vld [vmem:[%s19788_s1 + $0x1d00] sm:$0xff] }
 0x1a7   :  { %10465 = vmatpush1.bf16.msra.mxu1 %v13362_v54  ;;  %9933 = vmatprep.subr.bf16.mxu0 %v13369_v55  ;;  %v13410_v54 = vcombine.low %v907_v38, %v911_v39  ;;  %v13417_v55 = vcombine.high %v914_v46, %v918_v47  ;;  %v958_v38 = vld [vmem:[%s19788_s1 + $0x1d20] sm:$0xff]  ;;  %v955_v39 = vld [vmem:[%s19788_s1 + $0x1d08] sm:$0xff] }
 0x1a8   :  { %10466 = vmatprep.subr.bf16.mxu1 %v13371_v56  ;;  %v13419_v56 = vcombine.high %v915_v49, %v919_v50 }
 0x1aa   :  { %9934 = vmatpush1.bf16.msra.mxu0 %v13368_v0  ;;  %v13416_v0 = vcombine.low %v914_v46, %v918_v47  ;;  %v962_v47 = vld [vmem:[%s19788_s1 + $0x1d40] sm:$0xff] }
 0x1ab   :  { %10467 = vmatpush1.bf16.msra.mxu1 %v13370_v2  ;;  %9935 = vmatprep.subr.bf16.mxu0 %v13377_v63  ;;  %v13418_v2 = vcombine.low %v915_v49, %v919_v50  ;;  %v13425_v63 = vcombine.high %v922_v57, %v926_v60  ;;  %v966_v49 = vld [vmem:[%s19788_s1 + $0x1d60] sm:$0xff]  ;;  %v963_v50 = vld [vmem:[%s19788_s1 + $0x1d48] sm:$0xff] }
 0x1ac   :  { %10468 = vmatprep.subr.bf16.mxu1 %v13379_v3  ;;  %v13427_v3 = vcombine.high %v923_v8, %v927_v61 }
 0x1ae   :  { %9936 = vmatpush1.bf16.msra.mxu0 %v13376_v11  ;;  %v935_v11 = vld [vmem:[%s19788_s1 + $0x1c68] sm:$0xff] }
 0x1af   :  { %10469 = vmatpush1.bf16.msra.mxu1 %v13378_v12  ;;  %9937 = vmatprep.subr.bf16.mxu0 %v13385_v13  ;;  %v13424_v12 = vcombine.low %v922_v57, %v926_v60  ;;  %v13426_v13 = vcombine.low %v923_v8, %v927_v61  ;;  %v13435_v14 = vcombine.high %v931_v10, %v935_v11  ;;  %v970_v60 = vld [vmem:[%s19788_s1 + $0x1d80] sm:$0xff]  ;;  %v971_v61 = vld [vmem:[%s19788_s1 + $0x1d88] sm:$0xff] }
 0x1b0   :  { %10470 = vmatprep.subr.bf16.mxu1 %v13387_v1  ;;  %v13433_v1 = vcombine.high %v930_v5, %v934_v6  ;;  %v974_v8 = vld [vmem:[%s19788_s1 + $0x1da0] sm:$0xff] }
 0x1b2   :  { %9938 = vmatpush1.bf16.msra.mxu0 %v13384_v20  ;;  %v943_v20 = vld [vmem:[%s19788_s1 + $0x1ca8] sm:$0xff] }
 0x1b3   :  { %10471 = vmatpush1.bf16.msra.mxu1 %v13386_v21  ;;  %9939 = vmatprep.subr.bf16.mxu0 %v13393_v22  ;;  %v13432_v21 = vcombine.low %v930_v5, %v934_v6  ;;  %v13434_v22 = vcombine.low %v931_v10, %v935_v11  ;;  %v13443_v25 = vcombine.high %v939_v18, %v943_v20  ;;  %v978_v6 = vld [vmem:[%s19788_s1 + $0x1dc0] sm:$0xff]  ;;  %v979_v11 = vld [vmem:[%s19788_s1 + $0x1dc8] sm:$0xff] }
 0x1b4   :  { %10472 = vmatprep.subr.bf16.mxu1 %v13395_v24  ;;  %v13441_v24 = vcombine.high %v938_v15, %v942_v16  ;;  %v982_v10 = vld [vmem:[%s19788_s1 + $0x1de0] sm:$0xff] }
 0x1b6   :  { %9940 = vmatpush1.bf16.msra.mxu0 %v13392_v30  ;;  %v951_v30 = vld [vmem:[%s19788_s1 + $0x1ce8] sm:$0xff] }
 0x1b7   :  { %10473 = vmatpush1.bf16.msra.mxu1 %v13394_v31  ;;  %9941 = vmatprep.subr.bf16.mxu0 %v13401_v32  ;;  %v13440_v31 = vcombine.low %v938_v15, %v942_v16  ;;  %v13442_v32 = vcombine.low %v939_v18, %v943_v20  ;;  %v13451_v35 = vcombine.high %v947_v29, %v951_v30  ;;  %v986_v16 = vld [vmem:[%s19788_s1 + $0x1e00] sm:$0xff]  ;;  %v987_v20 = vld [vmem:[%s19788_s1 + $0x1e08] sm:$0xff] }
 0x1b8   :  { %10474 = vmatprep.subr.bf16.mxu1 %v13403_v34  ;;  %v13449_v34 = vcombine.high %v946_v26, %v950_v28  ;;  %v990_v18 = vld [vmem:[%s19788_s1 + $0x1e20] sm:$0xff] }
 0x1ba   :  { %9942 = vmatpush1.bf16.msra.mxu0 %v13400_v41  ;;  %v959_v41 = vld [vmem:[%s19788_s1 + $0x1d28] sm:$0xff] }
 0x1bb   :  { %10475 = vmatpush1.bf16.msra.mxu1 %v13402_v42  ;;  %9943 = vmatprep.subr.bf16.mxu0 %v13409_v44  ;;  %v13448_v42 = vcombine.low %v946_v26, %v950_v28  ;;  %v13450_v44 = vcombine.low %v947_v29, %v951_v30  ;;  %v13459_v46 = vcombine.high %v955_v39, %v959_v41  ;;  %v994_v28 = vld [vmem:[%s19788_s1 + $0x1e40] sm:$0xff]  ;;  %v995_v30 = vld [vmem:[%s19788_s1 + $0x1e48] sm:$0xff] }
 0x1bc   :  { %10476 = vmatprep.subr.bf16.mxu1 %v13411_v45  ;;  %v13457_v45 = vcombine.high %v954_v36, %v958_v38  ;;  %v998_v29 = vld [vmem:[%s19788_s1 + $0x1e60] sm:$0xff] }
 0x1be   :  { %9944 = vmatpush1.bf16.msra.mxu0 %v13408_v52  ;;  %v967_v52 = vld [vmem:[%s19788_s1 + $0x1d68] sm:$0xff] }
 0x1bf   :  { %10477 = vmatpush1.bf16.msra.mxu1 %v13410_v54  ;;  %9945 = vmatprep.subr.bf16.mxu0 %v13417_v55  ;;  %v13456_v54 = vcombine.low %v954_v36, %v958_v38  ;;  %v13458_v55 = vcombine.low %v955_v39, %v959_v41  ;;  %v13467_v57 = vcombine.high %v963_v50, %v967_v52  ;;  %v1002_v38 = vld [vmem:[%s19788_s1 + $0x1e80] sm:$0xff]  ;;  %v1003_v41 = vld [vmem:[%s19788_s1 + $0x1e88] sm:$0xff] }
 0x1c0   :  { %10478 = vmatprep.subr.bf16.mxu1 %v13419_v56  ;;  %v13465_v56 = vcombine.high %v962_v47, %v966_v49  ;;  %v1006_v39 = vld [vmem:[%s19788_s1 + $0x1ea0] sm:$0xff] }
 0x1c2   :  { %9946 = vmatpush1.bf16.msra.mxu0 %v13416_v0  ;;  %v975_v0 = vld [vmem:[%s19788_s1 + $0x1da8] sm:$0xff] }
 0x1c3   :  { %10479 = vmatpush1.bf16.msra.mxu1 %v13418_v2  ;;  %9956 = vmatprep.subr.bf16.mxu0 %v13425_v63  ;;  %v13464_v2 = vcombine.low %v962_v47, %v966_v49  ;;  %v13466_v63 = vcombine.low %v963_v50, %v967_v52  ;;  %v13475_v5 = vcombine.high %v971_v61, %v975_v0  ;;  %v1010_v49 = vld [vmem:[%s19788_s1 + $0x1ec0] sm:$0xff]  ;;  %v1011_v52 = vld [vmem:[%s19788_s1 + $0x1ec8] sm:$0xff] }
 0x1c4   :  { %10489 = vmatprep.subr.bf16.mxu1 %v13427_v3  ;;  %v13473_v3 = vcombine.high %v970_v60, %v974_v8  ;;  %v1014_v50 = vld [vmem:[%s19788_s1 + $0x1ee0] sm:$0xff] }
 0x1c5   :  { %9948 = vmatmul.mubr.bf16.vlgmr.msra.gmra.mrb[0].mxu0 %v16059_v7 }
 0x1c6   :  { %9957 = vmatpush1.bf16.msra.mxu0 %v13424_v12  ;;  %10481 = vmatmul.mubr.bf16.vlgmr.msra.gmra.mrb[0].mxu1 %v16059_v7  ;;  %v983_v12 = vld [vmem:[%s19788_s1 + $0x1de8] sm:$0xff] }
 0x1c7   :  { %10490 = vmatpush1.bf16.msra.mxu1 %v13426_v13  ;;  %9958 = vmatprep.subr.bf16.mxu0 %v13433_v1  ;;  %v13472_v13 = vcombine.low %v970_v60, %v974_v8  ;;  %v13474_v1 = vcombine.low %v971_v61, %v975_v0  ;;  %v13483_v15 = vcombine.high %v979_v11, %v983_v12  ;;  %v1018_v8 = vld [vmem:[%s19788_s1 + $0x1f00] sm:$0xff]  ;;  %v1019_v0 = vld [vmem:[%s19788_s1 + $0x1f08] sm:$0xff] }
 0x1c8   :  { %10491 = vmatprep.subr.bf16.mxu1 %v13435_v14  ;;  %9988 = vmatprep.mubr.bf16.mxu0 %v16075_v17  ;;  %v13481_v14 = vcombine.high %v978_v6, %v982_v10  ;;  %v1022_v61 = vld [vmem:[%s19788_s1 + $0x1f20] sm:$0xff] }
 0x1c9   :  { %10521 = vmatprep.mubr.bf16.mxu1 %v16075_v17 }
 0x1ca   :  { %9959 = vmatpush1.bf16.msra.mxu0 %v13432_v21  ;;  %v991_v21 = vld [vmem:[%s19788_s1 + $0x1e28] sm:$0xff] }
 0x1cb   :  { %10492 = vmatpush1.bf16.msra.mxu1 %v13434_v22  ;;  %9960 = vmatprep.subr.bf16.mxu0 %v13441_v24  ;;  %v13480_v22 = vcombine.low %v978_v6, %v982_v10  ;;  %v13482_v24 = vcombine.low %v979_v11, %v983_v12  ;;  %v13491_v26 = vcombine.high %v987_v20, %v991_v21  ;;  %v1026_v10 = vld [vmem:[%s19788_s1 + $0x1f40] sm:$0xff]  ;;  %v1027_v12 = vld [vmem:[%s19788_s1 + $0x1f48] sm:$0xff] }
 0x1cc   :  { %10493 = vmatprep.subr.bf16.mxu1 %v13443_v25  ;;  %v13489_v25 = vcombine.high %v986_v16, %v990_v18  ;;  %v1030_v11 = vld [vmem:[%s19788_s1 + $0x1f60] sm:$0xff] }
 0x1ce   :  { %9961 = vmatpush1.bf16.msra.mxu0 %v13440_v31  ;;  %v999_v31 = vld [vmem:[%s19788_s1 + $0x1e68] sm:$0xff] }
 0x1cf   :  { %10494 = vmatpush1.bf16.msra.mxu1 %v13442_v32  ;;  %9962 = vmatprep.subr.bf16.mxu0 %v13449_v34  ;;  %v13488_v32 = vcombine.low %v986_v16, %v990_v18  ;;  %v13490_v34 = vcombine.low %v987_v20, %v991_v21  ;;  %v13499_v36 = vcombine.high %v995_v30, %v999_v31  ;;  %v1034_v18 = vld [vmem:[%s19788_s1 + $0x1f80] sm:$0xff]  ;;  %v1035_v21 = vld [vmem:[%s19788_s1 + $0x1f88] sm:$0xff] }
 0x1d0   :  { %10495 = vmatprep.subr.bf16.mxu1 %v13451_v35  ;;  %v13497_v35 = vcombine.high %v994_v28, %v998_v29  ;;  %v1038_v20 = vld [vmem:[%s19788_s1 + $0x1fa0] sm:$0xff] }
 0x1d2   :  { %9963 = vmatpush1.bf16.msra.mxu0 %v13448_v42  ;;  %v1007_v42 = vld [vmem:[%s19788_s1 + $0x1ea8] sm:$0xff] }
 0x1d3   :  { %10496 = vmatpush1.bf16.msra.mxu1 %v13450_v44  ;;  %9964 = vmatprep.subr.bf16.mxu0 %v13457_v45  ;;  %v13496_v44 = vcombine.low %v994_v28, %v998_v29  ;;  %v13498_v45 = vcombine.low %v995_v30, %v999_v31  ;;  %v13507_v47 = vcombine.high %v1003_v41, %v1007_v42  ;;  %v1042_v29 = vld [vmem:[%s19788_s1 + $0x1fc0] sm:$0xff]  ;;  %v1043_v31 = vld [vmem:[%s19788_s1 + $0x1fc8] sm:$0xff] }
 0x1d4   :  { %10497 = vmatprep.subr.bf16.mxu1 %v13459_v46  ;;  %v13505_v46 = vcombine.high %v1002_v38, %v1006_v39  ;;  %v1046_v30 = vld [vmem:[%s19788_s1 + $0x1fe0] sm:$0xff] }
 0x1d6   :  { %9965 = vmatpush1.bf16.msra.mxu0 %v13456_v54  ;;  %v1015_v54 = vld [vmem:[%s19788_s1 + $0x1ee8] sm:$0xff] }
 0x1d7   :  { %10498 = vmatpush1.bf16.msra.mxu1 %v13458_v55  ;;  %9966 = vmatprep.subr.bf16.mxu0 %v13465_v56  ;;  %v13504_v55 = vcombine.low %v1002_v38, %v1006_v39  ;;  %v13506_v56 = vcombine.low %v1003_v41, %v1007_v42  ;;  %v13515_v60 = vcombine.high %v1011_v52, %v1015_v54  ;;  %v1050_v41 = vld [vmem:[%s19788_s1 + $0x2000] sm:$0xff] }
 0x1d8   :  { %10499 = vmatprep.subr.bf16.mxu1 %v13467_v57  ;;  %v13513_v57 = vcombine.high %v1010_v49, %v1014_v50  ;;  %v13545_v38 = vcombine.high %v1042_v29, %v1046_v30  ;;  %v1054_v42 = vld [vmem:[%s19788_s1 + $0x2020] sm:$0xff] }
 0x1da   :  { %9967 = vmatpush1.bf16.msra.mxu0 %v13464_v2  ;;  %v1023_v2 = vld [vmem:[%s19788_s1 + $0x1f28] sm:$0xff] }
 0x1db   :  { %10500 = vmatpush1.bf16.msra.mxu1 %v13466_v63  ;;  %9968 = vmatprep.subr.bf16.mxu0 %v13473_v3  ;;  %v13512_v63 = vcombine.low %v1010_v49, %v1014_v50  ;;  %v13514_v3 = vcombine.low %v1011_v52, %v1015_v54  ;;  %v13523_v6 = vcombine.high %v1019_v0, %v1023_v2  ;;  %v1058_v54 = vld [vmem:[%s19788_s1 + $0x2040] sm:$0xff] }
 0x1dc   :  { %10501 = vmatprep.subr.bf16.mxu1 %v13475_v5  ;;  %v13521_v5 = vcombine.high %v1018_v8, %v1022_v61  ;;  %v13553_v50 = vcombine.high %v1050_v41, %v1054_v42 }
 0x1de   :  { %9969 = vmatpush1.bf16.msra.mxu0 %v13472_v13  ;;  %v1031_v13 = vld [vmem:[%s19788_s1 + $0x1f68] sm:$0xff] }
 0x1df   :  { %10502 = vmatpush1.bf16.msra.mxu1 %v13474_v1  ;;  %9970 = vmatprep.subr.bf16.mxu0 %v13481_v14  ;;  %v13520_v1 = vcombine.low %v1018_v8, %v1022_v61  ;;  %v13522_v14 = vcombine.low %v1019_v0, %v1023_v2  ;;  %v13531_v16 = vcombine.high %v1027_v12, %v1031_v13  ;;  %v1063_v8 = vld [vmem:[%s19788_s1 + $0x2068] sm:$0xff] }
 0x1e0   :  { %10503 = vmatprep.subr.bf16.mxu1 %v13483_v15  ;;  %v13529_v15 = vcombine.high %v1026_v10, %v1030_v11  ;;  %v13552_v61 = vcombine.low %v1050_v41, %v1054_v42  ;;  %v1091_v41 = vld [vmem:[%s19788_s1 + $0x2148] sm:$0xff] }
 0x1e1   :  { %v1095_v42 = vld [vmem:[%s19788_s1 + $0x2168] sm:$0xff] }
 0x1e2   :  { %9971 = vmatpush1.bf16.msra.mxu0 %v13480_v22  ;;  %v1039_v22 = vld [vmem:[%s19788_s1 + $0x1fa8] sm:$0xff] }
 0x1e3   :  { %10504 = vmatpush1.bf16.msra.mxu1 %v13482_v24  ;;  %9972 = vmatprep.subr.bf16.mxu0 %v13489_v25  ;;  %v13528_v24 = vcombine.low %v1026_v10, %v1030_v11  ;;  %v13530_v25 = vcombine.low %v1027_v12, %v1031_v13  ;;  %v13539_v28 = vcombine.high %v1035_v21, %v1039_v22  ;;  %v1067_v10 = vld [vmem:[%s19788_s1 + $0x2088] sm:$0xff] }
 0x1e4   :  { %10505 = vmatprep.subr.bf16.mxu1 %v13491_v26  ;;  %v13537_v26 = vcombine.high %v1034_v18, %v1038_v20  ;;  %v1071_v11 = vld [vmem:[%s19788_s1 + $0x20a8] sm:$0xff] }
 0x1e6   :  { %9973 = vmatpush1.bf16.msra.mxu0 %v13488_v32  ;;  %v1047_v32 = vld [vmem:[%s19788_s1 + $0x1fe8] sm:$0xff] }
 0x1e7   :  { %10506 = vmatpush1.bf16.msra.mxu1 %v13490_v34  ;;  %9974 = vmatprep.subr.bf16.mxu0 %v13497_v35  ;;  %v16246_v34 = vld [vmem:[%s19787_s0 + $0x10] sm:$0xff]  ;;  %v13536_v35 = vcombine.low %v1034_v18, %v1038_v20  ;;  %v13547_v39 = vcombine.high %v1043_v31, %v1047_v32  ;;  %v13546_v49 = vcombine.low %v1043_v31, %v1047_v32  ;;  %v1075_v18 = vld [vmem:[%s19788_s1 + $0x20c8] sm:$0xff] }
 0x1e8   :  { %10507 = vmatprep.subr.bf16.mxu1 %v13499_v36  ;;  %v13538_v36 = vcombine.low %v1035_v21, %v1039_v22  ;;  %v1079_v20 = vld [vmem:[%s19788_s1 + $0x20e8] sm:$0xff]  ;;  %v13570_v22 = vcombine.low %v1067_v10, %v1071_v11 }
 0x1e9   :  { %v13578_v32 = vcombine.low %v1075_v18, %v1079_v20 }
 0x1ea   :  { %9975 = vmatpush1.bf16.msra.mxu0 %v13496_v44  ;;  %v16256_v44 = vrot.slane %v16246_v34, %v14661_v53 }
 0x1eb   :  { %10508 = vmatpush1.bf16.msra.mxu1 %v13498_v45  ;;  %9976 = vmatprep.subr.bf16.mxu0 %v13505_v46  ;;  %v1051_v45 = vld [vmem:[%s19788_s1 + $0x2008] sm:$0xff] }
 0x1ec   :  { %10509 = vmatprep.subr.bf16.mxu1 %v13507_v47  ;;  %v1055_v46 = vld [vmem:[%s19788_s1 + $0x2028] sm:$0xff]  ;;  %v13544_v47 = vcombine.low %v1042_v29, %v1046_v30 }
 0x1ed   :  { %v13555_v52 = vcombine.high %v1051_v45, %v1055_v46  ;;  %v13554_v0 = vcombine.low %v1051_v45, %v1055_v46  ;;  %v1083_v29 = vld [vmem:[%s19788_s1 + $0x2108] sm:$0xff] }
 0x1ee   :  { %9977 = vmatpush1.bf16.msra.mxu0 %v13504_v55  ;;  %v1062_v55 = vld [vmem:[%s19788_s1 + $0x2060] sm:$0xff]  ;;  %v1087_v30 = vld [vmem:[%s19788_s1 + $0x2128] sm:$0xff] }
 0x1ef   :  { %10510 = vmatpush1.bf16.msra.mxu1 %v13506_v56  ;;  %9978 = vmatprep.subr.bf16.mxu0 %v13513_v57  ;;  %v1753_v56 = vcombine.high %v16256_v44, %v16256_v44  ;;  %v16274_v57 = vcombine.high %v16059_v7, %v16059_v7  ;;  %v13561_v2 = vcombine.high %v1058_v54, %v1062_v55 }
 0x1f0   :  { %10511 = vmatprep.subr.bf16.mxu1 %v13515_v60  ;;  %v1059_v60 = vld [vmem:[%s19788_s1 + $0x2048] sm:$0xff]  ;;  %v13560_v12 = vcombine.low %v1058_v54, %v1062_v55  ;;  %v13586_v46 = vcombine.low %v1083_v29, %v1087_v30 }
 0x1f1   :  { %v13562_v13 = vcombine.low %v1059_v60, %v1063_v8  ;;  %v1099_v54 = vld [vmem:[%s19788_s1 + $0x2188] sm:$0xff] }
 0x1f2   :  { %9979 = vmatpush1.bf16.msra.mxu0 %v13512_v63  ;;  %v13563_v63 = vcombine.high %v1059_v60, %v1063_v8  ;;  %v1103_v55 = vld [vmem:[%s19788_s1 + $0x21a8] sm:$0xff]  ;;  %v13594_v60 = vcombine.low %v1091_v41, %v1095_v42 }
 0x1f3   :  { %10512 = vmatpush1.bf16.msra.mxu1 %v13514_v3  ;;  %9980 = vmatprep.subr.bf16.mxu0 %v13521_v5  ;;  %v1066_v3 = vld [vmem:[%s19788_s1 + $0x2080] sm:$0xff] }
 0x1f4   :  { %10513 = vmatprep.subr.bf16.mxu1 %v13523_v6  ;;  %v1070_v5 = vld [vmem:[%s19788_s1 + $0x20a0] sm:$0xff]  ;;  %v16289_v6 = vrot.slane %v1753_v56, %v14661_v53 }
 0x1f5   :  { %v13568_v21 = vcombine.low %v1066_v3, %v1070_v5 }
 0x1f6   :  { %9981 = vmatpush1.bf16.msra.mxu0 %v13520_v1  ;;  %v13569_v1 = vcombine.high %v1066_v3, %v1070_v5  ;;  %v1111_v3 = vld [vmem:[%s19788_s1 + $0x21e8] sm:$0xff] }
 0x1f7   :  { %10514 = vmatpush1.bf16.msra.mxu1 %v13522_v14  ;;  %9982 = vmatprep.subr.bf16.mxu0 %v13529_v15  ;;  %v13571_v14 = vcombine.high %v1067_v10, %v1071_v11  ;;  %v1074_v15 = vld [vmem:[%s19788_s1 + $0x20c0] sm:$0xff]  ;;  %v13602_v10 = vcombine.low %v1099_v54, %v1103_v55 }
 0x1f8   :  { %10515 = vmatprep.subr.bf16.mxu1 %v13531_v16  ;;  %v1078_v16 = vld [vmem:[%s19788_s1 + $0x20e0] sm:$0xff] }
 0x1f9   :  { %v13576_v31 = vcombine.low %v1074_v15, %v1078_v16 }
 0x1fa   :  { %9983 = vmatpush1.bf16.msra.mxu0 %v13528_v24  ;;  %v13577_v24 = vcombine.high %v1074_v15, %v1078_v16  ;;  %v1119_v15 = vld [vmem:[%s19788_s1 + $0x2228] sm:$0xff] }
 0x1fb   :  { %10516 = vmatpush1.bf16.msra.mxu1 %v13530_v25  ;;  %9984 = vmatprep.subr.bf16.mxu0 %v13537_v26  ;;  %v13579_v25 = vcombine.high %v1075_v18, %v1079_v20  ;;  %v1082_v26 = vld [vmem:[%s19788_s1 + $0x2100] sm:$0xff] }
 0x1fc   :  { %10517 = vmatprep.subr.bf16.mxu1 %v13539_v28  ;;  %v1086_v28 = vld [vmem:[%s19788_s1 + $0x2120] sm:$0xff] }
 0x1fd   :  { %v13584_v45 = vcombine.low %v1082_v26, %v1086_v28 }
 0x1fe   :  { %9985 = vmatpush1.bf16.msra.mxu0 %v13536_v35  ;;  %v13585_v35 = vcombine.high %v1082_v26, %v1086_v28  ;;  %v1127_v26 = vld [vmem:[%s19788_s1 + $0x2268] sm:$0xff] }
 0x1ff   :  { %10518 = vmatpush1.bf16.msra.mxu1 %v13538_v36  ;;  %9986 = vmatprep.subr.bf16.mxu0 %v13545_v38  ;;  %v13587_v36 = vcombine.high %v1083_v29, %v1087_v30  ;;  %v1090_v38 = vld [vmem:[%s19788_s1 + $0x2140] sm:$0xff] }
 0x200   :  { %10519 = vmatprep.subr.bf16.mxu1 %v13547_v39  ;;  %v1094_v39 = vld [vmem:[%s19788_s1 + $0x2160] sm:$0xff] }
 0x201   :  { %v13592_v56 = vcombine.low %v1090_v38, %v1094_v39 }
 0x202   :  { %9987 = vmatpush1.bf16.msra.mxu0 %v13544_v47  ;;  %v13593_v47 = vcombine.high %v1090_v38, %v1094_v39  ;;  %v1135_v38 = vld [vmem:[%s19788_s1 + $0x22a8] sm:$0xff] }
 0x203   :  { %10520 = vmatpush1.bf16.msra.mxu1 %v13546_v49  ;;  %9997 = vmatprep.subr.bf16.mxu0 %v13553_v50  ;;  %v13595_v49 = vcombine.high %v1091_v41, %v1095_v42  ;;  %v1098_v50 = vld [vmem:[%s19788_s1 + $0x2180] sm:$0xff] }
 0x204   :  { %10530 = vmatprep.subr.bf16.mxu1 %v13555_v52  ;;  %v1102_v52 = vld [vmem:[%s19788_s1 + $0x21a0] sm:$0xff] }
 0x205   :  { %9989 = vmatmul.mubr.bf16.vlgmr.msra.gmra.mrb[0].mxu0 %v16274_v57  ;;  %v13601_v8 = vcombine.high %v1098_v50, %v1102_v52  ;;  %v13600_v5 = vcombine.low %v1098_v50, %v1102_v52  ;;  %v1143_v50 = vld [vmem:[%s19788_s1 + $0x22e8] sm:$0xff] }
 0x206   :  { %9998 = vmatpush1.bf16.msra.mxu0 %v13552_v61  ;;  %10522 = vmatmul.mubr.bf16.vlgmr.msra.gmra.mrb[0].mxu1 %v16274_v57  ;;  %v13603_v61 = vcombine.high %v1099_v54, %v1103_v55 }
 0x207   :  { %10531 = vmatpush1.bf16.msra.mxu1 %v13554_v0  ;;  %9999 = vmatprep.subr.bf16.mxu0 %v13561_v2  ;;  %v1106_v0 = vld [vmem:[%s19788_s1 + $0x21c0] sm:$0xff] }
 0x208   :  { %10532 = vmatprep.subr.bf16.mxu1 %v13563_v63  ;;  %10029 = vmatprep.mubr.bf16.mxu0 %v16289_v6  ;;  %v1110_v2 = vld [vmem:[%s19788_s1 + $0x21e0] sm:$0xff]  ;;  %v1107_v63 = vld [vmem:[%s19788_s1 + $0x21c8] sm:$0xff] }
 0x209   :  { %10562 = vmatprep.mubr.bf16.mxu1 %v16289_v6  ;;  %v13609_v11 = vcombine.high %v1106_v0, %v1110_v2  ;;  %v13608_v16 = vcombine.low %v1106_v0, %v1110_v2  ;;  %v13610_v18 = vcombine.low %v1107_v63, %v1111_v3  ;;  %v1151_v0 = vld [vmem:[%s19788_s1 + $0x2328] sm:$0xff] }
 0x20a   :  { %10000 = vmatpush1.bf16.msra.mxu0 %v13560_v12  ;;  %v13611_v12 = vcombine.high %v1107_v63, %v1111_v3 }
 0x20b   :  { %10533 = vmatpush1.bf16.msra.mxu1 %v13562_v13  ;;  %10001 = vmatprep.subr.bf16.mxu0 %v13569_v1  ;;  %v1114_v13 = vld [vmem:[%s19788_s1 + $0x2200] sm:$0xff] }
 0x20c   :  { %10534 = vmatprep.subr.bf16.mxu1 %v13571_v14  ;;  %v1118_v1 = vld [vmem:[%s19788_s1 + $0x2220] sm:$0xff]  ;;  %v1115_v14 = vld [vmem:[%s19788_s1 + $0x2208] sm:$0xff] }
 0x20d   :  { %v13617_v20 = vcombine.high %v1114_v13, %v1118_v1  ;;  %v13616_v28 = vcombine.low %v1114_v13, %v1118_v1  ;;  %v13618_v29 = vcombine.low %v1115_v14, %v1119_v15  ;;  %v1159_v13 = vld [vmem:[%s19788_s1 + $0x2368] sm:$0xff] }
 0x20e   :  { %10002 = vmatpush1.bf16.msra.mxu0 %v13568_v21  ;;  %v13619_v21 = vcombine.high %v1115_v14, %v1119_v15 }
 0x20f   :  { %10535 = vmatpush1.bf16.msra.mxu1 %v13570_v22  ;;  %10003 = vmatprep.subr.bf16.mxu0 %v13577_v24  ;;  %v1122_v22 = vld [vmem:[%s19788_s1 + $0x2240] sm:$0xff] }
 0x210   :  { %10536 = vmatprep.subr.bf16.mxu1 %v13579_v25  ;;  %v1126_v24 = vld [vmem:[%s19788_s1 + $0x2260] sm:$0xff]  ;;  %v1123_v25 = vld [vmem:[%s19788_s1 + $0x2248] sm:$0xff] }
 0x211   :  { %v13625_v30 = vcombine.high %v1122_v22, %v1126_v24  ;;  %v13624_v39 = vcombine.low %v1122_v22, %v1126_v24  ;;  %v13626_v41 = vcombine.low %v1123_v25, %v1127_v26  ;;  %v1167_v22 = vld [vmem:[%s19788_s1 + $0x23a8] sm:$0xff] }
 0x212   :  { %10004 = vmatpush1.bf16.msra.mxu0 %v13576_v31  ;;  %v13627_v31 = vcombine.high %v1123_v25, %v1127_v26 }
 0x213   :  { %10537 = vmatpush1.bf16.msra.mxu1 %v13578_v32  ;;  %10005 = vmatprep.subr.bf16.mxu0 %v13585_v35  ;;  %v1130_v32 = vld [vmem:[%s19788_s1 + $0x2280] sm:$0xff] }
 0x214   :  { %10538 = vmatprep.subr.bf16.mxu1 %v13587_v36  ;;  %v1134_v35 = vld [vmem:[%s19788_s1 + $0x22a0] sm:$0xff]  ;;  %v1131_v36 = vld [vmem:[%s19788_s1 + $0x2288] sm:$0xff] }
 0x215   :  { %v13633_v42 = vcombine.high %v1130_v32, %v1134_v35  ;;  %v13632_v52 = vcombine.low %v1130_v32, %v1134_v35  ;;  %v13634_v54 = vcombine.low %v1131_v36, %v1135_v38  ;;  %v1175_v32 = vld [vmem:[%s19788_s1 + $0x23e8] sm:$0xff] }
 0x216   :  { %10006 = vmatpush1.bf16.msra.mxu0 %v13584_v45  ;;  %v13635_v45 = vcombine.high %v1131_v36, %v1135_v38 }
 0x217   :  { %10539 = vmatpush1.bf16.msra.mxu1 %v13586_v46  ;;  %10007 = vmatprep.subr.bf16.mxu0 %v13593_v47  ;;  %v1138_v46 = vld [vmem:[%s19788_s1 + $0x22c0] sm:$0xff] }
 0x218   :  { %10540 = vmatprep.subr.bf16.mxu1 %v13595_v49  ;;  %v1142_v47 = vld [vmem:[%s19788_s1 + $0x22e0] sm:$0xff]  ;;  %v1139_v49 = vld [vmem:[%s19788_s1 + $0x22c8] sm:$0xff] }
 0x219   :  { %v13641_v55 = vcombine.high %v1138_v46, %v1142_v47  ;;  %v13640_v2 = vcombine.low %v1138_v46, %v1142_v47  ;;  %v13642_v63 = vcombine.low %v1139_v49, %v1143_v50  ;;  %v1183_v46 = vld [vmem:[%s19788_s1 + $0x2428] sm:$0xff] }
 0x21a   :  { %10008 = vmatpush1.bf16.msra.mxu0 %v13592_v56  ;;  %v13643_v56 = vcombine.high %v1139_v49, %v1143_v50 }
 0x21b   :  { %10541 = vmatpush1.bf16.msra.mxu1 %v13594_v60  ;;  %10009 = vmatprep.subr.bf16.mxu0 %v13601_v8  ;;  %v1146_v60 = vld [vmem:[%s19788_s1 + $0x2300] sm:$0xff] }
 0x21c   :  { %10542 = vmatprep.subr.bf16.mxu1 %v13603_v61  ;;  %v1150_v8 = vld [vmem:[%s19788_s1 + $0x2320] sm:$0xff]  ;;  %v1147_v61 = vld [vmem:[%s19788_s1 + $0x2308] sm:$0xff] }
 0x21d   :  { %v13649_v3 = vcombine.high %v1146_v60, %v1150_v8  ;;  %v13648_v1 = vcombine.low %v1146_v60, %v1150_v8  ;;  %v13650_v14 = vcombine.low %v1147_v61, %v1151_v0  ;;  %v1187_v60 = vld [vmem:[%s19788_s1 + $0x2448] sm:$0xff] }
 0x21e   :  { %10010 = vmatpush1.bf16.msra.mxu0 %v13600_v5  ;;  %v13651_v5 = vcombine.high %v1147_v61, %v1151_v0  ;;  %v1191_v8 = vld [vmem:[%s19788_s1 + $0x2468] sm:$0xff] }
 0x21f   :  { %10543 = vmatpush1.bf16.msra.mxu1 %v13602_v10  ;;  %10011 = vmatprep.subr.bf16.mxu0 %v13609_v11  ;;  %v1154_v10 = vld [vmem:[%s19788_s1 + $0x2340] sm:$0xff] }
 0x220   :  { %10544 = vmatprep.subr.bf16.mxu1 %v13611_v12  ;;  %v1158_v11 = vld [vmem:[%s19788_s1 + $0x2360] sm:$0xff]  ;;  %v1155_v12 = vld [vmem:[%s19788_s1 + $0x2348] sm:$0xff] }
 0x221   :  { %v13657_v15 = vcombine.high %v1154_v10, %v1158_v11  ;;  %v13656_v24 = vcombine.low %v1154_v10, %v1158_v11  ;;  %v13658_v25 = vcombine.low %v1155_v12, %v1159_v13  ;;  %v1195_v10 = vld [vmem:[%s19788_s1 + $0x2488] sm:$0xff] }
 0x222   :  { %10012 = vmatpush1.bf16.msra.mxu0 %v13608_v16  ;;  %v13659_v16 = vcombine.high %v1155_v12, %v1159_v13  ;;  %v1199_v11 = vld [vmem:[%s19788_s1 + $0x24a8] sm:$0xff]  ;;  %v13690_v13 = vcombine.low %v1187_v60, %v1191_v8 }
 0x223   :  { %10545 = vmatpush1.bf16.msra.mxu1 %v13610_v18  ;;  %10013 = vmatprep.subr.bf16.mxu0 %v13617_v20  ;;  %v1162_v18 = vld [vmem:[%s19788_s1 + $0x2380] sm:$0xff] }
 0x224   :  { %10546 = vmatprep.subr.bf16.mxu1 %v13619_v21  ;;  %v1166_v20 = vld [vmem:[%s19788_s1 + $0x23a0] sm:$0xff]  ;;  %v1163_v21 = vld [vmem:[%s19788_s1 + $0x2388] sm:$0xff] }
 0x225   :  { %v13665_v26 = vcombine.high %v1162_v18, %v1166_v20  ;;  %v13664_v35 = vcombine.low %v1162_v18, %v1166_v20  ;;  %v13666_v36 = vcombine.low %v1163_v21, %v1167_v22  ;;  %v1203_v18 = vld [vmem:[%s19788_s1 + $0x24c8] sm:$0xff] }
 0x226   :  { %10014 = vmatpush1.bf16.msra.mxu0 %v13616_v28  ;;  %v13667_v28 = vcombine.high %v1163_v21, %v1167_v22  ;;  %v1207_v20 = vld [vmem:[%s19788_s1 + $0x24e8] sm:$0xff]  ;;  %v13698_v22 = vcombine.low %v1195_v10, %v1199_v11 }
 0x227   :  { %10547 = vmatpush1.bf16.msra.mxu1 %v13618_v29  ;;  %10015 = vmatprep.subr.bf16.mxu0 %v13625_v30  ;;  %v1170_v29 = vld [vmem:[%s19788_s1 + $0x23c0] sm:$0xff] }
 0x228   :  { %10548 = vmatprep.subr.bf16.mxu1 %v13627_v31  ;;  %v1174_v30 = vld [vmem:[%s19788_s1 + $0x23e0] sm:$0xff]  ;;  %v1171_v31 = vld [vmem:[%s19788_s1 + $0x23c8] sm:$0xff] }
 0x229   :  { %v13673_v38 = vcombine.high %v1170_v29, %v1174_v30  ;;  %v13672_v47 = vcombine.low %v1170_v29, %v1174_v30  ;;  %v13674_v49 = vcombine.low %v1171_v31, %v1175_v32  ;;  %v1211_v29 = vld [vmem:[%s19788_s1 + $0x2508] sm:$0xff] }
 0x22a   :  { %10016 = vmatpush1.bf16.msra.mxu0 %v13624_v39  ;;  %v13675_v39 = vcombine.high %v1171_v31, %v1175_v32  ;;  %v1215_v30 = vld [vmem:[%s19788_s1 + $0x2528] sm:$0xff]  ;;  %v13706_v32 = vcombine.low %v1203_v18, %v1207_v20 }
 0x22b   :  { %10549 = vmatpush1.bf16.msra.mxu1 %v13626_v41  ;;  %10017 = vmatprep.subr.bf16.mxu0 %v13633_v42  ;;  %v1178_v41 = vld [vmem:[%s19788_s1 + $0x2400] sm:$0xff] }
 0x22c   :  { %10550 = vmatprep.subr.bf16.mxu1 %v13635_v45  ;;  %v1182_v42 = vld [vmem:[%s19788_s1 + $0x2420] sm:$0xff]  ;;  %v1179_v45 = vld [vmem:[%s19788_s1 + $0x2408] sm:$0xff] }
 0x22d   :  { %v13681_v50 = vcombine.high %v1178_v41, %v1182_v42  ;;  %v13680_v61 = vcombine.low %v1178_v41, %v1182_v42  ;;  %v13682_v0 = vcombine.low %v1179_v45, %v1183_v46  ;;  %v1219_v41 = vld [vmem:[%s19788_s1 + $0x2548] sm:$0xff] }
 0x22e   :  { %10018 = vmatpush1.bf16.msra.mxu0 %v13632_v52  ;;  %v13683_v52 = vcombine.high %v1179_v45, %v1183_v46  ;;  %v1223_v42 = vld [vmem:[%s19788_s1 + $0x2568] sm:$0xff]  ;;  %v13714_v46 = vcombine.low %v1211_v29, %v1215_v30 }
 0x22f   :  { %10551 = vmatpush1.bf16.msra.mxu1 %v13634_v54  ;;  %10019 = vmatprep.subr.bf16.mxu0 %v13641_v55  ;;  %v1186_v54 = vld [vmem:[%s19788_s1 + $0x2440] sm:$0xff] }
 0x230   :  { %10552 = vmatprep.subr.bf16.mxu1 %v13643_v56  ;;  %v1190_v55 = vld [vmem:[%s19788_s1 + $0x2460] sm:$0xff]  ;;  %v16477_v56 = vrot.slane %v16256_v44, %v14661_v53 }
 0x231   :  { %v1194_v44 = vld [vmem:[%s19788_s1 + $0x2480] sm:$0xff]  ;;  %v13688_v12 = vcombine.low %v1186_v54, %v1190_v55 }
 0x232   :  { %10020 = vmatpush1.bf16.msra.mxu0 %v13640_v2  ;;  %v13689_v2 = vcombine.high %v1186_v54, %v1190_v55  ;;  %v1227_v54 = vld [vmem:[%s19788_s1 + $0x2588] sm:$0xff] }
 0x233   :  { %10553 = vmatpush1.bf16.msra.mxu1 %v13642_v63  ;;  %10021 = vmatprep.subr.bf16.mxu0 %v13649_v3  ;;  %v13691_v63 = vcombine.high %v1187_v60, %v1191_v8  ;;  %v1198_v3 = vld [vmem:[%s19788_s1 + $0x24a0] sm:$0xff]  ;;  %v1231_v55 = vld [vmem:[%s19788_s1 + $0x25a8] sm:$0xff]  ;;  %v13722_v8 = vcombine.low %v1219_v41, %v1223_v42 }
 0x234   :  { %10554 = vmatprep.subr.bf16.mxu1 %v13651_v5  ;;  %v16493_v5 = vcombine.high %v16289_v6, %v16289_v6  ;;  %v13696_v21 = vcombine.low %v1194_v44, %v1198_v3 }
 0x236   :  { %10022 = vmatpush1.bf16.msra.mxu0 %v13648_v1  ;;  %v13697_v1 = vcombine.high %v1194_v44, %v1198_v3  ;;  %v1235_v44 = vld [vmem:[%s19788_s1 + $0x25c8] sm:$0xff] }
 0x237   :  { %10555 = vmatpush1.bf16.msra.mxu1 %v13650_v14  ;;  %10023 = vmatprep.subr.bf16.mxu0 %v13657_v15  ;;  %v13699_v14 = vcombine.high %v1195_v10, %v1199_v11  ;;  %v1202_v15 = vld [vmem:[%s19788_s1 + $0x24c0] sm:$0xff]  ;;  %v1239_v3 = vld [vmem:[%s19788_s1 + $0x25e8] sm:$0xff]  ;;  %v13730_v11 = vcombine.low %v1227_v54, %v1231_v55 }
 0x238   :  { %10556 = vmatprep.subr.bf16.mxu1 %v13659_v16  ;;  %v1206_v16 = vld [vmem:[%s19788_s1 + $0x24e0] sm:$0xff] }
 0x239   :  { %v13704_v31 = vcombine.low %v1202_v15, %v1206_v16 }
 0x23a   :  { %10024 = vmatpush1.bf16.msra.mxu0 %v13656_v24  ;;  %v13705_v24 = vcombine.high %v1202_v15, %v1206_v16  ;;  %v1243_v15 = vld [vmem:[%s19788_s1 + $0x2608] sm:$0xff] }
 0x23b   :  { %10557 = vmatpush1.bf16.msra.mxu1 %v13658_v25  ;;  %10025 = vmatprep.subr.bf16.mxu0 %v13665_v26  ;;  %v13707_v25 = vcombine.high %v1203_v18, %v1207_v20  ;;  %v1210_v26 = vld [vmem:[%s19788_s1 + $0x2500] sm:$0xff]  ;;  %v1247_v16 = vld [vmem:[%s19788_s1 + $0x2628] sm:$0xff]  ;;  %v13738_v20 = vcombine.low %v1235_v44, %v1239_v3 }
 0x23c   :  { %10558 = vmatprep.subr.bf16.mxu1 %v13667_v28  ;;  %v1214_v28 = vld [vmem:[%s19788_s1 + $0x2520] sm:$0xff] }
 0x23d   :  { %v13712_v45 = vcombine.low %v1210_v26, %v1214_v28 }
 0x23e   :  { %10026 = vmatpush1.bf16.msra.mxu0 %v13664_v35  ;;  %v13713_v35 = vcombine.high %v1210_v26, %v1214_v28  ;;  %v1251_v26 = vld [vmem:[%s19788_s1 + $0x2648] sm:$0xff] }
 0x23f   :  { %10559 = vmatpush1.bf16.msra.mxu1 %v13666_v36  ;;  %10027 = vmatprep.subr.bf16.mxu0 %v13673_v38  ;;  %v13715_v36 = vcombine.high %v1211_v29, %v1215_v30  ;;  %v1218_v38 = vld [vmem:[%s19788_s1 + $0x2540] sm:$0xff]  ;;  %v1255_v28 = vld [vmem:[%s19788_s1 + $0x2668] sm:$0xff]  ;;  %v13746_v30 = vcombine.low %v1243_v15, %v1247_v16 }
 0x240   :  { %10560 = vmatprep.subr.bf16.mxu1 %v13675_v39  ;;  %v1222_v39 = vld [vmem:[%s19788_s1 + $0x2560] sm:$0xff] }
 0x241   :  { %v13720_v60 = vcombine.low %v1218_v38, %v1222_v39 }
 0x242   :  { %10028 = vmatpush1.bf16.msra.mxu0 %v13672_v47  ;;  %v13721_v47 = vcombine.high %v1218_v38, %v1222_v39  ;;  %v1259_v38 = vld [vmem:[%s19788_s1 + $0x2688] sm:$0xff] }
 0x243   :  { %10561 = vmatpush1.bf16.msra.mxu1 %v13674_v49  ;;  %10038 = vmatprep.subr.bf16.mxu0 %v13681_v50  ;;  %v13723_v49 = vcombine.high %v1219_v41, %v1223_v42  ;;  %v1226_v50 = vld [vmem:[%s19788_s1 + $0x2580] sm:$0xff]  ;;  %v1263_v39 = vld [vmem:[%s19788_s1 + $0x26a8] sm:$0xff]  ;;  %v13754_v42 = vcombine.low %v1251_v26, %v1255_v28 }
 0x244   :  { %10571 = vmatprep.subr.bf16.mxu1 %v13683_v52  ;;  %v1230_v52 = vld [vmem:[%s19788_s1 + $0x25a0] sm:$0xff] }
 0x245   :  { %10030 = vmatmul.mubr.bf16.vlgmr.msra.gmra.mrb[0].mxu0 %v16477_v56  ;;  %v13728_v10 = vcombine.low %v1226_v50, %v1230_v52 }
 0x246   :  { %10039 = vmatpush1.bf16.msra.mxu0 %v13680_v61  ;;  %10563 = vmatmul.mubr.bf16.vlgmr.msra.gmra.mrb[0].mxu1 %v16477_v56  ;;  %v13729_v61 = vcombine.high %v1226_v50, %v1230_v52  ;;  %v1267_v50 = vld [vmem:[%s19788_s1 + $0x26c8] sm:$0xff] }
 0x247   :  { %10572 = vmatpush1.bf16.msra.mxu1 %v13682_v0  ;;  %10040 = vmatprep.subr.bf16.mxu0 %v13689_v2  ;;  %v13731_v0 = vcombine.high %v1227_v54, %v1231_v55  ;;  %v1234_v2 = vld [vmem:[%s19788_s1 + $0x25c0] sm:$0xff]  ;;  %v1271_v52 = vld [vmem:[%s19788_s1 + $0x26e8] sm:$0xff]  ;;  %v13762_v55 = vcombine.low %v1259_v38, %v1263_v39 }
 0x248   :  { %10573 = vmatprep.subr.bf16.mxu1 %v13691_v63  ;;  %10070 = vmatprep.mubr.bf16.mxu0 %v16493_v5  ;;  %v1238_v63 = vld [vmem:[%s19788_s1 + $0x25e0] sm:$0xff] }
 0x249   :  { %10603 = vmatprep.mubr.bf16.mxu1 %v16493_v5  ;;  %v13736_v18 = vcombine.low %v1234_v2, %v1238_v63 }
 0x24a   :  { %10041 = vmatpush1.bf16.msra.mxu0 %v13688_v12  ;;  %v13737_v12 = vcombine.high %v1234_v2, %v1238_v63  ;;  %v1275_v2 = vld [vmem:[%s19788_s1 + $0x2708] sm:$0xff] }
 0x24b   :  { %10574 = vmatpush1.bf16.msra.mxu1 %v13690_v13  ;;  %10042 = vmatprep.subr.bf16.mxu0 %v13697_v1  ;;  %v13739_v13 = vcombine.high %v1235_v44, %v1239_v3  ;;  %v1242_v1 = vld [vmem:[%s19788_s1 + $0x2600] sm:$0xff]  ;;  %v1279_v63 = vld [vmem:[%s19788_s1 + $0x2728] sm:$0xff]  ;;  %v13770_v3 = vcombine.low %v1267_v50, %v1271_v52 }
 0x24c   :  { %10575 = vmatprep.subr.bf16.mxu1 %v13699_v14  ;;  %v1246_v14 = vld [vmem:[%s19788_s1 + $0x2620] sm:$0xff] }
 0x24d   :  { %v13744_v29 = vcombine.low %v1242_v1, %v1246_v14 }
 0x24e   :  { %10043 = vmatpush1.bf16.msra.mxu0 %v13696_v21  ;;  %v13745_v21 = vcombine.high %v1242_v1, %v1246_v14  ;;  %v1283_v1 = vld [vmem:[%s19788_s1 + $0x2748] sm:$0xff] }
 0x24f   :  { %10576 = vmatpush1.bf16.msra.mxu1 %v13698_v22  ;;  %10044 = vmatprep.subr.bf16.mxu0 %v13705_v24  ;;  %v13747_v22 = vcombine.high %v1243_v15, %v1247_v16  ;;  %v1250_v24 = vld [vmem:[%s19788_s1 + $0x2640] sm:$0xff]  ;;  %v1287_v14 = vld [vmem:[%s19788_s1 + $0x2768] sm:$0xff]  ;;  %v13778_v16 = vcombine.low %v1275_v2, %v1279_v63 }
 0x250   :  { %10577 = vmatprep.subr.bf16.mxu1 %v13707_v25  ;;  %v1254_v25 = vld [vmem:[%s19788_s1 + $0x2660] sm:$0xff] }
 0x251   :  { %v13752_v41 = vcombine.low %v1250_v24, %v1254_v25 }
 0x252   :  { %10045 = vmatpush1.bf16.msra.mxu0 %v13704_v31  ;;  %v13753_v31 = vcombine.high %v1250_v24, %v1254_v25  ;;  %v1291_v24 = vld [vmem:[%s19788_s1 + $0x2788] sm:$0xff] }
 0x253   :  { %10578 = vmatpush1.bf16.msra.mxu1 %v13706_v32  ;;  %10046 = vmatprep.subr.bf16.mxu0 %v13713_v35  ;;  %v13755_v32 = vcombine.high %v1251_v26, %v1255_v28  ;;  %v1258_v35 = vld [vmem:[%s19788_s1 + $0x2680] sm:$0xff]  ;;  %v1295_v25 = vld [vmem:[%s19788_s1 + $0x27a8] sm:$0xff]  ;;  %v13786_v28 = vcombine.low %v1283_v1, %v1287_v14 }
 0x254   :  { %10579 = vmatprep.subr.bf16.mxu1 %v13715_v36  ;;  %v1262_v36 = vld [vmem:[%s19788_s1 + $0x26a0] sm:$0xff] }
 0x255   :  { %v13760_v54 = vcombine.low %v1258_v35, %v1262_v36 }
 0x256   :  { %10047 = vmatpush1.bf16.msra.mxu0 %v13712_v45  ;;  %v13761_v45 = vcombine.high %v1258_v35, %v1262_v36  ;;  %v1738_v35 = vcombine.high %v16246_v34, %v16246_v34  ;;  %v1299_v36 = vld [vmem:[%s19788_s1 + $0x27c8] sm:$0xff]  ;;  %v1306_v34 = vld [vmem:[%s19788_s1 + $0x2800] sm:$0xff] }
 0x257   :  { %10580 = vmatpush1.bf16.msra.mxu1 %v13714_v46  ;;  %10048 = vmatprep.subr.bf16.mxu0 %v13721_v47  ;;  %v13763_v46 = vcombine.high %v1259_v38, %v1263_v39  ;;  %v1266_v47 = vld [vmem:[%s19788_s1 + $0x26c0] sm:$0xff]  ;;  %v1303_v38 = vld [vmem:[%s19788_s1 + $0x27e8] sm:$0xff] }
 0x258   :  { %10581 = vmatprep.subr.bf16.mxu1 %v13723_v49  ;;  %v1270_v49 = vld [vmem:[%s19788_s1 + $0x26e0] sm:$0xff] }
 0x259   :  { %v13768_v44 = vcombine.low %v1266_v47, %v1270_v49 }
 0x25a   :  { %10049 = vmatpush1.bf16.msra.mxu0 %v13720_v60  ;;  %v13769_v60 = vcombine.high %v1266_v47, %v1270_v49  ;;  %v16670_v47 = vrot.slane %v1738_v35, %v14661_v53  ;;  %v1307_v49 = vld [vmem:[%s19788_s1 + $0x2808] sm:$0xff]  ;;  %v1338_v35 = vld [vmem:[%s19788_s1 + $0x2900] sm:$0xff] }
 0x25b   :  { %10582 = vmatpush1.bf16.msra.mxu1 %v13722_v8  ;;  %10050 = vmatprep.subr.bf16.mxu0 %v13729_v61  ;;  %v13771_v8 = vcombine.high %v1267_v50, %v1271_v52  ;;  %v1274_v61 = vld [vmem:[%s19788_s1 + $0x2700] sm:$0xff]  ;;  %v1311_v50 = vld [vmem:[%s19788_s1 + $0x2828] sm:$0xff] }
 0x25c   :  { %10583 = vmatprep.subr.bf16.mxu1 %v13731_v0  ;;  %v1278_v0 = vld [vmem:[%s19788_s1 + $0x2720] sm:$0xff] }
 0x25d   :  { %v13776_v15 = vcombine.low %v1274_v61, %v1278_v0 }
 0x25e   :  { %10051 = vmatpush1.bf16.msra.mxu0 %v13728_v10  ;;  %v13777_v10 = vcombine.high %v1274_v61, %v1278_v0  ;;  %v1318_v61 = vld [vmem:[%s19788_s1 + $0x2860] sm:$0xff]  ;;  %v1754_v0 = vcombine.high %v16670_v47, %v16670_v47 }
 0x25f   :  { %10584 = vmatpush1.bf16.msra.mxu1 %v13730_v11  ;;  %10052 = vmatprep.subr.bf16.mxu0 %v13737_v12  ;;  %v13779_v11 = vcombine.high %v1275_v2, %v1279_v63  ;;  %v1282_v12 = vld [vmem:[%s19788_s1 + $0x2740] sm:$0xff]  ;;  %v16688_v2 = vcombine.high %v16477_v56, %v16477_v56  ;;  %v1315_v63 = vld [vmem:[%s19788_s1 + $0x2848] sm:$0xff] }
 0x260   :  { %10585 = vmatprep.subr.bf16.mxu1 %v13739_v13  ;;  %v1286_v13 = vld [vmem:[%s19788_s1 + $0x2760] sm:$0xff] }
 0x261   :  { %v13784_v26 = vcombine.low %v1282_v12, %v1286_v13 }
 0x262   :  { %10053 = vmatpush1.bf16.msra.mxu0 %v13736_v18  ;;  %v13785_v18 = vcombine.high %v1282_v12, %v1286_v13  ;;  %v1322_v13 = vld [vmem:[%s19788_s1 + $0x2880] sm:$0xff] }
 0x263   :  { %10586 = vmatpush1.bf16.msra.mxu1 %v13738_v20  ;;  %10054 = vmatprep.subr.bf16.mxu0 %v13745_v21  ;;  %v13787_v20 = vcombine.high %v1283_v1, %v1287_v14  ;;  %v1290_v21 = vld [vmem:[%s19788_s1 + $0x2780] sm:$0xff]  ;;  %v16703_v14 = vrot.slane %v1754_v0, %v14661_v53 }
 0x264   :  { %10587 = vmatprep.subr.bf16.mxu1 %v13747_v22  ;;  %v1294_v22 = vld [vmem:[%s19788_s1 + $0x27a0] sm:$0xff] }
 0x265   :  { %v13792_v39 = vcombine.low %v1290_v21, %v1294_v22  ;;  %v1326_v1 = vld [vmem:[%s19788_s1 + $0x28a0] sm:$0xff] }
 0x266   :  { %10055 = vmatpush1.bf16.msra.mxu0 %v13744_v29  ;;  %v13793_v29 = vcombine.high %v1290_v21, %v1294_v22  ;;  %v13825_v21 = vcombine.high %v1322_v13, %v1326_v1  ;;  %v1358_v0 = vld [vmem:[%s19788_s1 + $0x29a0] sm:$0xff] }
 0x267   :  { %10588 = vmatpush1.bf16.msra.mxu1 %v13746_v30  ;;  %10056 = vmatprep.subr.bf16.mxu0 %v13753_v31  ;;  %v13795_v30 = vcombine.high %v1291_v24, %v1295_v25  ;;  %v1298_v31 = vld [vmem:[%s19788_s1 + $0x27c0] sm:$0xff] }
 0x268   :  { %10589 = vmatprep.subr.bf16.mxu1 %v13755_v32  ;;  %v1302_v32 = vld [vmem:[%s19788_s1 + $0x27e0] sm:$0xff] }
 0x269   :  { %v13800_v52 = vcombine.low %v1298_v31, %v1302_v32 }
 0x26a   :  { %10057 = vmatpush1.bf16.msra.mxu0 %v13752_v41  ;;  %v13794_v41 = vcombine.low %v1291_v24, %v1295_v25  ;;  %v1330_v24 = vld [vmem:[%s19788_s1 + $0x28c0] sm:$0xff] }
 0x26b   :  { %10590 = vmatpush1.bf16.msra.mxu1 %v13754_v42  ;;  %10058 = vmatprep.subr.bf16.mxu0 %v13761_v45  ;;  %v13801_v42 = vcombine.high %v1298_v31, %v1302_v32  ;;  %v13803_v45 = vcombine.high %v1299_v36, %v1303_v38  ;;  %v1334_v25 = vld [vmem:[%s19788_s1 + $0x28e0] sm:$0xff] }
 0x26c   :  { %10591 = vmatprep.subr.bf16.mxu1 %v13763_v46  ;;  %v1310_v46 = vld [vmem:[%s19788_s1 + $0x2820] sm:$0xff]  ;;  %v13833_v31 = vcombine.high %v1330_v24, %v1334_v25 }
 0x26e   :  { %10059 = vmatpush1.bf16.msra.mxu0 %v13760_v54  ;;  %v13802_v54 = vcombine.low %v1299_v36, %v1303_v38  ;;  %v1342_v36 = vld [vmem:[%s19788_s1 + $0x2920] sm:$0xff]  ;;  %v1339_v38 = vld [vmem:[%s19788_s1 + $0x2908] sm:$0xff] }
 0x26f   :  { %10592 = vmatpush1.bf16.msra.mxu1 %v13762_v55  ;;  %10060 = vmatprep.subr.bf16.mxu0 %v13769_v60  ;;  %v13809_v55 = vcombine.high %v1306_v34, %v1310_v46  ;;  %v13811_v60 = vcombine.high %v1307_v49, %v1311_v50 }
 0x270   :  { %10593 = vmatprep.subr.bf16.mxu1 %v13771_v8  ;;  %v1314_v8 = vld [vmem:[%s19788_s1 + $0x2840] sm:$0xff] }
 0x272   :  { %10061 = vmatpush1.bf16.msra.mxu0 %v13768_v44  ;;  %v1319_v44 = vld [vmem:[%s19788_s1 + $0x2868] sm:$0xff] }
 0x273   :  { %10594 = vmatpush1.bf16.msra.mxu1 %v13770_v3  ;;  %10062 = vmatprep.subr.bf16.mxu0 %v13777_v10  ;;  %v13808_v3 = vcombine.low %v1306_v34, %v1310_v46  ;;  %v13810_v10 = vcombine.low %v1307_v49, %v1311_v50  ;;  %v13819_v12 = vcombine.high %v1315_v63, %v1319_v44  ;;  %v1346_v46 = vld [vmem:[%s19788_s1 + $0x2940] sm:$0xff]  ;;  %v1347_v50 = vld [vmem:[%s19788_s1 + $0x2948] sm:$0xff] }
 0x274   :  { %10595 = vmatprep.subr.bf16.mxu1 %v13779_v11  ;;  %v13817_v11 = vcombine.high %v1314_v8, %v1318_v61  ;;  %v1350_v49 = vld [vmem:[%s19788_s1 + $0x2960] sm:$0xff] }
 0x276   :  { %10063 = vmatpush1.bf16.msra.mxu0 %v13776_v15  ;;  %v1323_v15 = vld [vmem:[%s19788_s1 + $0x2888] sm:$0xff] }
 0x277   :  { %10596 = vmatpush1.bf16.msra.mxu1 %v13778_v16  ;;  %10064 = vmatprep.subr.bf16.mxu0 %v13785_v18  ;;  %v1327_v16 = vld [vmem:[%s19788_s1 + $0x28a8] sm:$0xff]  ;;  %v13816_v18 = vcombine.low %v1314_v8, %v1318_v61  ;;  %v1354_v61 = vld [vmem:[%s19788_s1 + $0x2980] sm:$0xff] }
 0x278   :  { %10597 = vmatprep.subr.bf16.mxu1 %v13787_v20  ;;  %v13818_v20 = vcombine.low %v1315_v63, %v1319_v44  ;;  %v13827_v22 = vcombine.high %v1323_v15, %v1327_v16  ;;  %v1355_v63 = vld [vmem:[%s19788_s1 + $0x2988] sm:$0xff] }
 0x279   :  { %v1359_v44 = vld [vmem:[%s19788_s1 + $0x29a8] sm:$0xff] }
 0x27a   :  { %10065 = vmatpush1.bf16.msra.mxu0 %v13784_v26  ;;  %v1331_v26 = vld [vmem:[%s19788_s1 + $0x28c8] sm:$0xff] }
 0x27b   :  { %10598 = vmatpush1.bf16.msra.mxu1 %v13786_v28  ;;  %10066 = vmatprep.subr.bf16.mxu0 %v13793_v29  ;;  %v1335_v28 = vld [vmem:[%s19788_s1 + $0x28e8] sm:$0xff]  ;;  %v13824_v29 = vcombine.low %v1322_v13, %v1326_v1  ;;  %v1362_v13 = vld [vmem:[%s19788_s1 + $0x29c0] sm:$0xff] }
 0x27c   :  { %10599 = vmatprep.subr.bf16.mxu1 %v13795_v30  ;;  %v13826_v30 = vcombine.low %v1323_v15, %v1327_v16  ;;  %v13835_v32 = vcombine.high %v1331_v26, %v1335_v28  ;;  %v1366_v1 = vld [vmem:[%s19788_s1 + $0x29e0] sm:$0xff]  ;;  %v1363_v15 = vld [vmem:[%s19788_s1 + $0x29c8] sm:$0xff] }
 0x27d   :  { %v1367_v16 = vld [vmem:[%s19788_s1 + $0x29e8] sm:$0xff] }
 0x27e   :  { %10067 = vmatpush1.bf16.msra.mxu0 %v13792_v39  ;;  %v1343_v39 = vld [vmem:[%s19788_s1 + $0x2928] sm:$0xff] }
 0x27f   :  { %10600 = vmatpush1.bf16.msra.mxu1 %v13794_v41  ;;  %10068 = vmatprep.subr.bf16.mxu0 %v13801_v42  ;;  %v13832_v41 = vcombine.low %v1330_v24, %v1334_v25  ;;  %v13834_v42 = vcombine.low %v1331_v26, %v1335_v28  ;;  %v13843_v34 = vcombine.high %v1339_v38, %v1343_v39  ;;  %v1370_v24 = vld [vmem:[%s19788_s1 + $0x2a00] sm:$0xff]  ;;  %v1371_v26 = vld [vmem:[%s19788_s1 + $0x2a08] sm:$0xff] }
 0x280   :  { %10601 = vmatprep.subr.bf16.mxu1 %v13803_v45  ;;  %v13841_v45 = vcombine.high %v1338_v35, %v1342_v36  ;;  %v1374_v25 = vld [vmem:[%s19788_s1 + $0x2a20] sm:$0xff]  ;;  %v1375_v28 = vld [vmem:[%s19788_s1 + $0x2a28] sm:$0xff] }
 0x282   :  { %10069 = vmatpush1.bf16.msra.mxu0 %v13800_v52  ;;  %v1351_v52 = vld [vmem:[%s19788_s1 + $0x2968] sm:$0xff] }
 0x283   :  { %10602 = vmatpush1.bf16.msra.mxu1 %v13802_v54  ;;  %10079 = vmatprep.subr.bf16.mxu0 %v13809_v55  ;;  %v13840_v54 = vcombine.low %v1338_v35, %v1342_v36  ;;  %v13842_v55 = vcombine.low %v1339_v38, %v1343_v39  ;;  %v13851_v8 = vcombine.high %v1347_v50, %v1351_v52  ;;  %v1378_v35 = vld [vmem:[%s19788_s1 + $0x2a40] sm:$0xff]  ;;  %v1379_v38 = vld [vmem:[%s19788_s1 + $0x2a48] sm:$0xff] }
 0x284   :  { %10612 = vmatprep.subr.bf16.mxu1 %v13811_v60  ;;  %v13849_v60 = vcombine.high %v1346_v46, %v1350_v49  ;;  %v1382_v36 = vld [vmem:[%s19788_s1 + $0x2a60] sm:$0xff]  ;;  %v1383_v39 = vld [vmem:[%s19788_s1 + $0x2a68] sm:$0xff] }
 0x285   :  { %10071 = vmatmul.mubr.bf16.vlgmr.msra.gmra.mrb[0].mxu0 %v16688_v2 }
 0x286   :  { %10080 = vmatpush1.bf16.msra.mxu0 %v13808_v3  ;;  %10604 = vmatmul.mubr.bf16.vlgmr.msra.gmra.mrb[0].mxu1 %v16688_v2  ;;  %v13848_v3 = vcombine.low %v1346_v46, %v1350_v49  ;;  %v1386_v46 = vld [vmem:[%s19788_s1 + $0x2a80] sm:$0xff] }
 0x287   :  { %10613 = vmatpush1.bf16.msra.mxu1 %v13810_v10  ;;  %10081 = vmatprep.subr.bf16.mxu0 %v13817_v11  ;;  %v13850_v10 = vcombine.low %v1347_v50, %v1351_v52  ;;  %v13857_v11 = vcombine.high %v1354_v61, %v1358_v0  ;;  %v1390_v49 = vld [vmem:[%s19788_s1 + $0x2aa0] sm:$0xff]  ;;  %v1387_v50 = vld [vmem:[%s19788_s1 + $0x2a88] sm:$0xff] }
 0x288   :  { %10614 = vmatprep.subr.bf16.mxu1 %v13819_v12  ;;  %10111 = vmatprep.mubr.bf16.mxu0 %v16703_v14  ;;  %v13859_v12 = vcombine.high %v1355_v63, %v1359_v44  ;;  %v1391_v52 = vld [vmem:[%s19788_s1 + $0x2aa8] sm:$0xff] }
 0x289   :  { %10644 = vmatprep.mubr.bf16.mxu1 %v16703_v14 }
 0x28a   :  { %10082 = vmatpush1.bf16.msra.mxu0 %v13816_v18  ;;  %v13856_v18 = vcombine.low %v1354_v61, %v1358_v0  ;;  %v1394_v61 = vld [vmem:[%s19788_s1 + $0x2ac0] sm:$0xff] }
 0x28b   :  { %10615 = vmatpush1.bf16.msra.mxu1 %v13818_v20  ;;  %10083 = vmatprep.subr.bf16.mxu0 %v13825_v21  ;;  %v13858_v20 = vcombine.low %v1355_v63, %v1359_v44  ;;  %v13865_v21 = vcombine.high %v1362_v13, %v1366_v1  ;;  %v1398_v0 = vld [vmem:[%s19788_s1 + $0x2ae0] sm:$0xff]  ;;  %v1395_v63 = vld [vmem:[%s19788_s1 + $0x2ac8] sm:$0xff] }
 0x28c   :  { %10616 = vmatprep.subr.bf16.mxu1 %v13827_v22  ;;  %v13867_v22 = vcombine.high %v1363_v15, %v1367_v16  ;;  %v1399_v44 = vld [vmem:[%s19788_s1 + $0x2ae8] sm:$0xff] }
 0x28e   :  { %10084 = vmatpush1.bf16.msra.mxu0 %v13824_v29  ;;  %v13864_v29 = vcombine.low %v1362_v13, %v1366_v1  ;;  %v1402_v13 = vld [vmem:[%s19788_s1 + $0x2b00] sm:$0xff] }
 0x28f   :  { %10617 = vmatpush1.bf16.msra.mxu1 %v13826_v30  ;;  %10085 = vmatprep.subr.bf16.mxu0 %v13833_v31  ;;  %v13866_v30 = vcombine.low %v1363_v15, %v1367_v16  ;;  %v13873_v31 = vcombine.high %v1370_v24, %v1374_v25  ;;  %v1406_v1 = vld [vmem:[%s19788_s1 + $0x2b20] sm:$0xff]  ;;  %v1403_v15 = vld [vmem:[%s19788_s1 + $0x2b08] sm:$0xff] }
 0x290   :  { %10618 = vmatprep.subr.bf16.mxu1 %v13835_v32  ;;  %v13875_v32 = vcombine.high %v1371_v26, %v1375_v28  ;;  %v1407_v16 = vld [vmem:[%s19788_s1 + $0x2b28] sm:$0xff] }
 0x292   :  { %10086 = vmatpush1.bf16.msra.mxu0 %v13832_v41  ;;  %v13872_v41 = vcombine.low %v1370_v24, %v1374_v25  ;;  %v1410_v24 = vld [vmem:[%s19788_s1 + $0x2b40] sm:$0xff] }
 0x293   :  { %10619 = vmatpush1.bf16.msra.mxu1 %v13834_v42  ;;  %10087 = vmatprep.subr.bf16.mxu0 %v13841_v45  ;;  %v13874_v42 = vcombine.low %v1371_v26, %v1375_v28  ;;  %v13881_v45 = vcombine.high %v1378_v35, %v1382_v36  ;;  %v1414_v25 = vld [vmem:[%s19788_s1 + $0x2b60] sm:$0xff]  ;;  %v1411_v26 = vld [vmem:[%s19788_s1 + $0x2b48] sm:$0xff] }
 0x294   :  { %10620 = vmatprep.subr.bf16.mxu1 %v13843_v34  ;;  %v13883_v34 = vcombine.high %v1379_v38, %v1383_v39  ;;  %v1415_v28 = vld [vmem:[%s19788_s1 + $0x2b68] sm:$0xff] }
 0x296   :  { %10088 = vmatpush1.bf16.msra.mxu0 %v13840_v54  ;;  %v13880_v54 = vcombine.low %v1378_v35, %v1382_v36  ;;  %v1418_v35 = vld [vmem:[%s19788_s1 + $0x2b80] sm:$0xff] }
 0x297   :  { %10621 = vmatpush1.bf16.msra.mxu1 %v13842_v55  ;;  %10089 = vmatprep.subr.bf16.mxu0 %v13849_v60  ;;  %v13882_v55 = vcombine.low %v1379_v38, %v1383_v39  ;;  %v13889_v60 = vcombine.high %v1386_v46, %v1390_v49  ;;  %v1422_v36 = vld [vmem:[%s19788_s1 + $0x2ba0] sm:$0xff]  ;;  %v1419_v38 = vld [vmem:[%s19788_s1 + $0x2b88] sm:$0xff] }
 0x298   :  { %10622 = vmatprep.subr.bf16.mxu1 %v13851_v8  ;;  %v13891_v8 = vcombine.high %v1387_v50, %v1391_v52  ;;  %v1423_v39 = vld [vmem:[%s19788_s1 + $0x2ba8] sm:$0xff] }
 0x29a   :  { %10090 = vmatpush1.bf16.msra.mxu0 %v13848_v3  ;;  %v13888_v3 = vcombine.low %v1386_v46, %v1390_v49  ;;  %v1426_v46 = vld [vmem:[%s19788_s1 + $0x2bc0] sm:$0xff] }
 0x29b   :  { %10623 = vmatpush1.bf16.msra.mxu1 %v13850_v10  ;;  %10091 = vmatprep.subr.bf16.mxu0 %v13857_v11  ;;  %v13890_v10 = vcombine.low %v1387_v50, %v1391_v52  ;;  %v13897_v11 = vcombine.high %v1394_v61, %v1398_v0  ;;  %v1430_v49 = vld [vmem:[%s19788_s1 + $0x2be0] sm:$0xff]  ;;  %v1427_v50 = vld [vmem:[%s19788_s1 + $0x2bc8] sm:$0xff] }
 0x29c   :  { %10624 = vmatprep.subr.bf16.mxu1 %v13859_v12  ;;  %v13899_v12 = vcombine.high %v1395_v63, %v1399_v44  ;;  %v1431_v52 = vld [vmem:[%s19788_s1 + $0x2be8] sm:$0xff] }
 0x29e   :  { %10092 = vmatpush1.bf16.msra.mxu0 %v13856_v18  ;;  %v13896_v18 = vcombine.low %v1394_v61, %v1398_v0  ;;  %v1434_v61 = vld [vmem:[%s19788_s1 + $0x2c00] sm:$0xff] }
 0x29f   :  { %10625 = vmatpush1.bf16.msra.mxu1 %v13858_v20  ;;  %10093 = vmatprep.subr.bf16.mxu0 %v13865_v21  ;;  %v13898_v20 = vcombine.low %v1395_v63, %v1399_v44  ;;  %v13905_v21 = vcombine.high %v1402_v13, %v1406_v1  ;;  %v1438_v0 = vld [vmem:[%s19788_s1 + $0x2c20] sm:$0xff]  ;;  %v1435_v63 = vld [vmem:[%s19788_s1 + $0x2c08] sm:$0xff] }
 0x2a0   :  { %10626 = vmatprep.subr.bf16.mxu1 %v13867_v22  ;;  %v13907_v22 = vcombine.high %v1403_v15, %v1407_v16  ;;  %v1439_v44 = vld [vmem:[%s19788_s1 + $0x2c28] sm:$0xff] }
 0x2a2   :  { %10094 = vmatpush1.bf16.msra.mxu0 %v13864_v29  ;;  %v13904_v29 = vcombine.low %v1402_v13, %v1406_v1  ;;  %v1442_v13 = vld [vmem:[%s19788_s1 + $0x2c40] sm:$0xff] }
 0x2a3   :  { %10627 = vmatpush1.bf16.msra.mxu1 %v13866_v30  ;;  %10095 = vmatprep.subr.bf16.mxu0 %v13873_v31  ;;  %v13906_v30 = vcombine.low %v1403_v15, %v1407_v16  ;;  %v13913_v31 = vcombine.high %v1410_v24, %v1414_v25  ;;  %v1446_v1 = vld [vmem:[%s19788_s1 + $0x2c60] sm:$0xff]  ;;  %v16891_v15 = vrot.slane %v16670_v47, %v14661_v53  ;;  %v1443_v16 = vld [vmem:[%s19788_s1 + $0x2c48] sm:$0xff] }
 0x2a4   :  { %10628 = vmatprep.subr.bf16.mxu1 %v13875_v32  ;;  %v13915_v32 = vcombine.high %v1411_v26, %v1415_v28  ;;  %v1450_v47 = vld [vmem:[%s19788_s1 + $0x2c80] sm:$0xff] }
 0x2a6   :  { %10096 = vmatpush1.bf16.msra.mxu0 %v13872_v41  ;;  %v13912_v41 = vcombine.low %v1410_v24, %v1414_v25  ;;  %v1454_v25 = vld [vmem:[%s19788_s1 + $0x2ca0] sm:$0xff] }
 0x2a7   :  { %10629 = vmatpush1.bf16.msra.mxu1 %v13874_v42  ;;  %10097 = vmatprep.subr.bf16.mxu0 %v13881_v45  ;;  %v13914_v42 = vcombine.low %v1411_v26, %v1415_v28  ;;  %v13921_v45 = vcombine.high %v1418_v35, %v1422_v36  ;;  %v16907_v26 = vcombine.high %v16703_v14, %v16703_v14  ;;  %v1451_v28 = vld [vmem:[%s19788_s1 + $0x2c88] sm:$0xff] }
 0x2a8   :  { %10630 = vmatprep.subr.bf16.mxu1 %v13883_v34  ;;  %v13923_v34 = vcombine.high %v1419_v38, %v1423_v39 }
 0x2aa   :  { %10098 = vmatpush1.bf16.msra.mxu0 %v13880_v54  ;;  %v13920_v54 = vcombine.low %v1418_v35, %v1422_v36  ;;  %v1458_v36 = vld [vmem:[%s19788_s1 + $0x2cc0] sm:$0xff] }
 0x2ab   :  { %10631 = vmatpush1.bf16.msra.mxu1 %v13882_v55  ;;  %10099 = vmatprep.subr.bf16.mxu0 %v13889_v60  ;;  %v13922_v55 = vcombine.low %v1419_v38, %v1423_v39  ;;  %v13929_v60 = vcombine.high %v1426_v46, %v1430_v49  ;;  %v1462_v38 = vld [vmem:[%s19788_s1 + $0x2ce0] sm:$0xff]  ;;  %v1459_v39 = vld [vmem:[%s19788_s1 + $0x2cc8] sm:$0xff] }
 0x2ac   :  { %10632 = vmatprep.subr.bf16.mxu1 %v13891_v8  ;;  %v13931_v8 = vcombine.high %v1427_v50, %v1431_v52 }
 0x2ae   :  { %10100 = vmatpush1.bf16.msra.mxu0 %v13888_v3  ;;  %v13928_v3 = vcombine.low %v1426_v46, %v1430_v49  ;;  %v1466_v49 = vld [vmem:[%s19788_s1 + $0x2d00] sm:$0xff] }
 0x2af   :  { %10633 = vmatpush1.bf16.msra.mxu1 %v13890_v10  ;;  %10101 = vmatprep.subr.bf16.mxu0 %v13897_v11  ;;  %v13930_v10 = vcombine.low %v1427_v50, %v1431_v52  ;;  %v13937_v11 = vcombine.high %v1434_v61, %v1438_v0  ;;  %v1470_v50 = vld [vmem:[%s19788_s1 + $0x2d20] sm:$0xff]  ;;  %v1467_v52 = vld [vmem:[%s19788_s1 + $0x2d08] sm:$0xff] }
 0x2b0   :  { %10634 = vmatprep.subr.bf16.mxu1 %v13899_v12  ;;  %v13939_v12 = vcombine.high %v1435_v63, %v1439_v44 }
 0x2b2   :  { %10102 = vmatpush1.bf16.msra.mxu0 %v13896_v18  ;;  %v1447_v18 = vld [vmem:[%s19788_s1 + $0x2c68] sm:$0xff] }
 0x2b3   :  { %10635 = vmatpush1.bf16.msra.mxu1 %v13898_v20  ;;  %10103 = vmatprep.subr.bf16.mxu0 %v13905_v21  ;;  %v13936_v20 = vcombine.low %v1434_v61, %v1438_v0  ;;  %v13938_v21 = vcombine.low %v1435_v63, %v1439_v44  ;;  %v13947_v24 = vcombine.high %v1443_v16, %v1447_v18  ;;  %v1474_v0 = vld [vmem:[%s19788_s1 + $0x2d40] sm:$0xff]  ;;  %v1475_v44 = vld [vmem:[%s19788_s1 + $0x2d48] sm:$0xff] }
 0x2b4   :  { %10636 = vmatprep.subr.bf16.mxu1 %v13907_v22  ;;  %v13945_v22 = vcombine.high %v1442_v13, %v1446_v1  ;;  %v1478_v63 = vld [vmem:[%s19788_s1 + $0x2d60] sm:$0xff] }
 0x2b6   :  { %10104 = vmatpush1.bf16.msra.mxu0 %v13904_v29  ;;  %v1455_v29 = vld [vmem:[%s19788_s1 + $0x2ca8] sm:$0xff] }
 0x2b7   :  { %10637 = vmatpush1.bf16.msra.mxu1 %v13906_v30  ;;  %10105 = vmatprep.subr.bf16.mxu0 %v13913_v31  ;;  %v13944_v30 = vcombine.low %v1442_v13, %v1446_v1  ;;  %v13946_v31 = vcombine.low %v1443_v16, %v1447_v18  ;;  %v13955_v35 = vcombine.high %v1451_v28, %v1455_v29  ;;  %v1482_v1 = vld [vmem:[%s19788_s1 + $0x2d80] sm:$0xff]  ;;  %v1483_v18 = vld [vmem:[%s19788_s1 + $0x2d88] sm:$0xff] }
 0x2b8   :  { %10638 = vmatprep.subr.bf16.mxu1 %v13915_v32  ;;  %v13953_v32 = vcombine.high %v1450_v47, %v1454_v25  ;;  %v1486_v16 = vld [vmem:[%s19788_s1 + $0x2da0] sm:$0xff] }
 0x2ba   :  { %10106 = vmatpush1.bf16.msra.mxu0 %v13912_v41  ;;  %v1463_v41 = vld [vmem:[%s19788_s1 + $0x2ce8] sm:$0xff] }
 0x2bb   :  { %10639 = vmatpush1.bf16.msra.mxu1 %v13914_v42  ;;  %10107 = vmatprep.subr.bf16.mxu0 %v13921_v45  ;;  %v13952_v42 = vcombine.low %v1450_v47, %v1454_v25  ;;  %v13954_v45 = vcombine.low %v1451_v28, %v1455_v29  ;;  %v13963_v46 = vcombine.high %v1459_v39, %v1463_v41  ;;  %v1490_v25 = vld [vmem:[%s19788_s1 + $0x2dc0] sm:$0xff]  ;;  %v1491_v29 = vld [vmem:[%s19788_s1 + $0x2dc8] sm:$0xff] }
 0x2bc   :  { %10640 = vmatprep.subr.bf16.mxu1 %v13923_v34  ;;  %v13961_v34 = vcombine.high %v1458_v36, %v1462_v38  ;;  %v1494_v28 = vld [vmem:[%s19788_s1 + $0x2de0] sm:$0xff] }
 0x2be   :  { %10108 = vmatpush1.bf16.msra.mxu0 %v13920_v54  ;;  %v1471_v54 = vld [vmem:[%s19788_s1 + $0x2d28] sm:$0xff] }
 0x2bf   :  { %10641 = vmatpush1.bf16.msra.mxu1 %v13922_v55  ;;  %10109 = vmatprep.subr.bf16.mxu0 %v13929_v60  ;;  %v13960_v55 = vcombine.low %v1458_v36, %v1462_v38  ;;  %v13962_v60 = vcombine.low %v1459_v39, %v1463_v41  ;;  %v13971_v61 = vcombine.high %v1467_v52, %v1471_v54  ;;  %v1498_v38 = vld [vmem:[%s19788_s1 + $0x2e00] sm:$0xff]  ;;  %v1499_v41 = vld [vmem:[%s19788_s1 + $0x2e08] sm:$0xff] }
 0x2c0   :  { %10642 = vmatprep.subr.bf16.mxu1 %v13931_v8  ;;  %v13969_v8 = vcombine.high %v1466_v49, %v1470_v50  ;;  %v1502_v39 = vld [vmem:[%s19788_s1 + $0x2e20] sm:$0xff] }
 0x2c2   :  { %10110 = vmatpush1.bf16.msra.mxu0 %v13928_v3  ;;  %v1479_v3 = vld [vmem:[%s19788_s1 + $0x2d68] sm:$0xff] }
 0x2c3   :  { %10643 = vmatpush1.bf16.msra.mxu1 %v13930_v10  ;;  %10120 = vmatprep.subr.bf16.mxu0 %v13937_v11  ;;  %v13968_v10 = vcombine.low %v1466_v49, %v1470_v50  ;;  %v13970_v11 = vcombine.low %v1467_v52, %v1471_v54  ;;  %v13979_v13 = vcombine.high %v1475_v44, %v1479_v3  ;;  %v1506_v50 = vld [vmem:[%s19788_s1 + $0x2e40] sm:$0xff]  ;;  %v1507_v54 = vld [vmem:[%s19788_s1 + $0x2e48] sm:$0xff] }
 0x2c4   :  { %10653 = vmatprep.subr.bf16.mxu1 %v13939_v12  ;;  %v13977_v12 = vcombine.high %v1474_v0, %v1478_v63  ;;  %v1510_v52 = vld [vmem:[%s19788_s1 + $0x2e60] sm:$0xff] }
 0x2c5   :  { %10112 = vmatmul.mubr.bf16.vlgmr.msra.gmra.mrb[0].mxu0 %v16891_v15 }
 0x2c6   :  { %10121 = vmatpush1.bf16.msra.mxu0 %v13936_v20  ;;  %10645 = vmatmul.mubr.bf16.vlgmr.msra.gmra.mrb[0].mxu1 %v16891_v15  ;;  %v1487_v20 = vld [vmem:[%s19788_s1 + $0x2da8] sm:$0xff] }
 0x2c7   :  { %10654 = vmatpush1.bf16.msra.mxu1 %v13938_v21  ;;  %10122 = vmatprep.subr.bf16.mxu0 %v13945_v22  ;;  %v13976_v21 = vcombine.low %v1474_v0, %v1478_v63  ;;  %v13978_v22 = vcombine.low %v1475_v44, %v1479_v3  ;;  %v13987_v47 = vcombine.high %v1483_v18, %v1487_v20  ;;  %v1514_v63 = vld [vmem:[%s19788_s1 + $0x2e80] sm:$0xff]  ;;  %v1515_v3 = vld [vmem:[%s19788_s1 + $0x2e88] sm:$0xff] }
 0x2c8   :  { %10655 = vmatprep.subr.bf16.mxu1 %v13947_v24  ;;  %10152 = vmatprep.mubr.bf16.mxu0 %v16907_v26  ;;  %v13985_v24 = vcombine.high %v1482_v1, %v1486_v16  ;;  %v1518_v44 = vld [vmem:[%s19788_s1 + $0x2ea0] sm:$0xff] }
 0x2c9   :  { %10685 = vmatprep.mubr.bf16.mxu1 %v16907_v26 }
 0x2ca   :  { %10123 = vmatpush1.bf16.msra.mxu0 %v13944_v30  ;;  %v1495_v30 = vld [vmem:[%s19788_s1 + $0x2de8] sm:$0xff] }
 0x2cb   :  { %10656 = vmatpush1.bf16.msra.mxu1 %v13946_v31  ;;  %10124 = vmatprep.subr.bf16.mxu0 %v13953_v32  ;;  %v13984_v31 = vcombine.low %v1482_v1, %v1486_v16  ;;  %v13986_v32 = vcombine.low %v1483_v18, %v1487_v20  ;;  %v13995_v36 = vcombine.high %v1491_v29, %v1495_v30  ;;  %v1522_v16 = vld [vmem:[%s19788_s1 + $0x2ec0] sm:$0xff]  ;;  %v1523_v20 = vld [vmem:[%s19788_s1 + $0x2ec8] sm:$0xff] }
 0x2cc   :  { %10657 = vmatprep.subr.bf16.mxu1 %v13955_v35  ;;  %v13993_v35 = vcombine.high %v1490_v25, %v1494_v28  ;;  %v1526_v18 = vld [vmem:[%s19788_s1 + $0x2ee0] sm:$0xff] }
 0x2ce   :  { %10125 = vmatpush1.bf16.msra.mxu0 %v13952_v42  ;;  %v1503_v42 = vld [vmem:[%s19788_s1 + $0x2e28] sm:$0xff] }
 0x2cf   :  { %10658 = vmatpush1.bf16.msra.mxu1 %v13954_v45  ;;  %10126 = vmatprep.subr.bf16.mxu0 %v13961_v34  ;;  %v13992_v45 = vcombine.low %v1490_v25, %v1494_v28  ;;  %v13994_v34 = vcombine.low %v1491_v29, %v1495_v30  ;;  %v14003_v49 = vcombine.high %v1499_v41, %v1503_v42  ;;  %v1530_v28 = vld [vmem:[%s19788_s1 + $0x2f00] sm:$0xff]  ;;  %v1531_v30 = vld [vmem:[%s19788_s1 + $0x2f08] sm:$0xff] }
 0x2d0   :  { %10659 = vmatprep.subr.bf16.mxu1 %v13963_v46  ;;  %v14001_v46 = vcombine.high %v1498_v38, %v1502_v39  ;;  %v1534_v29 = vld [vmem:[%s19788_s1 + $0x2f20] sm:$0xff] }
 0x2d2   :  { %10127 = vmatpush1.bf16.msra.mxu0 %v13960_v55  ;;  %v1511_v55 = vld [vmem:[%s19788_s1 + $0x2e68] sm:$0xff] }
 0x2d3   :  { %10660 = vmatpush1.bf16.msra.mxu1 %v13962_v60  ;;  %10128 = vmatprep.subr.bf16.mxu0 %v13969_v8  ;;  %v14000_v60 = vcombine.low %v1498_v38, %v1502_v39  ;;  %v14002_v8 = vcombine.low %v1499_v41, %v1503_v42  ;;  %v14011_v0 = vcombine.high %v1507_v54, %v1511_v55  ;;  %v1538_v39 = vld [vmem:[%s19788_s1 + $0x2f40] sm:$0xff]  ;;  %v1539_v42 = vld [vmem:[%s19788_s1 + $0x2f48] sm:$0xff] }
 0x2d4   :  { %10661 = vmatprep.subr.bf16.mxu1 %v13971_v61  ;;  %v14009_v61 = vcombine.high %v1506_v50, %v1510_v52  ;;  %v1542_v41 = vld [vmem:[%s19788_s1 + $0x2f60] sm:$0xff] }
 0x2d6   :  { %10129 = vmatpush1.bf16.msra.mxu0 %v13968_v10  ;;  %v1519_v10 = vld [vmem:[%s19788_s1 + $0x2ea8] sm:$0xff] }
 0x2d7   :  { %10662 = vmatpush1.bf16.msra.mxu1 %v13970_v11  ;;  %10130 = vmatprep.subr.bf16.mxu0 %v13977_v12  ;;  %v14008_v11 = vcombine.low %v1506_v50, %v1510_v52  ;;  %v14010_v12 = vcombine.low %v1507_v54, %v1511_v55  ;;  %v14019_v1 = vcombine.high %v1515_v3, %v1519_v10  ;;  %v1546_v52 = vld [vmem:[%s19788_s1 + $0x2f80] sm:$0xff]  ;;  %v1547_v55 = vld [vmem:[%s19788_s1 + $0x2f88] sm:$0xff] }
 0x2d8   :  { %10663 = vmatprep.subr.bf16.mxu1 %v13979_v13  ;;  %v14017_v13 = vcombine.high %v1514_v63, %v1518_v44  ;;  %v1550_v54 = vld [vmem:[%s19788_s1 + $0x2fa0] sm:$0xff] }
 0x2da   :  { %10131 = vmatpush1.bf16.msra.mxu0 %v13976_v21  ;;  %v1527_v21 = vld [vmem:[%s19788_s1 + $0x2ee8] sm:$0xff] }
 0x2db   :  { %10664 = vmatpush1.bf16.msra.mxu1 %v13978_v22  ;;  %10132 = vmatprep.subr.bf16.mxu0 %v13985_v24  ;;  %v14016_v22 = vcombine.low %v1514_v63, %v1518_v44  ;;  %v14018_v24 = vcombine.low %v1515_v3, %v1519_v10  ;;  %v14027_v25 = vcombine.high %v1523_v20, %v1527_v21  ;;  %v1554_v44 = vld [vmem:[%s19788_s1 + $0x2fc0] sm:$0xff]  ;;  %v1555_v10 = vld [vmem:[%s19788_s1 + $0x2fc8] sm:$0xff] }
 0x2dc   :  { %10665 = vmatprep.subr.bf16.mxu1 %v13987_v47  ;;  %v14025_v47 = vcombine.high %v1522_v16, %v1526_v18  ;;  %v1558_v3 = vld [vmem:[%s19788_s1 + $0x2fe0] sm:$0xff] }
 0x2de   :  { %10133 = vmatpush1.bf16.msra.mxu0 %v13984_v31  ;;  %v1535_v31 = vld [vmem:[%s19788_s1 + $0x2f28] sm:$0xff] }
 0x2df   :  { %10666 = vmatpush1.bf16.msra.mxu1 %v13986_v32  ;;  %10134 = vmatprep.subr.bf16.mxu0 %v13993_v35  ;;  %v14024_v32 = vcombine.low %v1522_v16, %v1526_v18  ;;  %v14026_v35 = vcombine.low %v1523_v20, %v1527_v21  ;;  %v14035_v38 = vcombine.high %v1531_v30, %v1535_v31  ;;  %v1562_v18 = vld [vmem:[%s19788_s1 + $0x3000] sm:$0xff]  ;;  %v1563_v21 = vld [vmem:[%s19788_s1 + $0x3008] sm:$0xff] }
 0x2e0   :  { %10667 = vmatprep.subr.bf16.mxu1 %v13995_v36  ;;  %v14033_v36 = vcombine.high %v1530_v28, %v1534_v29  ;;  %v1566_v20 = vld [vmem:[%s19788_s1 + $0x3020] sm:$0xff] }
 0x2e2   :  { %10135 = vmatpush1.bf16.msra.mxu0 %v13992_v45  ;;  %v1543_v45 = vld [vmem:[%s19788_s1 + $0x2f68] sm:$0xff] }
 0x2e3   :  { %10668 = vmatpush1.bf16.msra.mxu1 %v13994_v34  ;;  %10136 = vmatprep.subr.bf16.mxu0 %v14001_v46  ;;  %v14032_v34 = vcombine.low %v1530_v28, %v1534_v29  ;;  %v14034_v46 = vcombine.low %v1531_v30, %v1535_v31  ;;  %v14043_v50 = vcombine.high %v1539_v42, %v1543_v45  ;;  %v1570_v29 = vld [vmem:[%s19788_s1 + $0x3040] sm:$0xff] }
 0x2e4   :  { %10669 = vmatprep.subr.bf16.mxu1 %v14003_v49  ;;  %v14041_v49 = vcombine.high %v1538_v39, %v1542_v41  ;;  %v1574_v30 = vld [vmem:[%s19788_s1 + $0x3060] sm:$0xff]  ;;  %v17095_v31 = vcombine.high %v16891_v15, %v16891_v15 }
 0x2e6   :  { %10137 = vmatpush1.bf16.msra.mxu0 %v14000_v60  ;;  %v1551_v60 = vld [vmem:[%s19788_s1 + $0x2fa8] sm:$0xff] }
 0x2e7   :  { %10670 = vmatpush1.bf16.msra.mxu1 %v14002_v8  ;;  %10138 = vmatprep.subr.bf16.mxu0 %v14009_v61  ;;  %v14040_v8 = vcombine.low %v1538_v39, %v1542_v41  ;;  %v14042_v61 = vcombine.low %v1539_v42, %v1543_v45  ;;  %v14051_v63 = vcombine.high %v1547_v55, %v1551_v60  ;;  %v1578_v42 = vld [vmem:[%s19788_s1 + $0x3080] sm:$0xff] }
 0x2e8   :  { %10671 = vmatprep.subr.bf16.mxu1 %v14011_v0  ;;  %v14049_v0 = vcombine.high %v1546_v52, %v1550_v54  ;;  %v14073_v39 = vcombine.high %v1570_v29, %v1574_v30  ;;  %v1582_v45 = vld [vmem:[%s19788_s1 + $0x30a0] sm:$0xff] }
 0x2ea   :  { %10139 = vmatpush1.bf16.msra.mxu0 %v14008_v11  ;;  %v1559_v11 = vld [vmem:[%s19788_s1 + $0x2fe8] sm:$0xff] }
 0x2eb   :  { %10672 = vmatpush1.bf16.msra.mxu1 %v14010_v12  ;;  %10140 = vmatprep.subr.bf16.mxu0 %v14017_v13  ;;  %v14048_v12 = vcombine.low %v1546_v52, %v1550_v54  ;;  %v14050_v13 = vcombine.low %v1547_v55, %v1551_v60  ;;  %v14059_v16 = vcombine.high %v1555_v10, %v1559_v11  ;;  %v1586_v55 = vld [vmem:[%s19788_s1 + $0x30c0] sm:$0xff] }
 0x2ec   :  { %10673 = vmatprep.subr.bf16.mxu1 %v14019_v1  ;;  %v14057_v1 = vcombine.high %v1554_v44, %v1558_v3  ;;  %v14081_v52 = vcombine.high %v1578_v42, %v1582_v45  ;;  %v1590_v60 = vld [vmem:[%s19788_s1 + $0x30e0] sm:$0xff] }
 0x2ee   :  { %10141 = vmatpush1.bf16.msra.mxu0 %v14016_v22  ;;  %v1567_v22 = vld [vmem:[%s19788_s1 + $0x3028] sm:$0xff] }
 0x2ef   :  { %10674 = vmatpush1.bf16.msra.mxu1 %v14018_v24  ;;  %10142 = vmatprep.subr.bf16.mxu0 %v14025_v47  ;;  %v14056_v24 = vcombine.low %v1554_v44, %v1558_v3  ;;  %v14058_v47 = vcombine.low %v1555_v10, %v1559_v11  ;;  %v14067_v28 = vcombine.high %v1563_v21, %v1567_v22  ;;  %v28_v11 = vld [vmem:[%s19788_s1 + $0x10] sm:$0xff] }
 0x2f0   :  { %10675 = vmatprep.subr.bf16.mxu1 %v14027_v25  ;;  %v14065_v25 = vcombine.high %v1562_v18, %v1566_v20  ;;  %v14089_v3 = vcombine.high %v1586_v55, %v1590_v60 }
 0x2f2   :  { %10143 = vmatpush1.bf16.msra.mxu0 %v14024_v32  ;;  %v1571_v32 = vld [vmem:[%s19788_s1 + $0x3048] sm:$0xff] }
 0x2f3   :  { %10676 = vmatpush1.bf16.msra.mxu1 %v14026_v35  ;;  %10144 = vmatprep.subr.bf16.mxu0 %v14033_v36  ;;  %v1575_v35 = vld [vmem:[%s19788_s1 + $0x3068] sm:$0xff]  ;;  %v14064_v36 = vcombine.low %v1562_v18, %v1566_v20  ;;  %v12527_v18 = vld.sshfl [vmem:[%s19787_s0 + $0x18] sm:$0x1 pattern:$0x75316420] }
 0x2f4   :  { %10677 = vmatprep.subr.bf16.mxu1 %v14035_v38  ;;  %v14066_v38 = vcombine.low %v1563_v21, %v1567_v22  ;;  %v14075_v41 = vcombine.high %v1571_v32, %v1575_v35 }
 0x2f6   :  { %10145 = vmatpush1.bf16.msra.mxu0 %v14032_v34  ;;  %v1579_v34 = vld [vmem:[%s19788_s1 + $0x3088] sm:$0xff] }
 0x2f7   :  { %10678 = vmatpush1.bf16.msra.mxu1 %v14034_v46  ;;  %10146 = vmatprep.subr.bf16.mxu0 %v14041_v49  ;;  %v1583_v46 = vld [vmem:[%s19788_s1 + $0x30a8] sm:$0xff]  ;;  %v14072_v49 = vcombine.low %v1570_v29, %v1574_v30  ;;  %v41_v29 = vld [vmem:[%s19788_s1 + $0x78] sm:$0xff] }
 0x2f8   :  { %10679 = vmatprep.subr.bf16.mxu1 %v14043_v50  ;;  %v14074_v50 = vcombine.low %v1571_v32, %v1575_v35  ;;  %v14083_v54 = vcombine.high %v1579_v34, %v1583_v46  ;;  %v14082_v44 = vcombine.low %v1579_v34, %v1583_v46 }
 0x2fa   :  { %10147 = vmatpush1.bf16.msra.mxu0 %v14040_v8  ;;  %v14548_v8 = vmov 0  }
 0x2fb   :  { %10680 = vmatpush1.bf16.msra.mxu1 %v14042_v61  ;;  %10148 = vmatprep.subr.bf16.mxu0 %v14049_v0  ;;  %v1587_v61 = vld [vmem:[%s19788_s1 + $0x30c8] sm:$0xff] }
 0x2fc   :  { %10681 = vmatprep.subr.bf16.mxu1 %v14051_v63  ;;  %v1591_v0 = vld [vmem:[%s19788_s1 + $0x30e8] sm:$0xff]  ;;  %v14080_v63 = vcombine.low %v1578_v42, %v1582_v45 }
 0x2fd   :  { %v14091_v10 = vcombine.high %v1587_v61, %v1591_v0  ;;  %v14090_v20 = vcombine.low %v1587_v61, %v1591_v0 }
 0x2fe   :  { %10149 = vmatpush1.bf16.msra.mxu0 %v14048_v12  ;;  %v32_v12 = vld [vmem:[%s19788_s1 + $0x30] sm:$0xff] }
 0x2ff   :  { %10682 = vmatpush1.bf16.msra.mxu1 %v14050_v13  ;;  %10150 = vmatprep.subr.bf16.mxu0 %v14057_v1  ;;  %v29_v13 = vld [vmem:[%s19788_s1 + $0x18] sm:$0xff]  ;;  %v12533_v21 = vcombine.high %v28_v11, %v32_v12  ;;  %v12532_v30 = vcombine.low %v28_v11, %v32_v12 }
 0x300   :  { %10683 = vmatprep.subr.bf16.mxu1 %v14059_v16  ;;  %v33_v1 = vld [vmem:[%s19788_s1 + $0x38] sm:$0xff]  ;;  %v14088_v16 = vcombine.low %v1586_v55, %v1590_v60 }
 0x301   :  { %v12535_v22 = vcombine.high %v29_v13, %v33_v1  ;;  %v12534_v32 = vcombine.low %v29_v13, %v33_v1  ;;  %v68_v1 = vld [vmem:[%s19788_s1 + $0x150] sm:$0xff] }
 0x302   :  { %10151 = vmatpush1.bf16.msra.mxu0 %v14056_v24  ;;  %v36_v24 = vld [vmem:[%s19788_s1 + $0x50] sm:$0xff] }
 0x303   :  { %10684 = vmatpush1.bf16.msra.mxu1 %v14058_v47  ;;  %10161 = vmatprep.subr.bf16.mxu0 %v14065_v25  ;;  %v40_v47 = vld [vmem:[%s19788_s1 + $0x70] sm:$0xff]  ;;  %v17153_v25 = vrot.slane %v12527_v18, %v14661_v53  ;;  %v69_v18 = vld [vmem:[%s19788_s1 + $0x158] sm:$0xff] }
 0x304   :  { %10694 = vmatprep.subr.bf16.mxu1 %v14067_v28  ;;  %v37_v28 = vld [vmem:[%s19788_s1 + $0x58] sm:$0xff]  ;;  %v12541_v35 = vcombine.high %v36_v24, %v40_v47  ;;  %v44_v53 = vld [vmem:[%s19788_s1 + $0x90] sm:$0xff]  ;;  %v12540_v42 = vcombine.low %v36_v24, %v40_v47 }
 0x305   :  { %10153 = vmatmul.mubr.bf16.vlgmr.msra.gmra.mrb[0].mxu0 %v17095_v31  ;;  %v12542_v45 = vcombine.low %v37_v28, %v41_v29 }
 0x306   :  { %10162 = vmatpush1.bf16.msra.mxu0 %v14064_v36  ;;  %10686 = vmatmul.mubr.bf16.vlgmr.msra.gmra.mrb[0].mxu1 %v17095_v31  ;;  %v12543_v36 = vcombine.high %v37_v28, %v41_v29  ;;  %v76_v28 = vld [vmem:[%s19788_s1 + $0x190] sm:$0xff] }
 0x307   :  { %10695 = vmatpush1.bf16.msra.mxu1 %v14066_v38  ;;  %10163 = vmatprep.subr.bf16.mxu0 %v14073_v39  ;;  %v48_v38 = vld [vmem:[%s19788_s1 + $0xb0] sm:$0xff]  ;;  %v45_v39 = vld [vmem:[%s19788_s1 + $0x98] sm:$0xff] }
 0x308   :  { %10696 = vmatprep.subr.bf16.mxu1 %v14075_v41  ;;  %10193 = vmatprep.mubr.bf16.mxu0 %v14548_v8  ;;  %v49_v41 = vld [vmem:[%s19788_s1 + $0xb8] sm:$0xff]  ;;  %v12549_v34 = vcombine.high %v44_v53, %v48_v38  ;;  %v12548_v55 = vcombine.low %v44_v53, %v48_v38  ;;  %v80_v29 = vld [vmem:[%s19788_s1 + $0x1b0] sm:$0xff] }
 0x309   :  { %10726 = vmatprep.mubr.bf16.mxu1 %v14548_v8  ;;  %v12551_v46 = vcombine.high %v45_v39, %v49_v41  ;;  %v12550_v60 = vcombine.low %v45_v39, %v49_v41  ;;  %v12581_v53 = vcombine.high %v76_v28, %v80_v29  ;;  %v84_v39 = vld [vmem:[%s19788_s1 + $0x1d0] sm:$0xff] }
 0x30a   :  { %10164 = vmatpush1.bf16.msra.mxu0 %v14072_v49  ;;  %v52_v49 = vld [vmem:[%s19788_s1 + $0xd0] sm:$0xff] }
 0x30b   :  { %10697 = vmatpush1.bf16.msra.mxu1 %v14074_v50  ;;  %10165 = vmatprep.subr.bf16.mxu0 %v14081_v52  ;;  %v56_v50 = vld [vmem:[%s19788_s1 + $0xf0] sm:$0xff]  ;;  %v53_v52 = vld [vmem:[%s19788_s1 + $0xd8] sm:$0xff] }
 0x30c   :  { %10698 = vmatprep.subr.bf16.mxu1 %v14083_v54  ;;  %v57_v54 = vld [vmem:[%s19788_s1 + $0xf8] sm:$0xff]  ;;  %v12557_v61 = vcombine.high %v52_v49, %v56_v50  ;;  %v88_v41 = vld [vmem:[%s19788_s1 + $0x1f0] sm:$0xff] }
 0x30d   :  { %v12559_v0 = vcombine.high %v53_v52, %v57_v54  ;;  %v12558_v11 = vcombine.low %v53_v52, %v57_v54  ;;  %v92_v52 = vld [vmem:[%s19788_s1 + $0x210] sm:$0xff] }
 0x30e   :  { %10166 = vmatpush1.bf16.msra.mxu0 %v14080_v63  ;;  %v60_v63 = vld [vmem:[%s19788_s1 + $0x110] sm:$0xff] }
 0x30f   :  { %10699 = vmatpush1.bf16.msra.mxu1 %v14082_v44  ;;  %10167 = vmatprep.subr.bf16.mxu0 %v14089_v3  ;;  %v64_v44 = vld [vmem:[%s19788_s1 + $0x130] sm:$0xff]  ;;  %v65_v3 = vld [vmem:[%s19788_s1 + $0x138] sm:$0xff] }
 0x310   :  { %10700 = vmatprep.subr.bf16.mxu1 %v14091_v10  ;;  %v12556_v10 = vcombine.low %v52_v49, %v56_v50  ;;  %v12565_v12 = vcombine.high %v60_v63, %v64_v44  ;;  %v12589_v49 = vcombine.high %v84_v39, %v88_v41  ;;  %v96_v54 = vld [vmem:[%s19788_s1 + $0x230] sm:$0xff] }
 0x312   :  { %10168 = vmatpush1.bf16.msra.mxu0 %v14088_v16  ;;  %v72_v16 = vld [vmem:[%s19788_s1 + $0x170] sm:$0xff] }
 0x313   :  { %10701 = vmatpush1.bf16.msra.mxu1 %v14090_v20  ;;  %10735 = vmatprep.subr.bf16.mxu0 %v12533_v21  ;;  %v73_v20 = vld [vmem:[%s19788_s1 + $0x178] sm:$0xff]  ;;  %v12564_v21 = vcombine.low %v60_v63, %v64_v44  ;;  %v12573_v24 = vcombine.high %v68_v1, %v72_v16  ;;  %v12597_v63 = vcombine.high %v92_v52, %v96_v54 }
 0x314   :  { %11268 = vmatprep.subr.bf16.mxu1 %v12535_v22  ;;  %v12575_v47 = vcombine.high %v69_v18, %v73_v20 }
 0x315   :  { %14096 = vmatmul.mubr.msk.bf16.vlgmr.msra.gmra.mrb[0].mxu0 %vm9665_vm0, %v17153_v25 }
 0x316   :  { %14097 = vmatmul.mubr.msk.bf16.vlgmr.msra.gmra.mrb[0].mxu1 %vm9665_vm0, %v17153_v25  ;;  %10736 = vmatpush1.bf16.msra.mxu0 %v12532_v30  ;;  %v77_v30 = vld [vmem:[%s19788_s1 + $0x198] sm:$0xff] }
 0x317   :  { %11269 = vmatpush1.bf16.msra.mxu1 %v12534_v32  ;;  %10737 = vmatprep.subr.bf16.mxu0 %v12541_v35  ;;  %v81_v32 = vld [vmem:[%s19788_s1 + $0x1b8] sm:$0xff]  ;;  %v12572_v35 = vcombine.low %v68_v1, %v72_v16 }
 0x318   :  { %11270 = vmatprep.subr.bf16.mxu1 %v12543_v36  ;;  %10767 = vmatprep.mubr.bf16.mxu0 %v14699_v9  ;;  %v12574_v36 = vcombine.low %v69_v18, %v73_v20  ;;  %v12583_v38 = vcombine.high %v77_v30, %v81_v32  ;;  %v108_v18 = vld [vmem:[%s19788_s1 + $0x290] sm:$0xff] }
 0x319   :  { %11300 = vmatprep.mubr.bf16.mxu1 %v14699_v9  ;;  %v61_v9 = vld [vmem:[%s19788_s1 + $0x118] sm:$0xff]  ;;  %v112_v20 = vld [vmem:[%s19788_s1 + $0x2b0] sm:$0xff] }
 0x31a   :  { %10738 = vmatpush1.bf16.msra.mxu0 %v12540_v42  ;;  %v12567_v13 = vcombine.high %v61_v9, %v65_v3  ;;  %v12566_v22 = vcombine.low %v61_v9, %v65_v3  ;;  %v85_v42 = vld [vmem:[%s19788_s1 + $0x1d8] sm:$0xff]  ;;  %v100_v9 = vld [vmem:[%s19788_s1 + $0x250] sm:$0xff] }
 0x31b   :  { %11271 = vmatpush1.bf16.msra.mxu1 %v12542_v45  ;;  %10739 = vmatprep.subr.bf16.mxu0 %v12549_v34  ;;  %v89_v45 = vld [vmem:[%s19788_s1 + $0x1f8] sm:$0xff]  ;;  %v12580_v34 = vcombine.low %v76_v28, %v80_v29  ;;  %v104_v3 = vld [vmem:[%s19788_s1 + $0x270] sm:$0xff]  ;;  %v12613_v28 = vcombine.high %v108_v18, %v112_v20 }
 0x31c   :  { %11272 = vmatprep.subr.bf16.mxu1 %v12551_v46  ;;  %v12582_v46 = vcombine.low %v77_v30, %v81_v32  ;;  %v12591_v50 = vcombine.high %v85_v42, %v89_v45  ;;  %v12605_v1 = vcombine.high %v100_v9, %v104_v3  ;;  %v116_v30 = vld [vmem:[%s19788_s1 + $0x2d0] sm:$0xff] }
 0x31d   :  { %v120_v32 = vld [vmem:[%s19788_s1 + $0x2f0] sm:$0xff] }
 0x31e   :  { %10740 = vmatpush1.bf16.msra.mxu0 %v12548_v55  ;;  %v93_v55 = vld [vmem:[%s19788_s1 + $0x218] sm:$0xff] }
 0x31f   :  { %11273 = vmatpush1.bf16.msra.mxu1 %v12550_v60  ;;  %10741 = vmatprep.subr.bf16.mxu0 %v12557_v61  ;;  %v97_v60 = vld [vmem:[%s19788_s1 + $0x238] sm:$0xff]  ;;  %v12588_v61 = vcombine.low %v84_v39, %v88_v41  ;;  %v12621_v39 = vcombine.high %v116_v30, %v120_v32 }
 0x320   :  { %11274 = vmatprep.subr.bf16.mxu1 %v12559_v0  ;;  %v12590_v0 = vcombine.low %v85_v42, %v89_v45  ;;  %v12599_v44 = vcombine.high %v93_v55, %v97_v60  ;;  %v124_v42 = vld [vmem:[%s19788_s1 + $0x310] sm:$0xff] }
 0x321   :  { %v128_v45 = vld [vmem:[%s19788_s1 + $0x330] sm:$0xff] }
 0x322   :  { %10742 = vmatpush1.bf16.msra.mxu0 %v12556_v10  ;;  %v101_v10 = vld [vmem:[%s19788_s1 + $0x258] sm:$0xff] }
 0x323   :  { %11275 = vmatpush1.bf16.msra.mxu1 %v12558_v11  ;;  %10743 = vmatprep.subr.bf16.mxu0 %v12565_v12  ;;  %v105_v11 = vld [vmem:[%s19788_s1 + $0x278] sm:$0xff]  ;;  %v12596_v12 = vcombine.low %v92_v52, %v96_v54  ;;  %v12629_v52 = vcombine.high %v124_v42, %v128_v45 }
 0x324   :  { %11276 = vmatprep.subr.bf16.mxu1 %v12567_v13  ;;  %v12598_v13 = vcombine.low %v93_v55, %v97_v60  ;;  %v12607_v16 = vcombine.high %v101_v10, %v105_v11  ;;  %v132_v55 = vld [vmem:[%s19788_s1 + $0x350] sm:$0xff] }
 0x325   :  { %v136_v60 = vld [vmem:[%s19788_s1 + $0x370] sm:$0xff] }
 0x326   :  { %10744 = vmatpush1.bf16.msra.mxu0 %v12564_v21  ;;  %v109_v21 = vld [vmem:[%s19788_s1 + $0x298] sm:$0xff] }
 0x327   :  { %11277 = vmatpush1.bf16.msra.mxu1 %v12566_v22  ;;  %10745 = vmatprep.subr.bf16.mxu0 %v12573_v24  ;;  %v113_v22 = vld [vmem:[%s19788_s1 + $0x2b8] sm:$0xff]  ;;  %v12604_v24 = vcombine.low %v100_v9, %v104_v3  ;;  %v12637_v9 = vcombine.high %v132_v55, %v136_v60 }
 0x328   :  { %11278 = vmatprep.subr.bf16.mxu1 %v12575_v47  ;;  %v12606_v47 = vcombine.low %v101_v10, %v105_v11  ;;  %v12615_v29 = vcombine.high %v109_v21, %v113_v22  ;;  %v140_v10 = vld [vmem:[%s19788_s1 + $0x390] sm:$0xff] }
 0x329   :  { %v144_v11 = vld [vmem:[%s19788_s1 + $0x3b0] sm:$0xff] }
 0x32a   :  { %10746 = vmatpush1.bf16.msra.mxu0 %v12572_v35  ;;  %v117_v35 = vld [vmem:[%s19788_s1 + $0x2d8] sm:$0xff] }
 0x32b   :  { %11279 = vmatpush1.bf16.msra.mxu1 %v12574_v36  ;;  %10747 = vmatprep.subr.bf16.mxu0 %v12581_v53  ;;  %v121_v36 = vld [vmem:[%s19788_s1 + $0x2f8] sm:$0xff]  ;;  %v12612_v53 = vcombine.low %v108_v18, %v112_v20  ;;  %v12645_v18 = vcombine.high %v140_v10, %v144_v11 }
 0x32c   :  { %11280 = vmatprep.subr.bf16.mxu1 %v12583_v38  ;;  %v12614_v38 = vcombine.low %v109_v21, %v113_v22  ;;  %v12623_v41 = vcombine.high %v117_v35, %v121_v36  ;;  %v148_v21 = vld [vmem:[%s19788_s1 + $0x3d0] sm:$0xff] }
 0x32d   :  { %v152_v22 = vld [vmem:[%s19788_s1 + $0x3f0] sm:$0xff] }
 0x32e   :  { %10748 = vmatpush1.bf16.msra.mxu0 %v12580_v34  ;;  %v125_v34 = vld [vmem:[%s19788_s1 + $0x318] sm:$0xff] }
 0x32f   :  { %11281 = vmatpush1.bf16.msra.mxu1 %v12582_v46  ;;  %10749 = vmatprep.subr.bf16.mxu0 %v12589_v49  ;;  %v129_v46 = vld [vmem:[%s19788_s1 + $0x338] sm:$0xff]  ;;  %v12620_v49 = vcombine.low %v116_v30, %v120_v32  ;;  %v12653_v30 = vcombine.high %v148_v21, %v152_v22 }
 0x330   :  { %11282 = vmatprep.subr.bf16.mxu1 %v12591_v50  ;;  %v12622_v50 = vcombine.low %v117_v35, %v121_v36  ;;  %v12631_v54 = vcombine.high %v125_v34, %v129_v46  ;;  %v156_v35 = vld [vmem:[%s19788_s1 + $0x410] sm:$0xff] }
 0x331   :  { %v160_v36 = vld [vmem:[%s19788_s1 + $0x430] sm:$0xff] }
 0x332   :  { %10750 = vmatpush1.bf16.msra.mxu0 %v12588_v61  ;;  %v133_v61 = vld [vmem:[%s19788_s1 + $0x358] sm:$0xff] }
 0x333   :  { %11283 = vmatpush1.bf16.msra.mxu1 %v12590_v0  ;;  %10751 = vmatprep.subr.bf16.mxu0 %v12597_v63  ;;  %v137_v0 = vld [vmem:[%s19788_s1 + $0x378] sm:$0xff]  ;;  %v12628_v63 = vcombine.low %v124_v42, %v128_v45  ;;  %v12661_v42 = vcombine.high %v156_v35, %v160_v36 }
 0x334   :  { %11284 = vmatprep.subr.bf16.mxu1 %v12599_v44  ;;  %v12630_v44 = vcombine.low %v125_v34, %v129_v46  ;;  %v12639_v3 = vcombine.high %v133_v61, %v137_v0  ;;  %v164_v34 = vld [vmem:[%s19788_s1 + $0x450] sm:$0xff] }
 0x335   :  { %v168_v46 = vld [vmem:[%s19788_s1 + $0x470] sm:$0xff] }
 0x336   :  { %10752 = vmatpush1.bf16.msra.mxu0 %v12596_v12  ;;  %v141_v12 = vld [vmem:[%s19788_s1 + $0x398] sm:$0xff] }
 0x337   :  { %11285 = vmatpush1.bf16.msra.mxu1 %v12598_v13  ;;  %10753 = vmatprep.subr.bf16.mxu0 %v12605_v1  ;;  %v145_v13 = vld [vmem:[%s19788_s1 + $0x3b8] sm:$0xff]  ;;  %v12636_v1 = vcombine.low %v132_v55, %v136_v60  ;;  %v12669_v55 = vcombine.high %v164_v34, %v168_v46 }
 0x338   :  { %11286 = vmatprep.subr.bf16.mxu1 %v12607_v16  ;;  %v12638_v16 = vcombine.low %v133_v61, %v137_v0  ;;  %v12647_v20 = vcombine.high %v141_v12, %v145_v13  ;;  %v172_v61 = vld [vmem:[%s19788_s1 + $0x490] sm:$0xff] }
 0x339   :  { %v176_v0 = vld [vmem:[%s19788_s1 + $0x4b0] sm:$0xff] }
 0x33a   :  { %10754 = vmatpush1.bf16.msra.mxu0 %v12604_v24  ;;  %v149_v24 = vld [vmem:[%s19788_s1 + $0x3d8] sm:$0xff] }
 0x33b   :  { %11287 = vmatpush1.bf16.msra.mxu1 %v12606_v47  ;;  %10755 = vmatprep.subr.bf16.mxu0 %v12613_v28  ;;  %v153_v47 = vld [vmem:[%s19788_s1 + $0x3f8] sm:$0xff]  ;;  %v12644_v28 = vcombine.low %v140_v10, %v144_v11  ;;  %v12677_v10 = vcombine.high %v172_v61, %v176_v0 }
 0x33c   :  { %11288 = vmatprep.subr.bf16.mxu1 %v12615_v29  ;;  %v12646_v29 = vcombine.low %v141_v12, %v145_v13  ;;  %v12655_v32 = vcombine.high %v149_v24, %v153_v47  ;;  %v180_v12 = vld [vmem:[%s19788_s1 + $0x4d0] sm:$0xff] }
 0x33d   :  { %v184_v13 = vld [vmem:[%s19788_s1 + $0x4f0] sm:$0xff] }
 0x33e   :  { %10756 = vmatpush1.bf16.msra.mxu0 %v12612_v53  ;;  %v157_v53 = vld [vmem:[%s19788_s1 + $0x418] sm:$0xff] }
 0x33f   :  { %11289 = vmatpush1.bf16.msra.mxu1 %v12614_v38  ;;  %10757 = vmatprep.subr.bf16.mxu0 %v12621_v39  ;;  %v161_v38 = vld [vmem:[%s19788_s1 + $0x438] sm:$0xff]  ;;  %v12652_v39 = vcombine.low %v148_v21, %v152_v22  ;;  %v188_v22 = vld [vmem:[%s19788_s1 + $0x510] sm:$0xff] }
 0x340   :  { %11290 = vmatprep.subr.bf16.mxu1 %v12623_v41  ;;  %v12654_v41 = vcombine.low %v149_v24, %v153_v47  ;;  %v12663_v45 = vcombine.high %v157_v53, %v161_v38  ;;  %v192_v24 = vld [vmem:[%s19788_s1 + $0x530] sm:$0xff]  ;;  %v193_v47 = vld [vmem:[%s19788_s1 + $0x538] sm:$0xff] }
 0x342   :  { %10758 = vmatpush1.bf16.msra.mxu0 %v12620_v49  ;;  %v165_v49 = vld [vmem:[%s19788_s1 + $0x458] sm:$0xff] }
 0x343   :  { %11291 = vmatpush1.bf16.msra.mxu1 %v12622_v50  ;;  %10759 = vmatprep.subr.bf16.mxu0 %v12629_v52  ;;  %v169_v50 = vld [vmem:[%s19788_s1 + $0x478] sm:$0xff]  ;;  %v12660_v52 = vcombine.low %v156_v35, %v160_v36  ;;  %v196_v35 = vld [vmem:[%s19788_s1 + $0x550] sm:$0xff] }
 0x344   :  { %11292 = vmatprep.subr.bf16.mxu1 %v12631_v54  ;;  %v12662_v54 = vcombine.low %v157_v53, %v161_v38  ;;  %v12671_v60 = vcombine.high %v165_v49, %v169_v50  ;;  %v200_v36 = vld [vmem:[%s19788_s1 + $0x570] sm:$0xff]  ;;  %v197_v53 = vld [vmem:[%s19788_s1 + $0x558] sm:$0xff] }
 0x345   :  { %v201_v38 = vld [vmem:[%s19788_s1 + $0x578] sm:$0xff] }
 0x346   :  { %10760 = vmatpush1.bf16.msra.mxu0 %v12628_v63  ;;  %v173_v63 = vld [vmem:[%s19788_s1 + $0x498] sm:$0xff] }
 0x347   :  { %11293 = vmatpush1.bf16.msra.mxu1 %v12630_v44  ;;  %10761 = vmatprep.subr.bf16.mxu0 %v12637_v9  ;;  %v177_v44 = vld [vmem:[%s19788_s1 + $0x4b8] sm:$0xff]  ;;  %v12668_v9 = vcombine.low %v164_v34, %v168_v46  ;;  %v204_v34 = vld [vmem:[%s19788_s1 + $0x590] sm:$0xff] }
 0x348   :  { %11294 = vmatprep.subr.bf16.mxu1 %v12639_v3  ;;  %v12670_v3 = vcombine.low %v165_v49, %v169_v50  ;;  %v12679_v11 = vcombine.high %v173_v63, %v177_v44  ;;  %v208_v46 = vld [vmem:[%s19788_s1 + $0x5b0] sm:$0xff]  ;;  %v205_v49 = vld [vmem:[%s19788_s1 + $0x598] sm:$0xff] }
 0x349   :  { %v209_v50 = vld [vmem:[%s19788_s1 + $0x5b8] sm:$0xff] }
 0x34a   :  { %10762 = vmatpush1.bf16.msra.mxu0 %v12636_v1  ;;  %v185_v1 = vld [vmem:[%s19788_s1 + $0x4f8] sm:$0xff] }
 0x34b   :  { %11295 = vmatpush1.bf16.msra.mxu1 %v12638_v16  ;;  %10763 = vmatprep.subr.bf16.mxu0 %v12645_v18  ;;  %v12676_v16 = vcombine.low %v172_v61, %v176_v0  ;;  %v12678_v18 = vcombine.low %v173_v63, %v177_v44  ;;  %v212_v61 = vld [vmem:[%s19788_s1 + $0x5d0] sm:$0xff]  ;;  %v213_v63 = vld [vmem:[%s19788_s1 + $0x5d8] sm:$0xff] }
 0x34c   :  { %11296 = vmatprep.subr.bf16.mxu1 %v12647_v20  ;;  %v12685_v20 = vcombine.high %v180_v12, %v184_v13  ;;  %v216_v0 = vld [vmem:[%s19788_s1 + $0x5f0] sm:$0xff]  ;;  %v217_v44 = vld [vmem:[%s19788_s1 + $0x5f8] sm:$0xff] }
 0x34e   :  { %10764 = vmatpush1.bf16.msra.mxu0 %v12644_v28  ;;  %v12684_v28 = vcombine.low %v180_v12, %v184_v13  ;;  %v220_v12 = vld [vmem:[%s19788_s1 + $0x610] sm:$0xff] }
 0x34f   :  { %11297 = vmatpush1.bf16.msra.mxu1 %v12646_v29  ;;  %10765 = vmatprep.subr.bf16.mxu0 %v12653_v30  ;;  %v12693_v30 = vcombine.high %v188_v22, %v192_v24  ;;  %v224_v13 = vld [vmem:[%s19788_s1 + $0x630] sm:$0xff] }
 0x350   :  { %11298 = vmatprep.subr.bf16.mxu1 %v12655_v32 }
 0x352   :  { %10766 = vmatpush1.bf16.msra.mxu0 %v12652_v39  ;;  %v12692_v39 = vcombine.low %v188_v22, %v192_v24  ;;  %v228_v22 = vld [vmem:[%s19788_s1 + $0x650] sm:$0xff] }
 0x353   :  { %11299 = vmatpush1.bf16.msra.mxu1 %v12654_v41  ;;  %10776 = vmatprep.subr.bf16.mxu0 %v12661_v42  ;;  %v12701_v42 = vcombine.high %v196_v35, %v200_v36  ;;  %v232_v24 = vld [vmem:[%s19788_s1 + $0x670] sm:$0xff] }
 0x354   :  { %11309 = vmatprep.subr.bf16.mxu1 %v12663_v45  ;;  %v12703_v45 = vcombine.high %v197_v53, %v201_v38 }
 0x355   :  { %10768 = vmatmul.mubr.bf16.vlgmr.msra.gmra.mrb[4].mxu0 %v14813_v23 }
 0x356   :  { %10777 = vmatpush1.bf16.msra.mxu0 %v12660_v52  ;;  %11301 = vmatmul.mubr.bf16.vlgmr.msra.gmra.mrb[4].mxu1 %v14813_v23  ;;  %v181_v23 = vld [vmem:[%s19788_s1 + $0x4d8] sm:$0xff]  ;;  %v12700_v52 = vcombine.low %v196_v35, %v200_v36  ;;  %v236_v35 = vld [vmem:[%s19788_s1 + $0x690] sm:$0xff] }
 0x357   :  { %11310 = vmatpush1.bf16.msra.mxu1 %v12662_v54  ;;  %10778 = vmatprep.subr.bf16.mxu0 %v12669_v55  ;;  %v12687_v21 = vcombine.high %v181_v23, %v185_v1  ;;  %v12686_v29 = vcombine.low %v181_v23, %v185_v1  ;;  %v12702_v54 = vcombine.low %v197_v53, %v201_v38  ;;  %v221_v23 = vld [vmem:[%s19788_s1 + $0x618] sm:$0xff]  ;;  %v240_v36 = vld [vmem:[%s19788_s1 + $0x6b0] sm:$0xff] }
 0x358   :  { %11311 = vmatprep.subr.bf16.mxu1 %v12671_v60  ;;  %10808 = vmatprep.mubr.bf16.mxu0 %v14835_v33  ;;  %v12709_v55 = vcombine.high %v204_v34, %v208_v46  ;;  %v12711_v60 = vcombine.high %v205_v49, %v209_v50  ;;  %v225_v1 = vld [vmem:[%s19788_s1 + $0x638] sm:$0xff] }
 0x359   :  { %11341 = vmatprep.mubr.bf16.mxu1 %v14835_v33  ;;  %v189_v33 = vld [vmem:[%s19788_s1 + $0x518] sm:$0xff] }
 0x35a   :  { %10779 = vmatpush1.bf16.msra.mxu0 %v12668_v9  ;;  %v12695_v32 = vcombine.high %v189_v33, %v193_v47  ;;  %v12694_v41 = vcombine.low %v189_v33, %v193_v47  ;;  %v12708_v9 = vcombine.low %v204_v34, %v208_v46  ;;  %v229_v33 = vld [vmem:[%s19788_s1 + $0x658] sm:$0xff]  ;;  %v244_v34 = vld [vmem:[%s19788_s1 + $0x6d0] sm:$0xff] }
 0x35b   :  { %11312 = vmatpush1.bf16.msra.mxu1 %v12670_v3  ;;  %10780 = vmatprep.subr.bf16.mxu0 %v12677_v10  ;;  %v12710_v3 = vcombine.low %v205_v49, %v209_v50  ;;  %v12717_v10 = vcombine.high %v212_v61, %v216_v0  ;;  %v233_v47 = vld [vmem:[%s19788_s1 + $0x678] sm:$0xff]  ;;  %v248_v46 = vld [vmem:[%s19788_s1 + $0x6f0] sm:$0xff] }
 0x35c   :  { %11313 = vmatprep.subr.bf16.mxu1 %v12679_v11  ;;  %v12719_v11 = vcombine.high %v213_v63, %v217_v44  ;;  %v237_v53 = vld [vmem:[%s19788_s1 + $0x698] sm:$0xff] }
 0x35d   :  { %v241_v38 = vld [vmem:[%s19788_s1 + $0x6b8] sm:$0xff] }
 0x35e   :  { %10781 = vmatpush1.bf16.msra.mxu0 %v12676_v16  ;;  %v12716_v16 = vcombine.low %v212_v61, %v216_v0  ;;  %v245_v49 = vld [vmem:[%s19788_s1 + $0x6d8] sm:$0xff]  ;;  %v252_v61 = vld [vmem:[%s19788_s1 + $0x710] sm:$0xff] }
 0x35f   :  { %11314 = vmatpush1.bf16.msra.mxu1 %v12678_v18  ;;  %10782 = vmatprep.subr.bf16.mxu0 %v12685_v20  ;;  %v12718_v18 = vcombine.low %v213_v63, %v217_v44  ;;  %v12725_v20 = vcombine.high %v220_v12, %v224_v13  ;;  %v249_v50 = vld [vmem:[%s19788_s1 + $0x6f8] sm:$0xff]  ;;  %v256_v0 = vld [vmem:[%s19788_s1 + $0x730] sm:$0xff] }
 0x360   :  { %11315 = vmatprep.subr.bf16.mxu1 %v12687_v21  ;;  %v12727_v21 = vcombine.high %v221_v23, %v225_v1  ;;  %v253_v63 = vld [vmem:[%s19788_s1 + $0x718] sm:$0xff] }
 0x361   :  { %v257_v44 = vld [vmem:[%s19788_s1 + $0x738] sm:$0xff] }
 0x362   :  { %10783 = vmatpush1.bf16.msra.mxu0 %v12684_v28  ;;  %v12724_v28 = vcombine.low %v220_v12, %v224_v13  ;;  %v260_v12 = vld [vmem:[%s19788_s1 + $0x750] sm:$0xff] }
 0x363   :  { %11316 = vmatpush1.bf16.msra.mxu1 %v12686_v29  ;;  %10784 = vmatprep.subr.bf16.mxu0 %v12693_v30  ;;  %v12726_v29 = vcombine.low %v221_v23, %v225_v1  ;;  %v12733_v30 = vcombine.high %v228_v22, %v232_v24  ;;  %v264_v13 = vld [vmem:[%s19788_s1 + $0x770] sm:$0xff]  ;;  %v261_v23 = vld [vmem:[%s19788_s1 + $0x758] sm:$0xff] }
 0x364   :  { %11317 = vmatprep.subr.bf16.mxu1 %v12695_v32  ;;  %v12735_v32 = vcombine.high %v229_v33, %v233_v47  ;;  %v265_v1 = vld [vmem:[%s19788_s1 + $0x778] sm:$0xff] }
 0x366   :  { %10785 = vmatpush1.bf16.msra.mxu0 %v12692_v39  ;;  %v12732_v39 = vcombine.low %v228_v22, %v232_v24  ;;  %v268_v22 = vld [vmem:[%s19788_s1 + $0x790] sm:$0xff] }
 0x367   :  { %11318 = vmatpush1.bf16.msra.mxu1 %v12694_v41  ;;  %10786 = vmatprep.subr.bf16.mxu0 %v12701_v42  ;;  %v12734_v41 = vcombine.low %v229_v33, %v233_v47  ;;  %v12741_v42 = vcombine.high %v236_v35, %v240_v36  ;;  %v272_v24 = vld [vmem:[%s19788_s1 + $0x7b0] sm:$0xff]  ;;  %v269_v33 = vld [vmem:[%s19788_s1 + $0x798] sm:$0xff] }
 0x368   :  { %11319 = vmatprep.subr.bf16.mxu1 %v12703_v45  ;;  %v12743_v45 = vcombine.high %v237_v53, %v241_v38  ;;  %v273_v47 = vld [vmem:[%s19788_s1 + $0x7b8] sm:$0xff] }
 0x36a   :  { %10787 = vmatpush1.bf16.msra.mxu0 %v12700_v52  ;;  %v12740_v52 = vcombine.low %v236_v35, %v240_v36  ;;  %v276_v35 = vld [vmem:[%s19788_s1 + $0x7d0] sm:$0xff] }
 0x36b   :  { %11320 = vmatpush1.bf16.msra.mxu1 %v12702_v54  ;;  %10788 = vmatprep.subr.bf16.mxu0 %v12709_v55  ;;  %v12742_v54 = vcombine.low %v237_v53, %v241_v38  ;;  %v12749_v55 = vcombine.high %v244_v34, %v248_v46  ;;  %v280_v36 = vld [vmem:[%s19788_s1 + $0x7f0] sm:$0xff]  ;;  %v277_v53 = vld [vmem:[%s19788_s1 + $0x7d8] sm:$0xff] }
 0x36c   :  { %11321 = vmatprep.subr.bf16.mxu1 %v12711_v60  ;;  %v12751_v60 = vcombine.high %v245_v49, %v249_v50  ;;  %v281_v38 = vld [vmem:[%s19788_s1 + $0x7f8] sm:$0xff] }
 0x36e   :  { %10789 = vmatpush1.bf16.msra.mxu0 %v12708_v9  ;;  %v12748_v9 = vcombine.low %v244_v34, %v248_v46  ;;  %v284_v34 = vld [vmem:[%s19788_s1 + $0x810] sm:$0xff] }
 0x36f   :  { %11322 = vmatpush1.bf16.msra.mxu1 %v12710_v3  ;;  %10790 = vmatprep.subr.bf16.mxu0 %v12717_v10  ;;  %v12750_v3 = vcombine.low %v245_v49, %v249_v50  ;;  %v12757_v10 = vcombine.high %v252_v61, %v256_v0  ;;  %v288_v46 = vld [vmem:[%s19788_s1 + $0x830] sm:$0xff]  ;;  %v285_v49 = vld [vmem:[%s19788_s1 + $0x818] sm:$0xff] }
 0x370   :  { %11323 = vmatprep.subr.bf16.mxu1 %v12719_v11  ;;  %v12759_v11 = vcombine.high %v253_v63, %v257_v44  ;;  %v289_v50 = vld [vmem:[%s19788_s1 + $0x838] sm:$0xff] }
 0x372   :  { %10791 = vmatpush1.bf16.msra.mxu0 %v12716_v16  ;;  %v12756_v16 = vcombine.low %v252_v61, %v256_v0  ;;  %v292_v61 = vld [vmem:[%s19788_s1 + $0x850] sm:$0xff] }
 0x373   :  { %11324 = vmatpush1.bf16.msra.mxu1 %v12718_v18  ;;  %10792 = vmatprep.subr.bf16.mxu0 %v12725_v20  ;;  %v12758_v18 = vcombine.low %v253_v63, %v257_v44  ;;  %v12765_v20 = vcombine.high %v260_v12, %v264_v13  ;;  %v296_v0 = vld [vmem:[%s19788_s1 + $0x870] sm:$0xff]  ;;  %v293_v63 = vld [vmem:[%s19788_s1 + $0x858] sm:$0xff] }
 0x374   :  { %11325 = vmatprep.subr.bf16.mxu1 %v12727_v21  ;;  %v12767_v21 = vcombine.high %v261_v23, %v265_v1  ;;  %v297_v44 = vld [vmem:[%s19788_s1 + $0x878] sm:$0xff] }
 0x376   :  { %10793 = vmatpush1.bf16.msra.mxu0 %v12724_v28  ;;  %v12764_v28 = vcombine.low %v260_v12, %v264_v13  ;;  %v300_v12 = vld [vmem:[%s19788_s1 + $0x890] sm:$0xff] }
 0x377   :  { %11326 = vmatpush1.bf16.msra.mxu1 %v12726_v29  ;;  %10794 = vmatprep.subr.bf16.mxu0 %v12733_v30  ;;  %v12766_v29 = vcombine.low %v261_v23, %v265_v1  ;;  %v12773_v30 = vcombine.high %v268_v22, %v272_v24  ;;  %v304_v13 = vld [vmem:[%s19788_s1 + $0x8b0] sm:$0xff]  ;;  %v301_v23 = vld [vmem:[%s19788_s1 + $0x898] sm:$0xff] }
 0x378   :  { %11327 = vmatprep.subr.bf16.mxu1 %v12735_v32  ;;  %v12775_v32 = vcombine.high %v269_v33, %v273_v47  ;;  %v305_v1 = vld [vmem:[%s19788_s1 + $0x8b8] sm:$0xff] }
 0x37a   :  { %10795 = vmatpush1.bf16.msra.mxu0 %v12732_v39  ;;  %v12772_v39 = vcombine.low %v268_v22, %v272_v24  ;;  %v308_v22 = vld [vmem:[%s19788_s1 + $0x8d0] sm:$0xff] }
 0x37b   :  { %11328 = vmatpush1.bf16.msra.mxu1 %v12734_v41  ;;  %10796 = vmatprep.subr.bf16.mxu0 %v12741_v42  ;;  %v12774_v41 = vcombine.low %v269_v33, %v273_v47  ;;  %v12781_v42 = vcombine.high %v276_v35, %v280_v36  ;;  %v312_v24 = vld [vmem:[%s19788_s1 + $0x8f0] sm:$0xff]  ;;  %v313_v33 = vld [vmem:[%s19788_s1 + $0x8f8] sm:$0xff]  ;;  %v12804_v47 = vcombine.low %v300_v12, %v304_v13 }
 0x37c   :  { %11329 = vmatprep.subr.bf16.mxu1 %v12743_v45  ;;  %v12783_v45 = vcombine.high %v277_v53, %v281_v38 }
 0x37e   :  { %10797 = vmatpush1.bf16.msra.mxu0 %v12740_v52  ;;  %v12780_v52 = vcombine.low %v276_v35, %v280_v36  ;;  %v320_v35 = vld [vmem:[%s19788_s1 + $0x930] sm:$0xff]  ;;  %v321_v36 = vld [vmem:[%s19788_s1 + $0x938] sm:$0xff] }
 0x37f   :  { %11330 = vmatpush1.bf16.msra.mxu1 %v12742_v54  ;;  %10798 = vmatprep.subr.bf16.mxu0 %v12749_v55  ;;  %v12782_v54 = vcombine.low %v277_v53, %v281_v38  ;;  %v12789_v55 = vcombine.high %v284_v34, %v288_v46  ;;  %v12812_v53 = vcombine.low %v308_v22, %v312_v24 }
 0x380   :  { %11331 = vmatprep.subr.bf16.mxu1 %v12751_v60  ;;  %v12791_v60 = vcombine.high %v285_v49, %v289_v50 }
 0x382   :  { %10799 = vmatpush1.bf16.msra.mxu0 %v12748_v9  ;;  %v12788_v9 = vcombine.low %v284_v34, %v288_v46  ;;  %v325_v34 = vld [vmem:[%s19788_s1 + $0x958] sm:$0xff] }
 0x383   :  { %11332 = vmatpush1.bf16.msra.mxu1 %v12750_v3  ;;  %10800 = vmatprep.subr.bf16.mxu0 %v12757_v10  ;;  %v12790_v3 = vcombine.low %v285_v49, %v289_v50  ;;  %v12797_v10 = vcombine.high %v292_v61, %v296_v0  ;;  %v329_v46 = vld [vmem:[%s19788_s1 + $0x978] sm:$0xff] }
 0x384   :  { %11333 = vmatprep.subr.bf16.mxu1 %v12759_v11  ;;  %v12799_v11 = vcombine.high %v293_v63, %v297_v44 }
 0x386   :  { %10801 = vmatpush1.bf16.msra.mxu0 %v12756_v16  ;;  %v12796_v16 = vcombine.low %v292_v61, %v296_v0  ;;  %v333_v61 = vld [vmem:[%s19788_s1 + $0x998] sm:$0xff] }
 0x387   :  { %11334 = vmatpush1.bf16.msra.mxu1 %v12758_v18  ;;  %10802 = vmatprep.subr.bf16.mxu0 %v12765_v20  ;;  %v12798_v18 = vcombine.low %v293_v63, %v297_v44  ;;  %v12805_v20 = vcombine.high %v300_v12, %v304_v13  ;;  %v337_v0 = vld [vmem:[%s19788_s1 + $0x9b8] sm:$0xff]  ;;  %v12830_v44 = vcombine.low %v325_v34, %v329_v46 }
 0x388   :  { %11335 = vmatprep.subr.bf16.mxu1 %v12767_v21  ;;  %v12807_v21 = vcombine.high %v301_v23, %v305_v1  ;;  %v341_v12 = vld [vmem:[%s19788_s1 + $0x9d8] sm:$0xff] }
 0x389   :  { %v345_v13 = vld [vmem:[%s19788_s1 + $0x9f8] sm:$0xff] }
 0x38a   :  { %10803 = vmatpush1.bf16.msra.mxu0 %v12764_v28  ;;  %v12806_v28 = vcombine.low %v301_v23, %v305_v1  ;;  %v12838_v1 = vcombine.low %v333_v61, %v337_v0 }
 0x38b   :  { %11336 = vmatpush1.bf16.msra.mxu1 %v12766_v29  ;;  %10804 = vmatprep.subr.bf16.mxu0 %v12773_v30  ;;  %v12813_v29 = vcombine.high %v308_v22, %v312_v24  ;;  %v349_v22 = vld [vmem:[%s19788_s1 + $0xa18] sm:$0xff] }
 0x38c   :  { %11337 = vmatprep.subr.bf16.mxu1 %v12775_v32  ;;  %v316_v32 = vld [vmem:[%s19788_s1 + $0x910] sm:$0xff]  ;;  %v353_v24 = vld [vmem:[%s19788_s1 + $0xa38] sm:$0xff] }
 0x38d   :  { %v12820_v49 = vcombine.low %v316_v32, %v320_v35 }
 0x38e   :  { %10805 = vmatpush1.bf16.msra.mxu0 %v12772_v39  ;;  %v12821_v39 = vcombine.high %v316_v32, %v320_v35  ;;  %v357_v32 = vld [vmem:[%s19788_s1 + $0xa58] sm:$0xff] }
 0x38f   :  { %11338 = vmatpush1.bf16.msra.mxu1 %v12774_v41  ;;  %10806 = vmatprep.subr.bf16.mxu0 %v12781_v42  ;;  %v324_v42 = vld [vmem:[%s19788_s1 + $0x950] sm:$0xff]  ;;  %v361_v35 = vld [vmem:[%s19788_s1 + $0xa78] sm:$0xff] }
 0x390   :  { %11339 = vmatprep.subr.bf16.mxu1 %v12783_v45  ;;  %v328_v45 = vld [vmem:[%s19788_s1 + $0x970] sm:$0xff] }
 0x391   :  { %v12828_v63 = vcombine.low %v324_v42, %v328_v45 }
 0x392   :  { %10807 = vmatpush1.bf16.msra.mxu0 %v12780_v52  ;;  %v12829_v52 = vcombine.high %v324_v42, %v328_v45  ;;  %v365_v42 = vld [vmem:[%s19788_s1 + $0xa98] sm:$0xff] }
 0x393   :  { %11340 = vmatpush1.bf16.msra.mxu1 %v12782_v54  ;;  %10817 = vmatprep.subr.bf16.mxu0 %v12789_v55  ;;  %v12831_v54 = vcombine.high %v325_v34, %v329_v46  ;;  %v332_v55 = vld [vmem:[%s19788_s1 + $0x990] sm:$0xff]  ;;  %v369_v45 = vld [vmem:[%s19788_s1 + $0xab8] sm:$0xff]  ;;  %v12862_v46 = vcombine.low %v357_v32, %v361_v35 }
 0x394   :  { %11350 = vmatprep.subr.bf16.mxu1 %v12791_v60  ;;  %v336_v60 = vld [vmem:[%s19788_s1 + $0x9b0] sm:$0xff] }
 0x395   :  { %10809 = vmatmul.mubr.bf16.vlgmr.msra.gmra.mrb[4].mxu0 %v15030_v40  ;;  %v12836_v23 = vcombine.low %v332_v55, %v336_v60 }
 0x396   :  { %10818 = vmatpush1.bf16.msra.mxu0 %v12788_v9  ;;  %11342 = vmatmul.mubr.bf16.vlgmr.msra.gmra.mrb[4].mxu1 %v15030_v40  ;;  %v309_v40 = vld [vmem:[%s19788_s1 + $0x8d8] sm:$0xff]  ;;  %v12837_v9 = vcombine.high %v332_v55, %v336_v60 }
 0x397   :  { %11351 = vmatpush1.bf16.msra.mxu1 %v12790_v3  ;;  %10819 = vmatprep.subr.bf16.mxu0 %v12797_v10  ;;  %v12815_v30 = vcombine.high %v309_v40, %v313_v33  ;;  %v12814_v38 = vcombine.low %v309_v40, %v313_v33  ;;  %v12839_v3 = vcombine.high %v333_v61, %v337_v0  ;;  %v340_v10 = vld [vmem:[%s19788_s1 + $0x9d0] sm:$0xff]  ;;  %v373_v55 = vld [vmem:[%s19788_s1 + $0xad8] sm:$0xff] }
 0x398   :  { %11352 = vmatprep.subr.bf16.mxu1 %v12799_v11  ;;  %10849 = vmatprep.mubr.bf16.mxu0 %v15039_v48  ;;  %v344_v11 = vld [vmem:[%s19788_s1 + $0x9f0] sm:$0xff]  ;;  %v12846_v33 = vcombine.low %v341_v12, %v345_v13  ;;  %v377_v60 = vld [vmem:[%s19788_s1 + $0xaf8] sm:$0xff]  ;;  %v12870_v0 = vcombine.low %v365_v42, %v369_v45 }
 0x399   :  { %11382 = vmatprep.mubr.bf16.mxu1 %v15039_v48  ;;  %v317_v48 = vld [vmem:[%s19788_s1 + $0x918] sm:$0xff]  ;;  %v12844_v40 = vcombine.low %v340_v10, %v344_v11 }
 0x39a   :  { %10820 = vmatpush1.bf16.msra.mxu0 %v12796_v16  ;;  %v12823_v41 = vcombine.high %v317_v48, %v321_v36  ;;  %v12822_v50 = vcombine.low %v317_v48, %v321_v36  ;;  %v12845_v16 = vcombine.high %v340_v10, %v344_v11  ;;  %v12854_v36 = vcombine.low %v349_v22, %v353_v24  ;;  %v381_v10 = vld [vmem:[%s19788_s1 + $0xb18] sm:$0xff] }
 0x39b   :  { %11353 = vmatpush1.bf16.msra.mxu1 %v12798_v18  ;;  %10821 = vmatprep.subr.bf16.mxu0 %v12805_v20  ;;  %v12847_v18 = vcombine.high %v341_v12, %v345_v13  ;;  %v348_v20 = vld [vmem:[%s19788_s1 + $0xa10] sm:$0xff]  ;;  %v385_v11 = vld [vmem:[%s19788_s1 + $0xb38] sm:$0xff]  ;;  %v12878_v13 = vcombine.low %v373_v55, %v377_v60 }
 0x39c   :  { %11354 = vmatprep.subr.bf16.mxu1 %v12807_v21  ;;  %v352_v21 = vld [vmem:[%s19788_s1 + $0xa30] sm:$0xff] }
 0x39d   :  { %v12852_v48 = vcombine.low %v348_v20, %v352_v21 }
 0x39e   :  { %10822 = vmatpush1.bf16.msra.mxu0 %v12804_v47  ;;  %v12853_v47 = vcombine.high %v348_v20, %v352_v21  ;;  %v389_v20 = vld [vmem:[%s19788_s1 + $0xb58] sm:$0xff] }
 0x39f   :  { %11355 = vmatpush1.bf16.msra.mxu1 %v12806_v28  ;;  %10823 = vmatprep.subr.bf16.mxu0 %v12813_v29  ;;  %v12855_v28 = vcombine.high %v349_v22, %v353_v24  ;;  %v356_v29 = vld [vmem:[%s19788_s1 + $0xa50] sm:$0xff]  ;;  %v393_v21 = vld [vmem:[%s19788_s1 + $0xb78] sm:$0xff]  ;;  %v12886_v24 = vcombine.low %v381_v10, %v385_v11 }
 0x3a0   :  { %11356 = vmatprep.subr.bf16.mxu1 %v12815_v30  ;;  %v360_v30 = vld [vmem:[%s19788_s1 + $0xa70] sm:$0xff] }
 0x3a1   :  { %v12860_v34 = vcombine.low %v356_v29, %v360_v30 }
 0x3a2   :  { %10824 = vmatpush1.bf16.msra.mxu0 %v12812_v53  ;;  %v12861_v53 = vcombine.high %v356_v29, %v360_v30  ;;  %v397_v29 = vld [vmem:[%s19788_s1 + $0xb98] sm:$0xff] }
 0x3a3   :  { %11357 = vmatpush1.bf16.msra.mxu1 %v12814_v38  ;;  %10825 = vmatprep.subr.bf16.mxu0 %v12821_v39  ;;  %v12863_v38 = vcombine.high %v357_v32, %v361_v35  ;;  %v364_v39 = vld [vmem:[%s19788_s1 + $0xa90] sm:$0xff]  ;;  %v401_v30 = vld [vmem:[%s19788_s1 + $0xbb8] sm:$0xff]  ;;  %v12894_v35 = vcombine.low %v389_v20, %v393_v21 }
 0x3a4   :  { %11358 = vmatprep.subr.bf16.mxu1 %v12823_v41  ;;  %v368_v41 = vld [vmem:[%s19788_s1 + $0xab0] sm:$0xff] }
 0x3a5   :  { %v12868_v61 = vcombine.low %v364_v39, %v368_v41 }
 0x3a6   :  { %10826 = vmatpush1.bf16.msra.mxu0 %v12820_v49  ;;  %v12869_v49 = vcombine.high %v364_v39, %v368_v41  ;;  %v405_v39 = vld [vmem:[%s19788_s1 + $0xbd8] sm:$0xff] }
 0x3a7   :  { %11359 = vmatpush1.bf16.msra.mxu1 %v12822_v50  ;;  %10827 = vmatprep.subr.bf16.mxu0 %v12829_v52  ;;  %v12871_v50 = vcombine.high %v365_v42, %v369_v45  ;;  %v372_v52 = vld [vmem:[%s19788_s1 + $0xad0] sm:$0xff]  ;;  %v409_v41 = vld [vmem:[%s19788_s1 + $0xbf8] sm:$0xff]  ;;  %v12902_v45 = vcombine.low %v397_v29, %v401_v30 }
 0x3a8   :  { %11360 = vmatprep.subr.bf16.mxu1 %v12831_v54  ;;  %v376_v54 = vld [vmem:[%s19788_s1 + $0xaf0] sm:$0xff] }
 0x3a9   :  { %v12876_v12 = vcombine.low %v372_v52, %v376_v54 }
 0x3aa   :  { %10828 = vmatpush1.bf16.msra.mxu0 %v12828_v63  ;;  %v12877_v63 = vcombine.high %v372_v52, %v376_v54  ;;  %v413_v52 = vld [vmem:[%s19788_s1 + $0xc18] sm:$0xff] }
 0x3ab   :  { %11361 = vmatpush1.bf16.msra.mxu1 %v12830_v44  ;;  %10829 = vmatprep.subr.bf16.mxu0 %v12837_v9  ;;  %v12879_v44 = vcombine.high %v373_v55, %v377_v60  ;;  %v380_v9 = vld [vmem:[%s19788_s1 + $0xb10] sm:$0xff]  ;;  %v417_v54 = vld [vmem:[%s19788_s1 + $0xc38] sm:$0xff]  ;;  %v12910_v60 = vcombine.low %v405_v39, %v409_v41 }
 0x3ac   :  { %11362 = vmatprep.subr.bf16.mxu1 %v12839_v3  ;;  %v384_v3 = vld [vmem:[%s19788_s1 + $0xb30] sm:$0xff] }
 0x3ad   :  { %v12884_v22 = vcombine.low %v380_v9, %v384_v3 }
 0x3ae   :  { %10830 = vmatpush1.bf16.msra.mxu0 %v12836_v23  ;;  %v12885_v23 = vcombine.high %v380_v9, %v384_v3  ;;  %v421_v9 = vld [vmem:[%s19788_s1 + $0xc58] sm:$0xff] }
 0x3af   :  { %11363 = vmatpush1.bf16.msra.mxu1 %v12838_v1  ;;  %10831 = vmatprep.subr.bf16.mxu0 %v12845_v16  ;;  %v12887_v1 = vcombine.high %v381_v10, %v385_v11  ;;  %v388_v16 = vld [vmem:[%s19788_s1 + $0xb50] sm:$0xff]  ;;  %v425_v3 = vld [vmem:[%s19788_s1 + $0xc78] sm:$0xff]  ;;  %v12918_v11 = vcombine.low %v413_v52, %v417_v54 }
 0x3b0   :  { %11364 = vmatprep.subr.bf16.mxu1 %v12847_v18  ;;  %v392_v18 = vld [vmem:[%s19788_s1 + $0xb70] sm:$0xff] }
 0x3b1   :  { %v12892_v32 = vcombine.low %v388_v16, %v392_v18 }
 0x3b2   :  { %10832 = vmatpush1.bf16.msra.mxu0 %v12844_v40  ;;  %v12893_v40 = vcombine.high %v388_v16, %v392_v18  ;;  %v429_v16 = vld [vmem:[%s19788_s1 + $0xc98] sm:$0xff] }
 0x3b3   :  { %11365 = vmatpush1.bf16.msra.mxu1 %v12846_v33  ;;  %10833 = vmatprep.subr.bf16.mxu0 %v12853_v47  ;;  %v12895_v33 = vcombine.high %v389_v20, %v393_v21  ;;  %v396_v47 = vld [vmem:[%s19788_s1 + $0xb90] sm:$0xff]  ;;  %v433_v18 = vld [vmem:[%s19788_s1 + $0xcb8] sm:$0xff]  ;;  %v12926_v21 = vcombine.low %v421_v9, %v425_v3 }
 0x3b4   :  { %11366 = vmatprep.subr.bf16.mxu1 %v12855_v28  ;;  %v400_v28 = vld [vmem:[%s19788_s1 + $0xbb0] sm:$0xff] }
 0x3b5   :  { %v12900_v42 = vcombine.low %v396_v47, %v400_v28 }
 0x3b6   :  { %10834 = vmatpush1.bf16.msra.mxu0 %v12852_v48  ;;  %v12901_v48 = vcombine.high %v396_v47, %v400_v28  ;;  %v441_v47 = vld [vmem:[%s19788_s1 + $0xcf8] sm:$0xff] }
 0x3b7   :  { %11367 = vmatpush1.bf16.msra.mxu1 %v12854_v36  ;;  %10835 = vmatprep.subr.bf16.mxu0 %v12861_v53  ;;  %v12903_v36 = vcombine.high %v397_v29, %v401_v30  ;;  %v404_v53 = vld [vmem:[%s19788_s1 + $0xbd0] sm:$0xff]  ;;  %v12934_v29 = vcombine.low %v429_v16, %v433_v18 }
 0x3b8   :  { %11368 = vmatprep.subr.bf16.mxu1 %v12863_v38  ;;  %v408_v38 = vld [vmem:[%s19788_s1 + $0xbf0] sm:$0xff] }
 0x3b9   :  { %v12908_v55 = vcombine.low %v404_v53, %v408_v38 }
 0x3ba   :  { %10836 = vmatpush1.bf16.msra.mxu0 %v12860_v34  ;;  %v12909_v34 = vcombine.high %v404_v53, %v408_v38 }
 0x3bb   :  { %11369 = vmatpush1.bf16.msra.mxu1 %v12862_v46  ;;  %10837 = vmatprep.subr.bf16.mxu0 %v12869_v49  ;;  %v12911_v46 = vcombine.high %v405_v39, %v409_v41  ;;  %v412_v49 = vld [vmem:[%s19788_s1 + $0xc10] sm:$0xff] }
 0x3bc   :  { %11370 = vmatprep.subr.bf16.mxu1 %v12871_v50  ;;  %v416_v50 = vld [vmem:[%s19788_s1 + $0xc30] sm:$0xff] }
 0x3bd   :  { %v12916_v10 = vcombine.low %v412_v49, %v416_v50 }
 0x3be   :  { %10838 = vmatpush1.bf16.msra.mxu0 %v12868_v61  ;;  %v12917_v61 = vcombine.high %v412_v49, %v416_v50 }
 0x3bf   :  { %11371 = vmatpush1.bf16.msra.mxu1 %v12870_v0  ;;  %10839 = vmatprep.subr.bf16.mxu0 %v12877_v63  ;;  %v12919_v0 = vcombine.high %v413_v52, %v417_v54  ;;  %v420_v63 = vld [vmem:[%s19788_s1 + $0xc50] sm:$0xff] }
 0x3c0   :  { %11372 = vmatprep.subr.bf16.mxu1 %v12879_v44  ;;  %v424_v44 = vld [vmem:[%s19788_s1 + $0xc70] sm:$0xff] }
 0x3c1   :  { %v12924_v20 = vcombine.low %v420_v63, %v424_v44 }
 0x3c2   :  { %10840 = vmatpush1.bf16.msra.mxu0 %v12876_v12  ;;  %v12925_v12 = vcombine.high %v420_v63, %v424_v44 }
 0x3c3   :  { %11373 = vmatpush1.bf16.msra.mxu1 %v12878_v13  ;;  %10841 = vmatprep.subr.bf16.mxu0 %v12885_v23  ;;  %v12927_v13 = vcombine.high %v421_v9, %v425_v3  ;;  %v428_v23 = vld [vmem:[%s19788_s1 + $0xc90] sm:$0xff] }
 0x3c4   :  { %11374 = vmatprep.subr.bf16.mxu1 %v12887_v1  ;;  %v432_v1 = vld [vmem:[%s19788_s1 + $0xcb0] sm:$0xff] }
 0x3c5   :  { %v12932_v28 = vcombine.low %v428_v23, %v432_v1 }
 0x3c6   :  { %10842 = vmatpush1.bf16.msra.mxu0 %v12884_v22  ;;  %v12933_v22 = vcombine.high %v428_v23, %v432_v1  ;;  %v469_v1 = vld [vmem:[%s19788_s1 + $0xdd8] sm:$0xff] }
 0x3c7   :  { %11375 = vmatpush1.bf16.msra.mxu1 %v12886_v24  ;;  %10843 = vmatprep.subr.bf16.mxu0 %v12893_v40  ;;  %v12935_v24 = vcombine.high %v429_v16, %v433_v18  ;;  %v436_v40 = vld [vmem:[%s19788_s1 + $0xcd0] sm:$0xff]  ;;  %v473_v16 = vld [vmem:[%s19788_s1 + $0xdf8] sm:$0xff] }
 0x3c8   :  { %11376 = vmatprep.subr.bf16.mxu1 %v12895_v33  ;;  %v440_v33 = vld [vmem:[%s19788_s1 + $0xcf0] sm:$0xff] }
 0x3c9   :  { %v12941_v30 = vcombine.high %v436_v40, %v440_v33  ;;  %v12940_v53 = vcombine.low %v436_v40, %v440_v33 }
 0x3ca   :  { %10844 = vmatpush1.bf16.msra.mxu0 %v12892_v32 }
 0x3cb   :  { %11377 = vmatpush1.bf16.msra.mxu1 %v12894_v35  ;;  %10845 = vmatprep.subr.bf16.mxu0 %v12901_v48  ;;  %v444_v35 = vld [vmem:[%s19788_s1 + $0xd10] sm:$0xff] }
 0x3cc   :  { %11378 = vmatprep.subr.bf16.mxu1 %v12903_v36  ;;  %v448_v48 = vld [vmem:[%s19788_s1 + $0xd30] sm:$0xff]  ;;  %v449_v36 = vld [vmem:[%s19788_s1 + $0xd38] sm:$0xff] }
 0x3cd   :  { %v12949_v39 = vcombine.high %v444_v35, %v448_v48  ;;  %v12948_v49 = vcombine.low %v444_v35, %v448_v48  ;;  %v12974_v48 = vcombine.low %v469_v1, %v473_v16 }
 0x3ce   :  { %10846 = vmatpush1.bf16.msra.mxu0 %v12900_v42  ;;  %v452_v42 = vld [vmem:[%s19788_s1 + $0xd50] sm:$0xff] }
 0x3cf   :  { %11379 = vmatpush1.bf16.msra.mxu1 %v12902_v45  ;;  %10847 = vmatprep.subr.bf16.mxu0 %v12909_v34  ;;  %v456_v45 = vld [vmem:[%s19788_s1 + $0xd70] sm:$0xff]  ;;  %v453_v34 = vld [vmem:[%s19788_s1 + $0xd58] sm:$0xff] }
 0x3d0   :  { %11380 = vmatprep.subr.bf16.mxu1 %v12911_v46  ;;  %v457_v46 = vld [vmem:[%s19788_s1 + $0xd78] sm:$0xff]  ;;  %v12957_v52 = vcombine.high %v452_v42, %v456_v45  ;;  %v12956_v63 = vcombine.low %v452_v42, %v456_v45 }
 0x3d1   :  { %v12959_v54 = vcombine.high %v453_v34, %v457_v46  ;;  %v12958_v44 = vcombine.low %v453_v34, %v457_v46 }
 0x3d2   :  { %10848 = vmatpush1.bf16.msra.mxu0 %v12908_v55  ;;  %v460_v55 = vld [vmem:[%s19788_s1 + $0xd90] sm:$0xff] }
 0x3d3   :  { %11381 = vmatpush1.bf16.msra.mxu1 %v12910_v60  ;;  %10858 = vmatprep.subr.bf16.mxu0 %v12917_v61  ;;  %v464_v60 = vld [vmem:[%s19788_s1 + $0xdb0] sm:$0xff]  ;;  %v461_v61 = vld [vmem:[%s19788_s1 + $0xd98] sm:$0xff] }
 0x3d4   :  { %11391 = vmatprep.subr.bf16.mxu1 %v12919_v0  ;;  %v465_v0 = vld [vmem:[%s19788_s1 + $0xdb8] sm:$0xff]  ;;  %v12965_v9 = vcombine.high %v460_v55, %v464_v60 }
 0x3d5   :  { %10850 = vmatmul.mubr.bf16.vlgmr.msra.gmra.mrb[4].mxu0 %v15227_v58  ;;  %v12966_v40 = vcombine.low %v461_v61, %v465_v0 }
 0x3d6   :  { %10859 = vmatpush1.bf16.msra.mxu0 %v12916_v10  ;;  %11383 = vmatmul.mubr.bf16.vlgmr.msra.gmra.mrb[4].mxu1 %v15227_v58  ;;  %v437_v58 = vld [vmem:[%s19788_s1 + $0xcd8] sm:$0xff]  ;;  %v12967_v10 = vcombine.high %v461_v61, %v465_v0 }
 0x3d7   :  { %11392 = vmatpush1.bf16.msra.mxu1 %v12918_v11  ;;  %10860 = vmatprep.subr.bf16.mxu0 %v12925_v12  ;;  %v12943_v32 = vcombine.high %v437_v58, %v441_v47  ;;  %v12942_v38 = vcombine.low %v437_v58, %v441_v47  ;;  %v468_v11 = vld [vmem:[%s19788_s1 + $0xdd0] sm:$0xff]  ;;  %v12975_v58 = vcombine.high %v469_v1, %v473_v16 }
 0x3d8   :  { %11393 = vmatprep.subr.bf16.mxu1 %v12927_v13  ;;  %10890 = vmatprep.mubr.bf16.mxu0 %v15243_v4  ;;  %v472_v12 = vld [vmem:[%s19788_s1 + $0xdf0] sm:$0xff] }
 0x3d9   :  { %11423 = vmatprep.mubr.bf16.mxu1 %v15243_v4  ;;  %v445_v4 = vld [vmem:[%s19788_s1 + $0xd18] sm:$0xff]  ;;  %v12973_v33 = vcombine.high %v468_v11, %v472_v12  ;;  %v476_v47 = vld [vmem:[%s19788_s1 + $0xe10] sm:$0xff]  ;;  %v12972_v35 = vcombine.low %v468_v11, %v472_v12 }
 0x3da   :  { %10861 = vmatpush1.bf16.msra.mxu0 %v12924_v20  ;;  %v12951_v41 = vcombine.high %v445_v4, %v449_v36  ;;  %v12950_v50 = vcombine.low %v445_v4, %v449_v36 }
 0x3db   :  { %11394 = vmatpush1.bf16.msra.mxu1 %v12926_v21  ;;  %10862 = vmatprep.subr.bf16.mxu0 %v12933_v22  ;;  %v12964_v21 = vcombine.low %v460_v55, %v464_v60 }
 0x3dc   :  { %11395 = vmatprep.subr.bf16.mxu1 %v12935_v24 }
 0x3de   :  { %10863 = vmatpush1.bf16.msra.mxu0 %v12932_v28  ;;  %v480_v28 = vld [vmem:[%s19788_s1 + $0xe30] sm:$0xff] }
 0x3df   :  { %11396 = vmatpush1.bf16.msra.mxu1 %v12934_v29  ;;  %10864 = vmatprep.subr.bf16.mxu0 %v12941_v30  ;;  %v477_v30 = vld [vmem:[%s19788_s1 + $0xe18] sm:$0xff]  ;;  %v12981_v4 = vcombine.high %v476_v47, %v480_v28  ;;  %v12980_v42 = vcombine.low %v476_v47, %v480_v28  ;;  %v516_v28 = vld [vmem:[%s19788_s1 + $0xf50] sm:$0xff] }
 0x3e0   :  { %11397 = vmatprep.subr.bf16.mxu1 %v12943_v32  ;;  %v481_v32 = vld [vmem:[%s19788_s1 + $0xe38] sm:$0xff] }
 0x3e1   :  { %v12983_v36 = vcombine.high %v477_v30, %v481_v32  ;;  %v12982_v45 = vcombine.low %v477_v30, %v481_v32  ;;  %v517_v30 = vld [vmem:[%s19788_s1 + $0xf58] sm:$0xff] }
 0x3e2   :  { %10865 = vmatpush1.bf16.msra.mxu0 %v12940_v53  ;;  %v484_v53 = vld [vmem:[%s19788_s1 + $0xe50] sm:$0xff]  ;;  %v521_v32 = vld [vmem:[%s19788_s1 + $0xf78] sm:$0xff] }
 0x3e3   :  { %11398 = vmatpush1.bf16.msra.mxu1 %v12942_v38  ;;  %10866 = vmatprep.subr.bf16.mxu0 %v12949_v39  ;;  %v488_v38 = vld [vmem:[%s19788_s1 + $0xe70] sm:$0xff]  ;;  %v485_v39 = vld [vmem:[%s19788_s1 + $0xe58] sm:$0xff] }
 0x3e4   :  { %11399 = vmatprep.subr.bf16.mxu1 %v12951_v41  ;;  %v489_v41 = vld [vmem:[%s19788_s1 + $0xe78] sm:$0xff]  ;;  %v12989_v34 = vcombine.high %v484_v53, %v488_v38  ;;  %v12988_v55 = vcombine.low %v484_v53, %v488_v38  ;;  %v524_v53 = vld [vmem:[%s19788_s1 + $0xf90] sm:$0xff] }
 0x3e5   :  { %v12991_v46 = vcombine.high %v485_v39, %v489_v41  ;;  %v12990_v60 = vcombine.low %v485_v39, %v489_v41  ;;  %v528_v38 = vld [vmem:[%s19788_s1 + $0xfb0] sm:$0xff]  ;;  %v525_v39 = vld [vmem:[%s19788_s1 + $0xf98] sm:$0xff] }
 0x3e6   :  { %10867 = vmatpush1.bf16.msra.mxu0 %v12948_v49  ;;  %v492_v49 = vld [vmem:[%s19788_s1 + $0xe90] sm:$0xff]  ;;  %v529_v41 = vld [vmem:[%s19788_s1 + $0xfb8] sm:$0xff] }
 0x3e7   :  { %11400 = vmatpush1.bf16.msra.mxu1 %v12950_v50  ;;  %10868 = vmatprep.subr.bf16.mxu0 %v12957_v52  ;;  %v496_v50 = vld [vmem:[%s19788_s1 + $0xeb0] sm:$0xff]  ;;  %v493_v52 = vld [vmem:[%s19788_s1 + $0xe98] sm:$0xff] }
 0x3e8   :  { %v17815_v3 = vpop.f32.mrb[0].mxu0  ;;  %11401 = vmatprep.subr.bf16.mxu1 %v12959_v54  ;;  %v497_v54 = vld [vmem:[%s19788_s1 + $0xeb8] sm:$0xff]  ;;  %v12997_v61 = vcombine.high %v492_v49, %v496_v50  ;;  %v12996_v11 = vcombine.low %v492_v49, %v496_v50  ;;  %v532_v49 = vld [vmem:[%s19788_s1 + $0xfd0] sm:$0xff] }
 0x3e9   :  { %v17823_v13 = vpop.f32.mrb[0].mxu1  ;;  %v17825_v23 = vpop.f32.mrb[1].mxu0  ;;  %v12999_v0 = vcombine.high %v493_v52, %v497_v54  ;;  %v12998_v12 = vcombine.low %v493_v52, %v497_v54  ;;  %v536_v50 = vld [vmem:[%s19788_s1 + $0xff0] sm:$0xff]  ;;  %v533_v52 = vld [vmem:[%s19788_s1 + $0xfd8] sm:$0xff] }
 0x3ea   :  { %v17833_v18 = vpop.f32.mrb[1].mxu1  ;;  %v10199_v20 = vpop.f32.mrb[2].mxu0  ;;  %10869 = vmatpush1.bf16.msra.mxu0 %v12956_v63  ;;  %v500_v63 = vld [vmem:[%s19788_s1 + $0xed0] sm:$0xff]  ;;  %v537_v54 = vld [vmem:[%s19788_s1 + $0xff8] sm:$0xff] }
 0x3eb   :  { %v10732_v22 = vpop.f32.mrb[2].mxu1  ;;  %11402 = vmatpush1.bf16.msra.mxu1 %v12958_v44  ;;  %v10200_v24 = vpop.f32.mrb[3].mxu0  ;;  %10870 = vmatprep.subr.bf16.mxu0 %v12965_v9  ;;  %v504_v44 = vld [vmem:[%s19788_s1 + $0xef0] sm:$0xff]  ;;  %v501_v9 = vld [vmem:[%s19788_s1 + $0xed8] sm:$0xff] }
 0x3ec   :  { %11403 = vmatprep.subr.bf16.mxu1 %v12967_v10  ;;  %v10733_v29 = vpop.f32.mrb[3].mxu1  ;;  %v505_v10 = vld [vmem:[%s19788_s1 + $0xef8] sm:$0xff]  ;;  %v13005_v1 = vcombine.high %v500_v63, %v504_v44  ;;  %v508_v20 = vld [vmem:[%s19788_s1 + $0xf10] sm:$0xff] }
 0x3ed   :  { %v13007_v16 = vcombine.high %v501_v9, %v505_v10  ;;  %v509_v22 = vld [vmem:[%s19788_s1 + $0xf18] sm:$0xff]  ;;  %v520_v29 = vld [vmem:[%s19788_s1 + $0xf70] sm:$0xff] }
 0x3ee   :  { %10871 = vmatpush1.bf16.msra.mxu0 %v12964_v21  ;;  %v512_v21 = vld [vmem:[%s19788_s1 + $0xf30] sm:$0xff]  ;;  %v513_v24 = vld [vmem:[%s19788_s1 + $0xf38] sm:$0xff] }
 0x3ef   :  { %11404 = vmatpush1.bf16.msra.mxu1 %v12966_v40  ;;  %10872 = vmatprep.subr.bf16.mxu0 %v12973_v33  ;;  %v13004_v40 = vcombine.low %v500_v63, %v504_v44  ;;  %v13006_v33 = vcombine.low %v501_v9, %v505_v10  ;;  %v13015_v47 = vcombine.high %v509_v22, %v513_v24  ;;  %v540_v63 = vld [vmem:[%s19788_s1 + $0x1010] sm:$0xff]  ;;  %v541_v9 = vld [vmem:[%s19788_s1 + $0x1018] sm:$0xff] }
 0x3f0   :  { %11405 = vmatprep.subr.bf16.mxu1 %v12975_v58  ;;  %v13013_v58 = vcombine.high %v508_v20, %v512_v21  ;;  %v544_v44 = vld [vmem:[%s19788_s1 + $0x1030] sm:$0xff]  ;;  %v545_v10 = vld [vmem:[%s19788_s1 + $0x1038] sm:$0xff] }
 0x3f2   :  { %10873 = vmatpush1.bf16.msra.mxu0 %v12972_v35  ;;  %v13012_v35 = vcombine.low %v508_v20, %v512_v21  ;;  %v548_v20 = vld [vmem:[%s19788_s1 + $0x1050] sm:$0xff] }
 0x3f3   :  { %11406 = vmatpush1.bf16.msra.mxu1 %v12974_v48  ;;  %10874 = vmatprep.subr.bf16.mxu0 %v12981_v4  ;;  %v13014_v48 = vcombine.low %v509_v22, %v513_v24  ;;  %v13021_v4 = vcombine.high %v516_v28, %v520_v29  ;;  %v552_v21 = vld [vmem:[%s19788_s1 + $0x1070] sm:$0xff]  ;;  %v549_v22 = vld [vmem:[%s19788_s1 + $0x1058] sm:$0xff] }
 0x3f4   :  { %11407 = vmatprep.subr.bf16.mxu1 %v12983_v36  ;;  %v13023_v36 = vcombine.high %v517_v30, %v521_v32  ;;  %v553_v24 = vld [vmem:[%s19788_s1 + $0x1078] sm:$0xff] }
 0x3f6   :  { %10875 = vmatpush1.bf16.msra.mxu0 %v12980_v42  ;;  %v13020_v42 = vcombine.low %v516_v28, %v520_v29  ;;  %v556_v28 = vld [vmem:[%s19788_s1 + $0x1090] sm:$0xff] }
 0x3f7   :  { %11408 = vmatpush1.bf16.msra.mxu1 %v12982_v45  ;;  %10876 = vmatprep.subr.bf16.mxu0 %v12989_v34  ;;  %v13022_v45 = vcombine.low %v517_v30, %v521_v32  ;;  %v13029_v34 = vcombine.high %v524_v53, %v528_v38  ;;  %v560_v29 = vld [vmem:[%s19788_s1 + $0x10b0] sm:$0xff]  ;;  %v557_v30 = vld [vmem:[%s19788_s1 + $0x1098] sm:$0xff] }
 0x3f8   :  { %11409 = vmatprep.subr.bf16.mxu1 %v12991_v46  ;;  %v13031_v46 = vcombine.high %v525_v39, %v529_v41  ;;  %v561_v32 = vld [vmem:[%s19788_s1 + $0x10b8] sm:$0xff] }
 0x3fa   :  { %10877 = vmatpush1.bf16.msra.mxu0 %v12988_v55  ;;  %v13028_v55 = vcombine.low %v524_v53, %v528_v38  ;;  %v564_v53 = vld [vmem:[%s19788_s1 + $0x10d0] sm:$0xff] }
 0x3fb   :  { %11410 = vmatpush1.bf16.msra.mxu1 %v12990_v60  ;;  %10878 = vmatprep.subr.bf16.mxu0 %v12997_v61  ;;  %v13030_v60 = vcombine.low %v525_v39, %v529_v41  ;;  %v13037_v61 = vcombine.high %v532_v49, %v536_v50  ;;  %v568_v38 = vld [vmem:[%s19788_s1 + $0x10f0] sm:$0xff]  ;;  %v569_v39 = vld [vmem:[%s19788_s1 + $0x10f8] sm:$0xff]  ;;  %v13060_v41 = vcombine.low %v556_v28, %v560_v29 }
 0x3fc   :  { %11411 = vmatprep.subr.bf16.mxu1 %v12999_v0  ;;  %v13039_v0 = vcombine.high %v533_v52, %v537_v54 }
 0x3fe   :  { %10879 = vmatpush1.bf16.msra.mxu0 %v12996_v11  ;;  %v13036_v11 = vcombine.low %v532_v49, %v536_v50  ;;  %v576_v49 = vld [vmem:[%s19788_s1 + $0x1130] sm:$0xff]  ;;  %v577_v50 = vld [vmem:[%s19788_s1 + $0x1138] sm:$0xff] }
 0x3ff   :  { %11412 = vmatpush1.bf16.msra.mxu1 %v12998_v12  ;;  %10880 = vmatprep.subr.bf16.mxu0 %v13005_v1  ;;  %v13038_v12 = vcombine.low %v533_v52, %v537_v54  ;;  %v13045_v1 = vcombine.high %v540_v63, %v544_v44  ;;  %v13068_v52 = vcombine.low %v564_v53, %v568_v38 }
 0x400   :  { %11413 = vmatprep.subr.bf16.mxu1 %v13007_v16  ;;  %v13047_v16 = vcombine.high %v541_v9, %v545_v10 }
 0x402   :  { %10881 = vmatpush1.bf16.msra.mxu0 %v13004_v40  ;;  %v13044_v40 = vcombine.low %v540_v63, %v544_v44  ;;  %v581_v63 = vld [vmem:[%s19788_s1 + $0x1158] sm:$0xff] }
 0x403   :  { %11414 = vmatpush1.bf16.msra.mxu1 %v13006_v33  ;;  %10882 = vmatprep.subr.bf16.mxu0 %v13013_v58  ;;  %v13046_v33 = vcombine.low %v541_v9, %v545_v10  ;;  %v13053_v58 = vcombine.high %v548_v20, %v552_v21  ;;  %v585_v44 = vld [vmem:[%s19788_s1 + $0x1178] sm:$0xff] }
 0x404   :  { %11415 = vmatprep.subr.bf16.mxu1 %v13015_v47  ;;  %v13055_v47 = vcombine.high %v549_v22, %v553_v24 }
 0x406   :  { %10883 = vmatpush1.bf16.msra.mxu0 %v13012_v35  ;;  %v13052_v35 = vcombine.low %v548_v20, %v552_v21  ;;  %v589_v20 = vld [vmem:[%s19788_s1 + $0x1198] sm:$0xff] }
 0x407   :  { %11416 = vmatpush1.bf16.msra.mxu1 %v13014_v48  ;;  %10884 = vmatprep.subr.bf16.mxu0 %v13021_v4  ;;  %v13054_v48 = vcombine.low %v549_v22, %v553_v24  ;;  %v13061_v4 = vcombine.high %v556_v28, %v560_v29  ;;  %v593_v21 = vld [vmem:[%s19788_s1 + $0x11b8] sm:$0xff]  ;;  %v13086_v24 = vcombine.low %v581_v63, %v585_v44 }
 0x408   :  { %11417 = vmatprep.subr.bf16.mxu1 %v13023_v36  ;;  %v13063_v36 = vcombine.high %v557_v30, %v561_v32  ;;  %v597_v28 = vld [vmem:[%s19788_s1 + $0x11d8] sm:$0xff] }
 0x409   :  { %v601_v29 = vld [vmem:[%s19788_s1 + $0x11f8] sm:$0xff] }
 0x40a   :  { %10885 = vmatpush1.bf16.msra.mxu0 %v13020_v42  ;;  %v13062_v42 = vcombine.low %v557_v30, %v561_v32  ;;  %v13094_v32 = vcombine.low %v589_v20, %v593_v21 }
 0x40b   :  { %11418 = vmatpush1.bf16.msra.mxu1 %v13022_v45  ;;  %10886 = vmatprep.subr.bf16.mxu0 %v13029_v34  ;;  %v13069_v45 = vcombine.high %v564_v53, %v568_v38  ;;  %v605_v53 = vld [vmem:[%s19788_s1 + $0x1218] sm:$0xff] }
 0x40c   :  { %11419 = vmatprep.subr.bf16.mxu1 %v13031_v46  ;;  %v572_v46 = vld [vmem:[%s19788_s1 + $0x1110] sm:$0xff]  ;;  %v609_v38 = vld [vmem:[%s19788_s1 + $0x1238] sm:$0xff] }
 0x40d   :  { %v13076_v9 = vcombine.low %v572_v46, %v576_v49 }
 0x40e   :  { %10887 = vmatpush1.bf16.msra.mxu0 %v13028_v55  ;;  %v13077_v55 = vcombine.high %v572_v46, %v576_v49  ;;  %v613_v46 = vld [vmem:[%s19788_s1 + $0x1258] sm:$0xff] }
 0x40f   :  { %11420 = vmatpush1.bf16.msra.mxu1 %v13030_v60  ;;  %10888 = vmatprep.subr.bf16.mxu0 %v13037_v61  ;;  %v580_v61 = vld [vmem:[%s19788_s1 + $0x1150] sm:$0xff]  ;;  %v617_v49 = vld [vmem:[%s19788_s1 + $0x1278] sm:$0xff] }
 0x410   :  { %11421 = vmatprep.subr.bf16.mxu1 %v13039_v0  ;;  %v584_v0 = vld [vmem:[%s19788_s1 + $0x1170] sm:$0xff] }
 0x411   :  { %v13084_v22 = vcombine.low %v580_v61, %v584_v0 }
 0x412   :  { %10889 = vmatpush1.bf16.msra.mxu0 %v13036_v11  ;;  %v13085_v11 = vcombine.high %v580_v61, %v584_v0  ;;  %v621_v61 = vld [vmem:[%s19788_s1 + $0x1298] sm:$0xff] }
 0x413   :  { %11422 = vmatpush1.bf16.msra.mxu1 %v13038_v12  ;;  %10899 = vmatprep.subr.bf16.mxu0 %v13045_v1  ;;  %v13087_v12 = vcombine.high %v581_v63, %v585_v44  ;;  %v588_v1 = vld [vmem:[%s19788_s1 + $0x1190] sm:$0xff]  ;;  %v625_v0 = vld [vmem:[%s19788_s1 + $0x12b8] sm:$0xff]  ;;  %v13118_v44 = vcombine.low %v613_v46, %v617_v49 }
 0x414   :  { %11432 = vmatprep.subr.bf16.mxu1 %v13047_v16  ;;  %v592_v16 = vld [vmem:[%s19788_s1 + $0x11b0] sm:$0xff] }
 0x415   :  { %10891 = vmatmul.mubr.bf16.vlgmr.msra.gmra.mrb[4].mxu0 %v15442_v19  ;;  %v13092_v30 = vcombine.low %v588_v1, %v592_v16 }
 0x416   :  { %10900 = vmatpush1.bf16.msra.mxu0 %v13044_v40  ;;  %11424 = vmatmul.mubr.bf16.vlgmr.msra.gmra.mrb[4].mxu1 %v15442_v19  ;;  %v565_v19 = vld [vmem:[%s19788_s1 + $0x10d8] sm:$0xff]  ;;  %v13093_v40 = vcombine.high %v588_v1, %v592_v16 }
 0x417   :  { %11433 = vmatpush1.bf16.msra.mxu1 %v13046_v33  ;;  %10901 = vmatprep.subr.bf16.mxu0 %v13053_v58  ;;  %v13071_v34 = vcombine.high %v565_v19, %v569_v39  ;;  %v13070_v54 = vcombine.low %v565_v19, %v569_v39  ;;  %v13095_v33 = vcombine.high %v589_v20, %v593_v21  ;;  %v596_v58 = vld [vmem:[%s19788_s1 + $0x11d0] sm:$0xff]  ;;  %v629_v1 = vld [vmem:[%s19788_s1 + $0x12d8] sm:$0xff] }
 0x418   :  { %11434 = vmatprep.subr.bf16.mxu1 %v13055_v47  ;;  %10931 = vmatprep.mubr.bf16.mxu0 %v15457_v59  ;;  %v600_v47 = vld [vmem:[%s19788_s1 + $0x11f0] sm:$0xff]  ;;  %v13102_v39 = vcombine.low %v597_v28, %v601_v29  ;;  %v633_v16 = vld [vmem:[%s19788_s1 + $0x12f8] sm:$0xff]  ;;  %v13126_v21 = vcombine.low %v621_v61, %v625_v0 }
 0x419   :  { %11464 = vmatprep.mubr.bf16.mxu1 %v15457_v59  ;;  %v573_v59 = vld [vmem:[%s19788_s1 + $0x1118] sm:$0xff]  ;;  %v13100_v19 = vcombine.low %v596_v58, %v600_v47 }
 0x41a   :  { %10902 = vmatpush1.bf16.msra.mxu0 %v13052_v35  ;;  %v13079_v60 = vcombine.high %v573_v59, %v577_v50  ;;  %v13078_v10 = vcombine.low %v573_v59, %v577_v50  ;;  %v13101_v35 = vcombine.high %v596_v58, %v600_v47  ;;  %v13110_v50 = vcombine.low %v605_v53, %v609_v38  ;;  %v637_v58 = vld [vmem:[%s19788_s1 + $0x1318] sm:$0xff] }
 0x41b   :  { %11435 = vmatpush1.bf16.msra.mxu1 %v13054_v48  ;;  %10903 = vmatprep.subr.bf16.mxu0 %v13061_v4  ;;  %v13103_v48 = vcombine.high %v597_v28, %v601_v29  ;;  %v604_v4 = vld [vmem:[%s19788_s1 + $0x1210] sm:$0xff]  ;;  %v641_v47 = vld [vmem:[%s19788_s1 + $0x1338] sm:$0xff]  ;;  %v13134_v29 = vcombine.low %v629_v1, %v633_v16 }
 0x41c   :  { %11436 = vmatprep.subr.bf16.mxu1 %v13063_v36  ;;  %v608_v36 = vld [vmem:[%s19788_s1 + $0x1230] sm:$0xff] }
 0x41d   :  { %v13108_v59 = vcombine.low %v604_v4, %v608_v36 }
 0x41e   :  { %10904 = vmatpush1.bf16.msra.mxu0 %v13060_v41  ;;  %v13109_v41 = vcombine.high %v604_v4, %v608_v36  ;;  %v645_v4 = vld [vmem:[%s19788_s1 + $0x1358] sm:$0xff] }
 0x41f   :  { %11437 = vmatpush1.bf16.msra.mxu1 %v13062_v42  ;;  %10905 = vmatprep.subr.bf16.mxu0 %v13069_v45  ;;  %v13111_v42 = vcombine.high %v605_v53, %v609_v38  ;;  %v612_v45 = vld [vmem:[%s19788_s1 + $0x1250] sm:$0xff]  ;;  %v649_v36 = vld [vmem:[%s19788_s1 + $0x1378] sm:$0xff]  ;;  %v13142_v38 = vcombine.low %v637_v58, %v641_v47 }
 0x420   :  { %11438 = vmatprep.subr.bf16.mxu1 %v13071_v34  ;;  %v616_v34 = vld [vmem:[%s19788_s1 + $0x1270] sm:$0xff] }
 0x421   :  { %v13116_v63 = vcombine.low %v612_v45, %v616_v34 }
 0x422   :  { %10906 = vmatpush1.bf16.msra.mxu0 %v13068_v52  ;;  %v13117_v52 = vcombine.high %v612_v45, %v616_v34  ;;  %v653_v45 = vld [vmem:[%s19788_s1 + $0x1398] sm:$0xff] }
 0x423   :  { %11439 = vmatpush1.bf16.msra.mxu1 %v13070_v54  ;;  %10907 = vmatprep.subr.bf16.mxu0 %v13077_v55  ;;  %v13119_v54 = vcombine.high %v613_v46, %v617_v49  ;;  %v620_v55 = vld [vmem:[%s19788_s1 + $0x1290] sm:$0xff]  ;;  %v657_v34 = vld [vmem:[%s19788_s1 + $0x13b8] sm:$0xff]  ;;  %v13150_v49 = vcombine.low %v645_v4, %v649_v36 }
 0x424   :  { %11440 = vmatprep.subr.bf16.mxu1 %v13079_v60  ;;  %v624_v60 = vld [vmem:[%s19788_s1 + $0x12b0] sm:$0xff] }
 0x425   :  { %v13124_v20 = vcombine.low %v620_v55, %v624_v60 }
 0x426   :  { %10908 = vmatpush1.bf16.msra.mxu0 %v13076_v9  ;;  %v13125_v9 = vcombine.high %v620_v55, %v624_v60  ;;  %v661_v55 = vld [vmem:[%s19788_s1 + $0x13d8] sm:$0xff] }
 0x427   :  { %11441 = vmatpush1.bf16.msra.mxu1 %v13078_v10  ;;  %10909 = vmatprep.subr.bf16.mxu0 %v13085_v11  ;;  %v13127_v10 = vcombine.high %v621_v61, %v625_v0  ;;  %v628_v11 = vld [vmem:[%s19788_s1 + $0x12d0] sm:$0xff]  ;;  %v665_v60 = vld [vmem:[%s19788_s1 + $0x13f8] sm:$0xff]  ;;  %v13158_v0 = vcombine.low %v653_v45, %v657_v34 }
 0x428   :  { %11442 = vmatprep.subr.bf16.mxu1 %v13087_v12  ;;  %v632_v12 = vld [vmem:[%s19788_s1 + $0x12f0] sm:$0xff] }
 0x429   :  { %v13132_v28 = vcombine.low %v628_v11, %v632_v12 }
 0x42a   :  { %10910 = vmatpush1.bf16.msra.mxu0 %v13084_v22  ;;  %v13133_v22 = vcombine.high %v628_v11, %v632_v12  ;;  %v669_v11 = vld [vmem:[%s19788_s1 + $0x1418] sm:$0xff] }
 0x42b   :  { %11443 = vmatpush1.bf16.msra.mxu1 %v13086_v24  ;;  %10911 = vmatprep.subr.bf16.mxu0 %v13093_v40  ;;  %v13135_v24 = vcombine.high %v629_v1, %v633_v16  ;;  %v636_v40 = vld [vmem:[%s19788_s1 + $0x1310] sm:$0xff]  ;;  %v673_v12 = vld [vmem:[%s19788_s1 + $0x1438] sm:$0xff]  ;;  %v13166_v16 = vcombine.low %v661_v55, %v665_v60 }
 0x42c   :  { %11444 = vmatprep.subr.bf16.mxu1 %v13095_v33  ;;  %v640_v33 = vld [vmem:[%s19788_s1 + $0x1330] sm:$0xff] }
 0x42d   :  { %v13140_v53 = vcombine.low %v636_v40, %v640_v33 }
 0x42e   :  { %10912 = vmatpush1.bf16.msra.mxu0 %v13092_v30  ;;  %v13141_v30 = vcombine.high %v636_v40, %v640_v33  ;;  %v677_v40 = vld [vmem:[%s19788_s1 + $0x1458] sm:$0xff] }
 0x42f   :  { %11445 = vmatpush1.bf16.msra.mxu1 %v13094_v32  ;;  %10913 = vmatprep.subr.bf16.mxu0 %v13101_v35  ;;  %v13143_v32 = vcombine.high %v637_v58, %v641_v47  ;;  %v644_v35 = vld [vmem:[%s19788_s1 + $0x1350] sm:$0xff]  ;;  %v681_v33 = vld [vmem:[%s19788_s1 + $0x1478] sm:$0xff]  ;;  %v13174_v47 = vcombine.low %v669_v11, %v673_v12 }
 0x430   :  { %11446 = vmatprep.subr.bf16.mxu1 %v13103_v48  ;;  %v648_v48 = vld [vmem:[%s19788_s1 + $0x1370] sm:$0xff] }
 0x431   :  { %v13148_v46 = vcombine.low %v644_v35, %v648_v48 }
 0x432   :  { %10914 = vmatpush1.bf16.msra.mxu0 %v13100_v19  ;;  %v13149_v19 = vcombine.high %v644_v35, %v648_v48  ;;  %v685_v35 = vld [vmem:[%s19788_s1 + $0x1498] sm:$0xff] }
 0x433   :  { %11447 = vmatpush1.bf16.msra.mxu1 %v13102_v39  ;;  %10915 = vmatprep.subr.bf16.mxu0 %v13109_v41  ;;  %v13151_v39 = vcombine.high %v645_v4, %v649_v36  ;;  %v652_v41 = vld [vmem:[%s19788_s1 + $0x1390] sm:$0xff]  ;;  %v689_v48 = vld [vmem:[%s19788_s1 + $0x14b8] sm:$0xff]  ;;  %v13182_v36 = vcombine.low %v677_v40, %v681_v33 }
 0x434   :  { %11448 = vmatprep.subr.bf16.mxu1 %v13111_v42  ;;  %v656_v42 = vld [vmem:[%s19788_s1 + $0x13b0] sm:$0xff] }
 0x435   :  { %v13156_v61 = vcombine.low %v652_v41, %v656_v42 }
 0x436   :  { %10916 = vmatpush1.bf16.msra.mxu0 %v13108_v59  ;;  %v13157_v59 = vcombine.high %v652_v41, %v656_v42  ;;  %v697_v41 = vld [vmem:[%s19788_s1 + $0x14f8] sm:$0xff] }
 0x437   :  { %11449 = vmatpush1.bf16.msra.mxu1 %v13110_v50  ;;  %10917 = vmatprep.subr.bf16.mxu0 %v13117_v52  ;;  %v13159_v50 = vcombine.high %v653_v45, %v657_v34  ;;  %v660_v52 = vld [vmem:[%s19788_s1 + $0x13d0] sm:$0xff]  ;;  %v13190_v45 = vcombine.low %v685_v35, %v689_v48 }
 0x438   :  { %11450 = vmatprep.subr.bf16.mxu1 %v13119_v54  ;;  %v664_v54 = vld [vmem:[%s19788_s1 + $0x13f0] sm:$0xff] }
 0x439   :  { %v13164_v1 = vcombine.low %v660_v52, %v664_v54 }
 0x43a   :  { %10918 = vmatpush1.bf16.msra.mxu0 %v13116_v63  ;;  %v13165_v63 = vcombine.high %v660_v52, %v664_v54 }
 0x43b   :  { %11451 = vmatpush1.bf16.msra.mxu1 %v13118_v44  ;;  %10919 = vmatprep.subr.bf16.mxu0 %v13125_v9  ;;  %v13167_v44 = vcombine.high %v661_v55, %v665_v60  ;;  %v668_v9 = vld [vmem:[%s19788_s1 + $0x1410] sm:$0xff] }
 0x43c   :  { %11452 = vmatprep.subr.bf16.mxu1 %v13127_v10  ;;  %v672_v10 = vld [vmem:[%s19788_s1 + $0x1430] sm:$0xff] }
 0x43d   :  { %v13172_v58 = vcombine.low %v668_v9, %v672_v10 }
 0x43e   :  { %10920 = vmatpush1.bf16.msra.mxu0 %v13124_v20  ;;  %v13173_v20 = vcombine.high %v668_v9, %v672_v10 }
 0x43f   :  { %11453 = vmatpush1.bf16.msra.mxu1 %v13126_v21  ;;  %10921 = vmatprep.subr.bf16.mxu0 %v13133_v22  ;;  %v13175_v21 = vcombine.high %v669_v11, %v673_v12  ;;  %v676_v22 = vld [vmem:[%s19788_s1 + $0x1450] sm:$0xff] }
 0x440   :  { %11454 = vmatprep.subr.bf16.mxu1 %v13135_v24  ;;  %v680_v24 = vld [vmem:[%s19788_s1 + $0x1470] sm:$0xff] }
 0x441   :  { %v13180_v4 = vcombine.low %v676_v22, %v680_v24 }
 0x442   :  { %10922 = vmatpush1.bf16.msra.mxu0 %v13132_v28  ;;  %v13181_v28 = vcombine.high %v676_v22, %v680_v24 }
 0x443   :  { %11455 = vmatpush1.bf16.msra.mxu1 %v13134_v29  ;;  %10923 = vmatprep.subr.bf16.mxu0 %v13141_v30  ;;  %v13183_v29 = vcombine.high %v677_v40, %v681_v33  ;;  %v684_v30 = vld [vmem:[%s19788_s1 + $0x1490] sm:$0xff] }
 0x444   :  { %11456 = vmatprep.subr.bf16.mxu1 %v13143_v32  ;;  %v688_v32 = vld [vmem:[%s19788_s1 + $0x14b0] sm:$0xff] }
 0x445   :  { %v13188_v42 = vcombine.low %v684_v30, %v688_v32 }
 0x446   :  { %10924 = vmatpush1.bf16.msra.mxu0 %v13140_v53  ;;  %v13189_v53 = vcombine.high %v684_v30, %v688_v32 }
 0x447   :  { %11457 = vmatpush1.bf16.msra.mxu1 %v13142_v38  ;;  %10925 = vmatprep.subr.bf16.mxu0 %v13149_v19  ;;  %v13191_v38 = vcombine.high %v685_v35, %v689_v48  ;;  %v692_v19 = vld [vmem:[%s19788_s1 + $0x14d0] sm:$0xff] }
 0x448   :  { %11458 = vmatprep.subr.bf16.mxu1 %v13151_v39  ;;  %v696_v39 = vld [vmem:[%s19788_s1 + $0x14f0] sm:$0xff] }
 0x449   :  { %v13197_v34 = vcombine.high %v692_v19, %v696_v39  ;;  %v13196_v52 = vcombine.low %v692_v19, %v696_v39 }
 0x44a   :  { %10926 = vmatpush1.bf16.msra.mxu0 %v13148_v46 }
 0x44b   :  { %11459 = vmatpush1.bf16.msra.mxu1 %v13150_v49  ;;  %10927 = vmatprep.subr.bf16.mxu0 %v13157_v59  ;;  %v700_v49 = vld [vmem:[%s19788_s1 + $0x1510] sm:$0xff] }
 0x44c   :  { %11460 = vmatprep.subr.bf16.mxu1 %v13159_v50  ;;  %v704_v59 = vld [vmem:[%s19788_s1 + $0x1530] sm:$0xff]  ;;  %v705_v50 = vld [vmem:[%s19788_s1 + $0x1538] sm:$0xff] }
 0x44d   :  { %v13205_v55 = vcombine.high %v700_v49, %v704_v59  ;;  %v13204_v9 = vcombine.low %v700_v49, %v704_v59 }
 0x44e   :  { %10928 = vmatpush1.bf16.msra.mxu0 %v13156_v61  ;;  %v708_v61 = vld [vmem:[%s19788_s1 + $0x1550] sm:$0xff] }
 0x44f   :  { %11461 = vmatpush1.bf16.msra.mxu1 %v13158_v0  ;;  %10929 = vmatprep.subr.bf16.mxu0 %v13165_v63  ;;  %v712_v0 = vld [vmem:[%s19788_s1 + $0x1570] sm:$0xff]  ;;  %v709_v63 = vld [vmem:[%s19788_s1 + $0x1558] sm:$0xff] }
 0x450   :  { %11462 = vmatprep.subr.bf16.mxu1 %v13167_v44  ;;  %v713_v44 = vld [vmem:[%s19788_s1 + $0x1578] sm:$0xff]  ;;  %v13213_v11 = vcombine.high %v708_v61, %v712_v0  ;;  %v13212_v22 = vcombine.low %v708_v61, %v712_v0 }
 0x451   :  { %v13215_v12 = vcombine.high %v709_v63, %v713_v44  ;;  %v13214_v24 = vcombine.low %v709_v63, %v713_v44 }
 0x452   :  { %10930 = vmatpush1.bf16.msra.mxu0 %v13164_v1  ;;  %v716_v1 = vld [vmem:[%s19788_s1 + $0x1590] sm:$0xff] }
 0x453   :  { %11463 = vmatpush1.bf16.msra.mxu1 %v13166_v16  ;;  %10940 = vmatprep.subr.bf16.mxu0 %v13173_v20  ;;  %v720_v16 = vld [vmem:[%s19788_s1 + $0x15b0] sm:$0xff]  ;;  %v717_v20 = vld [vmem:[%s19788_s1 + $0x1598] sm:$0xff] }
 0x454   :  { %11473 = vmatprep.subr.bf16.mxu1 %v13175_v21  ;;  %v721_v21 = vld [vmem:[%s19788_s1 + $0x15b8] sm:$0xff]  ;;  %v13221_v40 = vcombine.high %v716_v1, %v720_v16  ;;  %v13220_v30 = vcombine.low %v716_v1, %v720_v16 }
 0x455   :  { %10932 = vmatmul.mubr.bf16.vlgmr.msra.gmra.mrb[4].mxu0 %v15645_v51  ;;  %v13223_v33 = vcombine.high %v717_v20, %v721_v21  ;;  %v13222_v32 = vcombine.low %v717_v20, %v721_v21 }
 0x456   :  { %10941 = vmatpush1.bf16.msra.mxu0 %v13172_v58  ;;  %11465 = vmatmul.mubr.bf16.vlgmr.msra.gmra.mrb[4].mxu1 %v15645_v51  ;;  %v693_v51 = vld [vmem:[%s19788_s1 + $0x14d8] sm:$0xff]  ;;  %v724_v58 = vld [vmem:[%s19788_s1 + $0x15d0] sm:$0xff] }
 0x457   :  { %11474 = vmatpush1.bf16.msra.mxu1 %v13174_v47  ;;  %10942 = vmatprep.subr.bf16.mxu0 %v13181_v28  ;;  %v13199_v46 = vcombine.high %v693_v51, %v697_v41  ;;  %v13198_v54 = vcombine.low %v693_v51, %v697_v41  ;;  %v728_v47 = vld [vmem:[%s19788_s1 + $0x15f0] sm:$0xff]  ;;  %v725_v28 = vld [vmem:[%s19788_s1 + $0x15d8] sm:$0xff] }
 0x458   :  { %11475 = vmatprep.subr.bf16.mxu1 %v13183_v29  ;;  %10972 = vmatprep.mubr.bf16.mxu0 %v15661_v62  ;;  %v729_v29 = vld [vmem:[%s19788_s1 + $0x15f8] sm:$0xff]  ;;  %v13229_v35 = vcombine.high %v724_v58, %v728_v47  ;;  %v13228_v19 = vcombine.low %v724_v58, %v728_v47 }
 0x459   :  { %11505 = vmatprep.mubr.bf16.mxu1 %v15661_v62  ;;  %v701_v62 = vld [vmem:[%s19788_s1 + $0x1518] sm:$0xff]  ;;  %v13231_v48 = vcombine.high %v725_v28, %v729_v29  ;;  %v13230_v39 = vcombine.low %v725_v28, %v729_v29 }
 0x45a   :  { %10943 = vmatpush1.bf16.msra.mxu0 %v13180_v4  ;;  %v13207_v60 = vcombine.high %v701_v62, %v705_v50  ;;  %v13206_v10 = vcombine.low %v701_v62, %v705_v50  ;;  %v732_v4 = vld [vmem:[%s19788_s1 + $0x1610] sm:$0xff] }
 0x45b   :  { %11476 = vmatpush1.bf16.msra.mxu1 %v13182_v36  ;;  %10944 = vmatprep.subr.bf16.mxu0 %v13189_v53  ;;  %v736_v36 = vld [vmem:[%s19788_s1 + $0x1630] sm:$0xff]  ;;  %v733_v53 = vld [vmem:[%s19788_s1 + $0x1618] sm:$0xff] }
 0x45c   :  { %11477 = vmatprep.subr.bf16.mxu1 %v13191_v38  ;;  %v737_v38 = vld [vmem:[%s19788_s1 + $0x1638] sm:$0xff]  ;;  %v13237_v51 = vcombine.high %v732_v4, %v736_v36  ;;  %v13236_v49 = vcombine.low %v732_v4, %v736_v36 }
 0x45d   :  { %v13239_v41 = vcombine.high %v733_v53, %v737_v38  ;;  %v13238_v59 = vcombine.low %v733_v53, %v737_v38 }
 0x45e   :  { %10945 = vmatpush1.bf16.msra.mxu0 %v13188_v42  ;;  %v740_v42 = vld [vmem:[%s19788_s1 + $0x1650] sm:$0xff] }
 0x45f   :  { %11478 = vmatpush1.bf16.msra.mxu1 %v13190_v45  ;;  %10946 = vmatprep.subr.bf16.mxu0 %v13197_v34  ;;  %v744_v45 = vld [vmem:[%s19788_s1 + $0x1670] sm:$0xff]  ;;  %v741_v34 = vld [vmem:[%s19788_s1 + $0x1658] sm:$0xff] }
 0x460   :  { %11479 = vmatprep.subr.bf16.mxu1 %v13199_v46  ;;  %v745_v46 = vld [vmem:[%s19788_s1 + $0x1678] sm:$0xff]  ;;  %v13245_v62 = vcombine.high %v740_v42, %v744_v45  ;;  %v13244_v61 = vcombine.low %v740_v42, %v744_v45 }
 0x461   :  { %v13247_v50 = vcombine.high %v741_v34, %v745_v46  ;;  %v13246_v0 = vcombine.low %v741_v34, %v745_v46 }
 0x462   :  { %10947 = vmatpush1.bf16.msra.mxu0 %v13196_v52  ;;  %v748_v52 = vld [vmem:[%s19788_s1 + $0x1690] sm:$0xff] }
 0x463   :  { %11480 = vmatpush1.bf16.msra.mxu1 %v13198_v54  ;;  %10948 = vmatprep.subr.bf16.mxu0 %v13205_v55  ;;  %v752_v54 = vld [vmem:[%s19788_s1 + $0x16b0] sm:$0xff]  ;;  %v749_v55 = vld [vmem:[%s19788_s1 + $0x1698] sm:$0xff] }
 0x464   :  { %11481 = vmatprep.subr.bf16.mxu1 %v13207_v60  ;;  %v753_v60 = vld [vmem:[%s19788_s1 + $0x16b8] sm:$0xff]  ;;  %v13253_v63 = vcombine.high %v748_v52, %v752_v54  ;;  %v13252_v1 = vcombine.low %v748_v52, %v752_v54 }
 0x465   :  { %v13255_v44 = vcombine.high %v749_v55, %v753_v60  ;;  %v13254_v16 = vcombine.low %v749_v55, %v753_v60 }
 0x466   :  { %10949 = vmatpush1.bf16.msra.mxu0 %v13204_v9  ;;  %v756_v9 = vld [vmem:[%s19788_s1 + $0x16d0] sm:$0xff] }
 0x467   :  { %11482 = vmatpush1.bf16.msra.mxu1 %v13206_v10  ;;  %10950 = vmatprep.subr.bf16.mxu0 %v13213_v11  ;;  %v760_v10 = vld [vmem:[%s19788_s1 + $0x16f0] sm:$0xff]  ;;  %v757_v11 = vld [vmem:[%s19788_s1 + $0x16d8] sm:$0xff] }
 0x468   :  { %11483 = vmatprep.subr.bf16.mxu1 %v13215_v12  ;;  %v761_v12 = vld [vmem:[%s19788_s1 + $0x16f8] sm:$0xff]  ;;  %v13261_v20 = vcombine.high %v756_v9, %v760_v10  ;;  %v13260_v58 = vcombine.low %v756_v9, %v760_v10 }
 0x469   :  { %v13263_v21 = vcombine.high %v757_v11, %v761_v12  ;;  %v13262_v47 = vcombine.low %v757_v11, %v761_v12 }
 0x46a   :  { %10951 = vmatpush1.bf16.msra.mxu0 %v13212_v22  ;;  %v764_v22 = vld [vmem:[%s19788_s1 + $0x1710] sm:$0xff] }
 0x46b   :  { %11484 = vmatpush1.bf16.msra.mxu1 %v13214_v24  ;;  %10952 = vmatprep.subr.bf16.mxu0 %v13221_v40  ;;  %v768_v24 = vld [vmem:[%s19788_s1 + $0x1730] sm:$0xff]  ;;  %v765_v40 = vld [vmem:[%s19788_s1 + $0x1718] sm:$0xff] }
 0x46c   :  { %11485 = vmatprep.subr.bf16.mxu1 %v13223_v33  ;;  %v769_v33 = vld [vmem:[%s19788_s1 + $0x1738] sm:$0xff]  ;;  %v13269_v28 = vcombine.high %v764_v22, %v768_v24  ;;  %v13268_v4 = vcombine.low %v764_v22, %v768_v24 }
 0x46d   :  { %v13271_v29 = vcombine.high %v765_v40, %v769_v33  ;;  %v13270_v36 = vcombine.low %v765_v40, %v769_v33 }
 0x46e   :  { %10953 = vmatpush1.bf16.msra.mxu0 %v13220_v30  ;;  %v772_v30 = vld [vmem:[%s19788_s1 + $0x1750] sm:$0xff] }
 0x46f   :  { %11486 = vmatpush1.bf16.msra.mxu1 %v13222_v32  ;;  %10954 = vmatprep.subr.bf16.mxu0 %v13229_v35  ;;  %v776_v32 = vld [vmem:[%s19788_s1 + $0x1770] sm:$0xff]  ;;  %v773_v35 = vld [vmem:[%s19788_s1 + $0x1758] sm:$0xff] }
 0x470   :  { %11487 = vmatprep.subr.bf16.mxu1 %v13231_v48  ;;  %v777_v48 = vld [vmem:[%s19788_s1 + $0x1778] sm:$0xff]  ;;  %v13277_v53 = vcombine.high %v772_v30, %v776_v32  ;;  %v13276_v42 = vcombine.low %v772_v30, %v776_v32 }
 0x471   :  { %v13279_v38 = vcombine.high %v773_v35, %v777_v48  ;;  %v13278_v45 = vcombine.low %v773_v35, %v777_v48 }
 0x472   :  { %10955 = vmatpush1.bf16.msra.mxu0 %v13228_v19  ;;  %v780_v19 = vld [vmem:[%s19788_s1 + $0x1790] sm:$0xff] }
 0x473   :  { %11488 = vmatpush1.bf16.msra.mxu1 %v13230_v39  ;;  %10956 = vmatprep.subr.bf16.mxu0 %v13237_v51  ;;  %v784_v39 = vld [vmem:[%s19788_s1 + $0x17b0] sm:$0xff]  ;;  %v781_v51 = vld [vmem:[%s19788_s1 + $0x1798] sm:$0xff] }
 0x474   :  { %11489 = vmatprep.subr.bf16.mxu1 %v13239_v41  ;;  %v785_v41 = vld [vmem:[%s19788_s1 + $0x17b8] sm:$0xff]  ;;  %v13285_v34 = vcombine.high %v780_v19, %v784_v39  ;;  %v13284_v52 = vcombine.low %v780_v19, %v784_v39 }
 0x475   :  { %v13287_v46 = vcombine.high %v781_v51, %v785_v41  ;;  %v13286_v54 = vcombine.low %v781_v51, %v785_v41  ;;  %v828_v41 = vld [vmem:[%s19788_s1 + $0x1910] sm:$0xff] }
 0x476   :  { %10957 = vmatpush1.bf16.msra.mxu0 %v13236_v49  ;;  %v788_v49 = vld [vmem:[%s19788_s1 + $0x17d0] sm:$0xff] }
 0x477   :  { %11490 = vmatpush1.bf16.msra.mxu1 %v13238_v59  ;;  %10958 = vmatprep.subr.bf16.mxu0 %v13245_v62  ;;  %v792_v59 = vld [vmem:[%s19788_s1 + $0x17f0] sm:$0xff]  ;;  %v789_v62 = vld [vmem:[%s19788_s1 + $0x17d8] sm:$0xff] }
 0x478   :  { %11491 = vmatprep.subr.bf16.mxu1 %v13247_v50  ;;  %v793_v50 = vld [vmem:[%s19788_s1 + $0x17f8] sm:$0xff]  ;;  %v13293_v55 = vcombine.high %v788_v49, %v792_v59  ;;  %v13292_v9 = vcombine.low %v788_v49, %v792_v59 }
 0x479   :  { %v13295_v60 = vcombine.high %v789_v62, %v793_v50  ;;  %v13294_v10 = vcombine.low %v789_v62, %v793_v50  ;;  %v836_v62 = vld [vmem:[%s19788_s1 + $0x1950] sm:$0xff] }
 0x47a   :  { %10959 = vmatpush1.bf16.msra.mxu0 %v13244_v61  ;;  %v796_v61 = vld [vmem:[%s19788_s1 + $0x1810] sm:$0xff] }
 0x47b   :  { %11492 = vmatpush1.bf16.msra.mxu1 %v13246_v0  ;;  %10960 = vmatprep.subr.bf16.mxu0 %v13253_v63  ;;  %v800_v0 = vld [vmem:[%s19788_s1 + $0x1830] sm:$0xff]  ;;  %v797_v63 = vld [vmem:[%s19788_s1 + $0x1818] sm:$0xff] }
 0x47c   :  { %11493 = vmatprep.subr.bf16.mxu1 %v13255_v44  ;;  %v801_v44 = vld [vmem:[%s19788_s1 + $0x1838] sm:$0xff]  ;;  %v13301_v11 = vcombine.high %v796_v61, %v800_v0  ;;  %v13300_v22 = vcombine.low %v796_v61, %v800_v0  ;;  %v840_v50 = vld [vmem:[%s19788_s1 + $0x1970] sm:$0xff] }
 0x47d   :  { %v13303_v12 = vcombine.high %v797_v63, %v801_v44  ;;  %v13302_v24 = vcombine.low %v797_v63, %v801_v44  ;;  %v13341_v61 = vcombine.high %v836_v62, %v840_v50  ;;  %v844_v63 = vld [vmem:[%s19788_s1 + $0x1990] sm:$0xff] }
 0x47e   :  { %10961 = vmatpush1.bf16.msra.mxu0 %v13252_v1  ;;  %v804_v1 = vld [vmem:[%s19788_s1 + $0x1850] sm:$0xff] }
 0x47f   :  { %11494 = vmatpush1.bf16.msra.mxu1 %v13254_v16  ;;  %10962 = vmatprep.subr.bf16.mxu0 %v13261_v20  ;;  %v808_v16 = vld [vmem:[%s19788_s1 + $0x1870] sm:$0xff]  ;;  %v805_v20 = vld [vmem:[%s19788_s1 + $0x1858] sm:$0xff] }
 0x480   :  { %11495 = vmatprep.subr.bf16.mxu1 %v13263_v21  ;;  %v809_v21 = vld [vmem:[%s19788_s1 + $0x1878] sm:$0xff]  ;;  %v13309_v40 = vcombine.high %v804_v1, %v808_v16  ;;  %v13308_v30 = vcombine.low %v804_v1, %v808_v16  ;;  %v848_v44 = vld [vmem:[%s19788_s1 + $0x19b0] sm:$0xff] }
 0x481   :  { %v13311_v33 = vcombine.high %v805_v20, %v809_v21  ;;  %v13310_v32 = vcombine.low %v805_v20, %v809_v21  ;;  %v13349_v1 = vcombine.high %v844_v63, %v848_v44  ;;  %v852_v20 = vld [vmem:[%s19788_s1 + $0x19d0] sm:$0xff] }
 0x482   :  { %10963 = vmatpush1.bf16.msra.mxu0 %v13260_v58  ;;  %v812_v58 = vld [vmem:[%s19788_s1 + $0x1890] sm:$0xff] }
 0x483   :  { %11496 = vmatpush1.bf16.msra.mxu1 %v13262_v47  ;;  %10964 = vmatprep.subr.bf16.mxu0 %v13269_v28  ;;  %v816_v47 = vld [vmem:[%s19788_s1 + $0x18b0] sm:$0xff]  ;;  %v813_v28 = vld [vmem:[%s19788_s1 + $0x1898] sm:$0xff] }
 0x484   :  { %11497 = vmatprep.subr.bf16.mxu1 %v13271_v29  ;;  %v817_v29 = vld [vmem:[%s19788_s1 + $0x18b8] sm:$0xff]  ;;  %v13317_v35 = vcombine.high %v812_v58, %v816_v47  ;;  %v856_v21 = vld [vmem:[%s19788_s1 + $0x19f0] sm:$0xff] }
 0x485   :  { %v13319_v48 = vcombine.high %v813_v28, %v817_v29  ;;  %v13318_v19 = vcombine.low %v813_v28, %v817_v29  ;;  %v860_v28 = vld [vmem:[%s19788_s1 + $0x1a10] sm:$0xff] }
 0x486   :  { %10965 = vmatpush1.bf16.msra.mxu0 %v13268_v4  ;;  %v820_v4 = vld [vmem:[%s19788_s1 + $0x18d0] sm:$0xff] }
 0x487   :  { %11498 = vmatpush1.bf16.msra.mxu1 %v13270_v36  ;;  %10966 = vmatprep.subr.bf16.mxu0 %v13277_v53  ;;  %v824_v36 = vld [vmem:[%s19788_s1 + $0x18f0] sm:$0xff]  ;;  %v825_v53 = vld [vmem:[%s19788_s1 + $0x18f8] sm:$0xff] }
 0x488   :  { %11499 = vmatprep.subr.bf16.mxu1 %v13279_v38  ;;  %v13316_v38 = vcombine.low %v812_v58, %v816_v47  ;;  %v13325_v39 = vcombine.high %v820_v4, %v824_v36  ;;  %v13357_v58 = vcombine.high %v852_v20, %v856_v21  ;;  %v864_v29 = vld [vmem:[%s19788_s1 + $0x1a30] sm:$0xff] }
 0x48a   :  { %10967 = vmatpush1.bf16.msra.mxu0 %v13276_v42  ;;  %v832_v42 = vld [vmem:[%s19788_s1 + $0x1930] sm:$0xff] }
 0x48b   :  { %11500 = vmatpush1.bf16.msra.mxu1 %v13278_v45  ;;  %10968 = vmatprep.subr.bf16.mxu0 %v13285_v34  ;;  %v833_v45 = vld [vmem:[%s19788_s1 + $0x1938] sm:$0xff]  ;;  %v13324_v34 = vcombine.low %v820_v4, %v824_v36  ;;  %v13333_v49 = vcombine.high %v828_v41, %v832_v42  ;;  %v13365_v4 = vcombine.high %v860_v28, %v864_v29 }
 0x48c   :  { %11501 = vmatprep.subr.bf16.mxu1 %v13287_v46 }
 0x48e   :  { %10969 = vmatpush1.bf16.msra.mxu0 %v13284_v52  ;;  %v837_v52 = vld [vmem:[%s19788_s1 + $0x1958] sm:$0xff] }
 0x48f   :  { %11502 = vmatpush1.bf16.msra.mxu1 %v13286_v54  ;;  %10970 = vmatprep.subr.bf16.mxu0 %v13293_v55  ;;  %v841_v54 = vld [vmem:[%s19788_s1 + $0x1978] sm:$0xff]  ;;  %v13332_v55 = vcombine.low %v828_v41, %v832_v42 }
 0x490   :  { %11503 = vmatprep.subr.bf16.mxu1 %v13295_v60  ;;  %v13343_v0 = vcombine.high %v837_v52, %v841_v54 }
 0x492   :  { %10971 = vmatpush1.bf16.msra.mxu0 %v13292_v9  ;;  %v845_v9 = vld [vmem:[%s19788_s1 + $0x1998] sm:$0xff] }
 0x493   :  { %11504 = vmatpush1.bf16.msra.mxu1 %v13294_v10  ;;  %10981 = vmatprep.subr.bf16.mxu0 %v13301_v11  ;;  %v849_v10 = vld [vmem:[%s19788_s1 + $0x19b8] sm:$0xff]  ;;  %v13340_v11 = vcombine.low %v836_v62, %v840_v50 }
 0x494   :  { %11514 = vmatprep.subr.bf16.mxu1 %v13303_v12  ;;  %v13342_v12 = vcombine.low %v837_v52, %v841_v54  ;;  %v13351_v16 = vcombine.high %v845_v9, %v849_v10  ;;  %v884_v52 = vld [vmem:[%s19788_s1 + $0x1ad0] sm:$0xff] }
 0x495   :  { %10973 = vmatmul.mubr.bf16.vlgmr.msra.gmra.mrb[4].mxu0 %v15856_v27  ;;  %v888_v54 = vld [vmem:[%s19788_s1 + $0x1af0] sm:$0xff] }
 0x496   :  { %10982 = vmatpush1.bf16.msra.mxu0 %v13300_v22  ;;  %11506 = vmatmul.mubr.bf16.vlgmr.msra.gmra.mrb[4].mxu1 %v15856_v27  ;;  %v821_v27 = vld [vmem:[%s19788_s1 + $0x18d8] sm:$0xff] }
 0x497   :  { %11515 = vmatpush1.bf16.msra.mxu1 %v13302_v24  ;;  %10983 = vmatprep.subr.bf16.mxu0 %v13309_v40  ;;  %v13327_v51 = vcombine.high %v821_v27, %v825_v53  ;;  %v13326_v46 = vcombine.low %v821_v27, %v825_v53  ;;  %v853_v22 = vld [vmem:[%s19788_s1 + $0x19d8] sm:$0xff]  ;;  %v13348_v40 = vcombine.low %v844_v63, %v848_v44  ;;  %v868_v27 = vld [vmem:[%s19788_s1 + $0x1a50] sm:$0xff] }
 0x498   :  { %11516 = vmatprep.subr.bf16.mxu1 %v13311_v33  ;;  %11013 = vmatprep.mubr.bf16.mxu0 %v15871_v37  ;;  %v857_v24 = vld [vmem:[%s19788_s1 + $0x19f8] sm:$0xff]  ;;  %v13350_v33 = vcombine.low %v845_v9, %v849_v10  ;;  %v872_v53 = vld [vmem:[%s19788_s1 + $0x1a70] sm:$0xff]  ;;  %v13389_v63 = vcombine.high %v884_v52, %v888_v54 }
 0x499   :  { %11546 = vmatprep.mubr.bf16.mxu1 %v15871_v37  ;;  %v829_v37 = vld [vmem:[%s19788_s1 + $0x1918] sm:$0xff]  ;;  %v13359_v47 = vcombine.high %v853_v22, %v857_v24  ;;  %v13373_v41 = vcombine.high %v868_v27, %v872_v53  ;;  %v892_v9 = vld [vmem:[%s19788_s1 + $0x1b10] sm:$0xff] }
 0x49a   :  { %10984 = vmatpush1.bf16.msra.mxu0 %v13308_v30  ;;  %v13335_v59 = vcombine.high %v829_v37, %v833_v45  ;;  %v13334_v60 = vcombine.low %v829_v37, %v833_v45  ;;  %v861_v30 = vld [vmem:[%s19788_s1 + $0x1a18] sm:$0xff]  ;;  %v876_v37 = vld [vmem:[%s19788_s1 + $0x1a90] sm:$0xff] }
 0x49b   :  { %11517 = vmatpush1.bf16.msra.mxu1 %v13310_v32  ;;  %10985 = vmatprep.subr.bf16.mxu0 %v13317_v35  ;;  %v865_v32 = vld [vmem:[%s19788_s1 + $0x1a38] sm:$0xff]  ;;  %v13356_v35 = vcombine.low %v852_v20, %v856_v21  ;;  %v880_v45 = vld [vmem:[%s19788_s1 + $0x1ab0] sm:$0xff] }
 0x49c   :  { %11518 = vmatprep.subr.bf16.mxu1 %v13319_v48  ;;  %v13358_v48 = vcombine.low %v853_v22, %v857_v24  ;;  %v13367_v36 = vcombine.high %v861_v30, %v865_v32  ;;  %v13381_v62 = vcombine.high %v876_v37, %v880_v45  ;;  %v896_v10 = vld [vmem:[%s19788_s1 + $0x1b30] sm:$0xff] }
 0x49d   :  { %v13397_v20 = vcombine.high %v892_v9, %v896_v10  ;;  %v900_v22 = vld [vmem:[%s19788_s1 + $0x1b50] sm:$0xff] }
 0x49e   :  { %10986 = vmatpush1.bf16.msra.mxu0 %v13316_v38  ;;  %v869_v38 = vld [vmem:[%s19788_s1 + $0x1a58] sm:$0xff]  ;;  %v904_v24 = vld [vmem:[%s19788_s1 + $0x1b70] sm:$0xff] }
 0x49f   :  { %11519 = vmatpush1.bf16.msra.mxu1 %v13318_v19  ;;  %10987 = vmatprep.subr.bf16.mxu0 %v13325_v39  ;;  %v873_v19 = vld [vmem:[%s19788_s1 + $0x1a78] sm:$0xff]  ;;  %v13364_v39 = vcombine.low %v860_v28, %v864_v29  ;;  %v13405_v28 = vcombine.high %v900_v22, %v904_v24 }
 0x4a0   :  { %11520 = vmatprep.subr.bf16.mxu1 %v13327_v51  ;;  %v13366_v51 = vcombine.low %v861_v30, %v865_v32  ;;  %v13375_v42 = vcombine.high %v869_v38, %v873_v19  ;;  %v908_v30 = vld [vmem:[%s19788_s1 + $0x1b90] sm:$0xff] }
 0x4a1   :  { %v912_v32 = vld [vmem:[%s19788_s1 + $0x1bb0] sm:$0xff] }
 0x4a2   :  { %10988 = vmatpush1.bf16.msra.mxu0 %v13324_v34  ;;  %v877_v34 = vld [vmem:[%s19788_s1 + $0x1a98] sm:$0xff] }
 0x4a3   :  { %11521 = vmatpush1.bf16.msra.mxu1 %v13326_v46  ;;  %10989 = vmatprep.subr.bf16.mxu0 %v13333_v49  ;;  %v881_v46 = vld [vmem:[%s19788_s1 + $0x1ab8] sm:$0xff]  ;;  %v13372_v49 = vcombine.low %v868_v27, %v872_v53  ;;  %v13413_v27 = vcombine.high %v908_v30, %v912_v32 }
 0x4a4   :  { %11522 = vmatprep.subr.bf16.mxu1 %v13335_v59  ;;  %v13374_v59 = vcombine.low %v869_v38, %v873_v19  ;;  %v13383_v50 = vcombine.high %v877_v34, %v881_v46  ;;  %v916_v38 = vld [vmem:[%s19788_s1 + $0x1bd0] sm:$0xff] }
 0x4a5   :  { %v920_v19 = vld [vmem:[%s19788_s1 + $0x1bf0] sm:$0xff] }
 0x4a6   :  { %10990 = vmatpush1.bf16.msra.mxu0 %v13332_v55  ;;  %v885_v55 = vld [vmem:[%s19788_s1 + $0x1ad8] sm:$0xff] }
 0x4a7   :  { %11523 = vmatpush1.bf16.msra.mxu1 %v13334_v60  ;;  %10991 = vmatprep.subr.bf16.mxu0 %v13341_v61  ;;  %v889_v60 = vld [vmem:[%s19788_s1 + $0x1af8] sm:$0xff]  ;;  %v13380_v61 = vcombine.low %v876_v37, %v880_v45  ;;  %v13421_v37 = vcombine.high %v916_v38, %v920_v19 }
 0x4a8   :  { %11524 = vmatprep.subr.bf16.mxu1 %v13343_v0  ;;  %v13382_v0 = vcombine.low %v877_v34, %v881_v46  ;;  %v13391_v44 = vcombine.high %v885_v55, %v889_v60  ;;  %v924_v34 = vld [vmem:[%s19788_s1 + $0x1c10] sm:$0xff] }
 0x4a9   :  { %v928_v46 = vld [vmem:[%s19788_s1 + $0x1c30] sm:$0xff] }
 0x4aa   :  { %10992 = vmatpush1.bf16.msra.mxu0 %v13340_v11  ;;  %v893_v11 = vld [vmem:[%s19788_s1 + $0x1b18] sm:$0xff] }
 0x4ab   :  { %11525 = vmatpush1.bf16.msra.mxu1 %v13342_v12  ;;  %10993 = vmatprep.subr.bf16.mxu0 %v13349_v1  ;;  %v897_v12 = vld [vmem:[%s19788_s1 + $0x1b38] sm:$0xff]  ;;  %v13388_v1 = vcombine.low %v884_v52, %v888_v54  ;;  %v13429_v52 = vcombine.high %v924_v34, %v928_v46 }
 0x4ac   :  { %11526 = vmatprep.subr.bf16.mxu1 %v13351_v16  ;;  %v13390_v16 = vcombine.low %v885_v55, %v889_v60  ;;  %v13399_v21 = vcombine.high %v893_v11, %v897_v12  ;;  %v932_v55 = vld [vmem:[%s19788_s1 + $0x1c50] sm:$0xff] }
 0x4ad   :  { %v936_v60 = vld [vmem:[%s19788_s1 + $0x1c70] sm:$0xff] }
 0x4ae   :  { %10994 = vmatpush1.bf16.msra.mxu0 %v13348_v40  ;;  %v901_v40 = vld [vmem:[%s19788_s1 + $0x1b58] sm:$0xff] }
 0x4af   :  { %11527 = vmatpush1.bf16.msra.mxu1 %v13350_v33  ;;  %10995 = vmatprep.subr.bf16.mxu0 %v13357_v58  ;;  %v905_v33 = vld [vmem:[%s19788_s1 + $0x1b78] sm:$0xff]  ;;  %v13396_v58 = vcombine.low %v892_v9, %v896_v10  ;;  %v13437_v9 = vcombine.high %v932_v55, %v936_v60 }
 0x4b0   :  { %11528 = vmatprep.subr.bf16.mxu1 %v13359_v47  ;;  %v13398_v47 = vcombine.low %v893_v11, %v897_v12  ;;  %v13407_v29 = vcombine.high %v901_v40, %v905_v33  ;;  %v940_v11 = vld [vmem:[%s19788_s1 + $0x1c90] sm:$0xff] }
 0x4b1   :  { %v944_v12 = vld [vmem:[%s19788_s1 + $0x1cb0] sm:$0xff] }
 0x4b2   :  { %10996 = vmatpush1.bf16.msra.mxu0 %v13356_v35  ;;  %v909_v35 = vld [vmem:[%s19788_s1 + $0x1b98] sm:$0xff] }
 0x4b3   :  { %11529 = vmatpush1.bf16.msra.mxu1 %v13358_v48  ;;  %10997 = vmatprep.subr.bf16.mxu0 %v13365_v4  ;;  %v913_v48 = vld [vmem:[%s19788_s1 + $0x1bb8] sm:$0xff]  ;;  %v13404_v4 = vcombine.low %v900_v22, %v904_v24  ;;  %v13445_v22 = vcombine.high %v940_v11, %v944_v12 }
 0x4b4   :  { %11530 = vmatprep.subr.bf16.mxu1 %v13367_v36  ;;  %v13406_v36 = vcombine.low %v901_v40, %v905_v33  ;;  %v13415_v53 = vcombine.high %v909_v35, %v913_v48  ;;  %v948_v40 = vld [vmem:[%s19788_s1 + $0x1cd0] sm:$0xff] }
 0x4b5   :  { %v952_v33 = vld [vmem:[%s19788_s1 + $0x1cf0] sm:$0xff] }
 0x4b6   :  { %10998 = vmatpush1.bf16.msra.mxu0 %v13364_v39  ;;  %v917_v39 = vld [vmem:[%s19788_s1 + $0x1bd8] sm:$0xff] }
 0x4b7   :  { %11531 = vmatpush1.bf16.msra.mxu1 %v13366_v51  ;;  %10999 = vmatprep.subr.bf16.mxu0 %v13373_v41  ;;  %v921_v51 = vld [vmem:[%s19788_s1 + $0x1bf8] sm:$0xff]  ;;  %v13412_v41 = vcombine.low %v908_v30, %v912_v32  ;;  %v956_v32 = vld [vmem:[%s19788_s1 + $0x1d10] sm:$0xff] }
 0x4b8   :  { %11532 = vmatprep.subr.bf16.mxu1 %v13375_v42  ;;  %v13414_v42 = vcombine.low %v909_v35, %v913_v48  ;;  %v13423_v45 = vcombine.high %v917_v39, %v921_v51  ;;  %v960_v35 = vld [vmem:[%s19788_s1 + $0x1d30] sm:$0xff]  ;;  %v961_v48 = vld [vmem:[%s19788_s1 + $0x1d38] sm:$0xff] }
 0x4ba   :  { %11000 = vmatpush1.bf16.msra.mxu0 %v13372_v49  ;;  %v925_v49 = vld [vmem:[%s19788_s1 + $0x1c18] sm:$0xff] }
 0x4bb   :  { %11533 = vmatpush1.bf16.msra.mxu1 %v13374_v59  ;;  %11001 = vmatprep.subr.bf16.mxu0 %v13381_v62  ;;  %v929_v59 = vld [vmem:[%s19788_s1 + $0x1c38] sm:$0xff]  ;;  %v13420_v62 = vcombine.low %v916_v38, %v920_v19  ;;  %v964_v38 = vld [vmem:[%s19788_s1 + $0x1d50] sm:$0xff] }
 0x4bc   :  { %11534 = vmatprep.subr.bf16.mxu1 %v13383_v50  ;;  %v13422_v50 = vcombine.low %v917_v39, %v921_v51  ;;  %v13431_v54 = vcombine.high %v925_v49, %v929_v59  ;;  %v968_v19 = vld [vmem:[%s19788_s1 + $0x1d70] sm:$0xff]  ;;  %v965_v39 = vld [vmem:[%s19788_s1 + $0x1d58] sm:$0xff] }
 0x4bd   :  { %v969_v51 = vld [vmem:[%s19788_s1 + $0x1d78] sm:$0xff] }
 0x4be   :  { %11002 = vmatpush1.bf16.msra.mxu0 %v13380_v61  ;;  %v933_v61 = vld [vmem:[%s19788_s1 + $0x1c58] sm:$0xff] }
 0x4bf   :  { %11535 = vmatpush1.bf16.msra.mxu1 %v13382_v0  ;;  %11003 = vmatprep.subr.bf16.mxu0 %v13389_v63  ;;  %v937_v0 = vld [vmem:[%s19788_s1 + $0x1c78] sm:$0xff]  ;;  %v13428_v63 = vcombine.low %v924_v34, %v928_v46  ;;  %v972_v34 = vld [vmem:[%s19788_s1 + $0x1d90] sm:$0xff] }
 0x4c0   :  { %11536 = vmatprep.subr.bf16.mxu1 %v13391_v44  ;;  %v13430_v44 = vcombine.low %v925_v49, %v929_v59  ;;  %v13439_v10 = vcombine.high %v933_v61, %v937_v0  ;;  %v976_v46 = vld [vmem:[%s19788_s1 + $0x1db0] sm:$0xff]  ;;  %v973_v49 = vld [vmem:[%s19788_s1 + $0x1d98] sm:$0xff] }
 0x4c1   :  { %v977_v59 = vld [vmem:[%s19788_s1 + $0x1db8] sm:$0xff] }
 0x4c2   :  { %11004 = vmatpush1.bf16.msra.mxu0 %v13388_v1  ;;  %v941_v1 = vld [vmem:[%s19788_s1 + $0x1c98] sm:$0xff] }
 0x4c3   :  { %11537 = vmatpush1.bf16.msra.mxu1 %v13390_v16  ;;  %11005 = vmatprep.subr.bf16.mxu0 %v13397_v20  ;;  %v945_v16 = vld [vmem:[%s19788_s1 + $0x1cb8] sm:$0xff]  ;;  %v13436_v20 = vcombine.low %v932_v55, %v936_v60  ;;  %v980_v55 = vld [vmem:[%s19788_s1 + $0x1dd0] sm:$0xff] }
 0x4c4   :  { %11538 = vmatprep.subr.bf16.mxu1 %v13399_v21  ;;  %v13438_v21 = vcombine.low %v933_v61, %v937_v0  ;;  %v13447_v24 = vcombine.high %v941_v1, %v945_v16  ;;  %v984_v60 = vld [vmem:[%s19788_s1 + $0x1df0] sm:$0xff]  ;;  %v981_v61 = vld [vmem:[%s19788_s1 + $0x1dd8] sm:$0xff] }
 0x4c5   :  { %v985_v0 = vld [vmem:[%s19788_s1 + $0x1df8] sm:$0xff] }
 0x4c6   :  { %11006 = vmatpush1.bf16.msra.mxu0 %v13396_v58  ;;  %v953_v58 = vld [vmem:[%s19788_s1 + $0x1cf8] sm:$0xff] }
 0x4c7   :  { %11539 = vmatpush1.bf16.msra.mxu1 %v13398_v47  ;;  %11007 = vmatprep.subr.bf16.mxu0 %v13405_v28  ;;  %v13444_v47 = vcombine.low %v940_v11, %v944_v12  ;;  %v13446_v28 = vcombine.low %v941_v1, %v945_v16  ;;  %v988_v11 = vld [vmem:[%s19788_s1 + $0x1e10] sm:$0xff]  ;;  %v989_v1 = vld [vmem:[%s19788_s1 + $0x1e18] sm:$0xff] }
 0x4c8   :  { %11540 = vmatprep.subr.bf16.mxu1 %v13407_v29  ;;  %v13453_v29 = vcombine.high %v948_v40, %v952_v33  ;;  %v992_v12 = vld [vmem:[%s19788_s1 + $0x1e30] sm:$0xff]  ;;  %v993_v16 = vld [vmem:[%s19788_s1 + $0x1e38] sm:$0xff] }
 0x4ca   :  { %11008 = vmatpush1.bf16.msra.mxu0 %v13404_v4  ;;  %v13452_v4 = vcombine.low %v948_v40, %v952_v33  ;;  %v996_v40 = vld [vmem:[%s19788_s1 + $0x1e50] sm:$0xff] }
 0x4cb   :  { %11541 = vmatpush1.bf16.msra.mxu1 %v13406_v36  ;;  %11009 = vmatprep.subr.bf16.mxu0 %v13413_v27  ;;  %v13461_v27 = vcombine.high %v956_v32, %v960_v35  ;;  %v1000_v33 = vld [vmem:[%s19788_s1 + $0x1e70] sm:$0xff] }
 0x4cc   :  { %11542 = vmatprep.subr.bf16.mxu1 %v13415_v53 }
 0x4ce   :  { %11010 = vmatpush1.bf16.msra.mxu0 %v13412_v41  ;;  %v13460_v41 = vcombine.low %v956_v32, %v960_v35  ;;  %v1004_v32 = vld [vmem:[%s19788_s1 + $0x1e90] sm:$0xff] }
 0x4cf   :  { %11543 = vmatpush1.bf16.msra.mxu1 %v13414_v42  ;;  %11011 = vmatprep.subr.bf16.mxu0 %v13421_v37  ;;  %v13469_v37 = vcombine.high %v964_v38, %v968_v19  ;;  %v1008_v35 = vld [vmem:[%s19788_s1 + $0x1eb0] sm:$0xff] }
 0x4d0   :  { %11544 = vmatprep.subr.bf16.mxu1 %v13423_v45  ;;  %v13471_v45 = vcombine.high %v965_v39, %v969_v51 }
 0x4d2   :  { %11012 = vmatpush1.bf16.msra.mxu0 %v13420_v62  ;;  %v13468_v62 = vcombine.low %v964_v38, %v968_v19  ;;  %v1012_v38 = vld [vmem:[%s19788_s1 + $0x1ed0] sm:$0xff] }
 0x4d3   :  { %11545 = vmatpush1.bf16.msra.mxu1 %v13422_v50  ;;  %11022 = vmatprep.subr.bf16.mxu0 %v13429_v52  ;;  %v13470_v50 = vcombine.low %v965_v39, %v969_v51  ;;  %v13477_v52 = vcombine.high %v972_v34, %v976_v46  ;;  %v1016_v19 = vld [vmem:[%s19788_s1 + $0x1ef0] sm:$0xff]  ;;  %v1013_v39 = vld [vmem:[%s19788_s1 + $0x1ed8] sm:$0xff] }
 0x4d4   :  { %11555 = vmatprep.subr.bf16.mxu1 %v13431_v54  ;;  %v13479_v54 = vcombine.high %v973_v49, %v977_v59  ;;  %v1017_v51 = vld [vmem:[%s19788_s1 + $0x1ef8] sm:$0xff] }
 0x4d5   :  { %11014 = vmatmul.mubr.bf16.vlgmr.msra.gmra.mrb[4].mxu0 %v16059_v7 }
 0x4d6   :  { %11023 = vmatpush1.bf16.msra.mxu0 %v13428_v63  ;;  %11547 = vmatmul.mubr.bf16.vlgmr.msra.gmra.mrb[4].mxu1 %v16059_v7  ;;  %v949_v7 = vld [vmem:[%s19788_s1 + $0x1cd8] sm:$0xff]  ;;  %v13476_v63 = vcombine.low %v972_v34, %v976_v46  ;;  %v1020_v34 = vld [vmem:[%s19788_s1 + $0x1f10] sm:$0xff] }
 0x4d7   :  { %11556 = vmatpush1.bf16.msra.mxu1 %v13430_v44  ;;  %11024 = vmatprep.subr.bf16.mxu0 %v13437_v9  ;;  %v13455_v30 = vcombine.high %v949_v7, %v953_v58  ;;  %v13454_v36 = vcombine.low %v949_v7, %v953_v58  ;;  %v13478_v44 = vcombine.low %v973_v49, %v977_v59  ;;  %v997_v7 = vld [vmem:[%s19788_s1 + $0x1e58] sm:$0xff]  ;;  %v1024_v46 = vld [vmem:[%s19788_s1 + $0x1f30] sm:$0xff] }
 0x4d8   :  { %11557 = vmatprep.subr.bf16.mxu1 %v13439_v10  ;;  %11054 = vmatprep.mubr.bf16.mxu0 %v16075_v17  ;;  %v13485_v9 = vcombine.high %v980_v55, %v984_v60  ;;  %v13487_v10 = vcombine.high %v981_v61, %v985_v0  ;;  %v1001_v58 = vld [vmem:[%s19788_s1 + $0x1e78] sm:$0xff] }
 0x4d9   :  { %11587 = vmatprep.mubr.bf16.mxu1 %v16075_v17  ;;  %v957_v17 = vld [vmem:[%s19788_s1 + $0x1d18] sm:$0xff] }
 0x4da   :  { %11025 = vmatpush1.bf16.msra.mxu0 %v13436_v20  ;;  %v13463_v53 = vcombine.high %v957_v17, %v961_v48  ;;  %v13462_v42 = vcombine.low %v957_v17, %v961_v48  ;;  %v13484_v20 = vcombine.low %v980_v55, %v984_v60  ;;  %v1005_v17 = vld [vmem:[%s19788_s1 + $0x1e98] sm:$0xff]  ;;  %v1028_v55 = vld [vmem:[%s19788_s1 + $0x1f50] sm:$0xff] }
 0x4db   :  { %11558 = vmatpush1.bf16.msra.mxu1 %v13438_v21  ;;  %11026 = vmatprep.subr.bf16.mxu0 %v13445_v22  ;;  %v13486_v21 = vcombine.low %v981_v61, %v985_v0  ;;  %v13493_v22 = vcombine.high %v988_v11, %v992_v12  ;;  %v1009_v48 = vld [vmem:[%s19788_s1 + $0x1eb8] sm:$0xff]  ;;  %v1032_v60 = vld [vmem:[%s19788_s1 + $0x1f70] sm:$0xff] }
 0x4dc   :  { %11559 = vmatprep.subr.bf16.mxu1 %v13447_v24  ;;  %v13495_v24 = vcombine.high %v989_v1, %v993_v16  ;;  %v1021_v49 = vld [vmem:[%s19788_s1 + $0x1f18] sm:$0xff] }
 0x4dd   :  { %v1025_v59 = vld [vmem:[%s19788_s1 + $0x1f38] sm:$0xff] }
 0x4de   :  { %11027 = vmatpush1.bf16.msra.mxu0 %v13444_v47  ;;  %v13492_v47 = vcombine.low %v988_v11, %v992_v12  ;;  %v1029_v61 = vld [vmem:[%s19788_s1 + $0x1f58] sm:$0xff]  ;;  %v1036_v11 = vld [vmem:[%s19788_s1 + $0x1f90] sm:$0xff] }
 0x4df   :  { %11560 = vmatpush1.bf16.msra.mxu1 %v13446_v28  ;;  %11028 = vmatprep.subr.bf16.mxu0 %v13453_v29  ;;  %v13494_v28 = vcombine.low %v989_v1, %v993_v16  ;;  %v13501_v29 = vcombine.high %v996_v40, %v1000_v33  ;;  %v1033_v0 = vld [vmem:[%s19788_s1 + $0x1f78] sm:$0xff]  ;;  %v1040_v12 = vld [vmem:[%s19788_s1 + $0x1fb0] sm:$0xff] }
 0x4e0   :  { %11561 = vmatprep.subr.bf16.mxu1 %v13455_v30  ;;  %v13503_v30 = vcombine.high %v997_v7, %v1001_v58  ;;  %v1037_v1 = vld [vmem:[%s19788_s1 + $0x1f98] sm:$0xff] }
 0x4e1   :  { %v1041_v16 = vld [vmem:[%s19788_s1 + $0x1fb8] sm:$0xff] }
 0x4e2   :  { %11029 = vmatpush1.bf16.msra.mxu0 %v13452_v4  ;;  %v13500_v4 = vcombine.low %v996_v40, %v1000_v33  ;;  %v1044_v40 = vld [vmem:[%s19788_s1 + $0x1fd0] sm:$0xff] }
 0x4e3   :  { %11562 = vmatpush1.bf16.msra.mxu1 %v13454_v36  ;;  %11030 = vmatprep.subr.bf16.mxu0 %v13461_v27  ;;  %v13502_v36 = vcombine.low %v997_v7, %v1001_v58  ;;  %v13509_v27 = vcombine.high %v1004_v32, %v1008_v35  ;;  %v1048_v33 = vld [vmem:[%s19788_s1 + $0x1ff0] sm:$0xff]  ;;  %v1045_v7 = vld [vmem:[%s19788_s1 + $0x1fd8] sm:$0xff] }
 0x4e4   :  { %11563 = vmatprep.subr.bf16.mxu1 %v13463_v53  ;;  %v13511_v53 = vcombine.high %v1005_v17, %v1009_v48  ;;  %v1049_v58 = vld [vmem:[%s19788_s1 + $0x1ff8] sm:$0xff] }
 0x4e6   :  { %11031 = vmatpush1.bf16.msra.mxu0 %v13460_v41  ;;  %v13508_v41 = vcombine.low %v1004_v32, %v1008_v35  ;;  %v1052_v32 = vld [vmem:[%s19788_s1 + $0x2010] sm:$0xff] }
 0x4e7   :  { %11564 = vmatpush1.bf16.msra.mxu1 %v13462_v42  ;;  %11032 = vmatprep.subr.bf16.mxu0 %v13469_v37  ;;  %v13510_v42 = vcombine.low %v1005_v17, %v1009_v48  ;;  %v13517_v37 = vcombine.high %v1012_v38, %v1016_v19  ;;  %v1056_v35 = vld [vmem:[%s19788_s1 + $0x2030] sm:$0xff]  ;;  %v1053_v17 = vld [vmem:[%s19788_s1 + $0x2018] sm:$0xff] }
 0x4e8   :  { %11565 = vmatprep.subr.bf16.mxu1 %v13471_v45  ;;  %v13519_v45 = vcombine.high %v1013_v39, %v1017_v51  ;;  %v1057_v48 = vld [vmem:[%s19788_s1 + $0x2038] sm:$0xff] }
 0x4ea   :  { %11033 = vmatpush1.bf16.msra.mxu0 %v13468_v62  ;;  %v13516_v62 = vcombine.low %v1012_v38, %v1016_v19  ;;  %v1060_v38 = vld [vmem:[%s19788_s1 + $0x2050] sm:$0xff] }
 0x4eb   :  { %11566 = vmatpush1.bf16.msra.mxu1 %v13470_v50  ;;  %11034 = vmatprep.subr.bf16.mxu0 %v13477_v52  ;;  %v13518_v50 = vcombine.low %v1013_v39, %v1017_v51  ;;  %v13525_v52 = vcombine.high %v1020_v34, %v1024_v46  ;;  %v1064_v19 = vld [vmem:[%s19788_s1 + $0x2070] sm:$0xff]  ;;  %v1061_v39 = vld [vmem:[%s19788_s1 + $0x2058] sm:$0xff] }
 0x4ec   :  { %11567 = vmatprep.subr.bf16.mxu1 %v13479_v54  ;;  %v13527_v54 = vcombine.high %v1021_v49, %v1025_v59  ;;  %v1065_v51 = vld [vmem:[%s19788_s1 + $0x2078] sm:$0xff] }
 0x4ee   :  { %11035 = vmatpush1.bf16.msra.mxu0 %v13476_v63  ;;  %v13524_v63 = vcombine.low %v1020_v34, %v1024_v46  ;;  %v1068_v34 = vld [vmem:[%s19788_s1 + $0x2090] sm:$0xff] }
 0x4ef   :  { %11568 = vmatpush1.bf16.msra.mxu1 %v13478_v44  ;;  %11036 = vmatprep.subr.bf16.mxu0 %v13485_v9  ;;  %v13526_v44 = vcombine.low %v1021_v49, %v1025_v59  ;;  %v13533_v9 = vcombine.high %v1028_v55, %v1032_v60  ;;  %v1072_v46 = vld [vmem:[%s19788_s1 + $0x20b0] sm:$0xff]  ;;  %v1069_v49 = vld [vmem:[%s19788_s1 + $0x2098] sm:$0xff] }
 0x4f0   :  { %11569 = vmatprep.subr.bf16.mxu1 %v13487_v10  ;;  %v13535_v10 = vcombine.high %v1029_v61, %v1033_v0  ;;  %v1073_v59 = vld [vmem:[%s19788_s1 + $0x20b8] sm:$0xff] }
 0x4f2   :  { %11037 = vmatpush1.bf16.msra.mxu0 %v13484_v20  ;;  %v13532_v20 = vcombine.low %v1028_v55, %v1032_v60  ;;  %v1076_v55 = vld [vmem:[%s19788_s1 + $0x20d0] sm:$0xff] }
 0x4f3   :  { %11570 = vmatpush1.bf16.msra.mxu1 %v13486_v21  ;;  %11038 = vmatprep.subr.bf16.mxu0 %v13493_v22  ;;  %v13534_v21 = vcombine.low %v1029_v61, %v1033_v0  ;;  %v13541_v22 = vcombine.high %v1036_v11, %v1040_v12  ;;  %v1080_v60 = vld [vmem:[%s19788_s1 + $0x20f0] sm:$0xff]  ;;  %v1081_v61 = vld [vmem:[%s19788_s1 + $0x20f8] sm:$0xff]  ;;  %v13572_v0 = vcombine.low %v1068_v34, %v1072_v46 }
 0x4f4   :  { %11571 = vmatprep.subr.bf16.mxu1 %v13495_v24  ;;  %v13543_v24 = vcombine.high %v1037_v1, %v1041_v16 }
 0x4f6   :  { %11039 = vmatpush1.bf16.msra.mxu0 %v13492_v47  ;;  %v13540_v47 = vcombine.low %v1036_v11, %v1040_v12  ;;  %v1088_v11 = vld [vmem:[%s19788_s1 + $0x2130] sm:$0xff]  ;;  %v1089_v12 = vld [vmem:[%s19788_s1 + $0x2138] sm:$0xff] }
 0x4f7   :  { %11572 = vmatpush1.bf16.msra.mxu1 %v13494_v28  ;;  %11040 = vmatprep.subr.bf16.mxu0 %v13501_v29  ;;  %v13542_v28 = vcombine.low %v1037_v1, %v1041_v16  ;;  %v13549_v29 = vcombine.high %v1044_v40, %v1048_v33  ;;  %v13580_v1 = vcombine.low %v1076_v55, %v1080_v60 }
 0x4f8   :  { %11573 = vmatprep.subr.bf16.mxu1 %v13503_v30  ;;  %v13551_v30 = vcombine.high %v1045_v7, %v1049_v58 }
 0x4fa   :  { %11041 = vmatpush1.bf16.msra.mxu0 %v13500_v4  ;;  %v13548_v4 = vcombine.low %v1044_v40, %v1048_v33  ;;  %v1093_v40 = vld [vmem:[%s19788_s1 + $0x2158] sm:$0xff] }
 0x4fb   :  { %11574 = vmatpush1.bf16.msra.mxu1 %v13502_v36  ;;  %11042 = vmatprep.subr.bf16.mxu0 %v13509_v27  ;;  %v13550_v36 = vcombine.low %v1045_v7, %v1049_v58  ;;  %v13557_v27 = vcombine.high %v1052_v32, %v1056_v35  ;;  %v1097_v33 = vld [vmem:[%s19788_s1 + $0x2178] sm:$0xff] }
 0x4fc   :  { %11575 = vmatprep.subr.bf16.mxu1 %v13511_v53  ;;  %v13559_v53 = vcombine.high %v1053_v17, %v1057_v48 }
 0x4fe   :  { %11043 = vmatpush1.bf16.msra.mxu0 %v13508_v41  ;;  %v13556_v41 = vcombine.low %v1052_v32, %v1056_v35  ;;  %v1101_v32 = vld [vmem:[%s19788_s1 + $0x2198] sm:$0xff] }
 0x4ff   :  { %11576 = vmatpush1.bf16.msra.mxu1 %v13510_v42  ;;  %11044 = vmatprep.subr.bf16.mxu0 %v13517_v37  ;;  %v13558_v42 = vcombine.low %v1053_v17, %v1057_v48  ;;  %v13565_v37 = vcombine.high %v1060_v38, %v1064_v19  ;;  %v1105_v35 = vld [vmem:[%s19788_s1 + $0x21b8] sm:$0xff]  ;;  %v13598_v48 = vcombine.low %v1093_v40, %v1097_v33 }
 0x500   :  { %11577 = vmatprep.subr.bf16.mxu1 %v13519_v45  ;;  %v13567_v45 = vcombine.high %v1061_v39, %v1065_v51 }
 0x502   :  { %11045 = vmatpush1.bf16.msra.mxu0 %v13516_v62  ;;  %v13564_v62 = vcombine.low %v1060_v38, %v1064_v19  ;;  %v1109_v38 = vld [vmem:[%s19788_s1 + $0x21d8] sm:$0xff] }
 0x503   :  { %11578 = vmatpush1.bf16.msra.mxu1 %v13518_v50  ;;  %11046 = vmatprep.subr.bf16.mxu0 %v13525_v52  ;;  %v13566_v50 = vcombine.low %v1061_v39, %v1065_v51  ;;  %v13573_v52 = vcombine.high %v1068_v34, %v1072_v46  ;;  %v1113_v19 = vld [vmem:[%s19788_s1 + $0x21f8] sm:$0xff]  ;;  %v13606_v51 = vcombine.low %v1101_v32, %v1105_v35 }
 0x504   :  { %11579 = vmatprep.subr.bf16.mxu1 %v13527_v54  ;;  %v13575_v54 = vcombine.high %v1069_v49, %v1073_v59  ;;  %v1117_v34 = vld [vmem:[%s19788_s1 + $0x2218] sm:$0xff] }
 0x505   :  { %v1121_v46 = vld [vmem:[%s19788_s1 + $0x2238] sm:$0xff] }
 0x506   :  { %11047 = vmatpush1.bf16.msra.mxu0 %v13524_v63  ;;  %v13574_v63 = vcombine.low %v1069_v49, %v1073_v59  ;;  %v13614_v59 = vcombine.low %v1109_v38, %v1113_v19 }
 0x507   :  { %11580 = vmatpush1.bf16.msra.mxu1 %v13526_v44  ;;  %11048 = vmatprep.subr.bf16.mxu0 %v13533_v9  ;;  %v13581_v44 = vcombine.high %v1076_v55, %v1080_v60  ;;  %v1125_v55 = vld [vmem:[%s19788_s1 + $0x2258] sm:$0xff] }
 0x508   :  { %11581 = vmatprep.subr.bf16.mxu1 %v13535_v10  ;;  %v1084_v10 = vld [vmem:[%s19788_s1 + $0x2110] sm:$0xff]  ;;  %v1129_v60 = vld [vmem:[%s19788_s1 + $0x2278] sm:$0xff] }
 0x509   :  { %v13588_v7 = vcombine.low %v1084_v10, %v1088_v11 }
 0x50a   :  { %11049 = vmatpush1.bf16.msra.mxu0 %v13532_v20  ;;  %v13589_v20 = vcombine.high %v1084_v10, %v1088_v11  ;;  %v1133_v10 = vld [vmem:[%s19788_s1 + $0x2298] sm:$0xff] }
 0x50b   :  { %11582 = vmatpush1.bf16.msra.mxu1 %v13534_v21  ;;  %11050 = vmatprep.subr.bf16.mxu0 %v13541_v22  ;;  %v1092_v22 = vld [vmem:[%s19788_s1 + $0x2150] sm:$0xff]  ;;  %v1137_v11 = vld [vmem:[%s19788_s1 + $0x22b8] sm:$0xff] }
 0x50c   :  { %11583 = vmatprep.subr.bf16.mxu1 %v13543_v24  ;;  %v1096_v24 = vld [vmem:[%s19788_s1 + $0x2170] sm:$0xff] }
 0x50d   :  { %v13596_v17 = vcombine.low %v1092_v22, %v1096_v24 }
 0x50e   :  { %11051 = vmatpush1.bf16.msra.mxu0 %v13540_v47  ;;  %v13597_v47 = vcombine.high %v1092_v22, %v1096_v24  ;;  %v1141_v22 = vld [vmem:[%s19788_s1 + $0x22d8] sm:$0xff] }
 0x50f   :  { %11584 = vmatpush1.bf16.msra.mxu1 %v13542_v28  ;;  %11052 = vmatprep.subr.bf16.mxu0 %v13549_v29  ;;  %v13599_v28 = vcombine.high %v1093_v40, %v1097_v33  ;;  %v1100_v29 = vld [vmem:[%s19788_s1 + $0x2190] sm:$0xff]  ;;  %v1145_v24 = vld [vmem:[%s19788_s1 + $0x22f8] sm:$0xff]  ;;  %v13638_v33 = vcombine.low %v1133_v10, %v1137_v11 }
 0x510   :  { %11585 = vmatprep.subr.bf16.mxu1 %v13551_v30  ;;  %v1104_v30 = vld [vmem:[%s19788_s1 + $0x21b0] sm:$0xff] }
 0x511   :  { %v13604_v39 = vcombine.low %v1100_v29, %v1104_v30 }
 0x512   :  { %11053 = vmatpush1.bf16.msra.mxu0 %v13548_v4  ;;  %v13605_v4 = vcombine.high %v1100_v29, %v1104_v30  ;;  %v1149_v29 = vld [vmem:[%s19788_s1 + $0x2318] sm:$0xff] }
 0x513   :  { %11586 = vmatpush1.bf16.msra.mxu1 %v13550_v36  ;;  %11063 = vmatprep.subr.bf16.mxu0 %v13557_v27  ;;  %v13607_v36 = vcombine.high %v1101_v32, %v1105_v35  ;;  %v1108_v27 = vld [vmem:[%s19788_s1 + $0x21d0] sm:$0xff]  ;;  %v1153_v30 = vld [vmem:[%s19788_s1 + $0x2338] sm:$0xff]  ;;  %v13646_v35 = vcombine.low %v1141_v22, %v1145_v24 }
 0x514   :  { %11596 = vmatprep.subr.bf16.mxu1 %v13559_v53  ;;  %v1112_v53 = vld [vmem:[%s19788_s1 + $0x21f0] sm:$0xff] }
 0x515   :  { %11055 = vmatmul.mubr.bf16.vlgmr.msra.gmra.mrb[4].mxu0 %v16274_v57  ;;  %v13612_v49 = vcombine.low %v1108_v27, %v1112_v53 }
 0x516   :  { %11064 = vmatpush1.bf16.msra.mxu0 %v13556_v41  ;;  %11588 = vmatmul.mubr.bf16.vlgmr.msra.gmra.mrb[4].mxu1 %v16274_v57  ;;  %v1077_v57 = vld [vmem:[%s19788_s1 + $0x20d8] sm:$0xff]  ;;  %v13613_v41 = vcombine.high %v1108_v27, %v1112_v53 }
 0x517   :  { %11597 = vmatpush1.bf16.msra.mxu1 %v13558_v42  ;;  %11065 = vmatprep.subr.bf16.mxu0 %v13565_v37  ;;  %v13583_v9 = vcombine.high %v1077_v57, %v1081_v61  ;;  %v13582_v16 = vcombine.low %v1077_v57, %v1081_v61  ;;  %v13615_v42 = vcombine.high %v1109_v38, %v1113_v19  ;;  %v1116_v37 = vld [vmem:[%s19788_s1 + $0x2210] sm:$0xff]  ;;  %v1157_v27 = vld [vmem:[%s19788_s1 + $0x2358] sm:$0xff] }
 0x518   :  { %11598 = vmatprep.subr.bf16.mxu1 %v13567_v45  ;;  %11095 = vmatprep.mubr.bf16.mxu0 %v16289_v6  ;;  %v1120_v45 = vld [vmem:[%s19788_s1 + $0x2230] sm:$0xff]  ;;  %v13622_v61 = vcombine.low %v1117_v34, %v1121_v46  ;;  %v1161_v53 = vld [vmem:[%s19788_s1 + $0x2378] sm:$0xff]  ;;  %v13654_v19 = vcombine.low %v1149_v29, %v1153_v30 }
 0x519   :  { %11628 = vmatprep.mubr.bf16.mxu1 %v16289_v6  ;;  %v1085_v6 = vld [vmem:[%s19788_s1 + $0x2118] sm:$0xff]  ;;  %v13620_v57 = vcombine.low %v1116_v37, %v1120_v45 }
 0x51a   :  { %11066 = vmatpush1.bf16.msra.mxu0 %v13564_v62  ;;  %v13591_v21 = vcombine.high %v1085_v6, %v1089_v12  ;;  %v13590_v58 = vcombine.low %v1085_v6, %v1089_v12  ;;  %v13621_v62 = vcombine.high %v1116_v37, %v1120_v45  ;;  %v13630_v12 = vcombine.low %v1125_v55, %v1129_v60  ;;  %v1165_v37 = vld [vmem:[%s19788_s1 + $0x2398] sm:$0xff] }
 0x51b   :  { %11599 = vmatpush1.bf16.msra.mxu1 %v13566_v50  ;;  %11067 = vmatprep.subr.bf16.mxu0 %v13573_v52  ;;  %v13623_v50 = vcombine.high %v1117_v34, %v1121_v46  ;;  %v1124_v52 = vld [vmem:[%s19788_s1 + $0x2250] sm:$0xff]  ;;  %v1169_v45 = vld [vmem:[%s19788_s1 + $0x23b8] sm:$0xff]  ;;  %v13662_v46 = vcombine.low %v1157_v27, %v1161_v53 }
 0x51c   :  { %11600 = vmatprep.subr.bf16.mxu1 %v13575_v54  ;;  %v1128_v54 = vld [vmem:[%s19788_s1 + $0x2270] sm:$0xff] }
 0x51d   :  { %v13628_v6 = vcombine.low %v1124_v52, %v1128_v54 }
 0x51e   :  { %11068 = vmatpush1.bf16.msra.mxu0 %v13572_v0  ;;  %v13629_v0 = vcombine.high %v1124_v52, %v1128_v54  ;;  %v1173_v52 = vld [vmem:[%s19788_s1 + $0x23d8] sm:$0xff] }
 0x51f   :  { %11601 = vmatpush1.bf16.msra.mxu1 %v13574_v63  ;;  %11069 = vmatprep.subr.bf16.mxu0 %v13581_v44  ;;  %v13631_v63 = vcombine.high %v1125_v55, %v1129_v60  ;;  %v1132_v44 = vld [vmem:[%s19788_s1 + $0x2290] sm:$0xff]  ;;  %v1177_v54 = vld [vmem:[%s19788_s1 + $0x23f8] sm:$0xff]  ;;  %v13670_v60 = vcombine.low %v1165_v37, %v1169_v45 }
 0x520   :  { %11602 = vmatprep.subr.bf16.mxu1 %v13583_v9  ;;  %v1136_v9 = vld [vmem:[%s19788_s1 + $0x22b0] sm:$0xff] }
 0x521   :  { %v13636_v40 = vcombine.low %v1132_v44, %v1136_v9 }
 0x522   :  { %11070 = vmatpush1.bf16.msra.mxu0 %v13580_v1  ;;  %v13637_v1 = vcombine.high %v1132_v44, %v1136_v9  ;;  %v1181_v44 = vld [vmem:[%s19788_s1 + $0x2418] sm:$0xff] }
 0x523   :  { %11603 = vmatpush1.bf16.msra.mxu1 %v13582_v16  ;;  %11071 = vmatprep.subr.bf16.mxu0 %v13589_v20  ;;  %v13639_v16 = vcombine.high %v1133_v10, %v1137_v11  ;;  %v1140_v20 = vld [vmem:[%s19788_s1 + $0x22d0] sm:$0xff]  ;;  %v1185_v9 = vld [vmem:[%s19788_s1 + $0x2438] sm:$0xff]  ;;  %v13678_v11 = vcombine.low %v1173_v52, %v1177_v54 }
 0x524   :  { %11604 = vmatprep.subr.bf16.mxu1 %v13591_v21  ;;  %v1144_v21 = vld [vmem:[%s19788_s1 + $0x22f0] sm:$0xff] }
 0x525   :  { %v13644_v32 = vcombine.low %v1140_v20, %v1144_v21 }
 0x526   :  { %11072 = vmatpush1.bf16.msra.mxu0 %v13588_v7  ;;  %v13645_v7 = vcombine.high %v1140_v20, %v1144_v21  ;;  %v1189_v20 = vld [vmem:[%s19788_s1 + $0x2458] sm:$0xff] }
 0x527   :  { %11605 = vmatpush1.bf16.msra.mxu1 %v13590_v58  ;;  %11073 = vmatprep.subr.bf16.mxu0 %v13597_v47  ;;  %v13647_v58 = vcombine.high %v1141_v22, %v1145_v24  ;;  %v1148_v47 = vld [vmem:[%s19788_s1 + $0x2310] sm:$0xff]  ;;  %v1193_v21 = vld [vmem:[%s19788_s1 + $0x2478] sm:$0xff]  ;;  %v13686_v24 = vcombine.low %v1181_v44, %v1185_v9 }
 0x528   :  { %11606 = vmatprep.subr.bf16.mxu1 %v13599_v28  ;;  %v1152_v28 = vld [vmem:[%s19788_s1 + $0x2330] sm:$0xff] }
 0x529   :  { %v13652_v38 = vcombine.low %v1148_v47, %v1152_v28 }
 0x52a   :  { %11074 = vmatpush1.bf16.msra.mxu0 %v13596_v17  ;;  %v13653_v17 = vcombine.high %v1148_v47, %v1152_v28  ;;  %v1197_v47 = vld [vmem:[%s19788_s1 + $0x2498] sm:$0xff] }
 0x52b   :  { %11607 = vmatpush1.bf16.msra.mxu1 %v13598_v48  ;;  %11075 = vmatprep.subr.bf16.mxu0 %v13605_v4  ;;  %v13655_v48 = vcombine.high %v1149_v29, %v1153_v30  ;;  %v1156_v4 = vld [vmem:[%s19788_s1 + $0x2350] sm:$0xff]  ;;  %v1201_v28 = vld [vmem:[%s19788_s1 + $0x24b8] sm:$0xff]  ;;  %v13694_v30 = vcombine.low %v1189_v20, %v1193_v21 }
 0x52c   :  { %11608 = vmatprep.subr.bf16.mxu1 %v13607_v36  ;;  %v1160_v36 = vld [vmem:[%s19788_s1 + $0x2370] sm:$0xff] }
 0x52d   :  { %v13660_v34 = vcombine.low %v1156_v4, %v1160_v36 }
 0x52e   :  { %11076 = vmatpush1.bf16.msra.mxu0 %v13604_v39  ;;  %v13661_v39 = vcombine.high %v1156_v4, %v1160_v36  ;;  %v1209_v4 = vld [vmem:[%s19788_s1 + $0x24f8] sm:$0xff] }
 0x52f   :  { %11609 = vmatpush1.bf16.msra.mxu1 %v13606_v51  ;;  %11077 = vmatprep.subr.bf16.mxu0 %v13613_v41  ;;  %v13663_v51 = vcombine.high %v1157_v27, %v1161_v53  ;;  %v1164_v41 = vld [vmem:[%s19788_s1 + $0x2390] sm:$0xff]  ;;  %v13702_v27 = vcombine.low %v1197_v47, %v1201_v28 }
 0x530   :  { %11610 = vmatprep.subr.bf16.mxu1 %v13615_v42  ;;  %v1168_v42 = vld [vmem:[%s19788_s1 + $0x23b0] sm:$0xff] }
 0x531   :  { %v13668_v55 = vcombine.low %v1164_v41, %v1168_v42 }
 0x532   :  { %11078 = vmatpush1.bf16.msra.mxu0 %v13612_v49  ;;  %v13669_v49 = vcombine.high %v1164_v41, %v1168_v42 }
 0x533   :  { %11611 = vmatpush1.bf16.msra.mxu1 %v13614_v59  ;;  %11079 = vmatprep.subr.bf16.mxu0 %v13621_v62  ;;  %v13671_v59 = vcombine.high %v1165_v37, %v1169_v45  ;;  %v1172_v62 = vld [vmem:[%s19788_s1 + $0x23d0] sm:$0xff] }
 0x534   :  { %11612 = vmatprep.subr.bf16.mxu1 %v13623_v50  ;;  %v1176_v50 = vld [vmem:[%s19788_s1 + $0x23f0] sm:$0xff] }
 0x535   :  { %v13676_v10 = vcombine.low %v1172_v62, %v1176_v50 }
 0x536   :  { %11080 = vmatpush1.bf16.msra.mxu0 %v13620_v57  ;;  %v13677_v57 = vcombine.high %v1172_v62, %v1176_v50 }
 0x537   :  { %11613 = vmatpush1.bf16.msra.mxu1 %v13622_v61  ;;  %11081 = vmatprep.subr.bf16.mxu0 %v13629_v0  ;;  %v13679_v61 = vcombine.high %v1173_v52, %v1177_v54  ;;  %v1180_v0 = vld [vmem:[%s19788_s1 + $0x2410] sm:$0xff] }
 0x538   :  { %11614 = vmatprep.subr.bf16.mxu1 %v13631_v63  ;;  %v1184_v63 = vld [vmem:[%s19788_s1 + $0x2430] sm:$0xff] }
 0x539   :  { %v13684_v22 = vcombine.low %v1180_v0, %v1184_v63 }
 0x53a   :  { %11082 = vmatpush1.bf16.msra.mxu0 %v13628_v6  ;;  %v13685_v6 = vcombine.high %v1180_v0, %v1184_v63 }
 0x53b   :  { %11615 = vmatpush1.bf16.msra.mxu1 %v13630_v12  ;;  %11083 = vmatprep.subr.bf16.mxu0 %v13637_v1  ;;  %v13687_v12 = vcombine.high %v1181_v44, %v1185_v9  ;;  %v1188_v1 = vld [vmem:[%s19788_s1 + $0x2450] sm:$0xff] }
 0x53c   :  { %11616 = vmatprep.subr.bf16.mxu1 %v13639_v16  ;;  %v1192_v16 = vld [vmem:[%s19788_s1 + $0x2470] sm:$0xff] }
 0x53d   :  { %v13692_v29 = vcombine.low %v1188_v1, %v1192_v16 }
 0x53e   :  { %11084 = vmatpush1.bf16.msra.mxu0 %v13636_v40  ;;  %v13693_v40 = vcombine.high %v1188_v1, %v1192_v16 }
 0x53f   :  { %11617 = vmatpush1.bf16.msra.mxu1 %v13638_v33  ;;  %11085 = vmatprep.subr.bf16.mxu0 %v13645_v7  ;;  %v13695_v33 = vcombine.high %v1189_v20, %v1193_v21  ;;  %v1196_v7 = vld [vmem:[%s19788_s1 + $0x2490] sm:$0xff] }
 0x540   :  { %11618 = vmatprep.subr.bf16.mxu1 %v13647_v58  ;;  %v1200_v58 = vld [vmem:[%s19788_s1 + $0x24b0] sm:$0xff] }
 0x541   :  { %v13700_v36 = vcombine.low %v1196_v7, %v1200_v58 }
 0x542   :  { %11086 = vmatpush1.bf16.msra.mxu0 %v13644_v32  ;;  %v13701_v32 = vcombine.high %v1196_v7, %v1200_v58 }
 0x543   :  { %11619 = vmatpush1.bf16.msra.mxu1 %v13646_v35  ;;  %11087 = vmatprep.subr.bf16.mxu0 %v13653_v17  ;;  %v13703_v35 = vcombine.high %v1197_v47, %v1201_v28  ;;  %v1204_v17 = vld [vmem:[%s19788_s1 + $0x24d0] sm:$0xff] }
 0x544   :  { %11620 = vmatprep.subr.bf16.mxu1 %v13655_v48  ;;  %v1208_v48 = vld [vmem:[%s19788_s1 + $0x24f0] sm:$0xff] }
 0x545   :  { %v13709_v53 = vcombine.high %v1204_v17, %v1208_v48  ;;  %v13708_v41 = vcombine.low %v1204_v17, %v1208_v48 }
 0x546   :  { %11088 = vmatpush1.bf16.msra.mxu0 %v13652_v38 }
 0x547   :  { %11621 = vmatpush1.bf16.msra.mxu1 %v13654_v19  ;;  %11089 = vmatprep.subr.bf16.mxu0 %v13661_v39  ;;  %v1212_v19 = vld [vmem:[%s19788_s1 + $0x2510] sm:$0xff] }
 0x548   :  { %11622 = vmatprep.subr.bf16.mxu1 %v13663_v51  ;;  %v1216_v39 = vld [vmem:[%s19788_s1 + $0x2530] sm:$0xff]  ;;  %v1217_v51 = vld [vmem:[%s19788_s1 + $0x2538] sm:$0xff] }
 0x549   :  { %v13717_v37 = vcombine.high %v1212_v19, %v1216_v39  ;;  %v13716_v62 = vcombine.low %v1212_v19, %v1216_v39 }
 0x54a   :  { %11090 = vmatpush1.bf16.msra.mxu0 %v13660_v34  ;;  %v1220_v34 = vld [vmem:[%s19788_s1 + $0x2550] sm:$0xff] }
 0x54b   :  { %11623 = vmatpush1.bf16.msra.mxu1 %v13662_v46  ;;  %11091 = vmatprep.subr.bf16.mxu0 %v13669_v49  ;;  %v1224_v46 = vld [vmem:[%s19788_s1 + $0x2570] sm:$0xff]  ;;  %v1221_v49 = vld [vmem:[%s19788_s1 + $0x2558] sm:$0xff] }
 0x54c   :  { %11624 = vmatprep.subr.bf16.mxu1 %v13671_v59  ;;  %v1225_v59 = vld [vmem:[%s19788_s1 + $0x2578] sm:$0xff]  ;;  %v13725_v52 = vcombine.high %v1220_v34, %v1224_v46  ;;  %v13724_v0 = vcombine.low %v1220_v34, %v1224_v46 }
 0x54d   :  { %v13727_v54 = vcombine.high %v1221_v49, %v1225_v59  ;;  %v13726_v63 = vcombine.low %v1221_v49, %v1225_v59 }
 0x54e   :  { %11092 = vmatpush1.bf16.msra.mxu0 %v13668_v55  ;;  %v1228_v55 = vld [vmem:[%s19788_s1 + $0x2590] sm:$0xff] }
 0x54f   :  { %11625 = vmatpush1.bf16.msra.mxu1 %v13670_v60  ;;  %11093 = vmatprep.subr.bf16.mxu0 %v13677_v57  ;;  %v1232_v60 = vld [vmem:[%s19788_s1 + $0x25b0] sm:$0xff]  ;;  %v1229_v57 = vld [vmem:[%s19788_s1 + $0x2598] sm:$0xff] }
 0x550   :  { %11626 = vmatprep.subr.bf16.mxu1 %v13679_v61  ;;  %v1233_v61 = vld [vmem:[%s19788_s1 + $0x25b8] sm:$0xff]  ;;  %v13733_v44 = vcombine.high %v1228_v55, %v1232_v60  ;;  %v13732_v1 = vcombine.low %v1228_v55, %v1232_v60 }
 0x551   :  { %v13735_v9 = vcombine.high %v1229_v57, %v1233_v61  ;;  %v13734_v16 = vcombine.low %v1229_v57, %v1233_v61 }
 0x552   :  { %11094 = vmatpush1.bf16.msra.mxu0 %v13676_v10  ;;  %v1236_v10 = vld [vmem:[%s19788_s1 + $0x25d0] sm:$0xff] }
 0x553   :  { %11627 = vmatpush1.bf16.msra.mxu1 %v13678_v11  ;;  %11104 = vmatprep.subr.bf16.mxu0 %v13685_v6  ;;  %v1240_v11 = vld [vmem:[%s19788_s1 + $0x25f0] sm:$0xff]  ;;  %v1237_v6 = vld [vmem:[%s19788_s1 + $0x25d8] sm:$0xff] }
 0x554   :  { %11637 = vmatprep.subr.bf16.mxu1 %v13687_v12  ;;  %v1241_v12 = vld [vmem:[%s19788_s1 + $0x25f8] sm:$0xff]  ;;  %v13741_v20 = vcombine.high %v1236_v10, %v1240_v11  ;;  %v13740_v7 = vcombine.low %v1236_v10, %v1240_v11 }
 0x555   :  { %11096 = vmatmul.mubr.bf16.vlgmr.msra.gmra.mrb[4].mxu0 %v16477_v56  ;;  %v13743_v21 = vcombine.high %v1237_v6, %v1241_v12  ;;  %v13742_v58 = vcombine.low %v1237_v6, %v1241_v12 }
 0x556   :  { %11105 = vmatpush1.bf16.msra.mxu0 %v13684_v22  ;;  %11629 = vmatmul.mubr.bf16.vlgmr.msra.gmra.mrb[4].mxu1 %v16477_v56  ;;  %v1205_v56 = vld [vmem:[%s19788_s1 + $0x24d8] sm:$0xff]  ;;  %v1244_v22 = vld [vmem:[%s19788_s1 + $0x2610] sm:$0xff] }
 0x557   :  { %11638 = vmatpush1.bf16.msra.mxu1 %v13686_v24  ;;  %11106 = vmatprep.subr.bf16.mxu0 %v13693_v40  ;;  %v13711_v38 = vcombine.high %v1205_v56, %v1209_v4  ;;  %v13710_v42 = vcombine.low %v1205_v56, %v1209_v4  ;;  %v1248_v24 = vld [vmem:[%s19788_s1 + $0x2630] sm:$0xff]  ;;  %v1245_v40 = vld [vmem:[%s19788_s1 + $0x2618] sm:$0xff] }
 0x558   :  { %11639 = vmatprep.subr.bf16.mxu1 %v13695_v33  ;;  %11136 = vmatprep.mubr.bf16.mxu0 %v16493_v5  ;;  %v1249_v33 = vld [vmem:[%s19788_s1 + $0x2638] sm:$0xff]  ;;  %v13749_v47 = vcombine.high %v1244_v22, %v1248_v24  ;;  %v13748_v17 = vcombine.low %v1244_v22, %v1248_v24 }
 0x559   :  { %11669 = vmatprep.mubr.bf16.mxu1 %v16493_v5  ;;  %v1213_v5 = vld [vmem:[%s19788_s1 + $0x2518] sm:$0xff]  ;;  %v13751_v28 = vcombine.high %v1245_v40, %v1249_v33  ;;  %v13750_v48 = vcombine.low %v1245_v40, %v1249_v33 }
 0x55a   :  { %11107 = vmatpush1.bf16.msra.mxu0 %v13692_v29  ;;  %v13719_v45 = vcombine.high %v1213_v5, %v1217_v51  ;;  %v13718_v50 = vcombine.low %v1213_v5, %v1217_v51  ;;  %v1252_v29 = vld [vmem:[%s19788_s1 + $0x2650] sm:$0xff] }
 0x55b   :  { %11640 = vmatpush1.bf16.msra.mxu1 %v13694_v30  ;;  %11108 = vmatprep.subr.bf16.mxu0 %v13701_v32  ;;  %v1256_v30 = vld [vmem:[%s19788_s1 + $0x2670] sm:$0xff]  ;;  %v1253_v32 = vld [vmem:[%s19788_s1 + $0x2658] sm:$0xff] }
 0x55c   :  { %11641 = vmatprep.subr.bf16.mxu1 %v13703_v35  ;;  %v1257_v35 = vld [vmem:[%s19788_s1 + $0x2678] sm:$0xff]  ;;  %v13757_v56 = vcombine.high %v1252_v29, %v1256_v30  ;;  %v13756_v19 = vcombine.low %v1252_v29, %v1256_v30 }
 0x55d   :  { %v13759_v4 = vcombine.high %v1253_v32, %v1257_v35  ;;  %v13758_v39 = vcombine.low %v1253_v32, %v1257_v35 }
 0x55e   :  { %11109 = vmatpush1.bf16.msra.mxu0 %v13700_v36  ;;  %v1260_v36 = vld [vmem:[%s19788_s1 + $0x2690] sm:$0xff] }
 0x55f   :  { %11642 = vmatpush1.bf16.msra.mxu1 %v13702_v27  ;;  %11110 = vmatprep.subr.bf16.mxu0 %v13709_v53  ;;  %v1264_v27 = vld [vmem:[%s19788_s1 + $0x26b0] sm:$0xff]  ;;  %v1261_v53 = vld [vmem:[%s19788_s1 + $0x2698] sm:$0xff] }
 0x560   :  { %11643 = vmatprep.subr.bf16.mxu1 %v13711_v38  ;;  %v1265_v38 = vld [vmem:[%s19788_s1 + $0x26b8] sm:$0xff]  ;;  %v13765_v5 = vcombine.high %v1260_v36, %v1264_v27  ;;  %v13764_v34 = vcombine.low %v1260_v36, %v1264_v27 }
 0x561   :  { %v13767_v51 = vcombine.high %v1261_v53, %v1265_v38  ;;  %v13766_v46 = vcombine.low %v1261_v53, %v1265_v38 }
 0x562   :  { %11111 = vmatpush1.bf16.msra.mxu0 %v13708_v41  ;;  %v1268_v41 = vld [vmem:[%s19788_s1 + $0x26d0] sm:$0xff] }
 0x563   :  { %11644 = vmatpush1.bf16.msra.mxu1 %v13710_v42  ;;  %11112 = vmatprep.subr.bf16.mxu0 %v13717_v37  ;;  %v1272_v42 = vld [vmem:[%s19788_s1 + $0x26f0] sm:$0xff]  ;;  %v1269_v37 = vld [vmem:[%s19788_s1 + $0x26d8] sm:$0xff] }
 0x564   :  { %11645 = vmatprep.subr.bf16.mxu1 %v13719_v45  ;;  %v1273_v45 = vld [vmem:[%s19788_s1 + $0x26f8] sm:$0xff]  ;;  %v13773_v49 = vcombine.high %v1268_v41, %v1272_v42  ;;  %v13772_v55 = vcombine.low %v1268_v41, %v1272_v42 }
 0x565   :  { %v13775_v59 = vcombine.high %v1269_v37, %v1273_v45  ;;  %v13774_v60 = vcombine.low %v1269_v37, %v1273_v45 }
 0x566   :  { %11113 = vmatpush1.bf16.msra.mxu0 %v13716_v62  ;;  %v1276_v62 = vld [vmem:[%s19788_s1 + $0x2710] sm:$0xff] }
 0x567   :  { %11646 = vmatpush1.bf16.msra.mxu1 %v13718_v50  ;;  %11114 = vmatprep.subr.bf16.mxu0 %v13725_v52  ;;  %v1280_v50 = vld [vmem:[%s19788_s1 + $0x2730] sm:$0xff]  ;;  %v1277_v52 = vld [vmem:[%s19788_s1 + $0x2718] sm:$0xff] }
 0x568   :  { %11647 = vmatprep.subr.bf16.mxu1 %v13727_v54  ;;  %v1281_v54 = vld [vmem:[%s19788_s1 + $0x2738] sm:$0xff]  ;;  %v13781_v57 = vcombine.high %v1276_v62, %v1280_v50  ;;  %v13780_v10 = vcombine.low %v1276_v62, %v1280_v50 }
 0x569   :  { %v13783_v61 = vcombine.high %v1277_v52, %v1281_v54  ;;  %v13782_v11 = vcombine.low %v1277_v52, %v1281_v54 }
 0x56a   :  { %11115 = vmatpush1.bf16.msra.mxu0 %v13724_v0  ;;  %v1284_v0 = vld [vmem:[%s19788_s1 + $0x2750] sm:$0xff] }
 0x56b   :  { %11648 = vmatpush1.bf16.msra.mxu1 %v13726_v63  ;;  %11116 = vmatprep.subr.bf16.mxu0 %v13733_v44  ;;  %v1288_v63 = vld [vmem:[%s19788_s1 + $0x2770] sm:$0xff]  ;;  %v1285_v44 = vld [vmem:[%s19788_s1 + $0x2758] sm:$0xff] }
 0x56c   :  { %11649 = vmatprep.subr.bf16.mxu1 %v13735_v9  ;;  %v1289_v9 = vld [vmem:[%s19788_s1 + $0x2778] sm:$0xff]  ;;  %v13789_v6 = vcombine.high %v1284_v0, %v1288_v63  ;;  %v13788_v22 = vcombine.low %v1284_v0, %v1288_v63 }
 0x56d   :  { %v13791_v12 = vcombine.high %v1285_v44, %v1289_v9  ;;  %v13790_v24 = vcombine.low %v1285_v44, %v1289_v9  ;;  %v1340_v9 = vld [vmem:[%s19788_s1 + $0x2910] sm:$0xff] }
 0x56e   :  { %11117 = vmatpush1.bf16.msra.mxu0 %v13732_v1  ;;  %v1292_v1 = vld [vmem:[%s19788_s1 + $0x2790] sm:$0xff] }
 0x56f   :  { %11650 = vmatpush1.bf16.msra.mxu1 %v13734_v16  ;;  %11118 = vmatprep.subr.bf16.mxu0 %v13741_v20  ;;  %v1296_v16 = vld [vmem:[%s19788_s1 + $0x27b0] sm:$0xff]  ;;  %v1293_v20 = vld [vmem:[%s19788_s1 + $0x2798] sm:$0xff] }
 0x570   :  { %11651 = vmatprep.subr.bf16.mxu1 %v13743_v21  ;;  %v1297_v21 = vld [vmem:[%s19788_s1 + $0x27b8] sm:$0xff]  ;;  %v13797_v40 = vcombine.high %v1292_v1, %v1296_v16  ;;  %v13796_v29 = vcombine.low %v1292_v1, %v1296_v16 }
 0x571   :  { %v13799_v33 = vcombine.high %v1293_v20, %v1297_v21  ;;  %v13798_v30 = vcombine.low %v1293_v20, %v1297_v21  ;;  %v1348_v20 = vld [vmem:[%s19788_s1 + $0x2950] sm:$0xff] }
 0x572   :  { %11119 = vmatpush1.bf16.msra.mxu0 %v13740_v7  ;;  %v1300_v7 = vld [vmem:[%s19788_s1 + $0x27d0] sm:$0xff] }
 0x573   :  { %11652 = vmatpush1.bf16.msra.mxu1 %v13742_v58  ;;  %11120 = vmatprep.subr.bf16.mxu0 %v13749_v47  ;;  %v1304_v58 = vld [vmem:[%s19788_s1 + $0x27f0] sm:$0xff]  ;;  %v1301_v47 = vld [vmem:[%s19788_s1 + $0x27d8] sm:$0xff] }
 0x574   :  { %11653 = vmatprep.subr.bf16.mxu1 %v13751_v28  ;;  %v1305_v28 = vld [vmem:[%s19788_s1 + $0x27f8] sm:$0xff]  ;;  %v13805_v32 = vcombine.high %v1300_v7, %v1304_v58  ;;  %v13804_v36 = vcombine.low %v1300_v7, %v1304_v58  ;;  %v1352_v21 = vld [vmem:[%s19788_s1 + $0x2970] sm:$0xff] }
 0x575   :  { %v13807_v35 = vcombine.high %v1301_v47, %v1305_v28  ;;  %v13806_v27 = vcombine.low %v1301_v47, %v1305_v28  ;;  %v13853_v7 = vcombine.high %v1348_v20, %v1352_v21  ;;  %v1356_v47 = vld [vmem:[%s19788_s1 + $0x2990] sm:$0xff] }
 0x576   :  { %11121 = vmatpush1.bf16.msra.mxu0 %v13748_v17  ;;  %v1308_v17 = vld [vmem:[%s19788_s1 + $0x2810] sm:$0xff] }
 0x577   :  { %11654 = vmatpush1.bf16.msra.mxu1 %v13750_v48  ;;  %11122 = vmatprep.subr.bf16.mxu0 %v13757_v56  ;;  %v1312_v48 = vld [vmem:[%s19788_s1 + $0x2830] sm:$0xff]  ;;  %v1309_v56 = vld [vmem:[%s19788_s1 + $0x2818] sm:$0xff] }
 0x578   :  { %11655 = vmatprep.subr.bf16.mxu1 %v13759_v4  ;;  %v1313_v4 = vld [vmem:[%s19788_s1 + $0x2838] sm:$0xff]  ;;  %v13813_v53 = vcombine.high %v1308_v17, %v1312_v48  ;;  %v13812_v41 = vcombine.low %v1308_v17, %v1312_v48  ;;  %v1360_v28 = vld [vmem:[%s19788_s1 + $0x29b0] sm:$0xff] }
 0x579   :  { %v13815_v38 = vcombine.high %v1309_v56, %v1313_v4  ;;  %v13814_v42 = vcombine.low %v1309_v56, %v1313_v4  ;;  %v13861_v17 = vcombine.high %v1356_v47, %v1360_v28  ;;  %v1364_v56 = vld [vmem:[%s19788_s1 + $0x29d0] sm:$0xff] }
 0x57a   :  { %11123 = vmatpush1.bf16.msra.mxu0 %v13756_v19  ;;  %v1316_v19 = vld [vmem:[%s19788_s1 + $0x2850] sm:$0xff] }
 0x57b   :  { %11656 = vmatpush1.bf16.msra.mxu1 %v13758_v39  ;;  %11124 = vmatprep.subr.bf16.mxu0 %v13765_v5  ;;  %v1320_v39 = vld [vmem:[%s19788_s1 + $0x2870] sm:$0xff]  ;;  %v1317_v5 = vld [vmem:[%s19788_s1 + $0x2858] sm:$0xff] }
 0x57c   :  { %11657 = vmatprep.subr.bf16.mxu1 %v13767_v51  ;;  %v1321_v51 = vld [vmem:[%s19788_s1 + $0x2878] sm:$0xff]  ;;  %v13821_v37 = vcombine.high %v1316_v19, %v1320_v39  ;;  %v13820_v62 = vcombine.low %v1316_v19, %v1320_v39  ;;  %v1368_v4 = vld [vmem:[%s19788_s1 + $0x29f0] sm:$0xff] }
 0x57d   :  { %v13823_v45 = vcombine.high %v1317_v5, %v1321_v51  ;;  %v13822_v50 = vcombine.low %v1317_v5, %v1321_v51  ;;  %v13869_v19 = vcombine.high %v1364_v56, %v1368_v4  ;;  %v1372_v5 = vld [vmem:[%s19788_s1 + $0x2a10] sm:$0xff] }
 0x57e   :  { %11125 = vmatpush1.bf16.msra.mxu0 %v13764_v34  ;;  %v1324_v34 = vld [vmem:[%s19788_s1 + $0x2890] sm:$0xff] }
 0x57f   :  { %11658 = vmatpush1.bf16.msra.mxu1 %v13766_v46  ;;  %11126 = vmatprep.subr.bf16.mxu0 %v13773_v49  ;;  %v1328_v46 = vld [vmem:[%s19788_s1 + $0x28b0] sm:$0xff]  ;;  %v1325_v49 = vld [vmem:[%s19788_s1 + $0x2898] sm:$0xff] }
 0x580   :  { %11659 = vmatprep.subr.bf16.mxu1 %v13775_v59  ;;  %v1329_v59 = vld [vmem:[%s19788_s1 + $0x28b8] sm:$0xff]  ;;  %v13829_v52 = vcombine.high %v1324_v34, %v1328_v46  ;;  %v1376_v51 = vld [vmem:[%s19788_s1 + $0x2a30] sm:$0xff] }
 0x581   :  { %v13831_v54 = vcombine.high %v1325_v49, %v1329_v59  ;;  %v13830_v0 = vcombine.low %v1325_v49, %v1329_v59  ;;  %v1380_v49 = vld [vmem:[%s19788_s1 + $0x2a50] sm:$0xff] }
 0x582   :  { %11127 = vmatpush1.bf16.msra.mxu0 %v13772_v55  ;;  %v1332_v55 = vld [vmem:[%s19788_s1 + $0x28d0] sm:$0xff] }
 0x583   :  { %11660 = vmatpush1.bf16.msra.mxu1 %v13774_v60  ;;  %11128 = vmatprep.subr.bf16.mxu0 %v13781_v57  ;;  %v1336_v60 = vld [vmem:[%s19788_s1 + $0x28f0] sm:$0xff]  ;;  %v1337_v57 = vld [vmem:[%s19788_s1 + $0x28f8] sm:$0xff] }
 0x584   :  { %11661 = vmatprep.subr.bf16.mxu1 %v13783_v61  ;;  %v13828_v61 = vcombine.low %v1324_v34, %v1328_v46  ;;  %v13837_v63 = vcombine.high %v1332_v55, %v1336_v60  ;;  %v13877_v34 = vcombine.high %v1372_v5, %v1376_v51  ;;  %v1384_v59 = vld [vmem:[%s19788_s1 + $0x2a70] sm:$0xff] }
 0x586   :  { %11129 = vmatpush1.bf16.msra.mxu0 %v13780_v10  ;;  %v1344_v10 = vld [vmem:[%s19788_s1 + $0x2930] sm:$0xff] }
 0x587   :  { %11662 = vmatpush1.bf16.msra.mxu1 %v13782_v11  ;;  %11130 = vmatprep.subr.bf16.mxu0 %v13789_v6  ;;  %v1345_v11 = vld [vmem:[%s19788_s1 + $0x2938] sm:$0xff]  ;;  %v13836_v6 = vcombine.low %v1332_v55, %v1336_v60  ;;  %v13845_v1 = vcombine.high %v1340_v9, %v1344_v10  ;;  %v13885_v55 = vcombine.high %v1380_v49, %v1384_v59 }
 0x588   :  { %11663 = vmatprep.subr.bf16.mxu1 %v13791_v12 }
 0x58a   :  { %11131 = vmatpush1.bf16.msra.mxu0 %v13788_v22  ;;  %v1349_v22 = vld [vmem:[%s19788_s1 + $0x2958] sm:$0xff] }
 0x58b   :  { %11664 = vmatpush1.bf16.msra.mxu1 %v13790_v24  ;;  %11132 = vmatprep.subr.bf16.mxu0 %v13797_v40  ;;  %v1353_v24 = vld [vmem:[%s19788_s1 + $0x2978] sm:$0xff]  ;;  %v13844_v40 = vcombine.low %v1340_v9, %v1344_v10 }
 0x58c   :  { %11665 = vmatprep.subr.bf16.mxu1 %v13799_v33  ;;  %v13855_v58 = vcombine.high %v1349_v22, %v1353_v24 }
 0x58e   :  { %11133 = vmatpush1.bf16.msra.mxu0 %v13796_v29  ;;  %v1357_v29 = vld [vmem:[%s19788_s1 + $0x2998] sm:$0xff] }
 0x58f   :  { %11666 = vmatpush1.bf16.msra.mxu1 %v13798_v30  ;;  %11134 = vmatprep.subr.bf16.mxu0 %v13805_v32  ;;  %v1361_v30 = vld [vmem:[%s19788_s1 + $0x29b8] sm:$0xff]  ;;  %v13852_v32 = vcombine.low %v1348_v20, %v1352_v21 }
 0x590   :  { %11667 = vmatprep.subr.bf16.mxu1 %v13807_v35  ;;  %v13854_v35 = vcombine.low %v1349_v22, %v1353_v24  ;;  %v13863_v48 = vcombine.high %v1357_v29, %v1361_v30  ;;  %v1404_v22 = vld [vmem:[%s19788_s1 + $0x2b10] sm:$0xff] }
 0x591   :  { %v1408_v24 = vld [vmem:[%s19788_s1 + $0x2b30] sm:$0xff] }
 0x592   :  { %11135 = vmatpush1.bf16.msra.mxu0 %v13804_v36  ;;  %v1365_v36 = vld [vmem:[%s19788_s1 + $0x29d8] sm:$0xff] }
 0x593   :  { %11668 = vmatpush1.bf16.msra.mxu1 %v13806_v27  ;;  %11145 = vmatprep.subr.bf16.mxu0 %v13813_v53  ;;  %v1369_v27 = vld [vmem:[%s19788_s1 + $0x29f8] sm:$0xff]  ;;  %v13860_v53 = vcombine.low %v1356_v47, %v1360_v28  ;;  %v13909_v47 = vcombine.high %v1404_v22, %v1408_v24 }
 0x594   :  { %11678 = vmatprep.subr.bf16.mxu1 %v13815_v38  ;;  %v13862_v38 = vcombine.low %v1357_v29, %v1361_v30  ;;  %v13871_v39 = vcombine.high %v1365_v36, %v1369_v27  ;;  %v1412_v29 = vld [vmem:[%s19788_s1 + $0x2b50] sm:$0xff] }
 0x595   :  { %11137 = vmatmul.mubr.bf16.vlgmr.msra.gmra.mrb[4].mxu0 %v16688_v2  ;;  %v1416_v30 = vld [vmem:[%s19788_s1 + $0x2b70] sm:$0xff] }
 0x596   :  { %11146 = vmatpush1.bf16.msra.mxu0 %v13812_v41  ;;  %11670 = vmatmul.mubr.bf16.vlgmr.msra.gmra.mrb[4].mxu1 %v16688_v2  ;;  %v1333_v2 = vld [vmem:[%s19788_s1 + $0x28d8] sm:$0xff] }
 0x597   :  { %11679 = vmatpush1.bf16.msra.mxu1 %v13814_v42  ;;  %11147 = vmatprep.subr.bf16.mxu0 %v13821_v37  ;;  %v13839_v44 = vcombine.high %v1333_v2, %v1337_v57  ;;  %v13838_v12 = vcombine.low %v1333_v2, %v1337_v57  ;;  %v1373_v41 = vld [vmem:[%s19788_s1 + $0x2a18] sm:$0xff]  ;;  %v13868_v37 = vcombine.low %v1364_v56, %v1368_v4  ;;  %v1388_v2 = vld [vmem:[%s19788_s1 + $0x2a90] sm:$0xff] }
 0x598   :  { %11680 = vmatprep.subr.bf16.mxu1 %v13823_v45  ;;  %11177 = vmatprep.mubr.bf16.mxu0 %v16703_v14  ;;  %v1377_v42 = vld [vmem:[%s19788_s1 + $0x2a38] sm:$0xff]  ;;  %v13870_v45 = vcombine.low %v1365_v36, %v1369_v27  ;;  %v1392_v57 = vld [vmem:[%s19788_s1 + $0x2ab0] sm:$0xff]  ;;  %v13917_v56 = vcombine.high %v1412_v29, %v1416_v30 }
 0x599   :  { %11710 = vmatprep.mubr.bf16.mxu1 %v16703_v14  ;;  %v1341_v14 = vld [vmem:[%s19788_s1 + $0x2918] sm:$0xff]  ;;  %v13879_v46 = vcombine.high %v1373_v41, %v1377_v42  ;;  %v13893_v9 = vcombine.high %v1388_v2, %v1392_v57  ;;  %v1420_v36 = vld [vmem:[%s19788_s1 + $0x2b90] sm:$0xff] }
 0x59a   :  { %11148 = vmatpush1.bf16.msra.mxu0 %v13820_v62  ;;  %v13847_v16 = vcombine.high %v1341_v14, %v1345_v11  ;;  %v13846_v33 = vcombine.low %v1341_v14, %v1345_v11  ;;  %v1381_v62 = vld [vmem:[%s19788_s1 + $0x2a58] sm:$0xff]  ;;  %v1396_v14 = vld [vmem:[%s19788_s1 + $0x2ad0] sm:$0xff] }
 0x59b   :  { %11681 = vmatpush1.bf16.msra.mxu1 %v13822_v50  ;;  %11149 = vmatprep.subr.bf16.mxu0 %v13829_v52  ;;  %v1385_v50 = vld [vmem:[%s19788_s1 + $0x2a78] sm:$0xff]  ;;  %v13876_v52 = vcombine.low %v1372_v5, %v1376_v51  ;;  %v1400_v11 = vld [vmem:[%s19788_s1 + $0x2af0] sm:$0xff] }
 0x59c   :  { %11682 = vmatprep.subr.bf16.mxu1 %v13831_v54  ;;  %v13878_v54 = vcombine.low %v1373_v41, %v1377_v42  ;;  %v13887_v60 = vcombine.high %v1381_v62, %v1385_v50  ;;  %v13901_v20 = vcombine.high %v1396_v14, %v1400_v11  ;;  %v1424_v27 = vld [vmem:[%s19788_s1 + $0x2bb0] sm:$0xff] }
 0x59d   :  { %v13925_v5 = vcombine.high %v1420_v36, %v1424_v27  ;;  %v1428_v41 = vld [vmem:[%s19788_s1 + $0x2bd0] sm:$0xff] }
 0x59e   :  { %11150 = vmatpush1.bf16.msra.mxu0 %v13828_v61  ;;  %v1389_v61 = vld [vmem:[%s19788_s1 + $0x2a98] sm:$0xff]  ;;  %v1432_v42 = vld [vmem:[%s19788_s1 + $0x2bf0] sm:$0xff] }
 0x59f   :  { %11683 = vmatpush1.bf16.msra.mxu1 %v13830_v0  ;;  %11151 = vmatprep.subr.bf16.mxu0 %v13837_v63  ;;  %v1393_v0 = vld [vmem:[%s19788_s1 + $0x2ab8] sm:$0xff]  ;;  %v13884_v63 = vcombine.low %v1380_v49, %v1384_v59  ;;  %v13933_v49 = vcombine.high %v1428_v41, %v1432_v42 }
 0x5a0   :  { %11684 = vmatprep.subr.bf16.mxu1 %v13839_v44  ;;  %v13886_v44 = vcombine.low %v1381_v62, %v1385_v50  ;;  %v13895_v10 = vcombine.high %v1389_v61, %v1393_v0  ;;  %v1436_v62 = vld [vmem:[%s19788_s1 + $0x2c10] sm:$0xff] }
 0x5a1   :  { %v1440_v50 = vld [vmem:[%s19788_s1 + $0x2c30] sm:$0xff] }
 0x5a2   :  { %11152 = vmatpush1.bf16.msra.mxu0 %v13836_v6  ;;  %v1397_v6 = vld [vmem:[%s19788_s1 + $0x2ad8] sm:$0xff] }
 0x5a3   :  { %11685 = vmatpush1.bf16.msra.mxu1 %v13838_v12  ;;  %11153 = vmatprep.subr.bf16.mxu0 %v13845_v1  ;;  %v1401_v12 = vld [vmem:[%s19788_s1 + $0x2af8] sm:$0xff]  ;;  %v13892_v1 = vcombine.low %v1388_v2, %v1392_v57  ;;  %v13941_v2 = vcombine.high %v1436_v62, %v1440_v50 }
 0x5a4   :  { %11686 = vmatprep.subr.bf16.mxu1 %v13847_v16  ;;  %v13894_v16 = vcombine.low %v1389_v61, %v1393_v0  ;;  %v13903_v21 = vcombine.high %v1397_v6, %v1401_v12  ;;  %v1444_v61 = vld [vmem:[%s19788_s1 + $0x2c50] sm:$0xff] }
 0x5a5   :  { %v1448_v0 = vld [vmem:[%s19788_s1 + $0x2c70] sm:$0xff] }
 0x5a6   :  { %11154 = vmatpush1.bf16.msra.mxu0 %v13844_v40  ;;  %v1405_v40 = vld [vmem:[%s19788_s1 + $0x2b18] sm:$0xff] }
 0x5a7   :  { %11687 = vmatpush1.bf16.msra.mxu1 %v13846_v33  ;;  %11155 = vmatprep.subr.bf16.mxu0 %v13853_v7  ;;  %v1409_v33 = vld [vmem:[%s19788_s1 + $0x2b38] sm:$0xff]  ;;  %v13900_v7 = vcombine.low %v1396_v14, %v1400_v11  ;;  %v13949_v14 = vcombine.high %v1444_v61, %v1448_v0 }
 0x5a8   :  { %11688 = vmatprep.subr.bf16.mxu1 %v13855_v58  ;;  %v13902_v58 = vcombine.low %v1397_v6, %v1401_v12  ;;  %v13911_v28 = vcombine.high %v1405_v40, %v1409_v33  ;;  %v1452_v6 = vld [vmem:[%s19788_s1 + $0x2c90] sm:$0xff] }
 0x5a9   :  { %v1456_v12 = vld [vmem:[%s19788_s1 + $0x2cb0] sm:$0xff] }
 0x5aa   :  { %11156 = vmatpush1.bf16.msra.mxu0 %v13852_v32  ;;  %v1413_v32 = vld [vmem:[%s19788_s1 + $0x2b58] sm:$0xff] }
 0x5ab   :  { %11689 = vmatpush1.bf16.msra.mxu1 %v13854_v35  ;;  %11157 = vmatprep.subr.bf16.mxu0 %v13861_v17  ;;  %v1417_v35 = vld [vmem:[%s19788_s1 + $0x2b78] sm:$0xff]  ;;  %v13908_v17 = vcombine.low %v1404_v22, %v1408_v24  ;;  %v13957_v22 = vcombine.high %v1452_v6, %v1456_v12 }
 0x5ac   :  { %11690 = vmatprep.subr.bf16.mxu1 %v13863_v48  ;;  %v13910_v48 = vcombine.low %v1405_v40, %v1409_v33  ;;  %v13919_v4 = vcombine.high %v1413_v32, %v1417_v35  ;;  %v1460_v40 = vld [vmem:[%s19788_s1 + $0x2cd0] sm:$0xff] }
 0x5ad   :  { %v1464_v33 = vld [vmem:[%s19788_s1 + $0x2cf0] sm:$0xff] }
 0x5ae   :  { %11158 = vmatpush1.bf16.msra.mxu0 %v13860_v53  ;;  %v1421_v53 = vld [vmem:[%s19788_s1 + $0x2b98] sm:$0xff] }
 0x5af   :  { %11691 = vmatpush1.bf16.msra.mxu1 %v13862_v38  ;;  %11159 = vmatprep.subr.bf16.mxu0 %v13869_v19  ;;  %v1425_v38 = vld [vmem:[%s19788_s1 + $0x2bb8] sm:$0xff]  ;;  %v13916_v19 = vcombine.low %v1412_v29, %v1416_v30  ;;  %v1468_v30 = vld [vmem:[%s19788_s1 + $0x2d10] sm:$0xff] }
 0x5b0   :  { %11692 = vmatprep.subr.bf16.mxu1 %v13871_v39  ;;  %v13918_v39 = vcombine.low %v1413_v32, %v1417_v35  ;;  %v13927_v51 = vcombine.high %v1421_v53, %v1425_v38  ;;  %v1472_v32 = vld [vmem:[%s19788_s1 + $0x2d30] sm:$0xff]  ;;  %v1473_v35 = vld [vmem:[%s19788_s1 + $0x2d38] sm:$0xff] }
 0x5b2   :  { %11160 = vmatpush1.bf16.msra.mxu0 %v13868_v37  ;;  %v1429_v37 = vld [vmem:[%s19788_s1 + $0x2bd8] sm:$0xff] }
 0x5b3   :  { %11693 = vmatpush1.bf16.msra.mxu1 %v13870_v45  ;;  %11161 = vmatprep.subr.bf16.mxu0 %v13877_v34  ;;  %v1433_v45 = vld [vmem:[%s19788_s1 + $0x2bf8] sm:$0xff]  ;;  %v13924_v34 = vcombine.low %v1420_v36, %v1424_v27  ;;  %v1476_v36 = vld [vmem:[%s19788_s1 + $0x2d50] sm:$0xff] }
 0x5b4   :  { %11694 = vmatprep.subr.bf16.mxu1 %v13879_v46  ;;  %v13926_v46 = vcombine.low %v1421_v53, %v1425_v38  ;;  %v13935_v59 = vcombine.high %v1429_v37, %v1433_v45  ;;  %v1480_v27 = vld [vmem:[%s19788_s1 + $0x2d70] sm:$0xff]  ;;  %v1477_v53 = vld [vmem:[%s19788_s1 + $0x2d58] sm:$0xff] }
 0x5b5   :  { %v1481_v38 = vld [vmem:[%s19788_s1 + $0x2d78] sm:$0xff] }
 0x5b6   :  { %11162 = vmatpush1.bf16.msra.mxu0 %v13876_v52  ;;  %v1437_v52 = vld [vmem:[%s19788_s1 + $0x2c18] sm:$0xff] }
 0x5b7   :  { %11695 = vmatpush1.bf16.msra.mxu1 %v13878_v54  ;;  %11163 = vmatprep.subr.bf16.mxu0 %v13885_v55  ;;  %v1441_v54 = vld [vmem:[%s19788_s1 + $0x2c38] sm:$0xff]  ;;  %v13932_v55 = vcombine.low %v1428_v41, %v1432_v42  ;;  %v1484_v41 = vld [vmem:[%s19788_s1 + $0x2d90] sm:$0xff] }
 0x5b8   :  { %11696 = vmatprep.subr.bf16.mxu1 %v13887_v60  ;;  %v13934_v60 = vcombine.low %v1429_v37, %v1433_v45  ;;  %v13943_v57 = vcombine.high %v1437_v52, %v1441_v54  ;;  %v1488_v42 = vld [vmem:[%s19788_s1 + $0x2db0] sm:$0xff]  ;;  %v1485_v37 = vld [vmem:[%s19788_s1 + $0x2d98] sm:$0xff] }
 0x5b9   :  { %v1489_v45 = vld [vmem:[%s19788_s1 + $0x2db8] sm:$0xff] }
 0x5ba   :  { %11164 = vmatpush1.bf16.msra.mxu0 %v13884_v63  ;;  %v1445_v63 = vld [vmem:[%s19788_s1 + $0x2c58] sm:$0xff] }
 0x5bb   :  { %11697 = vmatpush1.bf16.msra.mxu1 %v13886_v44  ;;  %11165 = vmatprep.subr.bf16.mxu0 %v13893_v9  ;;  %v1449_v44 = vld [vmem:[%s19788_s1 + $0x2c78] sm:$0xff]  ;;  %v13940_v9 = vcombine.low %v1436_v62, %v1440_v50  ;;  %v1492_v62 = vld [vmem:[%s19788_s1 + $0x2dd0] sm:$0xff] }
 0x5bc   :  { %11698 = vmatprep.subr.bf16.mxu1 %v13895_v10  ;;  %v13942_v10 = vcombine.low %v1437_v52, %v1441_v54  ;;  %v13951_v11 = vcombine.high %v1445_v63, %v1449_v44  ;;  %v1496_v50 = vld [vmem:[%s19788_s1 + $0x2df0] sm:$0xff]  ;;  %v1493_v52 = vld [vmem:[%s19788_s1 + $0x2dd8] sm:$0xff] }
 0x5bd   :  { %v1497_v54 = vld [vmem:[%s19788_s1 + $0x2df8] sm:$0xff] }
 0x5be   :  { %11166 = vmatpush1.bf16.msra.mxu0 %v13892_v1  ;;  %v1453_v1 = vld [vmem:[%s19788_s1 + $0x2c98] sm:$0xff] }
 0x5bf   :  { %11699 = vmatpush1.bf16.msra.mxu1 %v13894_v16  ;;  %11167 = vmatprep.subr.bf16.mxu0 %v13901_v20  ;;  %v1457_v16 = vld [vmem:[%s19788_s1 + $0x2cb8] sm:$0xff]  ;;  %v13948_v20 = vcombine.low %v1444_v61, %v1448_v0  ;;  %v1500_v61 = vld [vmem:[%s19788_s1 + $0x2e10] sm:$0xff] }
 0x5c0   :  { %11700 = vmatprep.subr.bf16.mxu1 %v13903_v21  ;;  %v13950_v21 = vcombine.low %v1445_v63, %v1449_v44  ;;  %v13959_v24 = vcombine.high %v1453_v1, %v1457_v16  ;;  %v1504_v0 = vld [vmem:[%s19788_s1 + $0x2e30] sm:$0xff]  ;;  %v1501_v63 = vld [vmem:[%s19788_s1 + $0x2e18] sm:$0xff] }
 0x5c1   :  { %v1505_v44 = vld [vmem:[%s19788_s1 + $0x2e38] sm:$0xff] }
 0x5c2   :  { %11168 = vmatpush1.bf16.msra.mxu0 %v13900_v7  ;;  %v1465_v7 = vld [vmem:[%s19788_s1 + $0x2cf8] sm:$0xff] }
 0x5c3   :  { %11701 = vmatpush1.bf16.msra.mxu1 %v13902_v58  ;;  %11169 = vmatprep.subr.bf16.mxu0 %v13909_v47  ;;  %v13956_v58 = vcombine.low %v1452_v6, %v1456_v12  ;;  %v13958_v47 = vcombine.low %v1453_v1, %v1457_v16  ;;  %v1508_v6 = vld [vmem:[%s19788_s1 + $0x2e50] sm:$0xff]  ;;  %v1509_v1 = vld [vmem:[%s19788_s1 + $0x2e58] sm:$0xff] }
 0x5c4   :  { %11702 = vmatprep.subr.bf16.mxu1 %v13911_v28  ;;  %v13965_v28 = vcombine.high %v1460_v40, %v1464_v33  ;;  %v1512_v12 = vld [vmem:[%s19788_s1 + $0x2e70] sm:$0xff]  ;;  %v1513_v16 = vld [vmem:[%s19788_s1 + $0x2e78] sm:$0xff] }
 0x5c6   :  { %11170 = vmatpush1.bf16.msra.mxu0 %v13908_v17  ;;  %v13964_v17 = vcombine.low %v1460_v40, %v1464_v33  ;;  %v1516_v40 = vld [vmem:[%s19788_s1 + $0x2e90] sm:$0xff] }
 0x5c7   :  { %11703 = vmatpush1.bf16.msra.mxu1 %v13910_v48  ;;  %11171 = vmatprep.subr.bf16.mxu0 %v13917_v56  ;;  %v13973_v56 = vcombine.high %v1468_v30, %v1472_v32  ;;  %v1520_v33 = vld [vmem:[%s19788_s1 + $0x2eb0] sm:$0xff] }
 0x5c8   :  { %11704 = vmatprep.subr.bf16.mxu1 %v13919_v4 }
 0x5ca   :  { %11172 = vmatpush1.bf16.msra.mxu0 %v13916_v19  ;;  %v13972_v19 = vcombine.low %v1468_v30, %v1472_v32  ;;  %v1524_v30 = vld [vmem:[%s19788_s1 + $0x2ed0] sm:$0xff] }
 0x5cb   :  { %11705 = vmatpush1.bf16.msra.mxu1 %v13918_v39  ;;  %11173 = vmatprep.subr.bf16.mxu0 %v13925_v5  ;;  %v13981_v5 = vcombine.high %v1476_v36, %v1480_v27  ;;  %v1528_v32 = vld [vmem:[%s19788_s1 + $0x2ef0] sm:$0xff] }
 0x5cc   :  { %11706 = vmatprep.subr.bf16.mxu1 %v13927_v51  ;;  %v13983_v51 = vcombine.high %v1477_v53, %v1481_v38 }
 0x5ce   :  { %11174 = vmatpush1.bf16.msra.mxu0 %v13924_v34  ;;  %v13980_v34 = vcombine.low %v1476_v36, %v1480_v27  ;;  %v1532_v36 = vld [vmem:[%s19788_s1 + $0x2f10] sm:$0xff] }
 0x5cf   :  { %11707 = vmatpush1.bf16.msra.mxu1 %v13926_v46  ;;  %11175 = vmatprep.subr.bf16.mxu0 %v13933_v49  ;;  %v13982_v46 = vcombine.low %v1477_v53, %v1481_v38  ;;  %v13989_v49 = vcombine.high %v1484_v41, %v1488_v42  ;;  %v1536_v27 = vld [vmem:[%s19788_s1 + $0x2f30] sm:$0xff]  ;;  %v1533_v53 = vld [vmem:[%s19788_s1 + $0x2f18] sm:$0xff] }
 0x5d0   :  { %11708 = vmatprep.subr.bf16.mxu1 %v13935_v59  ;;  %v13991_v59 = vcombine.high %v1485_v37, %v1489_v45  ;;  %v1537_v38 = vld [vmem:[%s19788_s1 + $0x2f38] sm:$0xff] }
 0x5d2   :  { %11176 = vmatpush1.bf16.msra.mxu0 %v13932_v55  ;;  %v13988_v55 = vcombine.low %v1484_v41, %v1488_v42  ;;  %v1540_v41 = vld [vmem:[%s19788_s1 + $0x2f50] sm:$0xff] }
 0x5d3   :  { %11709 = vmatpush1.bf16.msra.mxu1 %v13934_v60  ;;  %11186 = vmatprep.subr.bf16.mxu0 %v13941_v2  ;;  %v13990_v60 = vcombine.low %v1485_v37, %v1489_v45  ;;  %v13997_v2 = vcombine.high %v1492_v62, %v1496_v50  ;;  %v1544_v42 = vld [vmem:[%s19788_s1 + $0x2f70] sm:$0xff]  ;;  %v1541_v37 = vld [vmem:[%s19788_s1 + $0x2f58] sm:$0xff] }
 0x5d4   :  { %11719 = vmatprep.subr.bf16.mxu1 %v13943_v57  ;;  %v13999_v57 = vcombine.high %v1493_v52, %v1497_v54  ;;  %v1545_v45 = vld [vmem:[%s19788_s1 + $0x2f78] sm:$0xff] }
 0x5d5   :  { %11178 = vmatmul.mubr.bf16.vlgmr.msra.gmra.mrb[4].mxu0 %v16891_v15 }
 0x5d6   :  { %11187 = vmatpush1.bf16.msra.mxu0 %v13940_v9  ;;  %11711 = vmatmul.mubr.bf16.vlgmr.msra.gmra.mrb[4].mxu1 %v16891_v15  ;;  %v1461_v15 = vld [vmem:[%s19788_s1 + $0x2cd8] sm:$0xff]  ;;  %v13996_v9 = vcombine.low %v1492_v62, %v1496_v50  ;;  %v1548_v62 = vld [vmem:[%s19788_s1 + $0x2f90] sm:$0xff] }
 0x5d7   :  { %11720 = vmatpush1.bf16.msra.mxu1 %v13942_v10  ;;  %11188 = vmatprep.subr.bf16.mxu0 %v13949_v14  ;;  %v13967_v29 = vcombine.high %v1461_v15, %v1465_v7  ;;  %v13966_v48 = vcombine.low %v1461_v15, %v1465_v7  ;;  %v13998_v10 = vcombine.low %v1493_v52, %v1497_v54  ;;  %v1517_v15 = vld [vmem:[%s19788_s1 + $0x2e98] sm:$0xff]  ;;  %v1552_v50 = vld [vmem:[%s19788_s1 + $0x2fb0] sm:$0xff] }
 0x5d8   :  { %11721 = vmatprep.subr.bf16.mxu1 %v13951_v11  ;;  %11218 = vmatprep.mubr.bf16.mxu0 %v16907_v26  ;;  %v14005_v14 = vcombine.high %v1500_v61, %v1504_v0  ;;  %v14007_v11 = vcombine.high %v1501_v63, %v1505_v44  ;;  %v1521_v7 = vld [vmem:[%s19788_s1 + $0x2eb8] sm:$0xff] }
 0x5d9   :  { %11751 = vmatprep.mubr.bf16.mxu1 %v16907_v26  ;;  %v1469_v26 = vld [vmem:[%s19788_s1 + $0x2d18] sm:$0xff] }
 0x5da   :  { %11189 = vmatpush1.bf16.msra.mxu0 %v13948_v20  ;;  %v13975_v4 = vcombine.high %v1469_v26, %v1473_v35  ;;  %v13974_v39 = vcombine.low %v1469_v26, %v1473_v35  ;;  %v14004_v20 = vcombine.low %v1500_v61, %v1504_v0  ;;  %v1525_v26 = vld [vmem:[%s19788_s1 + $0x2ed8] sm:$0xff]  ;;  %v1556_v61 = vld [vmem:[%s19788_s1 + $0x2fd0] sm:$0xff] }
 0x5db   :  { %11722 = vmatpush1.bf16.msra.mxu1 %v13950_v21  ;;  %11190 = vmatprep.subr.bf16.mxu0 %v13957_v22  ;;  %v14006_v21 = vcombine.low %v1501_v63, %v1505_v44  ;;  %v14013_v22 = vcombine.high %v1508_v6, %v1512_v12  ;;  %v1529_v35 = vld [vmem:[%s19788_s1 + $0x2ef8] sm:$0xff]  ;;  %v1560_v0 = vld [vmem:[%s19788_s1 + $0x2ff0] sm:$0xff] }
 0x5dc   :  { %11723 = vmatprep.subr.bf16.mxu1 %v13959_v24  ;;  %v14015_v24 = vcombine.high %v1509_v1, %v1513_v16  ;;  %v1549_v52 = vld [vmem:[%s19788_s1 + $0x2f98] sm:$0xff] }
 0x5dd   :  { %v1553_v54 = vld [vmem:[%s19788_s1 + $0x2fb8] sm:$0xff] }
 0x5de   :  { %11191 = vmatpush1.bf16.msra.mxu0 %v13956_v58  ;;  %v14012_v58 = vcombine.low %v1508_v6, %v1512_v12  ;;  %v1557_v63 = vld [vmem:[%s19788_s1 + $0x2fd8] sm:$0xff]  ;;  %v1564_v6 = vld [vmem:[%s19788_s1 + $0x3010] sm:$0xff] }
 0x5df   :  { %11724 = vmatpush1.bf16.msra.mxu1 %v13958_v47  ;;  %11192 = vmatprep.subr.bf16.mxu0 %v13965_v28  ;;  %v14014_v47 = vcombine.low %v1509_v1, %v1513_v16  ;;  %v14021_v28 = vcombine.high %v1516_v40, %v1520_v33  ;;  %v1561_v44 = vld [vmem:[%s19788_s1 + $0x2ff8] sm:$0xff]  ;;  %v1568_v12 = vld [vmem:[%s19788_s1 + $0x3030] sm:$0xff] }
 0x5e0   :  { %11725 = vmatprep.subr.bf16.mxu1 %v13967_v29  ;;  %v14023_v29 = vcombine.high %v1517_v15, %v1521_v7  ;;  %v1565_v1 = vld [vmem:[%s19788_s1 + $0x3018] sm:$0xff] }
 0x5e1   :  { %v1569_v16 = vld [vmem:[%s19788_s1 + $0x3038] sm:$0xff] }
 0x5e2   :  { %11193 = vmatpush1.bf16.msra.mxu0 %v13964_v17  ;;  %v14020_v17 = vcombine.low %v1516_v40, %v1520_v33  ;;  %v1572_v40 = vld [vmem:[%s19788_s1 + $0x3050] sm:$0xff] }
 0x5e3   :  { %11726 = vmatpush1.bf16.msra.mxu1 %v13966_v48  ;;  %11194 = vmatprep.subr.bf16.mxu0 %v13973_v56  ;;  %v14022_v48 = vcombine.low %v1517_v15, %v1521_v7  ;;  %v14029_v56 = vcombine.high %v1524_v30, %v1528_v32  ;;  %v1576_v33 = vld [vmem:[%s19788_s1 + $0x3070] sm:$0xff]  ;;  %v1573_v15 = vld [vmem:[%s19788_s1 + $0x3058] sm:$0xff] }
 0x5e4   :  { %11727 = vmatprep.subr.bf16.mxu1 %v13975_v4  ;;  %v14031_v4 = vcombine.high %v1525_v26, %v1529_v35  ;;  %v1577_v7 = vld [vmem:[%s19788_s1 + $0x3078] sm:$0xff] }
 0x5e6   :  { %11195 = vmatpush1.bf16.msra.mxu0 %v13972_v19  ;;  %v14028_v19 = vcombine.low %v1524_v30, %v1528_v32  ;;  %v14070_v30 = vcombine.low %v1565_v1, %v1569_v16  ;;  %v14077_v32 = vcombine.high %v1572_v40, %v1576_v33 }
 0x5e7   :  { %11728 = vmatpush1.bf16.msra.mxu1 %v13974_v39  ;;  %11196 = vmatprep.subr.bf16.mxu0 %v13981_v5  ;;  %v14030_v39 = vcombine.low %v1525_v26, %v1529_v35  ;;  %v14037_v5 = vcombine.high %v1532_v36, %v1536_v27  ;;  %v14079_v26 = vcombine.high %v1573_v15, %v1577_v7  ;;  %v1580_v35 = vld [vmem:[%s19788_s1 + $0x3090] sm:$0xff] }
 0x5e8   :  { %11729 = vmatprep.subr.bf16.mxu1 %v13983_v51  ;;  %v14039_v51 = vcombine.high %v1533_v53, %v1537_v38 }
 0x5ea   :  { %11197 = vmatpush1.bf16.msra.mxu0 %v13980_v34  ;;  %v14036_v34 = vcombine.low %v1532_v36, %v1536_v27  ;;  %v14076_v36 = vcombine.low %v1572_v40, %v1576_v33  ;;  %v14479_v40 = vld [vmem:[%s19790_s3 + $0x68] sm:$0xff]  }
 0x5eb   :  { %11730 = vmatpush1.bf16.msra.mxu1 %v13982_v46  ;;  %11198 = vmatprep.subr.bf16.mxu0 %v13989_v49  ;;  %v14038_v46 = vcombine.low %v1533_v53, %v1537_v38  ;;  %v14045_v49 = vcombine.high %v1540_v41, %v1544_v42  ;;  %v14078_v53 = vcombine.low %v1573_v15, %v1577_v7  ;;  %v14480_v15 = vld [vmem:[%s19790_s3 + $0xe8] sm:$0xff]  }
 0x5ec   :  { %11731 = vmatprep.subr.bf16.mxu1 %v13991_v59  ;;  %v14047_v59 = vcombine.high %v1541_v37, %v1545_v45 }
 0x5ee   :  { %11199 = vmatpush1.bf16.msra.mxu0 %v13988_v55  ;;  %v14044_v55 = vcombine.low %v1540_v41, %v1544_v42 }
 0x5ef   :  { %11732 = vmatpush1.bf16.msra.mxu1 %v13990_v60  ;;  %11200 = vmatprep.subr.bf16.mxu0 %v13997_v2  ;;  %v14046_v60 = vcombine.low %v1541_v37, %v1545_v45  ;;  %v14053_v2 = vcombine.high %v1548_v62, %v1552_v50 }
 0x5f0   :  { %11733 = vmatprep.subr.bf16.mxu1 %v13999_v57  ;;  %v14055_v57 = vcombine.high %v1549_v52, %v1553_v54 }
 0x5f2   :  { %11201 = vmatpush1.bf16.msra.mxu0 %v13996_v9  ;;  %v14052_v9 = vcombine.low %v1548_v62, %v1552_v50  ;;  %v14461_v50 = vld [vmem:[%s19790_s3] sm:$0xff]  }
 0x5f3   :  { %11734 = vmatpush1.bf16.msra.mxu1 %v13998_v10  ;;  %11202 = vmatprep.subr.bf16.mxu0 %v14005_v14  ;;  %v14054_v10 = vcombine.low %v1549_v52, %v1553_v54  ;;  %v14061_v14 = vcombine.high %v1556_v61, %v1560_v0  ;;  %v14462_v54 = vld [vmem:[%s19790_s3 + $0x80] sm:$0xff]  }
 0x5f4   :  { %11735 = vmatprep.subr.bf16.mxu1 %v14007_v11  ;;  %v14063_v11 = vcombine.high %v1557_v63, %v1561_v44 }
 0x5f6   :  { %11203 = vmatpush1.bf16.msra.mxu0 %v14004_v20  ;;  %v14060_v20 = vcombine.low %v1556_v61, %v1560_v0  ;;  %v14465_v0 = vld [vmem:[%s19790_s3 + $0x8] sm:$0xff]  }
 0x5f7   :  { %11736 = vmatpush1.bf16.msra.mxu1 %v14006_v21  ;;  %11204 = vmatprep.subr.bf16.mxu0 %v14013_v22  ;;  %v14062_v21 = vcombine.low %v1557_v63, %v1561_v44  ;;  %v14069_v22 = vcombine.high %v1564_v6, %v1568_v12  ;;  %v14466_v63 = vld [vmem:[%s19790_s3 + $0x88] sm:$0xff]   ;;  %v14467_v44 = vld [vmem:[%s19790_s3 + $0x50] sm:$0xff]  }
 0x5f8   :  { %11737 = vmatprep.subr.bf16.mxu1 %v14015_v24  ;;  %v14071_v24 = vcombine.high %v1565_v1, %v1569_v16  ;;  %v14475_v1 = vld [vmem:[%s19790_s3 + $0x60] sm:$0xff]   ;;  %v1598_v16 = vsub.s32 0, %v14646_v43 }
 0x5fa   :  { %11205 = vmatpush1.bf16.msra.mxu0 %v14012_v58  ;;  %v1602_v58 = vsub.s32 1, %v14646_v43 }
 0x5fb   :  { %11738 = vmatpush1.bf16.msra.mxu1 %v14014_v47  ;;  %11206 = vmatprep.subr.bf16.mxu0 %v14021_v28  ;;  %v14068_v47 = vcombine.low %v1564_v6, %v1568_v12  ;;  %v19527_v28 = vld [vmem:[%s19789_s2] sm:$0xff]  ;;  %v14473_v6 = vld [vmem:[%s19790_s3 + $0x18] sm:$0xff]  }
 0x5fc   :  { %11739 = vmatprep.subr.bf16.mxu1 %v14023_v29  ;;  %v1610_v29 = vsub.s32 3, %v14646_v43  ;;  %v14474_v12 = vld [vmem:[%s19790_s3 + $0x98] sm:$0xff]   ;;  %v1599_v33 = vrot.slane %v19527_v28, %v1598_v16  ;;  %v1626_v16 = vsub.s32 7, %v14646_v43 }
 0x5fe   :  { %11207 = vmatpush1.bf16.msra.mxu0 %v14020_v17  ;;  %v1584_v17 = vld [vmem:[%s19788_s1 + $0x30b0] sm:$0xff]  ;;  %v1611_v27 = vrot.slane %v19527_v28, %v1610_v29 }
 0x5ff   :  { %11740 = vmatpush1.bf16.msra.mxu1 %v14022_v48  ;;  %11208 = vmatprep.subr.bf16.mxu0 %v14029_v56  ;;  %v1581_v48 = vld [vmem:[%s19788_s1 + $0x3098] sm:$0xff]  ;;  %v14085_v38 = vcombine.high %v1580_v35, %v1584_v17  ;;  %v14084_v42 = vcombine.low %v1580_v35, %v1584_v17  ;;  %v14483_v29 = vld [vmem:[%s19790_s3 + $0x70] sm:$0xff]  }
 0x600   :  { %11741 = vmatprep.subr.bf16.mxu1 %v14031_v4  ;;  %v1585_v56 = vld [vmem:[%s19788_s1 + $0x30b8] sm:$0xff]  ;;  %v1603_v4 = vrot.slane %v19527_v28, %v1602_v58  ;;  %v14256_v37 = vadd.f32 %v17833_v18, %v1611_v27  ;;  %v14460_v18 = vld [vmem:[%s19790_s3 + $0xc0] sm:$0xff]   ;;  %v14481_v58 = vld [vmem:[%s19790_s3 + $0x28] sm:$0xff]  }
 0x601   :  { %v14086_v45 = vcombine.low %v1581_v48, %v1585_v56  ;;  %v14485_v35 = vld [vmem:[%s19790_s3 + $0x30] sm:$0xff]   ;;  %v14491_v27 = vld [vmem:[%s19790_s3 + $0x140] sm:$0xff]  }
 0x602   :  { %11209 = vmatpush1.bf16.msra.mxu0 %v14028_v19  ;;  %v14087_v19 = vcombine.high %v1581_v48, %v1585_v56  ;;  %v14254_v41 = vadd.f32 %v17825_v23, %v1603_v4  ;;  %v11812_v62 = vmul.f32 0.01, %v14256_v37  ;;  %v14459_v23 = vld [vmem:[%s19790_s3 + $0x40] sm:$0xff]   ;;  %vm11804_vm2 = vcmp.ge.f32.partialorder %v14256_v37, 0.0  ;;  %v14486_v17 = vld [vmem:[%s19790_s3 + $0xb0] sm:$0xff]   ;;  %v14489_v4 = vld [vmem:[%s19790_s3 + $0x38] sm:$0xff]  }
 0x603   :  { %11742 = vmatpush1.bf16.msra.mxu1 %v14030_v39  ;;  %11210 = vmatprep.subr.bf16.mxu0 %v14037_v5  ;;  %v1588_v39 = vld [vmem:[%s19788_s1 + $0x30d0] sm:$0xff] }
 0x604   :  { %11743 = vmatprep.subr.bf16.mxu1 %v14039_v51  ;;  %v1592_v5 = vld [vmem:[%s19788_s1 + $0x30f0] sm:$0xff]  ;;  %v1593_v51 = vld [vmem:[%s19788_s1 + $0x30f8] sm:$0xff]  ;;  %vm11802_vm1 = vcmp.ge.f32.partialorder %v14254_v41, 0.0 }
 0x606   :  { %11211 = vmatpush1.bf16.msra.mxu0 %v14036_v34  ;;  %v14093_v34 = vcombine.high %v1588_v39, %v1592_v5 }
 0x607   :  { %11744 = vmatpush1.bf16.msra.mxu1 %v14038_v46  ;;  %11212 = vmatprep.subr.bf16.mxu0 %v14045_v49  ;;  %v11810_v49 = vmul.f32 0.01, %v14254_v41 }
 0x608   :  { %11745 = vmatprep.subr.bf16.mxu1 %v14047_v59  ;;  %v14092_v59 = vcombine.low %v1588_v39, %v1592_v5  ;;  %v14493_v39 = vld [vmem:[%s19790_s3 + $0x100] sm:$0xff]  }
 0x609   :  { %v11818_v52 = vsel %vm11802_vm1, %v14254_v41, %v11810_v49  ;;  %v14501_v49 = vld [vmem:[%s19790_s3 + $0x110] sm:$0xff]  }
 0x60a   :  { %11213 = vmatpush1.bf16.msra.mxu0 %v14044_v55  ;;  %v11820_v55 = vsel %vm11804_vm2, %v14256_v37, %v11812_v62  ;;  %v14497_v37 = vld [vmem:[%s19790_s3 + $0x108] sm:$0xff]   ;;  %v14503_v62 = vld [vmem:[%s19790_s3 + $0x158] sm:$0xff]  }
 0x60b   :  { %11746 = vmatpush1.bf16.msra.mxu1 %v14046_v60  ;;  %11214 = vmatprep.subr.bf16.mxu0 %v14053_v2  ;;  %v14463_v60 = vld [vmem:[%s19790_s3 + $0x48] sm:$0xff]   ;;  %v11826_v2 = vpack.c.bf16 %v11818_v52, %v11818_v52  ;;  %v11828_v61 = vpack.c.bf16 %v11820_v55, %v11820_v55  ;;  %v14508_v52 = vld [vmem:[%s19790_s3 + $0x1e0] sm:$0xff]  }
 0x60c   :  { %11747 = vmatprep.subr.bf16.mxu1 %v14055_v57  ;;  %v14464_v57 = vld [vmem:[%s19790_s3 + $0xc8] sm:$0xff]   ;;  %v14510_v55 = vld [vmem:[%s19790_s3 + $0x1a0] sm:$0xff]  }
 0x60e   :  { %11215 = vmatpush1.bf16.msra.mxu0 %v14052_v9  ;;  %v14469_v9 = vld [vmem:[%s19790_s3 + $0x10] sm:$0xff]  }
 0x60f   :  { %11748 = vmatpush1.bf16.msra.mxu1 %v14054_v10  ;;  %11216 = vmatprep.subr.bf16.mxu0 %v14061_v14  ;;  %v14470_v10 = vld [vmem:[%s19790_s3 + $0x90] sm:$0xff]   ;;  %v14471_v14 = vld [vmem:[%s19790_s3 + $0x58] sm:$0xff]  }
 0x610   :  { %11749 = vmatprep.subr.bf16.mxu1 %v14063_v11  ;;  %v14472_v11 = vld [vmem:[%s19790_s3 + $0xd8] sm:$0xff]  }
 0x612   :  { %11217 = vmatpush1.bf16.msra.mxu0 %v14060_v20  ;;  %v14476_v20 = vld [vmem:[%s19790_s3 + $0xe0] sm:$0xff]  }
 0x613   :  { %11750 = vmatpush1.bf16.msra.mxu1 %v14062_v21  ;;  %11227 = vmatprep.subr.bf16.mxu0 %v14069_v22  ;;  %v1606_v21 = vsub.s32 2, %v14646_v43  ;;  %v14477_v22 = vld [vmem:[%s19790_s3 + $0x20] sm:$0xff]  }
 0x614   :  { %11760 = vmatprep.subr.bf16.mxu1 %v14071_v24  ;;  %v14478_v24 = vld [vmem:[%s19790_s3 + $0xa0] sm:$0xff]  }
 0x615   :  { %11219 = vmatmul.mubr.bf16.vlgmr.msra.gmra.mrb[4].mxu0 %v17095_v31  ;;  %v1607_v7 = vrot.slane %v19527_v28, %v1606_v21 }
 0x616   :  { %11228 = vmatpush1.bf16.msra.mxu0 %v14068_v47  ;;  %11752 = vmatmul.mubr.bf16.vlgmr.msra.gmra.mrb[4].mxu1 %v17095_v31  ;;  %v1589_v31 = vld [vmem:[%s19788_s1 + $0x30d8] sm:$0xff]  ;;  %v14482_v47 = vld [vmem:[%s19790_s3 + $0xa8] sm:$0xff]  }
 0x617   :  { %11761 = vmatpush1.bf16.msra.mxu1 %v14070_v30  ;;  %11229 = vmatprep.subr.bf16.mxu0 %v14077_v32  ;;  %v14095_v46 = vcombine.high %v1589_v31, %v1593_v51  ;;  %v14253_v30 = vadd.f32 %v17815_v3, %v1599_v33  ;;  %v14484_v32 = vld [vmem:[%s19790_s3 + $0xf0] sm:$0xff]   ;;  %v14487_v3 = vld [vmem:[%s19790_s3 + $0x78] sm:$0xff]  }
 0x618   :  { %11762 = vmatprep.subr.bf16.mxu1 %v14079_v26  ;;  %11259 = vmatprep.mubr.bf16.mxu0 %v14548_v8  ;;  %v14255_v26 = vadd.f32 %v17823_v13, %v1607_v7  ;;  %v14488_v13 = vld [vmem:[%s19790_s3 + $0xf8] sm:$0xff]  }
 0x619   :  { %11792 = vmatprep.mubr.bf16.mxu1 %v14548_v8  ;;  %v14094_v8 = vcombine.low %v1589_v31, %v1593_v51  ;;  %v11809_v48 = vmul.f32 0.01, %v14253_v30  ;;  %vm11801_vm3 = vcmp.ge.f32.partialorder %v14253_v30, 0.0  ;;  %v14494_v31 = vld [vmem:[%s19790_s3 + $0x180] sm:$0xff]   ;;  %v14495_v51 = vld [vmem:[%s19790_s3 + $0x148] sm:$0xff]  }
 0x61a   :  { %11230 = vmatpush1.bf16.msra.mxu0 %v14076_v36  ;;  %v11811_v56 = vmul.f32 0.01, %v14255_v26  ;;  %vm11803_vm4 = vcmp.ge.f32.partialorder %v14255_v26, 0.0  ;;  %v14490_v36 = vld [vmem:[%s19790_s3 + $0xb8] sm:$0xff]  }
 0x61b   :  { %11763 = vmatpush1.bf16.msra.mxu1 %v14078_v53  ;;  %11231 = vmatprep.subr.bf16.mxu0 %v14085_v38  ;;  %v11817_v53 = vsel %vm11801_vm3, %v14253_v30, %v11809_v48  ;;  %v14492_v38 = vld [vmem:[%s19790_s3 + $0x1c0] sm:$0xff]  }
 0x61c   :  { %11764 = vmatprep.subr.bf16.mxu1 %v14087_v19  ;;  %v11819_v19 = vsel %vm11803_vm4, %v14255_v26, %v11811_v56  ;;  %v11825_v5 = vpack.c.bf16 %v11817_v53, %v11817_v53 }
 0x61d   :  { %v11827_v41 = vpack.c.bf16 %v11819_v19, %v11819_v19 }
 0x61e   :  { %11232 = vmatpush1.bf16.msra.mxu0 %v14084_v42  ;;  %v14496_v42 = vld [vmem:[%s19790_s3 + $0x1c8] sm:$0xff]  }
 0x61f   :  { %11765 = vmatpush1.bf16.msra.mxu1 %v14086_v45  ;;  %11233 = vmatprep.subr.bf16.mxu0 %v14093_v34  ;;  %v14498_v45 = vld [vmem:[%s19790_s3 + $0x188] sm:$0xff]   ;;  %v14499_v34 = vld [vmem:[%s19790_s3 + $0x150] sm:$0xff]  }
 0x620   :  { %11766 = vmatprep.subr.bf16.mxu1 %v14095_v46  ;;  %v14500_v46 = vld [vmem:[%s19790_s3 + $0x1d0] sm:$0xff]  }
 0x622   :  { %11234 = vmatpush1.bf16.msra.mxu0 %v14092_v59  ;;  %v14502_v59 = vld [vmem:[%s19790_s3 + $0x190] sm:$0xff]  }
 0x623   :  { %11767 = vmatpush1.bf16.msra.mxu1 %v14094_v8  ;;  %14165 = vmatprep.subr.bf16.mxu0 %v14459_v23  ;;  %v14504_v8 = vld [vmem:[%s19790_s3 + $0x1d8] sm:$0xff]  }
 0x624   :  { %14187 = vmatprep.subr.bf16.mxu1 %v14460_v18  ;;  %v14505_v23 = vld [vmem:[%s19790_s3 + $0x118] sm:$0xff]  }
 0x625   :  { %14098 = vmatmul.mubr.msk.bf16.vlgmr.msra.gmra.mrb[4].mxu0 %vm9665_vm0, %v17153_v25  ;;  %v14506_v18 = vld [vmem:[%s19790_s3 + $0x198] sm:$0xff]  }
 0x626   :  { %14099 = vmatmul.mubr.msk.bf16.vlgmr.msra.gmra.mrb[4].mxu1 %vm9665_vm0, %v17153_v25  ;;  %14166 = vmatpush3.bf16.msra.mxu0 %v14461_v50  ;;  %v14468_v25 = vld [vmem:[%s19790_s3 + $0xd0] sm:$0xff]   ;;  %v14507_v50 = vld [vmem:[%s19790_s3 + $0x160] sm:$0xff]  }
 0x627   :  { %12384 = vmatprep.mubr.bf16.mxu0 %v11826_v2  ;;  %14188 = vmatpush3.bf16.msra.mxu1 %v14462_v54  ;;  %v14509_v54 = vld [vmem:[%s19790_s3 + $0x120] sm:$0xff]   ;;  %v14512_v2 = vld [vmem:[%s19790_s3 + $0x1e8] sm:$0xff]  }
 0x628   :  { %12424 = vmatprep.mubr.bf16.mxu1 %v11828_v61  ;;  %14167 = vmatprep.subr.bf16.mxu0 %v14463_v60  ;;  %v14511_v60 = vld [vmem:[%s19790_s3 + $0x168] sm:$0xff]  }
 0x629   :  { %14189 = vmatprep.subr.bf16.mxu1 %v14464_v57  ;;  %v14513_v57 = vld [vmem:[%s19790_s3 + $0x128] sm:$0xff]  }
 0x62a   :  { %14168 = vmatpush3.bf16.msra.mxu0 %v14465_v0  ;;  %v14514_v61 = vld [vmem:[%s19790_s3 + $0x1a8] sm:$0xff]   ;;  %v14515_v0 = vld [vmem:[%s19790_s3 + $0x170] sm:$0xff]  }
 0x62b   :  { %14190 = vmatpush3.bf16.msra.mxu1 %v14466_v63  ;;  %14169 = vmatprep.subr.bf16.mxu0 %v14467_v44  ;;  %v14516_v63 = vld [vmem:[%s19790_s3 + $0x1f0] sm:$0xff]  }
 0x62c   :  { %14191 = vmatprep.subr.bf16.mxu1 %v14468_v25  ;;  %v14517_v44 = vld [vmem:[%s19790_s3 + $0x130] sm:$0xff]  }
 0x62d   :  { %v14518_v25 = vld [vmem:[%s19790_s3 + $0x1b0] sm:$0xff]  }
 0x62e   :  { %14170 = vmatpush3.bf16.msra.mxu0 %v14469_v9  ;;  %v14519_v9 = vld [vmem:[%s19790_s3 + $0x178] sm:$0xff]  }
 0x62f   :  { %14192 = vmatpush3.bf16.msra.mxu1 %v14470_v10  ;;  %14171 = vmatprep.subr.bf16.mxu0 %v14471_v14  ;;  %v14520_v10 = vld [vmem:[%s19790_s3 + $0x1f8] sm:$0xff]  }
 0x630   :  { %14193 = vmatprep.subr.bf16.mxu1 %v14472_v11  ;;  %v14521_v14 = vld [vmem:[%s19790_s3 + $0x138] sm:$0xff]  }
 0x631   :  { %v14522_v11 = vld [vmem:[%s19790_s3 + $0x1b8] sm:$0xff]  }
 0x632   :  { %14172 = vmatpush3.bf16.msra.mxu0 %v14473_v6  ;;  %v1614_v6 = vsub.s32 4, %v14646_v43 }
 0x633   :  { %14194 = vmatpush3.bf16.msra.mxu1 %v14474_v12  ;;  %14173 = vmatprep.subr.bf16.mxu0 %v14475_v1  ;;  %v1622_v12 = vsub.s32 6, %v14646_v43  ;;  %v1618_v1 = vsub.s32 5, %v14646_v43 }
 0x634   :  { %14195 = vmatprep.subr.bf16.mxu1 %v14476_v20  ;;  %v1615_v20 = vrot.slane %v19527_v28, %v1614_v6 }
 0x635   :  { %v1623_v21 = vrot.slane %v19527_v28, %v1622_v12 }
 0x636   :  { %14174 = vmatpush3.bf16.msra.mxu0 %v14477_v22  ;;  %v1619_v22 = vrot.slane %v19527_v28, %v1618_v1 }
 0x637   :  { %14196 = vmatpush3.bf16.msra.mxu1 %v14478_v24  ;;  %14175 = vmatprep.subr.bf16.mxu0 %v14479_v40  ;;  %v1627_v24 = vrot.slane %v19527_v28, %v1626_v16 }
 0x638   :  { %14197 = vmatprep.subr.bf16.mxu1 %v14480_v15 }
 0x63a   :  { %14176 = vmatpush3.bf16.msra.mxu0 %v14481_v58 }
 0x63b   :  { %14198 = vmatpush3.bf16.msra.mxu1 %v14482_v47  ;;  %14177 = vmatprep.subr.bf16.mxu0 %v14483_v29 }
 0x63c   :  { %14199 = vmatprep.subr.bf16.mxu1 %v14484_v32 }
 0x63e   :  { %14178 = vmatpush3.bf16.msra.mxu0 %v14485_v35 }
 0x63f   :  { %14200 = vmatpush3.bf16.msra.mxu1 %v14486_v17  ;;  %14179 = vmatprep.subr.bf16.mxu0 %v14487_v3 }
 0x640   :  { %14201 = vmatprep.subr.bf16.mxu1 %v14488_v13 }
 0x642   :  { %14180 = vmatpush3.bf16.msra.mxu0 %v14489_v4 }
 0x643   :  { %14202 = vmatpush3.bf16.msra.mxu1 %v14490_v36  ;;  %14209 = vmatprep.subr.bf16.mxu0 %v14491_v27 }
 0x644   :  { %14231 = vmatprep.subr.bf16.mxu1 %v14492_v38 }
 0x645   :  { %12385 = vmatmul.mubr.bf16.vlgmr.msra.gmra.mrb[8].mxu0 %v11825_v5 }
 0x646   :  { %12425 = vmatmul.mubr.bf16.vlgmr.msra.gmra.mrb[8].mxu1 %v11827_v41  ;;  %14210 = vmatpush3.bf16.msra.mxu0 %v14493_v39 }
 0x647   :  { %14232 = vmatpush3.bf16.msra.mxu1 %v14494_v31  ;;  %14211 = vmatprep.subr.bf16.mxu0 %v14495_v51  ;;  %v14100_v31 = vld [vmem:[%s19791_s4] ss:$0 sm:$0xff]  ;;  %s14549_s4 = smov [#allocation2]  }
 0x648   :  { %14233 = vmatprep.subr.bf16.mxu1 %v14496_v42  ;;  %s12519_s17 = sshll.u32 %s14549_s4, 4  ;;  %s12520_s17 = int_to_ptr.vmem [resolvable:$true] %s12519_s17 }
 0x649   :  { %s14523_s18 = scalar_lea.vmem %s12520_s17, 32  ;;  %p14528_p1 = scmp.lt.s32.totalorder %s12520_s17, %s12520_s17 }
 0x64a   :  { %14212 = vmatpush3.bf16.msra.mxu0 %v14497_v37  ;;  %p14524_p0 = scmp.ne.s32.totalorder %s12520_s17, %s14523_s18  ;;  %p14529_p2 = scmp.lt.s32.totalorder %s14523_s18, %s14523_s18 }
 0x64b   :  { %14234 = vmatpush3.bf16.msra.mxu1 %v14498_v45  ;;  %14213 = vmatprep.subr.bf16.mxu0 %v14499_v34 }
 0x64c   :  { %14235 = vmatprep.subr.bf16.mxu1 %v14500_v46  ;;  %p14530_p3 = por %p14529_p2, %p14528_p1 }
 0x64e   :  { %14214 = vmatpush3.bf16.msra.mxu0 %v14501_v49  ;;  %p14531_p4 = pnand %p14530_p3, %p14524_p0 }
 0x64f   :  { %14236 = vmatpush3.bf16.msra.mxu1 %v14502_v59  ;;  %14215 = vmatprep.subr.bf16.mxu0 %v14503_v62 }
 0x650   :  { %14237 = vmatprep.subr.bf16.mxu1 %v14504_v8 }
 0x652   :  { %14216 = vmatpush3.bf16.msra.mxu0 %v14505_v23 }
 0x653   :  { %14238 = vmatpush3.bf16.msra.mxu1 %v14506_v18  ;;  %14217 = vmatprep.subr.bf16.mxu0 %v14507_v50 }
 0x654   :  { %14239 = vmatprep.subr.bf16.mxu1 %v14508_v52 }
 0x656   :  { %14218 = vmatpush3.bf16.msra.mxu0 %v14509_v54 }
 0x657   :  { %14240 = vmatpush3.bf16.msra.mxu1 %v14510_v55  ;;  %14219 = vmatprep.subr.bf16.mxu0 %v14511_v60 }
 0x658   :  { %14241 = vmatprep.subr.bf16.mxu1 %v14512_v2 }
 0x65a   :  { %14220 = vmatpush3.bf16.msra.mxu0 %v14513_v57 }
 0x65b   :  { %14242 = vmatpush3.bf16.msra.mxu1 %v14514_v61  ;;  %14221 = vmatprep.subr.bf16.mxu0 %v14515_v0 }
 0x65c   :  { %14243 = vmatprep.subr.bf16.mxu1 %v14516_v63 }
 0x65e   :  { %14222 = vmatpush3.bf16.msra.mxu0 %v14517_v44 }
 0x65f   :  { %14244 = vmatpush3.bf16.msra.mxu1 %v14518_v25  ;;  %14223 = vmatprep.subr.bf16.mxu0 %v14519_v9 }
 0x660   :  { %14245 = vmatprep.subr.bf16.mxu1 %v14520_v10 }
 0x662   :  { %14224 = vmatpush3.bf16.msra.mxu0 %v14521_v14 }
 0x663   :  { %14246 = vmatpush3.bf16.msra.mxu1 %v14522_v11 }
 0x6f8   :  { %v11261_v40 = vpop.f32.mrb[4].mxu0 }
 0x6f9   :  { %v14257_v33 = vadd.f32 %v11261_v40, %v1615_v20  ;;  %v11794_v15 = vpop.f32.mrb[4].mxu1  ;;  %v11263_v7 = vpop.f32.mrb[5].mxu0 }
 0x6fa   :  { %v14259_v58 = vadd.f32 %v11794_v15, %v1623_v21  ;;  %v14258_v47 = vadd.f32 %v11263_v7, %v1619_v22  ;;  %v11796_v29 = vpop.f32.mrb[5].mxu1  ;;  %v11265_v30 = vpop.f32.mrb[6].mxu0 }
 0x6fb   :  { %vm11805_vm5 = vcmp.ge.f32.partialorder %v14257_v33, 0.0  ;;  %v11813_v32 = vmul.f32 0.01, %v14257_v33  ;;  %v14260_v26 = vadd.f32 %v11796_v29, %v1627_v24  ;;  %v11798_v43 = vpop.f32.mrb[6].mxu1  ;;  %v11266_v35 = vpop.f32.mrb[7].mxu0 }
 0x6fc   :  { %vm11807_vm6 = vcmp.ge.f32.partialorder %v14259_v58, 0.0  ;;  %v11815_v17 = vmul.f32 0.01, %v14259_v58  ;;  %vm11806_vm7 = vcmp.ge.f32.partialorder %v14258_v47, 0.0  ;;  %v11814_v3 = vmul.f32 0.01, %v14258_v47 }
 0x6fd   :  { %v11821_v48 = vsel %vm11805_vm5, %v14257_v33, %v11813_v32  ;;  %vm11808_vm8 = vcmp.ge.f32.partialorder %v14260_v26, 0.0  ;;  %v11816_v28 = vmul.f32 0.01, %v14260_v26  ;;  %v11799_v13 = vpop.f32.mrb[7].mxu1 }
 0x6fe   :  { %v11823_v56 = vsel %vm11807_vm6, %v14259_v58, %v11815_v17  ;;  %v11822_v4 = vsel %vm11806_vm7, %v14258_v47, %v11814_v3  ;;  %v11829_v53 = vpack.c.bf16 %v11821_v48, %v11821_v48 }
 0x6ff   :  { %v11830_v36 = vpack.c.bf16 %v11822_v4, %v11822_v4  ;;  %v11824_v27 = vsel %vm11808_vm8, %v14260_v26, %v11816_v28  ;;  %v11831_v19 = vpack.c.bf16 %v11823_v56, %v11823_v56 }
 0x700   :  { %v11832_v38 = vpack.c.bf16 %v11824_v27, %v11824_v27 }
 0x701   :  { %12464 = vmatprep.mubr.bf16.mxu0 %v11830_v36 }
 0x702   :  { %12504 = vmatprep.mubr.bf16.mxu1 %v11832_v38  ;;  %12465 = vmatmul.mubr.bf16.vlgmr.msra.gmra.mrb[12].mxu0 %v11829_v53 }
 0x703   :  { %12505 = vmatmul.mubr.bf16.vlgmr.msra.gmra.mrb[12].mxu1 %v11831_v19 }
 0x718   :  { %v14181_v39 = vpop.f32.mrb[8].mxu0 }
 0x719   :  { %v14203_v5 = vpop.f32.mrb[8].mxu1  ;;  %v14182_v51 = vpop.f32.mrb[9].mxu0 }
 0x71a   :  { %v14183_v41 = vadd.f32 %v14182_v51, %v14181_v39  ;;  %v14204_v42 = vpop.f32.mrb[9].mxu1  ;;  %v14184_v37 = vpop.f32.mrb[10].mxu0 }
 0x71b   :  { %v14205_v45 = vadd.f32 %v14204_v42, %v14203_v5  ;;  %v14206_v34 = vpop.f32.mrb[10].mxu1  ;;  %v14185_v46 = vpop.f32.mrb[11].mxu0 }
 0x71c   :  { %v12387_v49 = vadd.f32 %v14183_v41, %v14100_v31  ;;  %v14207_v59 = vpop.f32.mrb[11].mxu1 }
 0x71e   :  { %v12427_v62 = vadd.f32 %v14205_v45, %v12387_v49 }
 0x7d5   :  { %v14225_v8 = vpop.f32.mrb[12].mxu0 }
 0x7d6   :  { %v14247_v23 = vpop.f32.mrb[12].mxu1  ;;  %v14226_v18 = vpop.f32.mrb[13].mxu0 }
 0x7d7   :  { %v14227_v50 = vadd.f32 %v14226_v18, %v14225_v8  ;;  %v14248_v52 = vpop.f32.mrb[13].mxu1  ;;  %v14228_v54 = vpop.f32.mrb[14].mxu0 }
 0x7d8   :  { %v14249_v55 = vadd.f32 %v14248_v52, %v14247_v23  ;;  %v14250_v60 = vpop.f32.mrb[14].mxu1  ;;  %v14229_v2 = vpop.f32.mrb[15].mxu0 }
 0x7d9   :  { %v12467_v57 = vadd.f32 %v14227_v50, %v12427_v62  ;;  %v14251_v61 = vpop.f32.mrb[15].mxu1 }
 0x7db   :  { %v12507_v0 = vadd.f32 %v14249_v55, %v12467_v57 }
 0x7dd   :  { %12512 = vst [vmem:[#allocation2] sm:$0x3] %v12507_v0 }
 0x7de   :  { %14534 = shalt.err (!%p14531_p4)
}
 0x7df   :  { %s14535_s21 = scalar_lea.hbm %s19792_s5, 32 }
 0x7e0   :  { %p14536_p5 = scmp.ne.s32.totalorder %s19792_s5, %s14535_s21  ;;  %p14539_p6 = scmp.lt.u32.totalorder %s14535_s21, %s19792_s5 }
 0x7e2   :  { %p14541_p7 = pnand %p14539_p6, %p14536_p5 }
 0x7e4   :  { %14544 = shalt.err (!%p14541_p7)
}
 0x7e5   :  { %12522 = dma.vmem_to_hbm [thread:$0]  %s12520_s17, 32, %s19792_s5, [#allocation3]  }
 0x7e6   :  { %14545 = dma.done.wait [#allocation3], 32  }
 0x7e7   :  { %14546 = vsyncadd [#allocation3], 4294967264 }
 0x7e8   :  { %12526 = vsyncpa [#allocation3], 1 }

</bundles_post_ra>
